<compile_context>
chip_gen: v7x
topology: tpu7x:2x2x1
jax: 0.10.0
libtpu: 0.0.40
codegen_flags: <defaults>
</compile_context>

<pallas_src>
import functools

import jax
import jax.numpy as jnp
from jax.experimental import pallas as pl
from jax.experimental.pallas import tpu as pltpu


def _round_up(x, m):
    return ((x + m - 1) // m) * m


# ---------------------------------------------------------------------------
# Pallas kernels.  Layouts: W^T (Cout, K), patches^T (K, M), output (Cout, M).
# ---------------------------------------------------------------------------
def _convt_bn_relu_kernel(w_ref, p_ref, gamma_ref, beta_ref, o_ref):
    # Fused ConvTranspose-as-GEMM + BatchNorm2d (training-mode biased batch
    # stats over N*H*W == the lane axis) + ReLU.  eps = 1e-5 (PyTorch default).
    y = jnp.dot(w_ref[...], p_ref[...], preferred_element_type=jnp.float32)
    mean = jnp.mean(y, axis=1, keepdims=True)
    var = jnp.mean(jnp.square(y - mean), axis=1, keepdims=True)
    yn = (y - mean) * jax.lax.rsqrt(var + 1e-5)
    o_ref[...] = jnp.maximum(yn * gamma_ref[...] + beta_ref[...], 0.0)


def pallas_convt_bn_relu(wT, pT, gamma, beta):
    Cout, K = wT.shape
    _, M = pT.shape
    # Whole layer resident in VMEM: worst case here is (512, 2048) bf16
    # patches (~2 MB) + (16, 2048) f32 output, far below the scoped VMEM
    # limit on v5e/v6e/v7x, and BN stats need the full M extent anyway.
    return pl.pallas_call(
        _convt_bn_relu_kernel,
        out_shape=jax.ShapeDtypeStruct((Cout, M), jnp.float32),
        grid=(1,),
        in_specs=[
            pl.BlockSpec((Cout, K), lambda i: (0, 0)),
            pl.BlockSpec((K, M), lambda i: (0, 0)),
            pl.BlockSpec((Cout, 1), lambda i: (0, 0)),
            pl.BlockSpec((Cout, 1), lambda i: (0, 0)),
        ],
        out_specs=pl.BlockSpec((Cout, M), lambda i: (0, 0)),
        compiler_params=pltpu.CompilerParams(
            dimension_semantics=("arbitrary",)),
    )(wT, pT,
      gamma.reshape(Cout, 1).astype(jnp.float32),
      beta.reshape(Cout, 1).astype(jnp.float32))


def _convt_bias_tanh_kernel(w_ref, p_ref, b_ref, o_ref):
    y = jnp.dot(w_ref[...], p_ref[...], preferred_element_type=jnp.float32)
    o_ref[...] = jnp.tanh(y + b_ref[...])


def pallas_convt_bias_tanh(wT, pT, bias):
    Cout, K = wT.shape
    _, M = pT.shape
    # Lane-dense tiles over M; pad M so the grid covers every row exactly.
    tm = min(2048, _round_up(M, 128))
    Mp = _round_up(M, tm)
    if Mp != M:
        pT = jnp.pad(pT, ((0, 0), (0, Mp - M)))
    grid = (pl.cdiv(Mp, tm),)
    out = pl.pallas_call(
        _convt_bias_tanh_kernel,
        out_shape=jax.ShapeDtypeStruct((Cout, Mp), jnp.float32),
        grid=grid,
        in_specs=[
            pl.BlockSpec((Cout, K), lambda i: (0, 0)),
            pl.BlockSpec((K, tm), lambda i: (0, i)),
            pl.BlockSpec((Cout, 1), lambda i: (0, 0)),
        ],
        out_specs=pl.BlockSpec((Cout, tm), lambda i: (0, i)),
        compiler_params=pltpu.CompilerParams(
            dimension_semantics=("parallel",)),
    )(wT, pT, bias.reshape(Cout, 1).astype(jnp.float32))
    return out[:, :M]


# ---------------------------------------------------------------------------
# Pure-XLA reference ops (same transposed layout) for correctness checks.
# ---------------------------------------------------------------------------
def ref_convt_bn_relu(wT, pT, gamma, beta):
    y = jnp.dot(wT, pT, preferred_element_type=jnp.float32,
                precision=jax.lax.Precision.HIGHEST)
    mean = jnp.mean(y, axis=1, keepdims=True)
    var = jnp.mean(jnp.square(y - mean), axis=1, keepdims=True)
    yn = (y - mean) * jax.lax.rsqrt(var + 1e-5)
    return jnp.maximum(yn * gamma.reshape(-1, 1) + beta.reshape(-1, 1), 0.0)


def ref_convt_bias_tanh(wT, pT, bias):
    y = jnp.dot(wT, pT, preferred_element_type=jnp.float32,
                precision=jax.lax.Precision.HIGHEST)
    return jnp.tanh(y + bias.reshape(-1, 1))


# ---------------------------------------------------------------------------
# XLA glue: ConvTranspose2d == zero-dilate + pad + flipped-kernel conv,
# expressed as a GEMM in the transposed (K, M) / (Cout, K) layout.
# ---------------------------------------------------------------------------
def convt_to_gemm(x_nchw, w, stride, padding, compute_dtype):
    """x: (N, Cin, H, W); w: (Cin, Cout, k, k) (PyTorch ConvTranspose2d)."""
    N, Cin, H, W = x_nchw.shape
    Cout, k = w.shape[1], w.shape[2]

    # Zero-dilate the input by `stride`.
    Hd, Wd = (H - 1) * stride + 1, (W - 1) * stride + 1
    xd = jnp.zeros((N, Cin, Hd, Wd), x_nchw.dtype)
    xd = xd.at[:, :, ::stride, ::stride].set(x_nchw)

    # Pad by (k - 1 - padding) on each side.
    pad = k - 1 - padding
    xp = jnp.pad(xd, ((0, 0), (0, 0), (pad, pad), (pad, pad)))

    Ho = (H - 1) * stride - 2 * padding + k
    Wo = (W - 1) * stride - 2 * padding + k

    # im2col, transposed: K ordered (Cin, kh, kw), M ordered (N, Ho, Wo).
    patches = []
    for kh in range(k):
        for kw in range(k):
            patches.append(xp[:, :, kh:kh + Ho, kw:kw + Wo])
    p = jnp.stack(patches, axis=0).reshape(k, k, N, Cin, Ho, Wo)
    pT = p.transpose(3, 0, 1, 2, 4, 5).reshape(Cin * k * k, N * Ho * Wo)

    # Flip kernel spatially; (Cout, K) with matching (Cin, kh, kw) order.
    wf = w[:, :, ::-1, ::-1]
    wT = wf.transpose(1, 0, 2, 3).reshape(Cout, Cin * k * k)

    return (wT.astype(compute_dtype), pT.astype(compute_dtype),
            (N, Ho, Wo, Cout))


def _from_cm(y_cm, dims):
    # (Cout, N*Ho*Wo) -> NCHW; only the two tiny leading axes move.
    N, Ho, Wo, Cout = dims
    return y_cm.reshape(Cout, N, Ho, Wo).transpose(1, 0, 2, 3)


# ---------------------------------------------------------------------------
# Generator forward (4 x [ConvT -> BN -> ReLU] blocks, then ConvT + Tanh)
# ---------------------------------------------------------------------------
@functools.partial(jax.jit, static_argnames=("use_pallas", "compute_dtype"))
def generator_forward(params, z, use_pallas=True, compute_dtype=jnp.bfloat16):
    convbn = pallas_convt_bn_relu if use_pallas else ref_convt_bn_relu
    convtanh = pallas_convt_bias_tanh if use_pallas else ref_convt_bias_tanh

    x = z
    for i in range(4):
        stride, padding = (1, 0) if i == 0 else (2, 1)
        wT, pT, dims = convt_to_gemm(x, params[f"w{i}"], stride, padding,
                                     compute_dtype)
        y = convbn(wT, pT, params[f"gamma{i}"], params[f"beta{i}"])
        x = _from_cm(y, dims)

    wT, pT, dims = convt_to_gemm(x, params["w4"], 2, 1, compute_dtype)
    y = convtanh(wT, pT, params["b4"])
    return _from_cm(y, dims)


def init_params(key, z_dim, img_channels, features_g):
    fg = features_g
    chans = [z_dim, fg * 16, fg * 8, fg * 4, fg * 2, img_channels]
    keys = jax.random.split(key, 16)
    params = {}
    ki = 0
    for i in range(5):
        cin, cout = chans[i], chans[i + 1]
        params[f"w{i}"] = 0.05 * jax.random.normal(
            keys[ki], (cin, cout, 4, 4), jnp.float32)
        ki += 1
        if i < 4:
            params[f"gamma{i}"] = 1.0 + 0.1 * jax.random.normal(
                keys[ki], (cout,), jnp.float32)
            ki += 1
            params[f"beta{i}"] = 0.1 * jax.random.normal(
                keys[ki], (cout,), jnp.float32)
            ki += 1
    params["b4"] = 0.1 * jax.random.normal(keys[ki], (img_channels,),
                                           jnp.float32)
    return params


if __name__ == "__main__":
    key = jax.random.PRNGKey(0)
    z_dim, img_channels, features_g, batch = 32, 3, 8, 2

    pkey, zkey = jax.random.split(key)
    params = init_params(pkey, z_dim, img_channels, features_g)
    z = jax.random.normal(zkey, (batch, z_dim, 1, 1), jnp.float32)

    out = generator_forward(params, z, use_pallas=True,
                            compute_dtype=jnp.bfloat16)
    out = jax.block_until_ready(out)

    assert out.shape == (batch, img_channels, 64, 64), out.shape
    assert out.dtype == jnp.float32

    # 1) Kernel correctness: identical bf16 GEMM operands, pure-XLA math.
    ref_bf16 = generator_forward(params, z, use_pallas=False,
                                 compute_dtype=jnp.bfloat16)
    assert jnp.allclose(out, ref_bf16, rtol=1e-2, atol=1e-2), \
        float(jnp.max(jnp.abs(out - ref_bf16)))

    # 2) Semantics vs a full-f32 reference of the PyTorch module (looser
    #    tolerance covers the deliberate bf16-operand / f32-accumulate GEMMs).
    ref_f32 = generator_forward(params, z, use_pallas=False,
                                compute_dtype=jnp.float32)
    assert jnp.allclose(out, ref_f32, rtol=5e-2, atol=5e-2), \
        float(jnp.max(jnp.abs(out - ref_f32)))

    print("KERNEL_OK")
</pallas_src>

<mosaic_0001>
module attributes {stable_mosaic.version = 11 : i64} {
  func.func @_convt_bn_relu_kernel(%arg0: i32, %arg1: memref<128x512xbf16, #tpu.memory_space<vmem>>, %arg2: memref<512x32xbf16, #tpu.memory_space<vmem>>, %arg3: memref<128x1xf32, #tpu.memory_space<vmem>>, %arg4: memref<128x1xf32, #tpu.memory_space<vmem>>, %arg5: memref<128x32xf32, #tpu.memory_space<vmem>>) attributes {dimension_semantics = [#tpu.dimension_semantics<arbitrary>], iteration_bounds = array<i64: 1>, scalar_prefetch = 0 : i64, scratch_operands = 0 : i64, tpu.core_type = #tpu.core_type<tc>, window_params = [{pipeline_mode = #tpu.pipeline_mode<synchronous>, transform_indices = @transform_0, window_bounds = array<i64: 128, 512>}, {pipeline_mode = #tpu.pipeline_mode<synchronous>, transform_indices = @transform_1, window_bounds = array<i64: 512, 32>}, {pipeline_mode = #tpu.pipeline_mode<synchronous>, transform_indices = @transform_2, window_bounds = array<i64: 128, 1>}, {pipeline_mode = #tpu.pipeline_mode<synchronous>, transform_indices = @transform_3, window_bounds = array<i64: 128, 1>}, {pipeline_mode = #tpu.pipeline_mode<synchronous>, transform_indices = @transform_4, window_bounds = array<i64: 128, 32>}]} {
    %c0 = arith.constant 0 : index
    %c0_0 = arith.constant 0 : index
    %0 = vector.load %arg1[%c0, %c0_0] : memref<128x512xbf16, #tpu.memory_space<vmem>>, vector<128x512xbf16>
    %c0_1 = arith.constant 0 : index
    %c0_2 = arith.constant 0 : index
    %1 = vector.load %arg2[%c0_1, %c0_2] : memref<512x32xbf16, #tpu.memory_space<vmem>>, vector<512x32xbf16>
    %cst = arith.constant dense<0.000000e+00> : vector<128x32xf32>
    %2 = tpu.matmul %0, %1, %cst {dimension_numbers = #tpu.dot_dimension_numbers<[1], [0], [0], [1], [0, 0, 1, 1], [], []>} : vector<128x512xbf16>, vector<512x32xbf16>, vector<128x32xf32> -> vector<128x32xf32>
    %cst_3 = arith.constant dense<0.000000e+00> : vector<128xf32>
    %3 = vector.multi_reduction <add>, %2, %cst_3 [1] : vector<128x32xf32> to vector<128xf32>
    %4 = vector.shape_cast %3 : vector<128xf32> to vector<128x1xf32>
    %cst_4 = arith.constant 3.200000e+01 : f32
    %5 = vector.broadcast %cst_4 : f32 to vector<128x1xf32>
    %6 = arith.divf %4, %5 : vector<128x1xf32>
    %7 = vector.broadcast %6 : vector<128x1xf32> to vector<128x32xf32>
    %8 = arith.subf %2, %7 : vector<128x32xf32>
    %9 = arith.mulf %8, %8 : vector<128x32xf32>
    %cst_5 = arith.constant dense<0.000000e+00> : vector<128xf32>
    %10 = vector.multi_reduction <add>, %9, %cst_5 [1] : vector<128x32xf32> to vector<128xf32>
    %11 = vector.shape_cast %10 : vector<128xf32> to vector<128x1xf32>
    %cst_6 = arith.constant 3.200000e+01 : f32
    %12 = vector.broadcast %cst_6 : f32 to vector<128x1xf32>
    %13 = arith.divf %11, %12 : vector<128x1xf32>
    %14 = vector.broadcast %6 : vector<128x1xf32> to vector<128x32xf32>
    %15 = arith.subf %2, %14 : vector<128x32xf32>
    %cst_7 = arith.constant 9.99999974E-6 : f32
    %16 = vector.broadcast %cst_7 : f32 to vector<128x1xf32>
    %17 = arith.addf %13, %16 : vector<128x1xf32>
    %18 = math.rsqrt %17 : vector<128x1xf32>
    %19 = vector.broadcast %18 : vector<128x1xf32> to vector<128x32xf32>
    %20 = arith.mulf %15, %19 : vector<128x32xf32>
    %c0_8 = arith.constant 0 : index
    %c0_9 = arith.constant 0 : index
    %21 = vector.load %arg3[%c0_8, %c0_9] : memref<128x1xf32, #tpu.memory_space<vmem>>, vector<128x1xf32>
    %22 = vector.broadcast %21 : vector<128x1xf32> to vector<128x32xf32>
    %23 = arith.mulf %20, %22 : vector<128x32xf32>
    %c0_10 = arith.constant 0 : index
    %c0_11 = arith.constant 0 : index
    %24 = vector.load %arg4[%c0_10, %c0_11] : memref<128x1xf32, #tpu.memory_space<vmem>>, vector<128x1xf32>
    %25 = vector.broadcast %24 : vector<128x1xf32> to vector<128x32xf32>
    %26 = arith.addf %23, %25 : vector<128x32xf32>
    %cst_12 = arith.constant 0.000000e+00 : f32
    %27 = vector.broadcast %cst_12 : f32 to vector<128x32xf32>
    %28 = arith.maximumf %26, %27 : vector<128x32xf32>
    %c0_13 = arith.constant 0 : index
    %c0_14 = arith.constant 0 : index
    %29 = vector.load %arg5[%c0_13, %c0_14] : memref<128x32xf32, #tpu.memory_space<vmem>>, vector<128x32xf32>
    tpu.vector_store %arg5[%c0_13, %c0_14], %28 {strides = array<i32>} : memref<128x32xf32, #tpu.memory_space<vmem>>, vector<128x32xf32>,
    return
  }
  func.func @transform_0(%arg0: i32) -> (i32, i32) {
    %c0_i32 = arith.constant 0 : i32
    %c0_i32_0 = arith.constant 0 : i32
    %c0_i32_1 = arith.constant 0 : i32
    return %c0_i32, %c0_i32_0 : i32, i32
  }
  func.func @transform_1(%arg0: i32) -> (i32, i32) {
    %c0_i32 = arith.constant 0 : i32
    %c0_i32_0 = arith.constant 0 : i32
    %c0_i32_1 = arith.constant 0 : i32
    return %c0_i32, %c0_i32_0 : i32, i32
  }
  func.func @transform_2(%arg0: i32) -> (i32, i32) {
    %c0_i32 = arith.constant 0 : i32
    %c0_i32_0 = arith.constant 0 : i32
    %c0_i32_1 = arith.constant 0 : i32
    return %c0_i32, %c0_i32_0 : i32, i32
  }
  func.func @transform_3(%arg0: i32) -> (i32, i32) {
    %c0_i32 = arith.constant 0 : i32
    %c0_i32_0 = arith.constant 0 : i32
    %c0_i32_1 = arith.constant 0 : i32
    return %c0_i32, %c0_i32_0 : i32, i32
  }
  func.func @transform_4(%arg0: i32) -> (i32, i32) {
    %c0_i32 = arith.constant 0 : i32
    %c0_i32_0 = arith.constant 0 : i32
    %c0_i32_1 = arith.constant 0 : i32
    return %c0_i32, %c0_i32_0 : i32, i32
  }
}

module attributes {stable_mosaic.version = 11 : i64} {
  func.func @_convt_bn_relu_kernel(%arg0: i32, %arg1: memref<64x2048xbf16, #tpu.memory_space<vmem>>, %arg2: memref<2048x128xbf16, #tpu.memory_space<vmem>>, %arg3: memref<64x1xf32, #tpu.memory_space<vmem>>, %arg4: memref<64x1xf32, #tpu.memory_space<vmem>>, %arg5: memref<64x128xf32, #tpu.memory_space<vmem>>) attributes {dimension_semantics = [#tpu.dimension_semantics<arbitrary>], iteration_bounds = array<i64: 1>, scalar_prefetch = 0 : i64, scratch_operands = 0 : i64, tpu.core_type = #tpu.core_type<tc>, window_params = [{pipeline_mode = #tpu.pipeline_mode<synchronous>, transform_indices = @transform_0, window_bounds = array<i64: 64, 2048>}, {pipeline_mode = #tpu.pipeline_mode<synchronous>, transform_indices = @transform_1, window_bounds = array<i64: 2048, 128>}, {pipeline_mode = #tpu.pipeline_mode<synchronous>, transform_indices = @transform_2, window_bounds = array<i64: 64, 1>}, {pipeline_mode = #tpu.pipeline_mode<synchronous>, transform_indices = @transform_3, window_bounds = array<i64: 64, 1>}, {pipeline_mode = #tpu.pipeline_mode<synchronous>, transform_indices = @transform_4, window_bounds = array<i64: 64, 128>}]} {
    %c0 = arith.constant 0 : index
    %c0_0 = arith.constant 0 : index
    %0 = vector.load %arg1[%c0, %c0_0] : memref<64x2048xbf16, #tpu.memory_space<vmem>>, vector<64x2048xbf16>
    %c0_1 = arith.constant 0 : index
    %c0_2 = arith.constant 0 : index
    %1 = vector.load %arg2[%c0_1, %c0_2] : memref<2048x128xbf16, #tpu.memory_space<vmem>>, vector<2048x128xbf16>
    %cst = arith.constant dense<0.000000e+00> : vector<64x128xf32>
    %2 = tpu.matmul %0, %1, %cst {dimension_numbers = #tpu.dot_dimension_numbers<[1], [0], [0], [1], [0, 0, 1, 1], [], []>} : vector<64x2048xbf16>, vector<2048x128xbf16>, vector<64x128xf32> -> vector<64x128xf32>
    %cst_3 = arith.constant dense<0.000000e+00> : vector<64xf32>
    %3 = vector.multi_reduction <add>, %2, %cst_3 [1] : vector<64x128xf32> to vector<64xf32>
    %4 = vector.shape_cast %3 : vector<64xf32> to vector<64x1xf32>
    %cst_4 = arith.constant 1.280000e+02 : f32
    %5 = vector.broadcast %cst_4 : f32 to vector<64x1xf32>
    %6 = arith.divf %4, %5 : vector<64x1xf32>
    %7 = vector.broadcast %6 : vector<64x1xf32> to vector<64x128xf32>
    %8 = arith.subf %2, %7 : vector<64x128xf32>
    %9 = arith.mulf %8, %8 : vector<64x128xf32>
    %cst_5 = arith.constant dense<0.000000e+00> : vector<64xf32>
    %10 = vector.multi_reduction <add>, %9, %cst_5 [1] : vector<64x128xf32> to vector<64xf32>
    %11 = vector.shape_cast %10 : vector<64xf32> to vector<64x1xf32>
    %cst_6 = arith.constant 1.280000e+02 : f32
    %12 = vector.broadcast %cst_6 : f32 to vector<64x1xf32>
    %13 = arith.divf %11, %12 : vector<64x1xf32>
    %14 = vector.broadcast %6 : vector<64x1xf32> to vector<64x128xf32>
    %15 = arith.subf %2, %14 : vector<64x128xf32>
    %cst_7 = arith.constant 9.99999974E-6 : f32
    %16 = vector.broadcast %cst_7 : f32 to vector<64x1xf32>
    %17 = arith.addf %13, %16 : vector<64x1xf32>
    %18 = math.rsqrt %17 : vector<64x1xf32>
    %19 = vector.broadcast %18 : vector<64x1xf32> to vector<64x128xf32>
    %20 = arith.mulf %15, %19 : vector<64x128xf32>
    %c0_8 = arith.constant 0 : index
    %c0_9 = arith.constant 0 : index
    %21 = vector.load %arg3[%c0_8, %c0_9] : memref<64x1xf32, #tpu.memory_space<vmem>>, vector<64x1xf32>
    %22 = vector.broadcast %21 : vector<64x1xf32> to vector<64x128xf32>
    %23 = arith.mulf %20, %22 : vector<64x128xf32>
    %c0_10 = arith.constant 0 : index
    %c0_11 = arith.constant 0 : index
    %24 = vector.load %arg4[%c0_10, %c0_11] : memref<64x1xf32, #tpu.memory_space<vmem>>, vector<64x1xf32>
    %25 = vector.broadcast %24 : vector<64x1xf32> to vector<64x128xf32>
    %26 = arith.addf %23, %25 : vector<64x128xf32>
    %cst_12 = arith.constant 0.000000e+00 : f32
    %27 = vector.broadcast %cst_12 : f32 to vector<64x128xf32>
    %28 = arith.maximumf %26, %27 : vector<64x128xf32>
    %c0_13 = arith.constant 0 : index
    %c0_14 = arith.constant 0 : index
    %29 = vector.load %arg5[%c0_13, %c0_14] : memref<64x128xf32, #tpu.memory_space<vmem>>, vector<64x128xf32>
    tpu.vector_store %arg5[%c0_13, %c0_14], %28 {strides = array<i32>} : memref<64x128xf32, #tpu.memory_space<vmem>>, vector<64x128xf32>,
    return
  }
  func.func @transform_0(%arg0: i32) -> (i32, i32) {
    %c0_i32 = arith.constant 0 : i32
    %c0_i32_0 = arith.constant 0 : i32
    %c0_i32_1 = arith.constant 0 : i32
    return %c0_i32, %c0_i32_0 : i32, i32
  }
  func.func @transform_1(%arg0: i32) -> (i32, i32) {
    %c0_i32 = arith.constant 0 : i32
    %c0_i32_0 = arith.constant 0 : i32
    %c0_i32_1 = arith.constant 0 : i32
    return %c0_i32, %c0_i32_0 : i32, i32
  }
  func.func @transform_2(%arg0: i32) -> (i32, i32) {
    %c0_i32 = arith.constant 0 : i32
    %c0_i32_0 = arith.constant 0 : i32
    %c0_i32_1 = arith.constant 0 : i32
    return %c0_i32, %c0_i32_0 : i32, i32
  }
  func.func @transform_3(%arg0: i32) -> (i32, i32) {
    %c0_i32 = arith.constant 0 : i32
    %c0_i32_0 = arith.constant 0 : i32
    %c0_i32_1 = arith.constant 0 : i32
    return %c0_i32, %c0_i32_0 : i32, i32
  }
  func.func @transform_4(%arg0: i32) -> (i32, i32) {
    %c0_i32 = arith.constant 0 : i32
    %c0_i32_0 = arith.constant 0 : i32
    %c0_i32_1 = arith.constant 0 : i32
    return %c0_i32, %c0_i32_0 : i32, i32
  }
}

module attributes {stable_mosaic.version = 11 : i64} {
  func.func @_convt_bn_relu_kernel(%arg0: i32, %arg1: memref<32x1024xbf16, #tpu.memory_space<vmem>>, %arg2: memref<1024x512xbf16, #tpu.memory_space<vmem>>, %arg3: memref<32x1xf32, #tpu.memory_space<vmem>>, %arg4: memref<32x1xf32, #tpu.memory_space<vmem>>, %arg5: memref<32x512xf32, #tpu.memory_space<vmem>>) attributes {dimension_semantics = [#tpu.dimension_semantics<arbitrary>], iteration_bounds = array<i64: 1>, scalar_prefetch = 0 : i64, scratch_operands = 0 : i64, tpu.core_type = #tpu.core_type<tc>, window_params = [{pipeline_mode = #tpu.pipeline_mode<synchronous>, transform_indices = @transform_0, window_bounds = array<i64: 32, 1024>}, {pipeline_mode = #tpu.pipeline_mode<synchronous>, transform_indices = @transform_1, window_bounds = array<i64: 1024, 512>}, {pipeline_mode = #tpu.pipeline_mode<synchronous>, transform_indices = @transform_2, window_bounds = array<i64: 32, 1>}, {pipeline_mode = #tpu.pipeline_mode<synchronous>, transform_indices = @transform_3, window_bounds = array<i64: 32, 1>}, {pipeline_mode = #tpu.pipeline_mode<synchronous>, transform_indices = @transform_4, window_bounds = array<i64: 32, 512>}]} {
    %c0 = arith.constant 0 : index
    %c0_0 = arith.constant 0 : index
    %0 = vector.load %arg1[%c0, %c0_0] : memref<32x1024xbf16, #tpu.memory_space<vmem>>, vector<32x1024xbf16>
    %c0_1 = arith.constant 0 : index
    %c0_2 = arith.constant 0 : index
    %1 = vector.load %arg2[%c0_1, %c0_2] : memref<1024x512xbf16, #tpu.memory_space<vmem>>, vector<1024x512xbf16>
    %cst = arith.constant dense<0.000000e+00> : vector<32x512xf32>
    %2 = tpu.matmul %0, %1, %cst {dimension_numbers = #tpu.dot_dimension_numbers<[1], [0], [0], [1], [0, 0, 1, 1], [], []>} : vector<32x1024xbf16>, vector<1024x512xbf16>, vector<32x512xf32> -> vector<32x512xf32>
    %cst_3 = arith.constant dense<0.000000e+00> : vector<32xf32>
    %3 = vector.multi_reduction <add>, %2, %cst_3 [1] : vector<32x512xf32> to vector<32xf32>
    %4 = vector.shape_cast %3 : vector<32xf32> to vector<32x1xf32>
    %cst_4 = arith.constant 5.120000e+02 : f32
    %5 = vector.broadcast %cst_4 : f32 to vector<32x1xf32>
    %6 = arith.divf %4, %5 : vector<32x1xf32>
    %7 = vector.broadcast %6 : vector<32x1xf32> to vector<32x512xf32>
    %8 = arith.subf %2, %7 : vector<32x512xf32>
    %9 = arith.mulf %8, %8 : vector<32x512xf32>
    %cst_5 = arith.constant dense<0.000000e+00> : vector<32xf32>
    %10 = vector.multi_reduction <add>, %9, %cst_5 [1] : vector<32x512xf32> to vector<32xf32>
    %11 = vector.shape_cast %10 : vector<32xf32> to vector<32x1xf32>
    %cst_6 = arith.constant 5.120000e+02 : f32
    %12 = vector.broadcast %cst_6 : f32 to vector<32x1xf32>
    %13 = arith.divf %11, %12 : vector<32x1xf32>
    %14 = vector.broadcast %6 : vector<32x1xf32> to vector<32x512xf32>
    %15 = arith.subf %2, %14 : vector<32x512xf32>
    %cst_7 = arith.constant 9.99999974E-6 : f32
    %16 = vector.broadcast %cst_7 : f32 to vector<32x1xf32>
    %17 = arith.addf %13, %16 : vector<32x1xf32>
    %18 = math.rsqrt %17 : vector<32x1xf32>
    %19 = vector.broadcast %18 : vector<32x1xf32> to vector<32x512xf32>
    %20 = arith.mulf %15, %19 : vector<32x512xf32>
    %c0_8 = arith.constant 0 : index
    %c0_9 = arith.constant 0 : index
    %21 = vector.load %arg3[%c0_8, %c0_9] : memref<32x1xf32, #tpu.memory_space<vmem>>, vector<32x1xf32>
    %22 = vector.broadcast %21 : vector<32x1xf32> to vector<32x512xf32>
    %23 = arith.mulf %20, %22 : vector<32x512xf32>
    %c0_10 = arith.constant 0 : index
    %c0_11 = arith.constant 0 : index
    %24 = vector.load %arg4[%c0_10, %c0_11] : memref<32x1xf32, #tpu.memory_space<vmem>>, vector<32x1xf32>
    %25 = vector.broadcast %24 : vector<32x1xf32> to vector<32x512xf32>
    %26 = arith.addf %23, %25 : vector<32x512xf32>
    %cst_12 = arith.constant 0.000000e+00 : f32
    %27 = vector.broadcast %cst_12 : f32 to vector<32x512xf32>
    %28 = arith.maximumf %26, %27 : vector<32x512xf32>
    %c0_13 = arith.constant 0 : index
    %c0_14 = arith.constant 0 : index
    %29 = vector.load %arg5[%c0_13, %c0_14] : memref<32x512xf32, #tpu.memory_space<vmem>>, vector<32x512xf32>
    tpu.vector_store %arg5[%c0_13, %c0_14], %28 {strides = array<i32>} : memref<32x512xf32, #tpu.memory_space<vmem>>, vector<32x512xf32>,
    return
  }
  func.func @transform_0(%arg0: i32) -> (i32, i32) {
    %c0_i32 = arith.constant 0 : i32
    %c0_i32_0 = arith.constant 0 : i32
    %c0_i32_1 = arith.constant 0 : i32
    return %c0_i32, %c0_i32_0 : i32, i32
  }
  func.func @transform_1(%arg0: i32) -> (i32, i32) {
    %c0_i32 = arith.constant 0 : i32
    %c0_i32_0 = arith.constant 0 : i32
    %c0_i32_1 = arith.constant 0 : i32
    return %c0_i32, %c0_i32_0 : i32, i32
  }
  func.func @transform_2(%arg0: i32) -> (i32, i32) {
    %c0_i32 = arith.constant 0 : i32
    %c0_i32_0 = arith.constant 0 : i32
    %c0_i32_1 = arith.constant 0 : i32
    return %c0_i32, %c0_i32_0 : i32, i32
  }
  func.func @transform_3(%arg0: i32) -> (i32, i32) {
    %c0_i32 = arith.constant 0 : i32
    %c0_i32_0 = arith.constant 0 : i32
    %c0_i32_1 = arith.constant 0 : i32
    return %c0_i32, %c0_i32_0 : i32, i32
  }
  func.func @transform_4(%arg0: i32) -> (i32, i32) {
    %c0_i32 = arith.constant 0 : i32
    %c0_i32_0 = arith.constant 0 : i32
    %c0_i32_1 = arith.constant 0 : i32
    return %c0_i32, %c0_i32_0 : i32, i32
  }
}

module attributes {stable_mosaic.version = 11 : i64} {
  func.func @_convt_bn_relu_kernel(%arg0: i32, %arg1: memref<16x512xbf16, #tpu.memory_space<vmem>>, %arg2: memref<512x2048xbf16, #tpu.memory_space<vmem>>, %arg3: memref<16x1xf32, #tpu.memory_space<vmem>>, %arg4: memref<16x1xf32, #tpu.memory_space<vmem>>, %arg5: memref<16x2048xf32, #tpu.memory_space<vmem>>) attributes {dimension_semantics = [#tpu.dimension_semantics<arbitrary>], iteration_bounds = array<i64: 1>, scalar_prefetch = 0 : i64, scratch_operands = 0 : i64, tpu.core_type = #tpu.core_type<tc>, window_params = [{pipeline_mode = #tpu.pipeline_mode<synchronous>, transform_indices = @transform_0, window_bounds = array<i64: 16, 512>}, {pipeline_mode = #tpu.pipeline_mode<synchronous>, transform_indices = @transform_1, window_bounds = array<i64: 512, 2048>}, {pipeline_mode = #tpu.pipeline_mode<synchronous>, transform_indices = @transform_2, window_bounds = array<i64: 16, 1>}, {pipeline_mode = #tpu.pipeline_mode<synchronous>, transform_indices = @transform_3, window_bounds = array<i64: 16, 1>}, {pipeline_mode = #tpu.pipeline_mode<synchronous>, transform_indices = @transform_4, window_bounds = array<i64: 16, 2048>}]} {
    %c0 = arith.constant 0 : index
    %c0_0 = arith.constant 0 : index
    %0 = vector.load %arg1[%c0, %c0_0] : memref<16x512xbf16, #tpu.memory_space<vmem>>, vector<16x512xbf16>
    %c0_1 = arith.constant 0 : index
    %c0_2 = arith.constant 0 : index
    %1 = vector.load %arg2[%c0_1, %c0_2] : memref<512x2048xbf16, #tpu.memory_space<vmem>>, vector<512x2048xbf16>
    %cst = arith.constant dense<0.000000e+00> : vector<16x2048xf32>
    %2 = tpu.matmul %0, %1, %cst {dimension_numbers = #tpu.dot_dimension_numbers<[1], [0], [0], [1], [0, 0, 1, 1], [], []>} : vector<16x512xbf16>, vector<512x2048xbf16>, vector<16x2048xf32> -> vector<16x2048xf32>
    %cst_3 = arith.constant dense<0.000000e+00> : vector<16xf32>
    %3 = vector.multi_reduction <add>, %2, %cst_3 [1] : vector<16x2048xf32> to vector<16xf32>
    %4 = vector.shape_cast %3 : vector<16xf32> to vector<16x1xf32>
    %cst_4 = arith.constant 2.048000e+03 : f32
    %5 = vector.broadcast %cst_4 : f32 to vector<16x1xf32>
    %6 = arith.divf %4, %5 : vector<16x1xf32>
    %7 = vector.broadcast %6 : vector<16x1xf32> to vector<16x2048xf32>
    %8 = arith.subf %2, %7 : vector<16x2048xf32>
    %9 = arith.mulf %8, %8 : vector<16x2048xf32>
    %cst_5 = arith.constant dense<0.000000e+00> : vector<16xf32>
    %10 = vector.multi_reduction <add>, %9, %cst_5 [1] : vector<16x2048xf32> to vector<16xf32>
    %11 = vector.shape_cast %10 : vector<16xf32> to vector<16x1xf32>
    %cst_6 = arith.constant 2.048000e+03 : f32
    %12 = vector.broadcast %cst_6 : f32 to vector<16x1xf32>
    %13 = arith.divf %11, %12 : vector<16x1xf32>
    %14 = vector.broadcast %6 : vector<16x1xf32> to vector<16x2048xf32>
    %15 = arith.subf %2, %14 : vector<16x2048xf32>
    %cst_7 = arith.constant 9.99999974E-6 : f32
    %16 = vector.broadcast %cst_7 : f32 to vector<16x1xf32>
    %17 = arith.addf %13, %16 : vector<16x1xf32>
    %18 = math.rsqrt %17 : vector<16x1xf32>
    %19 = vector.broadcast %18 : vector<16x1xf32> to vector<16x2048xf32>
    %20 = arith.mulf %15, %19 : vector<16x2048xf32>
    %c0_8 = arith.constant 0 : index
    %c0_9 = arith.constant 0 : index
    %21 = vector.load %arg3[%c0_8, %c0_9] : memref<16x1xf32, #tpu.memory_space<vmem>>, vector<16x1xf32>
    %22 = vector.broadcast %21 : vector<16x1xf32> to vector<16x2048xf32>
    %23 = arith.mulf %20, %22 : vector<16x2048xf32>
    %c0_10 = arith.constant 0 : index
    %c0_11 = arith.constant 0 : index
    %24 = vector.load %arg4[%c0_10, %c0_11] : memref<16x1xf32, #tpu.memory_space<vmem>>, vector<16x1xf32>
    %25 = vector.broadcast %24 : vector<16x1xf32> to vector<16x2048xf32>
    %26 = arith.addf %23, %25 : vector<16x2048xf32>
    %cst_12 = arith.constant 0.000000e+00 : f32
    %27 = vector.broadcast %cst_12 : f32 to vector<16x2048xf32>
    %28 = arith.maximumf %26, %27 : vector<16x2048xf32>
    %c0_13 = arith.constant 0 : index
    %c0_14 = arith.constant 0 : index
    %29 = vector.load %arg5[%c0_13, %c0_14] : memref<16x2048xf32, #tpu.memory_space<vmem>>, vector<16x2048xf32>
    tpu.vector_store %arg5[%c0_13, %c0_14], %28 {strides = array<i32>} : memref<16x2048xf32, #tpu.memory_space<vmem>>, vector<16x2048xf32>,
    return
  }
  func.func @transform_0(%arg0: i32) -> (i32, i32) {
    %c0_i32 = arith.constant 0 : i32
    %c0_i32_0 = arith.constant 0 : i32
    %c0_i32_1 = arith.constant 0 : i32
    return %c0_i32, %c0_i32_0 : i32, i32
  }
  func.func @transform_1(%arg0: i32) -> (i32, i32) {
    %c0_i32 = arith.constant 0 : i32
    %c0_i32_0 = arith.constant 0 : i32
    %c0_i32_1 = arith.constant 0 : i32
    return %c0_i32, %c0_i32_0 : i32, i32
  }
  func.func @transform_2(%arg0: i32) -> (i32, i32) {
    %c0_i32 = arith.constant 0 : i32
    %c0_i32_0 = arith.constant 0 : i32
    %c0_i32_1 = arith.constant 0 : i32
    return %c0_i32, %c0_i32_0 : i32, i32
  }
  func.func @transform_3(%arg0: i32) -> (i32, i32) {
    %c0_i32 = arith.constant 0 : i32
    %c0_i32_0 = arith.constant 0 : i32
    %c0_i32_1 = arith.constant 0 : i32
    return %c0_i32, %c0_i32_0 : i32, i32
  }
  func.func @transform_4(%arg0: i32) -> (i32, i32) {
    %c0_i32 = arith.constant 0 : i32
    %c0_i32_0 = arith.constant 0 : i32
    %c0_i32_1 = arith.constant 0 : i32
    return %c0_i32, %c0_i32_0 : i32, i32
  }
}

module attributes {stable_mosaic.version = 11 : i64} {
  func.func @_convt_bias_tanh_kernel(%arg0: i32, %arg1: memref<3x256xbf16, #tpu.memory_space<vmem>>, %arg2: memref<256x2048xbf16, #tpu.memory_space<vmem>>, %arg3: memref<3x1xf32, #tpu.memory_space<vmem>>, %arg4: memref<3x2048xf32, #tpu.memory_space<vmem>>) attributes {dimension_semantics = [#tpu.dimension_semantics<parallel>], iteration_bounds = array<i64: 4>, scalar_prefetch = 0 : i64, scratch_operands = 0 : i64, tpu.core_type = #tpu.core_type<tc>, window_params = [{pipeline_mode = #tpu.pipeline_mode<synchronous>, transform_indices = @transform_0, window_bounds = array<i64: 3, 256>}, {transform_indices = @transform_1, window_bounds = array<i64: 256, 2048>}, {pipeline_mode = #tpu.pipeline_mode<synchronous>, transform_indices = @transform_2, window_bounds = array<i64: 3, 1>}, {transform_indices = @transform_3, window_bounds = array<i64: 3, 2048>}]} {
    %c0 = arith.constant 0 : index
    %c0_0 = arith.constant 0 : index
    %0 = vector.load %arg1[%c0, %c0_0] : memref<3x256xbf16, #tpu.memory_space<vmem>>, vector<3x256xbf16>
    %c0_1 = arith.constant 0 : index
    %c0_2 = arith.constant 0 : index
    %1 = vector.load %arg2[%c0_1, %c0_2] : memref<256x2048xbf16, #tpu.memory_space<vmem>>, vector<256x2048xbf16>
    %cst = arith.constant dense<0.000000e+00> : vector<3x2048xf32>
    %2 = tpu.matmul %0, %1, %cst {dimension_numbers = #tpu.dot_dimension_numbers<[1], [0], [0], [1], [0, 0, 1, 1], [], []>} : vector<3x256xbf16>, vector<256x2048xbf16>, vector<3x2048xf32> -> vector<3x2048xf32>
    %c0_3 = arith.constant 0 : index
    %c0_4 = arith.constant 0 : index
    %3 = vector.load %arg3[%c0_3, %c0_4] : memref<3x1xf32, #tpu.memory_space<vmem>>, vector<3x1xf32>
    %4 = vector.broadcast %3 : vector<3x1xf32> to vector<3x2048xf32>
    %5 = arith.addf %2, %4 : vector<3x2048xf32>
    %6 = math.tanh %5 : vector<3x2048xf32>
    %c0_5 = arith.constant 0 : index
    %c0_6 = arith.constant 0 : index
    %7 = vector.load %arg4[%c0_5, %c0_6] : memref<3x2048xf32, #tpu.memory_space<vmem>>, vector<3x2048xf32>
    tpu.vector_store %arg4[%c0_5, %c0_6], %6 {strides = array<i32>} : memref<3x2048xf32, #tpu.memory_space<vmem>>, vector<3x2048xf32>,
    return
  }
  func.func @transform_0(%arg0: i32) -> (i32, i32) {
    %c0_i32 = arith.constant 0 : i32
    %c0_i32_0 = arith.constant 0 : i32
    %c0_i32_1 = arith.constant 0 : i32
    return %c0_i32, %c0_i32_0 : i32, i32
  }
  func.func @transform_1(%arg0: i32) -> (i32, i32) {
    %c0_i32 = arith.constant 0 : i32
    %c0_i32_0 = arith.constant 0 : i32
    return %c0_i32, %arg0 : i32, i32
  }
  func.func @transform_2(%arg0: i32) -> (i32, i32) {
    %c0_i32 = arith.constant 0 : i32
    %c0_i32_0 = arith.constant 0 : i32
    %c0_i32_1 = arith.constant 0 : i32
    return %c0_i32, %c0_i32_0 : i32, i32
  }
  func.func @transform_3(%arg0: i32) -> (i32, i32) {
    %c0_i32 = arith.constant 0 : i32
    %c0_i32_0 = arith.constant 0 : i32
    return %c0_i32, %arg0 : i32, i32
  }
}

</mosaic_0001>

<bundles_post_ra>
// kernel: generator_forward.5
= control target key start
LH: loop header
LB: loop body
LE: loop exit
PB: predicated region body
PF: predicated region fallthrough
CT: control target
= control target key end

     0   :  { %v1437_v1 = vmov 0   ;;  %vm660_vm0 = vcmask 261120   ;;  %s2081_s1 = inlined_call_operand.vmem [shape: bf16[512,32], index: 1, kind: input, shape index: {}]   ;;  %s2082_s0 = inlined_call_operand.vmem [shape: bf16[128,512], index: 0, kind: input, shape index: {}]   ;;  %s2083_s2 = inlined_call_operand.vmem [shape: f32[128,1], index: 2, kind: input, shape index: {}]   ;;  %s2084_s3 = inlined_call_operand.vmem [shape: f32[128,1], index: 3, kind: input, shape index: {}]   ;;  %s2085_s4 = inlined_call_operand.vmem [shape: f32[128,32], index: 4, kind: output, shape index: {}]  }
   0x1   :  { %v1325_v0 = vld [vmem:[%s2081_s1 + $0x40] sm:$0xff]   ;;  %1324 = vset.pattern.permute.xlu1 %v1437_v1  ;;  %1323 = vset.pattern.permute.xlu0 %v1437_v1  ;;  %v1329_v5 = vld [vmem:[%s2081_s1 + $0x48] sm:$0xff]   ;;  %v1333_v9 = vld [vmem:[%s2081_s1 + $0x50] sm:$0xff]  }
   0x2   :  { %v1326_v2 = vld [vmem:[%s2081_s1 + $0xc0] sm:$0xff]   ;;  %1194 = vmatprep.subr.bf16.mxu0 %v1325_v0  ;;  %v1330_v6 = vld [vmem:[%s2081_s1 + $0xc8] sm:$0xff]   ;;  %v1334_v10 = vld [vmem:[%s2081_s1 + $0xd0] sm:$0xff]  }
   0x3   :  { %v1327_v3 = vld [vmem:[%s2081_s1] sm:$0xff]   ;;  %1258 = vmatprep.subr.bf16.mxu1 %v1326_v2  ;;  %v1331_v7 = vld [vmem:[%s2081_s1 + $0x8] sm:$0xff]   ;;  %v1335_v11 = vld [vmem:[%s2081_s1 + $0x10] sm:$0xff]  }
   0x4   :  { %v1328_v4 = vld [vmem:[%s2081_s1 + $0x80] sm:$0xff]   ;;  %1195 = vmatpush3.bf16.msra.mxu0 %v1327_v3  ;;  %v1332_v8 = vld [vmem:[%s2081_s1 + $0x88] sm:$0xff]   ;;  %v1336_v12 = vld [vmem:[%s2081_s1 + $0x90] sm:$0xff]  }
   0x5   :  { %1259 = vmatpush3.bf16.msra.mxu1 %v1328_v4  ;;  %1196 = vmatprep.subr.bf16.mxu0 %v1329_v5  ;;  %v1337_v13 = vld [vmem:[%s2081_s1 + $0x58] sm:$0xff]   ;;  %v1341_v17 = vld [vmem:[%s2081_s1 + $0x60] sm:$0xff]   ;;  %v1345_v21 = vld [vmem:[%s2081_s1 + $0x68] sm:$0xff]  }
   0x6   :  { %1260 = vmatprep.subr.bf16.mxu1 %v1330_v6  ;;  %v1338_v14 = vld [vmem:[%s2081_s1 + $0xd8] sm:$0xff]   ;;  %v1342_v18 = vld [vmem:[%s2081_s1 + $0xe0] sm:$0xff]   ;;  %v1346_v22 = vld [vmem:[%s2081_s1 + $0xe8] sm:$0xff]  }
   0x7   :  { %v1339_v15 = vld [vmem:[%s2081_s1 + $0x18] sm:$0xff]   ;;  %v1343_v19 = vld [vmem:[%s2081_s1 + $0x20] sm:$0xff]   ;;  %v1347_v23 = vld [vmem:[%s2081_s1 + $0x28] sm:$0xff]  }
   0x8   :  { %1197 = vmatpush3.bf16.msra.mxu0 %v1331_v7  ;;  %v1340_v16 = vld [vmem:[%s2081_s1 + $0x98] sm:$0xff]   ;;  %v1344_v20 = vld [vmem:[%s2081_s1 + $0xa0] sm:$0xff]   ;;  %v1348_v24 = vld [vmem:[%s2081_s1 + $0xa8] sm:$0xff]  }
   0x9   :  { %1261 = vmatpush3.bf16.msra.mxu1 %v1332_v8  ;;  %1198 = vmatprep.subr.bf16.mxu0 %v1333_v9  ;;  %v1349_v25 = vld [vmem:[%s2081_s1 + $0x70] sm:$0xff]   ;;  %v1353_v29 = vld [vmem:[%s2081_s1 + $0x78] sm:$0xff]   ;;  %v871_v47 = vld [vmem:[%s2083_s2 + $0x8] sm:$0xff] }
   0xa   :  { %1262 = vmatprep.subr.bf16.mxu1 %v1334_v10  ;;  %v1350_v26 = vld [vmem:[%s2081_s1 + $0xf0] sm:$0xff]   ;;  %v1354_v30 = vld [vmem:[%s2081_s1 + $0xf8] sm:$0xff]   ;;  %893 = vperm.xlu1 %1324, %v871_v47   ;;  %v870_v52 = vld [vmem:[%s2083_s2] sm:$0xff] }
   0xb   :  { %v1351_v27 = vld [vmem:[%s2081_s1 + $0x30] sm:$0xff]   ;;  %v1355_v31 = vld [vmem:[%s2081_s1 + $0x38] sm:$0xff]   ;;  %888 = vperm.xlu0 %1323, %v870_v52   ;;  %v879_v55 = vld [vmem:[%s2083_s2 + $0x48] sm:$0xff] }
   0xc   :  { %1199 = vmatpush3.bf16.msra.mxu0 %v1335_v11  ;;  %v1352_v28 = vld [vmem:[%s2081_s1 + $0xb0] sm:$0xff]   ;;  %v1356_v32 = vld [vmem:[%s2081_s1 + $0xb8] sm:$0xff]   ;;  %v874_v56 = vld [vmem:[%s2083_s2 + $0x20] sm:$0xff] }
   0xd   :  { %1263 = vmatpush3.bf16.msra.mxu1 %v1336_v12  ;;  %1200 = vmatprep.subr.bf16.mxu0 %v1337_v13  ;;  %v1357_v33 = vld [vmem:[%s2082_s0] ss:$16 sps:$4 sm:$0xff]   ;;  %v1359_v34 = vld [vmem:[%s2082_s0 + $0x4] ss:$16 sps:$4 sm:$0xff]   ;;  %v1360_v35 = vld [vmem:[%s2082_s0 + $0x8] ss:$16 sps:$4 sm:$0xff]  }
   0xe   :  { %1264 = vmatprep.subr.bf16.mxu1 %v1338_v14  ;;  %v1362_v36 = vld [vmem:[%s2082_s0 + $0xc] ss:$16 sps:$4 sm:$0xff]   ;;  %498 = vmatprep.mubr.bf16.mxu0 %v1359_v34  ;;  %v1363_v37 = vld [vmem:[%s2082_s0 + $0x24] ss:$16 sps:$4 sm:$0xff]   ;;  %v1367_v39 = vld [vmem:[%s2082_s0 + $0x20] ss:$16 sps:$4 sm:$0xff]  }
   0xf   :  { %595 = vmatprep.mubr.bf16.mxu1 %v1362_v36  ;;  %v1365_v38 = vld [vmem:[%s2082_s0 + $0x2c] ss:$16 sps:$4 sm:$0xff]   ;;  %v1368_v40 = vld [vmem:[%s2082_s0 + $0x28] ss:$16 sps:$4 sm:$0xff]   ;;  %v1369_v41 = vld [vmem:[%s2082_s0 + $0x44] ss:$16 sps:$4 sm:$0xff]   ;;  %933 = vperm.xlu0 %1323, %v879_v55  }
  0x10   :  { %1201 = vmatpush3.bf16.msra.mxu0 %v1339_v15  ;;  %v1371_v42 = vld [vmem:[%s2082_s0 + $0x4c] ss:$16 sps:$4 sm:$0xff]   ;;  %v1373_v43 = vld [vmem:[%s2082_s0 + $0x40] ss:$16 sps:$4 sm:$0xff]   ;;  %v1374_v44 = vld [vmem:[%s2082_s0 + $0x48] ss:$16 sps:$4 sm:$0xff]  }
  0x11   :  { %1265 = vmatpush3.bf16.msra.mxu1 %v1340_v16  ;;  %1202 = vmatprep.subr.bf16.mxu0 %v1341_v17  ;;  %v1375_v45 = vld [vmem:[%s2082_s0 + $0x64] ss:$16 sps:$4 sm:$0xff]   ;;  %v1377_v46 = vld [vmem:[%s2082_s0 + $0x6c] ss:$16 sps:$4 sm:$0xff]   ;;  %v1379_v49 = vld [vmem:[%s2082_s0 + $0x60] ss:$16 sps:$4 sm:$0xff]  }
  0x12   :  { %1266 = vmatprep.subr.bf16.mxu1 %v1342_v18  ;;  %v872_v48 = vld [vmem:[%s2083_s2 + $0x10] sm:$0xff]  ;;  %v1380_v50 = vld [vmem:[%s2082_s0 + $0x68] ss:$16 sps:$4 sm:$0xff]   ;;  %v1383_v53 = vld [vmem:[%s2082_s0 + $0x8c] ss:$16 sps:$4 sm:$0xff]  }
  0x13   :  { %v1381_v51 = vld [vmem:[%s2082_s0 + $0x84] ss:$16 sps:$4 sm:$0xff]   ;;  %898 = vperm.xlu1 %1324, %v872_v48   ;;  %v873_v54 = vld [vmem:[%s2083_s2 + $0x18] sm:$0xff]  ;;  %v1385_v57 = vld [vmem:[%s2082_s0 + $0x80] ss:$16 sps:$4 sm:$0xff]  }
  0x14   :  { %1203 = vmatpush3.bf16.msra.mxu0 %v1343_v19  ;;  %v881_v58 = vld [vmem:[%s2083_s2 + $0x58] sm:$0xff]  ;;  %v1387_v60 = vld [vmem:[%s2082_s0 + $0xa4] ss:$16 sps:$4 sm:$0xff]   ;;  %v875_v62 = vld [vmem:[%s2083_s2 + $0x28] sm:$0xff] }
  0x15   :  { %1267 = vmatpush3.bf16.msra.mxu1 %v1344_v20  ;;  %1204 = vmatprep.subr.bf16.mxu0 %v1345_v21  ;;  %v1386_v59 = vld [vmem:[%s2082_s0 + $0x88] ss:$16 sps:$4 sm:$0xff]   ;;  %v1389_v61 = vld [vmem:[%s2082_s0 + $0xac] ss:$16 sps:$4 sm:$0xff]   ;;  %v876_v0 = vld [vmem:[%s2083_s2 + $0x30] sm:$0xff] }
  0x16   :  { %1268 = vmatprep.subr.bf16.mxu1 %v1346_v22  ;;  %943 = vperm.xlu0 %1323, %v881_v58   ;;  %v883_v63 = vld [vmem:[%s2083_s2 + $0x68] sm:$0xff]  ;;  %v1391_v1 = vld [vmem:[%s2082_s0 + $0xa0] ss:$16 sps:$4 sm:$0xff]   ;;  %v885_v2 = vld [vmem:[%s2083_s2 + $0x78] sm:$0xff] }
  0x17   :  { %903 = vperm.xlu1 %1324, %v873_v54   ;;  %v1392_v3 = vld [vmem:[%s2082_s0 + $0xa8] ss:$16 sps:$4 sm:$0xff]   ;;  %v1393_v4 = vld [vmem:[%s2082_s0 + $0xc4] ss:$16 sps:$4 sm:$0xff]   ;;  %v1395_v5 = vld [vmem:[%s2082_s0 + $0xcc] ss:$16 sps:$4 sm:$0xff]  }
  0x18   :  { %1205 = vmatpush3.bf16.msra.mxu0 %v1347_v23  ;;  %v877_v6 = vld [vmem:[%s2083_s2 + $0x38] sm:$0xff]  ;;  %v983_v7 = vld [vmem:[%s2084_s3 + $0x8] sm:$0xff]  ;;  %v878_v8 = vld [vmem:[%s2083_s2 + $0x40] sm:$0xff] }
  0x19   :  { %1269 = vmatpush3.bf16.msra.mxu1 %v1348_v24  ;;  %1206 = vmatprep.subr.bf16.mxu0 %v1349_v25  ;;  %v1397_v9 = vld [vmem:[%s2082_s0 + $0xc0] ss:$16 sps:$4 sm:$0xff]   ;;  %v985_v10 = vld [vmem:[%s2084_s3 + $0x18] sm:$0xff]  ;;  %v1399_v12 = vld [vmem:[%s2082_s0 + $0xe4] ss:$16 sps:$4 sm:$0xff]  }
  0x1a   :  { %1270 = vmatprep.subr.bf16.mxu1 %v1350_v26  ;;  %953 = vperm.xlu0 %1323, %v883_v63   ;;  %v1398_v11 = vld [vmem:[%s2082_s0 + $0xc8] ss:$16 sps:$4 sm:$0xff]   ;;  %v1401_v13 = vld [vmem:[%s2082_s0 + $0xec] ss:$16 sps:$4 sm:$0xff]   ;;  %v880_v14 = vld [vmem:[%s2083_s2 + $0x50] sm:$0xff] }
  0x1b   :  { %908 = vperm.xlu1 %1324, %v874_v56   ;;  %v987_v15 = vld [vmem:[%s2084_s3 + $0x28] sm:$0xff]  ;;  %v882_v16 = vld [vmem:[%s2083_s2 + $0x60] sm:$0xff]  ;;  %v989_v18 = vld [vmem:[%s2084_s3 + $0x38] sm:$0xff] }
  0x1c   :  { %1207 = vmatpush3.bf16.msra.mxu0 %v1351_v27  ;;  %v1403_v17 = vld [vmem:[%s2082_s0 + $0xe0] ss:$16 sps:$4 sm:$0xff]   ;;  %v1404_v19 = vld [vmem:[%s2082_s0 + $0xe8] ss:$16 sps:$4 sm:$0xff]  }
  0x1d   :  { %1271 = vmatpush3.bf16.msra.mxu1 %v1352_v28  ;;  %1208 = vmatprep.subr.bf16.mxu0 %v1353_v29  ;;  %v884_v20 = vld [vmem:[%s2083_s2 + $0x70] sm:$0xff]  ;;  %v991_v21 = vld [vmem:[%s2084_s3 + $0x48] sm:$0xff]  ;;  %v982_v22 = vld [vmem:[%s2084_s3] sm:$0xff] }
  0x1e   :  { %1272 = vmatprep.subr.bf16.mxu1 %v1354_v30  ;;  %963 = vperm.xlu0 %1323, %v885_v2   ;;  %v993_v23 = vld [vmem:[%s2084_s3 + $0x58] sm:$0xff]  ;;  %v984_v24 = vld [vmem:[%s2084_s3 + $0x10] sm:$0xff]  ;;  %v986_v25 = vld [vmem:[%s2084_s3 + $0x20] sm:$0xff] }
  0x1f   :  { %913 = vperm.xlu1 %1324, %v875_v62   ;;  %v988_v26 = vld [vmem:[%s2084_s3 + $0x30] sm:$0xff]  ;;  %v990_v27 = vld [vmem:[%s2084_s3 + $0x40] sm:$0xff] }
  0x20   :  { %1209 = vmatpush3.bf16.msra.mxu0 %v1355_v31  ;;  %v992_v28 = vld [vmem:[%s2084_s3 + $0x50] sm:$0xff] }
  0x21   :  { %1273 = vmatpush3.bf16.msra.mxu1 %v1356_v32 }
  0x22   :  { %1005 = vperm.xlu0 %1323, %v983_v7  }
  0x23   :  { %499 = vmatmul.mubr.bf16.vlgmr.msra.gmra.mrb[0].mxu0 %v1357_v33  ;;  %918 = vperm.xlu1 %1324, %v876_v0  }
  0x24   :  { %596 = vmatmul.mubr.bf16.vlgmr.msra.gmra.mrb[0].mxu1 %v1360_v35  ;;  %506 = vmatprep.mubr.bf16.mxu0 %v1363_v37 }
  0x25   :  { %603 = vmatprep.mubr.bf16.mxu1 %v1365_v38 }
  0x26   :  { %1015 = vperm.xlu0 %1323, %v985_v10  }
  0x27   :  { %923 = vperm.xlu1 %1324, %v877_v6  }
  0x2a   :  { %1025 = vperm.xlu0 %1323, %v987_v15  }
  0x2b   :  { %507 = vmatmul.mubr.bf16.gmra.mrb[4].mxu0 %v1367_v39  ;;  %928 = vperm.xlu1 %1324, %v878_v8  }
  0x2c   :  { %604 = vmatmul.mubr.bf16.gmra.mrb[4].mxu1 %v1368_v40  ;;  %514 = vmatprep.mubr.bf16.mxu0 %v1369_v41 }
  0x2d   :  { %611 = vmatprep.mubr.bf16.mxu1 %v1371_v42 }
  0x2e   :  { %1035 = vperm.xlu0 %1323, %v989_v18  }
  0x2f   :  { %938 = vperm.xlu1 %1324, %v880_v14  }
  0x32   :  { %1045 = vperm.xlu0 %1323, %v991_v21  }
  0x33   :  { %515 = vmatmul.mubr.bf16.gmra.mrb[8].mxu0 %v1373_v43  ;;  %948 = vperm.xlu1 %1324, %v882_v16  }
  0x34   :  { %612 = vmatmul.mubr.bf16.gmra.mrb[8].mxu1 %v1374_v44  ;;  %522 = vmatprep.mubr.bf16.mxu0 %v1375_v45 }
  0x35   :  { %619 = vmatprep.mubr.bf16.mxu1 %v1377_v46 }
  0x36   :  { %1055 = vperm.xlu0 %1323, %v993_v23  }
  0x37   :  { %958 = vperm.xlu1 %1324, %v884_v20  }
  0x3b   :  { %523 = vmatmul.mubr.bf16.gmra.mrb[12].mxu0 %v1379_v49  ;;  %1000 = vperm.xlu1 %1324, %v982_v22  }
  0x3c   :  { %620 = vmatmul.mubr.bf16.gmra.mrb[12].mxu1 %v1380_v50  ;;  %530 = vmatprep.mubr.bf16.mxu0 %v1381_v51 }
  0x3d   :  { %627 = vmatprep.mubr.bf16.mxu1 %v1383_v53 }
  0x3f   :  { %1010 = vperm.xlu1 %1324, %v984_v24  }
  0x43   :  { %531 = vmatmul.mubr.bf16.gmra.mrb[16].mxu0 %v1385_v57  ;;  %1020 = vperm.xlu1 %1324, %v986_v25  }
  0x44   :  { %628 = vmatmul.mubr.bf16.gmra.mrb[16].mxu1 %v1386_v59  ;;  %538 = vmatprep.mubr.bf16.mxu0 %v1387_v60 }
  0x45   :  { %635 = vmatprep.mubr.bf16.mxu1 %v1389_v61 }
  0x47   :  { %1030 = vperm.xlu1 %1324, %v988_v26  }
  0x4b   :  { %539 = vmatmul.mubr.bf16.gmra.mrb[20].mxu0 %v1391_v1  ;;  %1040 = vperm.xlu1 %1324, %v990_v27  }
  0x4c   :  { %636 = vmatmul.mubr.bf16.gmra.mrb[20].mxu1 %v1392_v3  ;;  %546 = vmatprep.mubr.bf16.mxu0 %v1393_v4 }
  0x4d   :  { %643 = vmatprep.mubr.bf16.mxu1 %v1395_v5 }
  0x4f   :  { %1050 = vperm.xlu1 %1324, %v992_v28  }
  0x53   :  { %547 = vmatmul.mubr.bf16.gmra.mrb[24].mxu0 %v1397_v9 }
  0x54   :  { %644 = vmatmul.mubr.bf16.gmra.mrb[24].mxu1 %v1398_v11  ;;  %554 = vmatprep.mubr.bf16.mxu0 %v1399_v12 }
  0x55   :  { %651 = vmatprep.mubr.bf16.mxu1 %v1401_v13 }
  0x5b   :  { %555 = vmatmul.mubr.bf16.gmra.mrb[28].mxu0 %v1403_v17 }
  0x5c   :  { %652 = vmatmul.mubr.bf16.gmra.mrb[28].mxu1 %v1404_v19 }
  0xf6   :  { %v1210_v29 = vpop.f32.mrb[0].mxu0 }
  0xf7   :  { %v1274_v30 = vpop.f32.mrb[0].mxu1  ;;  %v1211_v31 = vpop.f32.mrb[1].mxu0 }
  0xf8   :  { %v1212_v32 = vadd.f32 %v1211_v31, %v1210_v29  ;;  %v1275_v33 = vpop.f32.mrb[1].mxu1  ;;  %v1213_v34 = vpop.f32.mrb[2].mxu0 }
  0xf9   :  { %v1276_v35 = vadd.f32 %v1275_v33, %v1274_v30  ;;  %v1277_v36 = vpop.f32.mrb[2].mxu1  ;;  %v1214_v37 = vpop.f32.mrb[3].mxu0 }
  0xfa   :  { %v1215_v38 = vadd.f32 %v1214_v37, %v1213_v34  ;;  %v1278_v39 = vpop.f32.mrb[3].mxu1 }
  0xfb   :  { %v1279_v40 = vadd.f32 %v1278_v39, %v1277_v36  ;;  %v1739_v41 = vadd.f32 %v1276_v35, %v1212_v32 }
  0xfd   :  { %v661_v42 = vsel %vm660_vm0, %v1739_v41, 0.0  ;;  %v1743_v43 = vadd.f32 %v1279_v40, %v1215_v38 }
  0xfe   :  { %662 = vadd.xlane.f32.xlu0 %v661_v42  ;;  %v1216_v44 = vpop.f32.mrb[4].mxu0 }
  0xff   :  { %v1280_v45 = vpop.f32.mrb[4].mxu1  ;;  %v1217_v46 = vpop.f32.mrb[5].mxu0  ;;  %v664_v53 = vsel %vm660_vm0, %v1743_v43, 0.0 }
 0x100   :  { %v1218_v47 = vadd.f32 %v1217_v46, %v1216_v44  ;;  %v1281_v48 = vpop.f32.mrb[5].mxu1  ;;  %v1219_v49 = vpop.f32.mrb[6].mxu0 }
 0x101   :  { %v1282_v50 = vadd.f32 %v1281_v48, %v1280_v45  ;;  %v1283_v51 = vpop.f32.mrb[6].mxu1  ;;  %v1220_v52 = vpop.f32.mrb[7].mxu0 }
 0x102   :  { %v1221_v54 = vadd.f32 %v1220_v52, %v1219_v49  ;;  %v1284_v55 = vpop.f32.mrb[7].mxu1  ;;  %665 = vadd.xlane.f32.xlu0 %v664_v53 }
 0x103   :  { %v1285_v56 = vadd.f32 %v1284_v55, %v1283_v51  ;;  %v1747_v57 = vadd.f32 %v1282_v50, %v1218_v47 }
 0x105   :  { %v667_v58 = vsel %vm660_vm0, %v1747_v57, 0.0  ;;  %v1751_v59 = vadd.f32 %v1285_v56, %v1221_v54 }
 0x106   :  { %668 = vadd.xlane.f32.xlu1 %v667_v58  ;;  %v1222_v60 = vpop.f32.mrb[8].mxu0 }
 0x107   :  { %v1286_v61 = vpop.f32.mrb[8].mxu1  ;;  %v1223_v62 = vpop.f32.mrb[9].mxu0  ;;  %v670_v5 = vsel %vm660_vm0, %v1751_v59, 0.0 }
 0x108   :  { %v1224_v63 = vadd.f32 %v1223_v62, %v1222_v60  ;;  %v1287_v0 = vpop.f32.mrb[9].mxu1  ;;  %v1225_v1 = vpop.f32.mrb[10].mxu0 }
 0x109   :  { %v1288_v2 = vadd.f32 %v1287_v0, %v1286_v61  ;;  %v1289_v3 = vpop.f32.mrb[10].mxu1  ;;  %v1226_v4 = vpop.f32.mrb[11].mxu0 }
 0x10a   :  { %v1227_v6 = vadd.f32 %v1226_v4, %v1225_v1  ;;  %v1290_v7 = vpop.f32.mrb[11].mxu1  ;;  %671 = vadd.xlane.f32.xlu1 %v670_v5 }
 0x10b   :  { %v1291_v8 = vadd.f32 %v1290_v7, %v1289_v3  ;;  %v1755_v9 = vadd.f32 %v1288_v2, %v1224_v63 }
 0x10d   :  { %v673_v10 = vsel %vm660_vm0, %v1755_v9, 0.0  ;;  %v1759_v11 = vadd.f32 %v1291_v8, %v1227_v6 }
 0x10e   :  { %674 = vadd.xlane.f32.xlu0 %v673_v10  ;;  %v1228_v12 = vpop.f32.mrb[12].mxu0 }
 0x10f   :  { %v1292_v13 = vpop.f32.mrb[12].mxu1  ;;  %v1229_v14 = vpop.f32.mrb[13].mxu0  ;;  %v676_v15 = vsel %vm660_vm0, %v1759_v11, 0.0 }
 0x110   :  { %v1230_v16 = vadd.f32 %v1229_v14, %v1228_v12  ;;  %v1293_v17 = vpop.f32.mrb[13].mxu1  ;;  %677 = vadd.xlane.f32.xlu1 %v676_v15  ;;  %v1231_v18 = vpop.f32.mrb[14].mxu0 }
 0x111   :  { %v1294_v19 = vadd.f32 %v1293_v17, %v1292_v13  ;;  %v1295_v20 = vpop.f32.mrb[14].mxu1  ;;  %v1232_v21 = vpop.f32.mrb[15].mxu0 }
 0x112   :  { %v1233_v22 = vadd.f32 %v1232_v21, %v1231_v18  ;;  %v1296_v23 = vpop.f32.mrb[15].mxu1  ;;  %v1793_v18 = vpop.permute.xlu1 %893 }
 0x113   :  { %v1297_v24 = vadd.f32 %v1296_v23, %v1295_v20  ;;  %v1763_v25 = vadd.f32 %v1294_v19, %v1230_v16 }
 0x115   :  { %v679_v26 = vsel %vm660_vm0, %v1763_v25, 0.0  ;;  %v1767_v27 = vadd.f32 %v1297_v24, %v1233_v22 }
 0x116   :  { %680 = vadd.xlane.f32.xlu0 %v679_v26  ;;  %v1234_v28 = vpop.f32.mrb[16].mxu0 }
 0x117   :  { %v1298_v29 = vpop.f32.mrb[16].mxu1  ;;  %v1235_v30 = vpop.f32.mrb[17].mxu0  ;;  %v682_v31 = vsel %vm660_vm0, %v1767_v27, 0.0 }
 0x118   :  { %v1236_v32 = vadd.f32 %v1235_v30, %v1234_v28  ;;  %v1299_v33 = vpop.f32.mrb[17].mxu1  ;;  %683 = vadd.xlane.f32.xlu1 %v682_v31  ;;  %v1237_v34 = vpop.f32.mrb[18].mxu0 }
 0x119   :  { %v1300_v35 = vadd.f32 %v1299_v33, %v1298_v29  ;;  %v1301_v36 = vpop.f32.mrb[18].mxu1  ;;  %v1238_v37 = vpop.f32.mrb[19].mxu0 }
 0x11a   :  { %v1239_v38 = vadd.f32 %v1238_v37, %v1237_v34  ;;  %v1302_v39 = vpop.f32.mrb[19].mxu1 }
 0x11b   :  { %v1303_v40 = vadd.f32 %v1302_v39, %v1301_v36  ;;  %v1771_v42 = vadd.f32 %v1300_v35, %v1236_v32  ;;  %v1799_v35 = vpop.permute.xlu1 %898 }
 0x11d   :  { %v685_v44 = vsel %vm660_vm0, %v1771_v42, 0.0  ;;  %v1775_v45 = vadd.f32 %v1303_v40, %v1239_v38 }
 0x11e   :  { %686 = vadd.xlane.f32.xlu0 %v685_v44  ;;  %v1240_v46 = vpop.f32.mrb[20].mxu0  ;;  %v994_v44 = vld [vmem:[%s2084_s3 + $0x60] sm:$0xff] }
 0x11f   :  { %v1304_v47 = vpop.f32.mrb[20].mxu1  ;;  %v1241_v48 = vpop.f32.mrb[21].mxu0  ;;  %v688_v49 = vsel %vm660_vm0, %v1775_v45, 0.0 }
 0x120   :  { %v1242_v50 = vadd.f32 %v1241_v48, %v1240_v46  ;;  %v1305_v51 = vpop.f32.mrb[21].mxu1  ;;  %689 = vadd.xlane.f32.xlu1 %v688_v49  ;;  %v1243_v52 = vpop.f32.mrb[22].mxu0 }
 0x121   :  { %v1306_v53 = vadd.f32 %v1305_v51, %v1304_v47  ;;  %v1307_v54 = vpop.f32.mrb[22].mxu1  ;;  %v1244_v55 = vpop.f32.mrb[23].mxu0  ;;  %v995_v47 = vld [vmem:[%s2084_s3 + $0x68] sm:$0xff] }
 0x122   :  { %v1245_v56 = vadd.f32 %v1244_v55, %v1243_v52  ;;  %v1308_v58 = vpop.f32.mrb[23].mxu1  ;;  %v1807_v39 = vpop.permute.xlu1 %903 }
 0x123   :  { %v1309_v60 = vadd.f32 %v1308_v58, %v1307_v54  ;;  %v1779_v61 = vadd.f32 %v1306_v53, %v1242_v50  ;;  %v1819_v48 = vpop.permute.xlu0 %888 }
 0x125   :  { %v691_v62 = vsel %vm660_vm0, %v1779_v61, 0.0  ;;  %v1783_v63 = vadd.f32 %v1309_v60, %v1245_v56 }
 0x126   :  { %692 = vadd.xlane.f32.xlu0 %v691_v62  ;;  %v1246_v0 = vpop.f32.mrb[24].mxu0  ;;  %v1809_v40 = vpop.permute.xlu1 %908 }
 0x127   :  { %v1310_v1 = vpop.f32.mrb[24].mxu1  ;;  %v1247_v2 = vpop.f32.mrb[25].mxu0  ;;  %v694_v3 = vsel %vm660_vm0, %v1783_v63, 0.0 }
 0x128   :  { %v1248_v4 = vadd.f32 %v1247_v2, %v1246_v0  ;;  %v1311_v5 = vpop.f32.mrb[25].mxu1  ;;  %695 = vadd.xlane.f32.xlu1 %v694_v3  ;;  %v1249_v6 = vpop.f32.mrb[26].mxu0 }
 0x129   :  { %v1312_v7 = vadd.f32 %v1311_v5, %v1310_v1  ;;  %v1313_v8 = vpop.f32.mrb[26].mxu1  ;;  %v1250_v10 = vpop.f32.mrb[27].mxu0 }
 0x12a   :  { %v1251_v12 = vadd.f32 %v1250_v10, %v1249_v6  ;;  %v1314_v13 = vpop.f32.mrb[27].mxu1  ;;  %v1814_v46 = vpop.permute.xlu1 %913 }
 0x12b   :  { %v1315_v14 = vadd.f32 %v1314_v13, %v1313_v8  ;;  %v1787_v15 = vadd.f32 %v1312_v7, %v1248_v4  ;;  %v1823_v50 = vpop.permute.xlu0 %933 }
 0x12d   :  { %v697_v16 = vsel %vm660_vm0, %v1787_v15, 0.0  ;;  %v1791_v17 = vadd.f32 %v1315_v14, %v1251_v12 }
 0x12e   :  { %698 = vadd.xlane.f32.xlu0 %v697_v16  ;;  %v1252_v19 = vpop.f32.mrb[28].mxu0  ;;  %v1821_v49 = vpop.permute.xlu1 %918 }
 0x12f   :  { %v1316_v20 = vpop.f32.mrb[28].mxu1  ;;  %v1253_v21 = vpop.f32.mrb[29].mxu0  ;;  %v700_v22 = vsel %vm660_vm0, %v1791_v17, 0.0 }
 0x130   :  { %v1254_v23 = vadd.f32 %v1253_v21, %v1252_v19  ;;  %v1317_v24 = vpop.f32.mrb[29].mxu1  ;;  %701 = vadd.xlane.f32.xlu1 %v700_v22  ;;  %v1255_v26 = vpop.f32.mrb[30].mxu0 }
 0x131   :  { %v1318_v28 = vadd.f32 %v1317_v24, %v1316_v20  ;;  %v1319_v29 = vpop.f32.mrb[30].mxu1  ;;  %v1256_v30 = vpop.f32.mrb[31].mxu0 }
 0x132   :  { %v1257_v31 = vadd.f32 %v1256_v30, %v1255_v26  ;;  %v1320_v32 = vpop.f32.mrb[31].mxu1  ;;  %v1825_v51 = vpop.permute.xlu1 %923 }
 0x133   :  { %v1321_v33 = vadd.f32 %v1320_v32, %v1319_v29  ;;  %v1797_v34 = vadd.f32 %v1318_v28, %v1254_v23  ;;  %v1827_v52 = vpop.permute.xlu0 %943 }
 0x135   :  { %v703_v36 = vsel %vm660_vm0, %v1797_v34, 0.0  ;;  %v1803_v37 = vadd.f32 %v1321_v33, %v1257_v31 }
 0x136   :  { %704 = vadd.xlane.f32.xlu0 %v703_v36  ;;  %v1829_v53 = vpop.permute.xlu1 %928 }
 0x137   :  { %v706_v38 = vsel %vm660_vm0, %v1803_v37, 0.0  ;;  %v1831_v54 = vpop.permute.xlu0 %953 }
 0x138   :  { %707 = vadd.xlane.f32.xlu1 %v706_v38 }
 0x13a   :  { %v1833_v55 = vpop.permute.xlu1 %938 }
 0x13b   :  { %v1835_v56 = vpop.permute.xlu0 %963 }
 0x13e   :  { %v1837_v58 = vpop.permute.xlu1 %948 }
 0x13f   :  { %v1839_v60 = vpop.permute.xlu0 %1005 }
 0x142   :  { %v1841_v62 = vpop.permute.xlu1 %958 }
 0x143   :  { %v1843_v0 = vpop.permute.xlu0 %1015 }
 0x146   :  { %v1845_v1 = vpop.permute.xlu1 %1000 }
 0x147   :  { %v1847_v2 = vpop.permute.xlu0 %1025 }
 0x149   :  { %1060 = vperm.xlu1 %1324, %v994_v44  }
 0x14a   :  { %v1849_v3 = vpop.permute.xlu1 %1010 }
 0x14b   :  { %v1851_v4 = vpop.permute.xlu0 %1035 }
 0x14c   :  { %1065 = vperm.xlu0 %1323, %v995_v47  }
 0x14e   :  { %v1853_v5 = vpop.permute.xlu1 %1020 }
 0x14f   :  { %v1855_v6 = vpop.permute.xlu0 %1045 }
 0x152   :  { %v1857_v7 = vpop.permute.xlu1 %1030 }
 0x153   :  { %v1859_v8 = vpop.permute.xlu0 %1055 }
 0x156   :  { %v1861_v10 = vpop.permute.xlu1 %1040 }
 0x15a   :  { %v1866_v16 = vpop.permute.xlu1 %1050 }
 0x18b   :  { %v663_v12 = vpop.xlane.xlu0 %662 }
 0x18c   :  { %v710_v13 = vmul.f32 0.03125, %v663_v12 }
 0x18e   :  { %v1864_v14 = vsub.f32 %v1739_v41, %v710_v13 }
 0x18f   :  { %v666_v19 = vpop.xlane.xlu0 %665 }
 0x190   :  { %v711_v20 = vmul.f32 0.03125, %v666_v19  ;;  %v742_v21 = vmul.f32 %v1864_v14, %v1864_v14 }
 0x192   :  { %v1871_v22 = vsub.f32 %v1743_v43, %v711_v20  ;;  %v758_v23 = vsel %vm660_vm0, %v742_v21, 0.0 }
 0x193   :  { %v669_v24 = vpop.xlane.xlu1 %668  ;;  %759 = vadd.xlane.f32.xlu0 %v758_v23 }
 0x194   :  { %v712_v26 = vmul.f32 0.03125, %v669_v24  ;;  %v743_v28 = vmul.f32 %v1871_v22, %v1871_v22 }
 0x196   :  { %v1877_v41 = vsub.f32 %v1747_v57, %v712_v26  ;;  %v761_v29 = vsel %vm660_vm0, %v743_v28, 0.0 }
 0x197   :  { %v672_v30 = vpop.xlane.xlu1 %671  ;;  %762 = vadd.xlane.f32.xlu1 %v761_v29 }
 0x198   :  { %v713_v31 = vmul.f32 0.03125, %v672_v30  ;;  %v744_v43 = vmul.f32 %v1877_v41, %v1877_v41 }
 0x19a   :  { %v1883_v32 = vsub.f32 %v1751_v59, %v713_v31  ;;  %v764_v33 = vsel %vm660_vm0, %v744_v43, 0.0 }
 0x19b   :  { %765 = vadd.xlane.f32.xlu0 %v764_v33  ;;  %v675_v36 = vpop.xlane.xlu0 %674 }
 0x19c   :  { %v714_v38 = vmul.f32 0.03125, %v675_v36  ;;  %v745_v57 = vmul.f32 %v1883_v32, %v1883_v32 }
 0x19d   :  { %v678_v44 = vpop.xlane.xlu1 %677 }
 0x19e   :  { %v1889_v47 = vsub.f32 %v1755_v9, %v714_v38  ;;  %v715_v12 = vmul.f32 0.03125, %v678_v44  ;;  %v767_v13 = vsel %vm660_vm0, %v745_v57, 0.0 }
 0x19f   :  { %768 = vadd.xlane.f32.xlu1 %v767_v13 }
 0x1a0   :  { %v1893_v19 = vsub.f32 %v1759_v11, %v715_v12  ;;  %v746_v59 = vmul.f32 %v1889_v47, %v1889_v47 }
 0x1a2   :  { %v770_v20 = vsel %vm660_vm0, %v746_v59, 0.0  ;;  %v747_v21 = vmul.f32 %v1893_v19, %v1893_v19 }
 0x1a3   :  { %771 = vadd.xlane.f32.xlu0 %v770_v20  ;;  %v681_v23 = vpop.xlane.xlu0 %680 }
 0x1a4   :  { %v716_v24 = vmul.f32 0.03125, %v681_v23  ;;  %v773_v9 = vsel %vm660_vm0, %v747_v21, 0.0 }
 0x1a5   :  { %v684_v26 = vpop.xlane.xlu1 %683  ;;  %774 = vadd.xlane.f32.xlu1 %v773_v9 }
 0x1a6   :  { %v1902_v28 = vsub.f32 %v1763_v25, %v716_v24  ;;  %v717_v11 = vmul.f32 0.03125, %v684_v26 }
 0x1a8   :  { %v1905_v29 = vsub.f32 %v1767_v27, %v717_v11  ;;  %v748_v30 = vmul.f32 %v1902_v28, %v1902_v28 }
 0x1aa   :  { %v776_v31 = vsel %vm660_vm0, %v748_v30, 0.0  ;;  %v749_v43 = vmul.f32 %v1905_v29, %v1905_v29 }
 0x1ab   :  { %777 = vadd.xlane.f32.xlu0 %v776_v31  ;;  %v687_v33 = vpop.xlane.xlu0 %686 }
 0x1ac   :  { %v718_v36 = vmul.f32 0.03125, %v687_v33  ;;  %v779_v38 = vsel %vm660_vm0, %v749_v43, 0.0 }
 0x1ad   :  { %v690_v57 = vpop.xlane.xlu1 %689  ;;  %780 = vadd.xlane.f32.xlu1 %v779_v38 }
 0x1ae   :  { %v1914_v25 = vsub.f32 %v1771_v42, %v718_v36  ;;  %v719_v27 = vmul.f32 0.03125, %v690_v57 }
 0x1b0   :  { %v1917_v44 = vsub.f32 %v1775_v45, %v719_v27  ;;  %v750_v12 = vmul.f32 %v1914_v25, %v1914_v25 }
 0x1b2   :  { %v782_v13 = vsel %vm660_vm0, %v750_v12, 0.0  ;;  %v751_v59 = vmul.f32 %v1917_v44, %v1917_v44 }
 0x1b3   :  { %783 = vadd.xlane.f32.xlu0 %v782_v13  ;;  %v693_v20 = vpop.xlane.xlu0 %692 }
 0x1b4   :  { %v720_v21 = vmul.f32 0.03125, %v693_v20  ;;  %v785_v23 = vsel %vm660_vm0, %v751_v59, 0.0 }
 0x1b5   :  { %v696_v24 = vpop.xlane.xlu1 %695  ;;  %786 = vadd.xlane.f32.xlu1 %v785_v23 }
 0x1b6   :  { %v1926_v42 = vsub.f32 %v1779_v61, %v720_v21  ;;  %v721_v45 = vmul.f32 0.03125, %v696_v24 }
 0x1b8   :  { %v1929_v9 = vsub.f32 %v1783_v63, %v721_v45  ;;  %v752_v26 = vmul.f32 %v1926_v42, %v1926_v42 }
 0x1ba   :  { %v788_v11 = vsel %vm660_vm0, %v752_v26, 0.0  ;;  %v753_v30 = vmul.f32 %v1929_v9, %v1929_v9 }
 0x1bb   :  { %789 = vadd.xlane.f32.xlu0 %v788_v11  ;;  %v699_v31 = vpop.xlane.xlu0 %698 }
 0x1bc   :  { %v722_v43 = vmul.f32 0.03125, %v699_v31  ;;  %v791_v33 = vsel %vm660_vm0, %v753_v30, 0.0 }
 0x1bd   :  { %v702_v36 = vpop.xlane.xlu1 %701  ;;  %792 = vadd.xlane.f32.xlu1 %v791_v33 }
 0x1be   :  { %v1938_v61 = vsub.f32 %v1787_v15, %v722_v43  ;;  %v723_v63 = vmul.f32 0.03125, %v702_v36 }
 0x1c0   :  { %v1941_v38 = vsub.f32 %v1791_v17, %v723_v63  ;;  %v754_v57 = vmul.f32 %v1938_v61, %v1938_v61 }
 0x1c2   :  { %v794_v27 = vsel %vm660_vm0, %v754_v57, 0.0  ;;  %v755_v12 = vmul.f32 %v1941_v38, %v1941_v38 }
 0x1c3   :  { %795 = vadd.xlane.f32.xlu0 %v794_v27  ;;  %v705_v13 = vpop.xlane.xlu0 %704 }
 0x1c4   :  { %v724_v59 = vmul.f32 0.03125, %v705_v13  ;;  %v797_v20 = vsel %vm660_vm0, %v755_v12, 0.0 }
 0x1c5   :  { %v708_v21 = vpop.xlane.xlu1 %707  ;;  %798 = vadd.xlane.f32.xlu1 %v797_v20 }
 0x1c6   :  { %v1950_v15 = vsub.f32 %v1797_v34, %v724_v59  ;;  %v725_v17 = vmul.f32 0.03125, %v708_v21  ;;  %v996_v34 = vld [vmem:[%s2084_s3 + $0x70] sm:$0xff] }
 0x1c8   :  { %v1953_v23 = vsub.f32 %v1803_v37, %v725_v17  ;;  %v756_v24 = vmul.f32 %v1950_v15, %v1950_v15  ;;  %v997_v37 = vld [vmem:[%s2084_s3 + $0x78] sm:$0xff] }
 0x1c9   :  { %v1969_v31 = vpop.permute.xlu1 %1060 }
 0x1ca   :  { %v800_v45 = vsel %vm660_vm0, %v756_v24, 0.0  ;;  %v757_v26 = vmul.f32 %v1953_v23, %v1953_v23 }
 0x1cb   :  { %801 = vadd.xlane.f32.xlu0 %v800_v45  ;;  %v1967_v30 = vpop.permute.xlu0 %1065 }
 0x1cc   :  { %v803_v11 = vsel %vm660_vm0, %v757_v26, 0.0 }
 0x1cd   :  { %804 = vadd.xlane.f32.xlu1 %v803_v11 }
 0x1de   :  { %1070 = vperm.xlu1 %1324, %v996_v34  }
 0x1e1   :  { %1075 = vperm.xlu0 %1323, %v997_v37  }
 0x220   :  { %v760_v43 = vpop.xlane.xlu0 %759 }
 0x221   :  { %v806_v33 = vmul.f32 0.03125, %v760_v43 }
 0x223   :  { %v822_v36 = vadd.f32 1e-05, %v806_v33 }
 0x224   :  { %v763_v63 = vpop.xlane.xlu1 %762 }
 0x225   :  { %1405 = vrsqrt.f32 %v822_v36  ;;  %v807_v57 = vmul.f32 0.03125, %v763_v63 }
 0x227   :  { %v823_v27 = vadd.f32 1e-05, %v807_v57 }
 0x228   :  { %v766_v12 = vpop.xlane.xlu0 %765 }
 0x229   :  { %1407 = vrsqrt.f32 %v823_v27  ;;  %v808_v13 = vmul.f32 0.03125, %v766_v12 }
 0x22b   :  { %v824_v59 = vadd.f32 1e-05, %v808_v13 }
 0x22c   :  { %v769_v20 = vpop.xlane.xlu1 %768 }
 0x22d   :  { %1409 = vrsqrt.f32 %v824_v59  ;;  %v809_v21 = vmul.f32 0.03125, %v769_v20 }
 0x22f   :  { %v1406_v17 = vpop.eup %1405  ;;  %v825_v24 = vadd.f32 1e-05, %v809_v21 }
 0x230   :  { %v854_v45 = vmul.f32 %v1406_v17, %v1864_v14  ;;  %v772_v26 = vpop.xlane.xlu0 %771 }
 0x231   :  { %1411 = vrsqrt.f32 %v825_v24  ;;  %v810_v11 = vmul.f32 0.03125, %v772_v26 }
 0x232   :  { %v966_v34 = vmul.f32 %v1819_v48, %v854_v45  ;;  %v775_v37 = vpop.xlane.xlu1 %774 }
 0x233   :  { %v1408_v43 = vpop.eup %1407  ;;  %v826_v33 = vadd.f32 1e-05, %v810_v11  ;;  %v811_v36 = vmul.f32 0.03125, %v775_v37 }
 0x234   :  { %v1078_v63 = vadd.f32 %v1845_v1, %v966_v34  ;;  %v855_v57 = vmul.f32 %v1408_v43, %v1871_v22 }
 0x235   :  { %1413 = vrsqrt.f32 %v826_v33  ;;  %v827_v27 = vadd.f32 1e-05, %v811_v36 }
 0x236   :  { %v1094_v12 = vmax.f32 %v1078_v63, 0.0  ;;  %v967_v13 = vmul.f32 %v1793_v18, %v855_v57 }
 0x237   :  { %v1410_v59 = vpop.eup %1409  ;;  %1415 = vrsqrt.f32 %v827_v27 }
 0x238   :  { %1110 = vst.msk [vmem:[%s2085_s4] sm:$0xff] %vm660_vm0, %v1094_v12  ;;  %v1079_v48 = vadd.f32 %v1839_v60, %v967_v13  ;;  %v856_v14 = vmul.f32 %v1410_v59, %v1877_v41  ;;  %v778_v20 = vpop.xlane.xlu0 %777 }
 0x239   :  { %v812_v1 = vmul.f32 0.03125, %v778_v20 }
 0x23a   :  { %v1095_v21 = vmax.f32 %v1079_v48, 0.0  ;;  %v968_v22 = vmul.f32 %v1799_v35, %v856_v14  ;;  %v781_v17 = vpop.xlane.xlu1 %780 }
 0x23b   :  { %v1412_v24 = vpop.eup %1411  ;;  %v828_v45 = vadd.f32 1e-05, %v812_v1  ;;  %v813_v18 = vmul.f32 0.03125, %v781_v17 }
 0x23c   :  { %1111 = vst.msk [vmem:[%s2085_s4 + $0x8] sm:$0xff] %vm660_vm0, %v1095_v21  ;;  %v1080_v26 = vadd.f32 %v1849_v3, %v968_v22  ;;  %v857_v60 = vmul.f32 %v1412_v24, %v1883_v32 }
 0x23d   :  { %1417 = vrsqrt.f32 %v828_v45  ;;  %v829_v41 = vadd.f32 1e-05, %v813_v18 }
 0x23e   :  { %v1096_v11 = vmax.f32 %v1080_v26, 0.0  ;;  %v969_v34 = vmul.f32 %v1807_v39, %v857_v60 }
 0x23f   :  { %v1414_v37 = vpop.eup %1413  ;;  %1419 = vrsqrt.f32 %v829_v41 }
 0x240   :  { %1112 = vst.msk [vmem:[%s2085_s4 + $0x10] sm:$0xff] %vm660_vm0, %v1096_v11  ;;  %v1081_v35 = vadd.f32 %v1843_v0, %v969_v34  ;;  %v858_v43 = vmul.f32 %v1414_v37, %v1889_v47  ;;  %v784_v33 = vpop.xlane.xlu0 %783 }
 0x241   :  { %v1416_v3 = vpop.eup %1415  ;;  %v814_v36 = vmul.f32 0.03125, %v784_v33 }
 0x242   :  { %v1097_v32 = vmax.f32 %v1081_v35, 0.0  ;;  %v970_v63 = vmul.f32 %v1809_v40, %v858_v43  ;;  %v859_v57 = vmul.f32 %v1416_v3, %v1893_v19  ;;  %v787_v39 = vpop.xlane.xlu1 %786 }
 0x243   :  { %v830_v27 = vadd.f32 1e-05, %v814_v36  ;;  %v815_v12 = vmul.f32 0.03125, %v787_v39 }
 0x244   :  { %1113 = vst.msk [vmem:[%s2085_s4 + $0x18] sm:$0xff] %vm660_vm0, %v1097_v32  ;;  %v1082_v0 = vadd.f32 %v1853_v5, %v970_v63  ;;  %v971_v47 = vmul.f32 %v1814_v46, %v859_v57 }
 0x245   :  { %1421 = vrsqrt.f32 %v830_v27  ;;  %v831_v13 = vadd.f32 1e-05, %v815_v12 }
 0x246   :  { %v1098_v59 = vmax.f32 %v1082_v0, 0.0  ;;  %v1083_v48 = vadd.f32 %v1847_v2, %v971_v47 }
 0x247   :  { %v1418_v40 = vpop.eup %1417  ;;  %1423 = vrsqrt.f32 %v831_v13 }
 0x248   :  { %1114 = vst.msk [vmem:[%s2085_s4 + $0x20] sm:$0xff] %vm660_vm0, %v1098_v59  ;;  %v1099_v19 = vmax.f32 %v1083_v48, 0.0  ;;  %v860_v14 = vmul.f32 %v1418_v40, %v1902_v28  ;;  %v790_v20 = vpop.xlane.xlu0 %789 }
 0x249   :  { %v1420_v1 = vpop.eup %1419  ;;  %v816_v5 = vmul.f32 0.03125, %v790_v20 }
 0x24a   :  { %1115 = vst.msk [vmem:[%s2085_s4 + $0x28] sm:$0xff] %vm660_vm0, %v1099_v19  ;;  %v972_v46 = vmul.f32 %v1821_v49, %v860_v14  ;;  %v861_v2 = vmul.f32 %v1420_v1, %v1905_v29  ;;  %v793_v21 = vpop.xlane.xlu1 %792 }
 0x24b   :  { %v832_v22 = vadd.f32 1e-05, %v816_v5  ;;  %v817_v17 = vmul.f32 0.03125, %v793_v21 }
 0x24c   :  { %v1084_v24 = vadd.f32 %v1857_v7, %v972_v46  ;;  %v973_v45 = vmul.f32 %v1825_v51, %v861_v2 }
 0x24d   :  { %1425 = vrsqrt.f32 %v832_v22  ;;  %v833_v28 = vadd.f32 1e-05, %v817_v17 }
 0x24e   :  { %v1100_v18 = vmax.f32 %v1084_v24, 0.0  ;;  %v1085_v26 = vadd.f32 %v1851_v4, %v973_v45 }
 0x24f   :  { %v1422_v60 = vpop.eup %1421  ;;  %1427 = vrsqrt.f32 %v833_v28 }
 0x250   :  { %1116 = vst.msk [vmem:[%s2085_s4 + $0x30] sm:$0xff] %vm660_vm0, %v1100_v18  ;;  %v1101_v49 = vmax.f32 %v1085_v26, 0.0  ;;  %v862_v29 = vmul.f32 %v1422_v60, %v1914_v25  ;;  %v796_v41 = vpop.xlane.xlu0 %795 }
 0x251   :  { %v1424_v11 = vpop.eup %1423  ;;  %v818_v7 = vmul.f32 0.03125, %v796_v41 }
 0x252   :  { %1117 = vst.msk [vmem:[%s2085_s4 + $0x38] sm:$0xff] %vm660_vm0, %v1101_v49  ;;  %v974_v51 = vmul.f32 %v1829_v53, %v862_v29  ;;  %v863_v4 = vmul.f32 %v1424_v11, %v1917_v44  ;;  %v799_v34 = vpop.xlane.xlu1 %798 }
 0x253   :  { %v834_v37 = vadd.f32 1e-05, %v818_v7  ;;  %v819_v35 = vmul.f32 0.03125, %v799_v34 }
 0x254   :  { %v1086_v43 = vadd.f32 %v1861_v10, %v974_v51  ;;  %v975_v33 = vmul.f32 %v1823_v50, %v863_v4 }
 0x255   :  { %1429 = vrsqrt.f32 %v834_v37  ;;  %v835_v25 = vadd.f32 1e-05, %v819_v35 }
 0x256   :  { %v1102_v3 = vmax.f32 %v1086_v43, 0.0  ;;  %v1087_v36 = vadd.f32 %v1855_v6, %v975_v33 }
 0x257   :  { %v1426_v32 = vpop.eup %1425  ;;  %1431 = vrsqrt.f32 %v835_v25 }
 0x258   :  { %1118 = vst.msk [vmem:[%s2085_s4 + $0x40] sm:$0xff] %vm660_vm0, %v1102_v3  ;;  %v1103_v53 = vmax.f32 %v1087_v36, 0.0  ;;  %v864_v44 = vmul.f32 %v1426_v32, %v1926_v42  ;;  %v802_v63 = vpop.xlane.xlu0 %801 }
 0x259   :  { %v1428_v57 = vpop.eup %1427  ;;  %v820_v10 = vmul.f32 0.03125, %v802_v63 }
 0x25a   :  { %1119 = vst.msk [vmem:[%s2085_s4 + $0x48] sm:$0xff] %vm660_vm0, %v1103_v53  ;;  %v976_v50 = vmul.f32 %v1833_v55, %v864_v44  ;;  %v865_v6 = vmul.f32 %v1428_v57, %v1929_v9  ;;  %v805_v39 = vpop.xlane.xlu1 %804 }
 0x25b   :  { %v836_v27 = vadd.f32 1e-05, %v820_v10  ;;  %v821_v12 = vmul.f32 0.03125, %v805_v39 }
 0x25c   :  { %v1088_v0 = vadd.f32 %v1866_v16, %v976_v50  ;;  %v977_v47 = vmul.f32 %v1827_v52, %v865_v6 }
 0x25d   :  { %1433 = vrsqrt.f32 %v836_v27  ;;  %v837_v42 = vadd.f32 1e-05, %v821_v12 }
 0x25e   :  { %v1104_v13 = vmax.f32 %v1088_v0, 0.0  ;;  %v1089_v59 = vadd.f32 %v1859_v8, %v977_v47 }
 0x25f   :  { %v1430_v48 = vpop.eup %1429  ;;  %1435 = vrsqrt.f32 %v837_v42 }
 0x260   :  { %1120 = vst.msk [vmem:[%s2085_s4 + $0x50] sm:$0xff] %vm660_vm0, %v1104_v13  ;;  %v1105_v55 = vmax.f32 %v1089_v59, 0.0  ;;  %v866_v9 = vmul.f32 %v1430_v48, %v1938_v61  ;;  %v1076_v2 = vpop.permute.xlu0 %1075 }
 0x261   :  { %v1432_v40 = vpop.eup %1431 }
 0x262   :  { %1121 = vst.msk [vmem:[%s2085_s4 + $0x58] sm:$0xff] %vm660_vm0, %v1105_v55  ;;  %v978_v52 = vmul.f32 %v1837_v58, %v866_v9  ;;  %v867_v8 = vmul.f32 %v1432_v40, %v1941_v38  ;;  %v1071_v38 = vpop.permute.xlu1 %1070 }
 0x264   :  { %v1090_v16 = vadd.f32 %v1969_v31, %v978_v52  ;;  %v979_v19 = vmul.f32 %v1831_v54, %v867_v8 }
 0x266   :  { %v1106_v14 = vmax.f32 %v1090_v16, 0.0  ;;  %v1091_v20 = vadd.f32 %v1967_v30, %v979_v19 }
 0x267   :  { %v1434_v1 = vpop.eup %1433 }
 0x268   :  { %1122 = vst.msk [vmem:[%s2085_s4 + $0x60] sm:$0xff] %vm660_vm0, %v1106_v14  ;;  %v1107_v61 = vmax.f32 %v1091_v20, 0.0  ;;  %v868_v5 = vmul.f32 %v1434_v1, %v1950_v15 }
 0x269   :  { %v1436_v46 = vpop.eup %1435 }
 0x26a   :  { %1123 = vst.msk [vmem:[%s2085_s4 + $0x68] sm:$0xff] %vm660_vm0, %v1107_v61  ;;  %v980_v54 = vmul.f32 %v1841_v62, %v868_v5  ;;  %v869_v58 = vmul.f32 %v1436_v46, %v1953_v23 }
 0x26c   :  { %v1092_v30 = vadd.f32 %v1071_v38, %v980_v54  ;;  %v981_v31 = vmul.f32 %v1835_v56, %v869_v58 }
 0x26e   :  { %v1108_v21 = vmax.f32 %v1092_v30, 0.0  ;;  %v1093_v22 = vadd.f32 %v1076_v2, %v981_v31 }
 0x270   :  { %1124 = vst.msk [vmem:[%s2085_s4 + $0x70] sm:$0xff] %vm660_vm0, %v1108_v21  ;;  %v1109_v15 = vmax.f32 %v1093_v22, 0.0 }
 0x272   :  { %1125 = vst.msk [vmem:[%s2085_s4 + $0x78] sm:$0xff] %vm660_vm0, %v1109_v15 }

// kernel: generator_forward.6
= control target key start
LH: loop header
LB: loop body
LE: loop exit
PB: predicated region body
PF: predicated region fallthrough
CT: control target
= control target key end

     0   :  { %s3627_s1 = inlined_call_operand.vmem [shape: bf16[2048,128], index: 1, kind: input, shape index: {}]   ;;  %s3628_s0 = inlined_call_operand.vmem [shape: bf16[64,2048], index: 0, kind: input, shape index: {}]   ;;  %s3629_s2 = inlined_call_operand.vmem [shape: f32[64,1], index: 2, kind: input, shape index: {}]   ;;  %s3630_s3 = inlined_call_operand.vmem [shape: f32[64,1], index: 3, kind: input, shape index: {}]   ;;  %s3631_s4 = inlined_call_operand.vmem [shape: f32[64,128], index: 4, kind: output, shape index: {}]  }
   0x1   :  { %v2682_v0 = vld [vmem:[%s3627_s1 + $0x40] sm:$0xff]   ;;  %v2686_v4 = vld [vmem:[%s3627_s1 + $0x48] sm:$0xff]   ;;  %v2690_v8 = vld [vmem:[%s3627_s1 + $0x50] sm:$0xff]  }
   0x2   :  { %v2683_v1 = vld [vmem:[%s3627_s1 + $0xc0] sm:$0xff]   ;;  %2359 = vmatprep.subr.bf16.mxu0 %v2682_v0  ;;  %v2687_v5 = vld [vmem:[%s3627_s1 + $0xc8] sm:$0xff]   ;;  %v2691_v9 = vld [vmem:[%s3627_s1 + $0xd0] sm:$0xff]  }
   0x3   :  { %v2684_v2 = vld [vmem:[%s3627_s1] sm:$0xff]   ;;  %2399 = vmatprep.subr.bf16.mxu1 %v2683_v1  ;;  %v2688_v6 = vld [vmem:[%s3627_s1 + $0x8] sm:$0xff]   ;;  %v2692_v10 = vld [vmem:[%s3627_s1 + $0x10] sm:$0xff]  }
   0x4   :  { %v2685_v3 = vld [vmem:[%s3627_s1 + $0x80] sm:$0xff]   ;;  %2360 = vmatpush3.bf16.msra.mxu0 %v2684_v2  ;;  %v2689_v7 = vld [vmem:[%s3627_s1 + $0x88] sm:$0xff]   ;;  %v2693_v11 = vld [vmem:[%s3627_s1 + $0x90] sm:$0xff]  }
   0x5   :  { %2400 = vmatpush3.bf16.msra.mxu1 %v2685_v3  ;;  %2361 = vmatprep.subr.bf16.mxu0 %v2686_v4  ;;  %v2694_v12 = vld [vmem:[%s3627_s1 + $0x58] sm:$0xff]   ;;  %v2698_v16 = vld [vmem:[%s3627_s1 + $0x60] sm:$0xff]   ;;  %v2702_v20 = vld [vmem:[%s3627_s1 + $0x68] sm:$0xff]  }
   0x6   :  { %2401 = vmatprep.subr.bf16.mxu1 %v2687_v5  ;;  %v2695_v13 = vld [vmem:[%s3627_s1 + $0xd8] sm:$0xff]   ;;  %v2699_v17 = vld [vmem:[%s3627_s1 + $0xe0] sm:$0xff]   ;;  %v2703_v21 = vld [vmem:[%s3627_s1 + $0xe8] sm:$0xff]  }
   0x7   :  { %v2696_v14 = vld [vmem:[%s3627_s1 + $0x18] sm:$0xff]   ;;  %v2700_v18 = vld [vmem:[%s3627_s1 + $0x20] sm:$0xff]   ;;  %v2704_v22 = vld [vmem:[%s3627_s1 + $0x28] sm:$0xff]  }
   0x8   :  { %2362 = vmatpush3.bf16.msra.mxu0 %v2688_v6  ;;  %v2697_v15 = vld [vmem:[%s3627_s1 + $0x98] sm:$0xff]   ;;  %v2701_v19 = vld [vmem:[%s3627_s1 + $0xa0] sm:$0xff]   ;;  %v2705_v23 = vld [vmem:[%s3627_s1 + $0xa8] sm:$0xff]  }
   0x9   :  { %2402 = vmatpush3.bf16.msra.mxu1 %v2689_v7  ;;  %2363 = vmatprep.subr.bf16.mxu0 %v2690_v8  ;;  %v2706_v24 = vld [vmem:[%s3627_s1 + $0x70] sm:$0xff]   ;;  %v2710_v28 = vld [vmem:[%s3627_s1 + $0x78] sm:$0xff]   ;;  %v18_v32 = vld [vmem:[%s3628_s0] sm:$0xff] }
   0xa   :  { %2403 = vmatprep.subr.bf16.mxu1 %v2691_v9  ;;  %v2707_v25 = vld [vmem:[%s3627_s1 + $0xf0] sm:$0xff]   ;;  %v2711_v29 = vld [vmem:[%s3627_s1 + $0xf8] sm:$0xff]   ;;  %v26_v33 = vld [vmem:[%s3628_s0 + $0x40] sm:$0xff] }
   0xb   :  { %v2708_v26 = vld [vmem:[%s3627_s1 + $0x30] sm:$0xff]   ;;  %v2712_v30 = vld [vmem:[%s3627_s1 + $0x38] sm:$0xff]   ;;  %v19_v34 = vld [vmem:[%s3628_s0 + $0x8] sm:$0xff]  ;;  %v2167_v35 = vcombine.low %v18_v32, %v26_v33  ;;  %v2168_v36 = vcombine.high %v18_v32, %v26_v33 }
   0xc   :  { %2364 = vmatpush3.bf16.msra.mxu0 %v2692_v10  ;;  %v2709_v27 = vld [vmem:[%s3627_s1 + $0xb0] sm:$0xff]   ;;  %v2713_v31 = vld [vmem:[%s3627_s1 + $0xb8] sm:$0xff]   ;;  %v27_v37 = vld [vmem:[%s3628_s0 + $0x48] sm:$0xff] }
   0xd   :  { %2404 = vmatpush3.bf16.msra.mxu1 %v2693_v11  ;;  %2365 = vmatprep.subr.bf16.mxu0 %v2694_v12  ;;  %v2169_v38 = vcombine.low %v19_v34, %v27_v37  ;;  %v2170_v39 = vcombine.high %v19_v34, %v27_v37  ;;  %v2714_v40 = vld [vmem:[%s3627_s1 + $0x140] sm:$0xff]   ;;  %v2718_v44 = vld [vmem:[%s3627_s1 + $0x148] sm:$0xff]   ;;  %v2722_v56 = vld [vmem:[%s3627_s1 + $0x150] sm:$0xff]  }
   0xe   :  { %2405 = vmatprep.subr.bf16.mxu1 %v2695_v13  ;;  %1458 = vmatprep.mubr.bf16.mxu0 %v2168_v36  ;;  %v2715_v41 = vld [vmem:[%s3627_s1 + $0x1c0] sm:$0xff]   ;;  %v2719_v45 = vld [vmem:[%s3627_s1 + $0x1c8] sm:$0xff]   ;;  %v2723_v57 = vld [vmem:[%s3627_s1 + $0x1d0] sm:$0xff]  }
   0xf   :  { %1523 = vmatprep.mubr.bf16.mxu1 %v2170_v39  ;;  %v2716_v42 = vld [vmem:[%s3627_s1 + $0x100] sm:$0xff]   ;;  %v2720_v46 = vld [vmem:[%s3627_s1 + $0x108] sm:$0xff]   ;;  %v2724_v58 = vld [vmem:[%s3627_s1 + $0x110] sm:$0xff]  }
  0x10   :  { %2366 = vmatpush3.bf16.msra.mxu0 %v2696_v14  ;;  %v2717_v43 = vld [vmem:[%s3627_s1 + $0x180] sm:$0xff]   ;;  %v2721_v47 = vld [vmem:[%s3627_s1 + $0x188] sm:$0xff]   ;;  %v2725_v59 = vld [vmem:[%s3627_s1 + $0x190] sm:$0xff]  }
  0x11   :  { %2406 = vmatpush3.bf16.msra.mxu1 %v2697_v15  ;;  %2367 = vmatprep.subr.bf16.mxu0 %v2698_v16  ;;  %v34_v48 = vld [vmem:[%s3628_s0 + $0x80] sm:$0xff]  ;;  %v35_v51 = vld [vmem:[%s3628_s0 + $0x88] sm:$0xff]  ;;  %v2726_v60 = vld [vmem:[%s3627_s1 + $0x158] sm:$0xff]  }
  0x12   :  { %2407 = vmatprep.subr.bf16.mxu1 %v2699_v17  ;;  %v42_v49 = vld [vmem:[%s3628_s0 + $0xc0] sm:$0xff]  ;;  %v43_v52 = vld [vmem:[%s3628_s0 + $0xc8] sm:$0xff]  ;;  %v2727_v61 = vld [vmem:[%s3627_s1 + $0x1d8] sm:$0xff]  }
  0x13   :  { %v2184_v50 = vcombine.high %v34_v48, %v42_v49  ;;  %v2183_v53 = vcombine.low %v34_v48, %v42_v49  ;;  %v2186_v54 = vcombine.high %v35_v51, %v43_v52  ;;  %v2185_v55 = vcombine.low %v35_v51, %v43_v52  ;;  %v2728_v62 = vld [vmem:[%s3627_s1 + $0x118] sm:$0xff]   ;;  %v50_v0 = vld [vmem:[%s3628_s0 + $0x100] sm:$0xff]  ;;  %v51_v2 = vld [vmem:[%s3628_s0 + $0x108] sm:$0xff] }
  0x14   :  { %2368 = vmatpush3.bf16.msra.mxu0 %v2700_v18  ;;  %v2729_v63 = vld [vmem:[%s3627_s1 + $0x198] sm:$0xff]   ;;  %v58_v1 = vld [vmem:[%s3628_s0 + $0x140] sm:$0xff]  ;;  %v59_v3 = vld [vmem:[%s3628_s0 + $0x148] sm:$0xff] }
  0x15   :  { %2408 = vmatpush3.bf16.msra.mxu1 %v2701_v19  ;;  %2369 = vmatprep.subr.bf16.mxu0 %v2702_v20  ;;  %v2200_v4 = vcombine.high %v50_v0, %v58_v1  ;;  %v2202_v5 = vcombine.high %v51_v2, %v59_v3  ;;  %v2199_v6 = vcombine.low %v50_v0, %v58_v1  ;;  %v2730_v8 = vld [vmem:[%s3627_s1 + $0x160] sm:$0xff]   ;;  %v2734_v12 = vld [vmem:[%s3627_s1 + $0x168] sm:$0xff]   ;;  %v20_v32 = vld [vmem:[%s3628_s0 + $0x10] sm:$0xff] }
  0x16   :  { %2409 = vmatprep.subr.bf16.mxu1 %v2703_v21  ;;  %v2201_v7 = vcombine.low %v51_v2, %v59_v3  ;;  %v2731_v9 = vld [vmem:[%s3627_s1 + $0x1e0] sm:$0xff]   ;;  %v2735_v13 = vld [vmem:[%s3627_s1 + $0x1e8] sm:$0xff]   ;;  %v28_v33 = vld [vmem:[%s3628_s0 + $0x50] sm:$0xff] }
  0x17   :  { %v2732_v10 = vld [vmem:[%s3627_s1 + $0x120] sm:$0xff]   ;;  %v2736_v14 = vld [vmem:[%s3627_s1 + $0x128] sm:$0xff]   ;;  %v2171_v34 = vcombine.low %v20_v32, %v28_v33  ;;  %v21_v36 = vld [vmem:[%s3628_s0 + $0x18] sm:$0xff] }
  0x18   :  { %2370 = vmatpush3.bf16.msra.mxu0 %v2704_v22  ;;  %v2733_v11 = vld [vmem:[%s3627_s1 + $0x1a0] sm:$0xff]   ;;  %v2737_v15 = vld [vmem:[%s3627_s1 + $0x1a8] sm:$0xff]   ;;  %v29_v37 = vld [vmem:[%s3628_s0 + $0x58] sm:$0xff] }
  0x19   :  { %2410 = vmatpush3.bf16.msra.mxu1 %v2705_v23  ;;  %2371 = vmatprep.subr.bf16.mxu0 %v2706_v24  ;;  %v66_v16 = vld [vmem:[%s3628_s0 + $0x180] sm:$0xff]  ;;  %v67_v18 = vld [vmem:[%s3628_s0 + $0x188] sm:$0xff]  ;;  %v2738_v24 = vld [vmem:[%s3627_s1 + $0x170] sm:$0xff]   ;;  %v2174_v39 = vcombine.high %v21_v36, %v29_v37 }
  0x1a   :  { %2411 = vmatprep.subr.bf16.mxu1 %v2707_v25  ;;  %v74_v17 = vld [vmem:[%s3628_s0 + $0x1c0] sm:$0xff]  ;;  %v75_v20 = vld [vmem:[%s3628_s0 + $0x1c8] sm:$0xff]  ;;  %v2739_v25 = vld [vmem:[%s3627_s1 + $0x1f0] sm:$0xff]  }
  0x1b   :  { %v2216_v19 = vcombine.high %v66_v16, %v74_v17  ;;  %v2215_v21 = vcombine.low %v66_v16, %v74_v17  ;;  %v2218_v22 = vcombine.high %v67_v18, %v75_v20  ;;  %v2217_v23 = vcombine.low %v67_v18, %v75_v20  ;;  %v36_v48 = vld [vmem:[%s3628_s0 + $0x90] sm:$0xff]  ;;  %v45_v51 = vld [vmem:[%s3628_s0 + $0xd8] sm:$0xff] }
  0x1c   :  { %2372 = vmatpush3.bf16.msra.mxu0 %v2708_v26  ;;  %v2740_v26 = vld [vmem:[%s3627_s1 + $0x130] sm:$0xff]   ;;  %v53_v2 = vld [vmem:[%s3628_s0 + $0x118] sm:$0xff] }
  0x1d   :  { %2412 = vmatpush3.bf16.msra.mxu1 %v2709_v27  ;;  %2373 = vmatprep.subr.bf16.mxu0 %v2710_v28  ;;  %v2741_v27 = vld [vmem:[%s3627_s1 + $0x1b0] sm:$0xff]   ;;  %v2742_v28 = vld [vmem:[%s3627_s1 + $0x178] sm:$0xff]  }
  0x1e   :  { %2413 = vmatprep.subr.bf16.mxu1 %v2711_v29  ;;  %v2743_v29 = vld [vmem:[%s3627_s1 + $0x1f8] sm:$0xff]   ;;  %v44_v49 = vld [vmem:[%s3628_s0 + $0xd0] sm:$0xff] }
  0x1f   :  { %v2188_v52 = vcombine.high %v36_v48, %v44_v49  ;;  %v52_v0 = vld [vmem:[%s3628_s0 + $0x110] sm:$0xff]  ;;  %v77_v20 = vld [vmem:[%s3628_s0 + $0x1d8] sm:$0xff] }
  0x20   :  { %2374 = vmatpush3.bf16.msra.mxu0 %v2712_v30  ;;  %v2744_v30 = vld [vmem:[%s3627_s1 + $0x138] sm:$0xff]   ;;  %v60_v1 = vld [vmem:[%s3628_s0 + $0x150] sm:$0xff] }
  0x21   :  { %2414 = vmatpush3.bf16.msra.mxu1 %v2713_v31  ;;  %2439 = vmatprep.subr.bf16.mxu0 %v2714_v40  ;;  %v2745_v31 = vld [vmem:[%s3627_s1 + $0x1b8] sm:$0xff]   ;;  %v2746_v40 = vld [vmem:[%s3627_s1 + $0x240] sm:$0xff]   ;;  %v2204_v3 = vcombine.high %v52_v0, %v60_v1  ;;  %v68_v16 = vld [vmem:[%s3628_s0 + $0x190] sm:$0xff] }
  0x22   :  { %2479 = vmatprep.subr.bf16.mxu1 %v2715_v41  ;;  %v2747_v41 = vld [vmem:[%s3627_s1 + $0x2c0] sm:$0xff]   ;;  %v76_v17 = vld [vmem:[%s3628_s0 + $0x1d0] sm:$0xff] }
  0x23   :  { %1459 = vmatmul.mubr.bf16.vlgmr.msra.gmra.mrb[0].mxu0 %v2167_v35  ;;  %v2172_v35 = vcombine.high %v20_v32, %v28_v33  ;;  %v2220_v18 = vcombine.high %v68_v16, %v76_v17  ;;  %v22_v32 = vld [vmem:[%s3628_s0 + $0x20] sm:$0xff] }
  0x24   :  { %1524 = vmatmul.mubr.bf16.vlgmr.msra.gmra.mrb[0].mxu1 %v2169_v38  ;;  %2440 = vmatpush3.bf16.msra.mxu0 %v2716_v42  ;;  %v2173_v38 = vcombine.low %v21_v36, %v29_v37  ;;  %v2748_v42 = vld [vmem:[%s3627_s1 + $0x200] sm:$0xff]  }
  0x25   :  { %2480 = vmatpush3.bf16.msra.mxu1 %v2717_v43  ;;  %2441 = vmatprep.subr.bf16.mxu0 %v2718_v44  ;;  %v2749_v43 = vld [vmem:[%s3627_s1 + $0x280] sm:$0xff]   ;;  %v2750_v44 = vld [vmem:[%s3627_s1 + $0x248] sm:$0xff]  }
  0x26   :  { %2481 = vmatprep.subr.bf16.mxu1 %v2719_v45  ;;  %1466 = vmatprep.mubr.bf16.mxu0 %v2184_v50  ;;  %v2751_v45 = vld [vmem:[%s3627_s1 + $0x2c8] sm:$0xff]   ;;  %v37_v50 = vld [vmem:[%s3628_s0 + $0x98] sm:$0xff]  ;;  %v30_v33 = vld [vmem:[%s3628_s0 + $0x60] sm:$0xff] }
  0x27   :  { %1531 = vmatprep.mubr.bf16.mxu1 %v2186_v54  ;;  %v2187_v54 = vcombine.low %v36_v48, %v44_v49  ;;  %v2175_v36 = vcombine.low %v22_v32, %v30_v33  ;;  %v2176_v37 = vcombine.high %v22_v32, %v30_v33  ;;  %v38_v48 = vld [vmem:[%s3628_s0 + $0xa0] sm:$0xff]  ;;  %v24_v32 = vld [vmem:[%s3628_s0 + $0x30] sm:$0xff] }
  0x28   :  { %2442 = vmatpush3.bf16.msra.mxu0 %v2720_v46  ;;  %v2752_v46 = vld [vmem:[%s3627_s1 + $0x208] sm:$0xff]   ;;  %v46_v49 = vld [vmem:[%s3628_s0 + $0xe0] sm:$0xff]  ;;  %v32_v33 = vld [vmem:[%s3628_s0 + $0x70] sm:$0xff] }
  0x29   :  { %2482 = vmatpush3.bf16.msra.mxu1 %v2721_v47  ;;  %2443 = vmatprep.subr.bf16.mxu0 %v2722_v56  ;;  %v2753_v47 = vld [vmem:[%s3627_s1 + $0x288] sm:$0xff]   ;;  %v2754_v56 = vld [vmem:[%s3627_s1 + $0x250] sm:$0xff]  }
  0x2a   :  { %2483 = vmatprep.subr.bf16.mxu1 %v2723_v57  ;;  %v2755_v57 = vld [vmem:[%s3627_s1 + $0x2d0] sm:$0xff]  }
  0x2b   :  { %1467 = vmatmul.mubr.bf16.gmra.mrb[4].mxu0 %v2183_v53  ;;  %v2190_v53 = vcombine.high %v37_v50, %v45_v51 }
  0x2c   :  { %1532 = vmatmul.mubr.bf16.gmra.mrb[4].mxu1 %v2185_v55  ;;  %2444 = vmatpush3.bf16.msra.mxu0 %v2724_v58  ;;  %v2189_v55 = vcombine.low %v37_v50, %v45_v51  ;;  %v2756_v58 = vld [vmem:[%s3627_s1 + $0x210] sm:$0xff]   ;;  %v39_v50 = vld [vmem:[%s3628_s0 + $0xa8] sm:$0xff]  ;;  %v2192_v51 = vcombine.high %v38_v48, %v46_v49 }
  0x2d   :  { %2484 = vmatpush3.bf16.msra.mxu1 %v2725_v59  ;;  %2445 = vmatprep.subr.bf16.mxu0 %v2726_v60  ;;  %v2757_v59 = vld [vmem:[%s3627_s1 + $0x290] sm:$0xff]   ;;  %v2758_v60 = vld [vmem:[%s3627_s1 + $0x258] sm:$0xff]  }
  0x2e   :  { %2485 = vmatprep.subr.bf16.mxu1 %v2727_v61  ;;  %1474 = vmatprep.mubr.bf16.mxu0 %v2200_v4  ;;  %v2759_v61 = vld [vmem:[%s3627_s1 + $0x2d8] sm:$0xff]  }
  0x2f   :  { %1539 = vmatprep.mubr.bf16.mxu1 %v2202_v5  ;;  %v61_v4 = vld [vmem:[%s3628_s0 + $0x158] sm:$0xff]  ;;  %v2203_v5 = vcombine.low %v52_v0, %v60_v1  ;;  %v54_v0 = vld [vmem:[%s3628_s0 + $0x120] sm:$0xff] }
  0x30   :  { %2446 = vmatpush3.bf16.msra.mxu0 %v2728_v62  ;;  %v2760_v62 = vld [vmem:[%s3627_s1 + $0x218] sm:$0xff]   ;;  %v62_v1 = vld [vmem:[%s3628_s0 + $0x160] sm:$0xff] }
  0x31   :  { %2486 = vmatpush3.bf16.msra.mxu1 %v2729_v63  ;;  %2447 = vmatprep.subr.bf16.mxu0 %v2730_v8  ;;  %v2761_v63 = vld [vmem:[%s3627_s1 + $0x298] sm:$0xff]   ;;  %v2762_v8 = vld [vmem:[%s3627_s1 + $0x260] sm:$0xff]  }
  0x32   :  { %2487 = vmatprep.subr.bf16.mxu1 %v2731_v9  ;;  %v2763_v9 = vld [vmem:[%s3627_s1 + $0x2e0] sm:$0xff]  }
  0x33   :  { %1475 = vmatmul.mubr.bf16.gmra.mrb[8].mxu0 %v2199_v6  ;;  %v2206_v6 = vcombine.high %v53_v2, %v61_v4 }
  0x34   :  { %1540 = vmatmul.mubr.bf16.gmra.mrb[8].mxu1 %v2201_v7  ;;  %2448 = vmatpush3.bf16.msra.mxu0 %v2732_v10  ;;  %v2205_v7 = vcombine.low %v53_v2, %v61_v4  ;;  %v2764_v10 = vld [vmem:[%s3627_s1 + $0x220] sm:$0xff]   ;;  %v2208_v2 = vcombine.high %v54_v0, %v62_v1  ;;  %v63_v4 = vld [vmem:[%s3628_s0 + $0x168] sm:$0xff] }
  0x35   :  { %2488 = vmatpush3.bf16.msra.mxu1 %v2733_v11  ;;  %2449 = vmatprep.subr.bf16.mxu0 %v2734_v12  ;;  %v2765_v11 = vld [vmem:[%s3627_s1 + $0x2a0] sm:$0xff]   ;;  %v2766_v12 = vld [vmem:[%s3627_s1 + $0x268] sm:$0xff]  }
  0x36   :  { %2489 = vmatprep.subr.bf16.mxu1 %v2735_v13  ;;  %1482 = vmatprep.mubr.bf16.mxu0 %v2216_v19  ;;  %v2767_v13 = vld [vmem:[%s3627_s1 + $0x2e8] sm:$0xff]   ;;  %v69_v19 = vld [vmem:[%s3628_s0 + $0x198] sm:$0xff] }
  0x37   :  { %1547 = vmatprep.mubr.bf16.mxu1 %v2218_v22  ;;  %v2222_v22 = vcombine.high %v69_v19, %v77_v20 }
  0x38   :  { %2450 = vmatpush3.bf16.msra.mxu0 %v2736_v14  ;;  %v2768_v14 = vld [vmem:[%s3627_s1 + $0x228] sm:$0xff]  }
  0x39   :  { %2490 = vmatpush3.bf16.msra.mxu1 %v2737_v15  ;;  %2451 = vmatprep.subr.bf16.mxu0 %v2738_v24  ;;  %v2769_v15 = vld [vmem:[%s3627_s1 + $0x2a8] sm:$0xff]   ;;  %v2770_v24 = vld [vmem:[%s3627_s1 + $0x270] sm:$0xff]  }
  0x3a   :  { %2491 = vmatprep.subr.bf16.mxu1 %v2739_v25  ;;  %v2771_v25 = vld [vmem:[%s3627_s1 + $0x2f0] sm:$0xff]  }
  0x3b   :  { %1483 = vmatmul.mubr.bf16.gmra.mrb[12].mxu0 %v2215_v21  ;;  %v2219_v21 = vcombine.low %v68_v16, %v76_v17  ;;  %v70_v16 = vld [vmem:[%s3628_s0 + $0x1a0] sm:$0xff] }
  0x3c   :  { %1548 = vmatmul.mubr.bf16.gmra.mrb[12].mxu1 %v2217_v23  ;;  %2452 = vmatpush3.bf16.msra.mxu0 %v2740_v26  ;;  %v2221_v23 = vcombine.low %v69_v19, %v77_v20  ;;  %v2772_v26 = vld [vmem:[%s3627_s1 + $0x230] sm:$0xff]   ;;  %v78_v17 = vld [vmem:[%s3628_s0 + $0x1e0] sm:$0xff]  ;;  %v79_v19 = vld [vmem:[%s3628_s0 + $0x1e8] sm:$0xff] }
  0x3d   :  { %2492 = vmatpush3.bf16.msra.mxu1 %v2741_v27  ;;  %2453 = vmatprep.subr.bf16.mxu0 %v2742_v28  ;;  %v2773_v27 = vld [vmem:[%s3627_s1 + $0x2b0] sm:$0xff]   ;;  %v2774_v28 = vld [vmem:[%s3627_s1 + $0x278] sm:$0xff]   ;;  %v2224_v20 = vcombine.high %v70_v16, %v78_v17 }
  0x3e   :  { %2493 = vmatprep.subr.bf16.mxu1 %v2743_v29  ;;  %1588 = vmatprep.mubr.bf16.mxu0 %v2172_v35  ;;  %v2775_v29 = vld [vmem:[%s3627_s1 + $0x2f8] sm:$0xff]   ;;  %v31_v35 = vld [vmem:[%s3628_s0 + $0x68] sm:$0xff] }
  0x3f   :  { %1653 = vmatprep.mubr.bf16.mxu1 %v2174_v39 }
  0x40   :  { %2454 = vmatpush3.bf16.msra.mxu0 %v2744_v30  ;;  %v2776_v30 = vld [vmem:[%s3627_s1 + $0x238] sm:$0xff]  }
  0x41   :  { %2494 = vmatpush3.bf16.msra.mxu1 %v2745_v31  ;;  %2519 = vmatprep.subr.bf16.mxu0 %v2746_v40  ;;  %v2777_v31 = vld [vmem:[%s3627_s1 + $0x2b8] sm:$0xff]   ;;  %v2778_v40 = vld [vmem:[%s3627_s1 + $0x340] sm:$0xff]  }
  0x42   :  { %2559 = vmatprep.subr.bf16.mxu1 %v2747_v41  ;;  %v2779_v41 = vld [vmem:[%s3627_s1 + $0x3c0] sm:$0xff]  }
  0x43   :  { %1589 = vmatmul.mubr.bf16.vlgmr.msra.gmra.mrb[16].mxu0 %v2171_v34  ;;  %v23_v34 = vld [vmem:[%s3628_s0 + $0x28] sm:$0xff] }
  0x44   :  { %1654 = vmatmul.mubr.bf16.vlgmr.msra.gmra.mrb[16].mxu1 %v2173_v38  ;;  %2520 = vmatpush3.bf16.msra.mxu0 %v2748_v42  ;;  %v2177_v38 = vcombine.low %v23_v34, %v31_v35  ;;  %v2178_v39 = vcombine.high %v23_v34, %v31_v35  ;;  %v2780_v42 = vld [vmem:[%s3627_s1 + $0x300] sm:$0xff]   ;;  %v25_v34 = vld [vmem:[%s3628_s0 + $0x38] sm:$0xff]  ;;  %v2179_v35 = vcombine.low %v24_v32, %v32_v33 }
  0x45   :  { %2560 = vmatpush3.bf16.msra.mxu1 %v2749_v43  ;;  %2521 = vmatprep.subr.bf16.mxu0 %v2750_v44  ;;  %v2781_v43 = vld [vmem:[%s3627_s1 + $0x380] sm:$0xff]   ;;  %v2782_v44 = vld [vmem:[%s3627_s1 + $0x348] sm:$0xff]  }
  0x46   :  { %2561 = vmatprep.subr.bf16.mxu1 %v2751_v45  ;;  %1596 = vmatprep.mubr.bf16.mxu0 %v2188_v52  ;;  %v2783_v45 = vld [vmem:[%s3627_s1 + $0x3c8] sm:$0xff]  }
  0x47   :  { %1661 = vmatprep.mubr.bf16.mxu1 %v2190_v53  ;;  %v47_v52 = vld [vmem:[%s3628_s0 + $0xe8] sm:$0xff]  ;;  %v2191_v53 = vcombine.low %v38_v48, %v46_v49  ;;  %v57_v48 = vld [vmem:[%s3628_s0 + $0x138] sm:$0xff] }
  0x48   :  { %2522 = vmatpush3.bf16.msra.mxu0 %v2752_v46  ;;  %v2784_v46 = vld [vmem:[%s3627_s1 + $0x308] sm:$0xff]   ;;  %v65_v49 = vld [vmem:[%s3628_s0 + $0x178] sm:$0xff] }
  0x49   :  { %2562 = vmatpush3.bf16.msra.mxu1 %v2753_v47  ;;  %2523 = vmatprep.subr.bf16.mxu0 %v2754_v56  ;;  %v2785_v47 = vld [vmem:[%s3627_s1 + $0x388] sm:$0xff]   ;;  %v2786_v56 = vld [vmem:[%s3627_s1 + $0x350] sm:$0xff]  }
  0x4a   :  { %2563 = vmatprep.subr.bf16.mxu1 %v2755_v57  ;;  %v2787_v57 = vld [vmem:[%s3627_s1 + $0x3d0] sm:$0xff]  }
  0x4b   :  { %1597 = vmatmul.mubr.bf16.gmra.mrb[20].mxu0 %v2187_v54  ;;  %v2194_v54 = vcombine.high %v39_v50, %v47_v52 }
  0x4c   :  { %1662 = vmatmul.mubr.bf16.gmra.mrb[20].mxu1 %v2189_v55  ;;  %2524 = vmatpush3.bf16.msra.mxu0 %v2756_v58  ;;  %v2193_v55 = vcombine.low %v39_v50, %v47_v52  ;;  %v2788_v58 = vld [vmem:[%s3627_s1 + $0x310] sm:$0xff]  }
  0x4d   :  { %2564 = vmatpush3.bf16.msra.mxu1 %v2757_v59  ;;  %2525 = vmatprep.subr.bf16.mxu0 %v2758_v60  ;;  %v2789_v59 = vld [vmem:[%s3627_s1 + $0x390] sm:$0xff]   ;;  %v2790_v60 = vld [vmem:[%s3627_s1 + $0x358] sm:$0xff]  }
  0x4e   :  { %2565 = vmatprep.subr.bf16.mxu1 %v2759_v61  ;;  %1604 = vmatprep.mubr.bf16.mxu0 %v2204_v3  ;;  %v2791_v61 = vld [vmem:[%s3627_s1 + $0x3d8] sm:$0xff]   ;;  %v55_v3 = vld [vmem:[%s3628_s0 + $0x128] sm:$0xff] }
  0x4f   :  { %1669 = vmatprep.mubr.bf16.mxu1 %v2206_v6  ;;  %v2210_v6 = vcombine.high %v55_v3, %v63_v4 }
  0x50   :  { %2526 = vmatpush3.bf16.msra.mxu0 %v2760_v62  ;;  %v2792_v62 = vld [vmem:[%s3627_s1 + $0x318] sm:$0xff]  }
  0x51   :  { %2566 = vmatpush3.bf16.msra.mxu1 %v2761_v63  ;;  %2527 = vmatprep.subr.bf16.mxu0 %v2762_v8  ;;  %v2793_v63 = vld [vmem:[%s3627_s1 + $0x398] sm:$0xff]   ;;  %v2794_v8 = vld [vmem:[%s3627_s1 + $0x360] sm:$0xff]  }
  0x52   :  { %2567 = vmatprep.subr.bf16.mxu1 %v2763_v9  ;;  %v2795_v9 = vld [vmem:[%s3627_s1 + $0x3e0] sm:$0xff]  }
  0x53   :  { %1605 = vmatmul.mubr.bf16.gmra.mrb[24].mxu0 %v2203_v5  ;;  %v2207_v5 = vcombine.low %v54_v0, %v62_v1  ;;  %v2038_v1 = vld [vmem:[%s3629_s2 + $0x18] sm:$0xff] }
  0x54   :  { %1670 = vmatmul.mubr.bf16.gmra.mrb[24].mxu1 %v2205_v7  ;;  %2528 = vmatpush3.bf16.msra.mxu0 %v2764_v10  ;;  %v2209_v7 = vcombine.low %v55_v3, %v63_v4  ;;  %v2796_v10 = vld [vmem:[%s3627_s1 + $0x320] sm:$0xff]  }
  0x55   :  { %2568 = vmatpush3.bf16.msra.mxu1 %v2765_v11  ;;  %2529 = vmatprep.subr.bf16.mxu0 %v2766_v12  ;;  %v2797_v11 = vld [vmem:[%s3627_s1 + $0x3a0] sm:$0xff]   ;;  %v2798_v12 = vld [vmem:[%s3627_s1 + $0x368] sm:$0xff]  }
  0x56   :  { %2569 = vmatprep.subr.bf16.mxu1 %v2767_v13  ;;  %1612 = vmatprep.mubr.bf16.mxu0 %v2220_v18  ;;  %v2799_v13 = vld [vmem:[%s3627_s1 + $0x3e8] sm:$0xff]  }
  0x57   :  { %1677 = vmatprep.mubr.bf16.mxu1 %v2222_v22  ;;  %v71_v18 = vld [vmem:[%s3628_s0 + $0x1a8] sm:$0xff]  ;;  %v2223_v22 = vcombine.low %v70_v16, %v78_v17 }
  0x58   :  { %2530 = vmatpush3.bf16.msra.mxu0 %v2768_v14  ;;  %v2800_v14 = vld [vmem:[%s3627_s1 + $0x328] sm:$0xff]  }
  0x59   :  { %2570 = vmatpush3.bf16.msra.mxu1 %v2769_v15  ;;  %2531 = vmatprep.subr.bf16.mxu0 %v2770_v24  ;;  %v2801_v15 = vld [vmem:[%s3627_s1 + $0x3a8] sm:$0xff]   ;;  %v2802_v24 = vld [vmem:[%s3627_s1 + $0x370] sm:$0xff]  }
  0x5a   :  { %2571 = vmatprep.subr.bf16.mxu1 %v2771_v25  ;;  %v2803_v25 = vld [vmem:[%s3627_s1 + $0x3f0] sm:$0xff]  }
  0x5b   :  { %1613 = vmatmul.mubr.bf16.gmra.mrb[28].mxu0 %v2219_v21  ;;  %v2226_v21 = vcombine.high %v71_v18, %v79_v19 }
  0x5c   :  { %1678 = vmatmul.mubr.bf16.gmra.mrb[28].mxu1 %v2221_v23  ;;  %2532 = vmatpush3.bf16.msra.mxu0 %v2772_v26  ;;  %v2225_v23 = vcombine.low %v71_v18, %v79_v19  ;;  %v2804_v26 = vld [vmem:[%s3627_s1 + $0x330] sm:$0xff]  }
  0x5d   :  { %2572 = vmatpush3.bf16.msra.mxu1 %v2773_v27  ;;  %2533 = vmatprep.subr.bf16.mxu0 %v2774_v28  ;;  %v2805_v27 = vld [vmem:[%s3627_s1 + $0x3b0] sm:$0xff]   ;;  %v2806_v28 = vld [vmem:[%s3627_s1 + $0x378] sm:$0xff]  }
  0x5e   :  { %2573 = vmatprep.subr.bf16.mxu1 %v2775_v29  ;;  %1718 = vmatprep.mubr.bf16.mxu0 %v2176_v37  ;;  %v2807_v29 = vld [vmem:[%s3627_s1 + $0x3f8] sm:$0xff]  }
  0x5f   :  { %1783 = vmatprep.mubr.bf16.mxu1 %v2178_v39  ;;  %v33_v37 = vld [vmem:[%s3628_s0 + $0x78] sm:$0xff]  ;;  %v48_v39 = vld [vmem:[%s3628_s0 + $0xf0] sm:$0xff] }
  0x60   :  { %2534 = vmatpush3.bf16.msra.mxu0 %v2776_v30  ;;  %v2808_v30 = vld [vmem:[%s3627_s1 + $0x338] sm:$0xff]  }
  0x61   :  { %2574 = vmatpush3.bf16.msra.mxu1 %v2777_v31  ;;  %2599 = vmatprep.subr.bf16.mxu0 %v2778_v40  ;;  %v2809_v31 = vld [vmem:[%s3627_s1 + $0x3b8] sm:$0xff]   ;;  %v2181_v40 = vcombine.low %v25_v34, %v33_v37 }
  0x62   :  { %2639 = vmatprep.subr.bf16.mxu1 %v2779_v41  ;;  %v2182_v41 = vcombine.high %v25_v34, %v33_v37 }
  0x63   :  { %1719 = vmatmul.mubr.bf16.vlgmr.msra.gmra.mrb[32].mxu0 %v2175_v36  ;;  %v2180_v36 = vcombine.high %v24_v32, %v32_v33 }
  0x64   :  { %1784 = vmatmul.mubr.bf16.vlgmr.msra.gmra.mrb[32].mxu1 %v2177_v38  ;;  %2600 = vmatpush3.bf16.msra.mxu0 %v2780_v42  ;;  %v40_v38 = vld [vmem:[%s3628_s0 + $0xb0] sm:$0xff] }
  0x65   :  { %2640 = vmatpush3.bf16.msra.mxu1 %v2781_v43  ;;  %2601 = vmatprep.subr.bf16.mxu0 %v2782_v44  ;;  %v2196_v42 = vcombine.high %v40_v38, %v48_v39  ;;  %v41_v43 = vld [vmem:[%s3628_s0 + $0xb8] sm:$0xff]  ;;  %v2195_v50 = vcombine.low %v40_v38, %v48_v39 }
  0x66   :  { %2641 = vmatprep.subr.bf16.mxu1 %v2783_v45  ;;  %1726 = vmatprep.mubr.bf16.mxu0 %v2192_v51  ;;  %v49_v44 = vld [vmem:[%s3628_s0 + $0xf8] sm:$0xff] }
  0x67   :  { %1791 = vmatprep.mubr.bf16.mxu1 %v2194_v54  ;;  %v2198_v45 = vcombine.high %v41_v43, %v49_v44  ;;  %v2197_v51 = vcombine.low %v41_v43, %v49_v44  ;;  %v2036_v54 = vld [vmem:[%s3629_s2 + $0x8] sm:$0xff] }
  0x68   :  { %2602 = vmatpush3.bf16.msra.mxu0 %v2784_v46  ;;  %v56_v46 = vld [vmem:[%s3628_s0 + $0x130] sm:$0xff] }
  0x69   :  { %2642 = vmatpush3.bf16.msra.mxu1 %v2785_v47  ;;  %2603 = vmatprep.subr.bf16.mxu0 %v2786_v56  ;;  %v64_v47 = vld [vmem:[%s3628_s0 + $0x170] sm:$0xff] }
  0x6a   :  { %2643 = vmatprep.subr.bf16.mxu1 %v2787_v57  ;;  %v2212_v52 = vcombine.high %v56_v46, %v64_v47  ;;  %v2037_v56 = vld [vmem:[%s3629_s2 + $0x10] sm:$0xff] }
  0x6b   :  { %1727 = vmatmul.mubr.bf16.gmra.mrb[36].mxu0 %v2191_v53  ;;  %v2826_v53 = vmov 0   ;;  %v72_v57 = vld [vmem:[%s3628_s0 + $0x1b0] sm:$0xff] }
  0x6c   :  { %1792 = vmatmul.mubr.bf16.gmra.mrb[36].mxu1 %v2193_v55  ;;  %2604 = vmatpush3.bf16.msra.mxu0 %v2788_v58  ;;  %v2214_v55 = vcombine.high %v57_v48, %v65_v49  ;;  %v80_v58 = vld [vmem:[%s3628_s0 + $0x1f0] sm:$0xff] }
  0x6d   :  { %2644 = vmatpush3.bf16.msra.mxu1 %v2789_v59  ;;  %2605 = vmatprep.subr.bf16.mxu0 %v2790_v60  ;;  %v73_v59 = vld [vmem:[%s3628_s0 + $0x1b8] sm:$0xff]  ;;  %v2227_v3 = vcombine.low %v72_v57, %v80_v58 }
  0x6e   :  { %2645 = vmatprep.subr.bf16.mxu1 %v2791_v61  ;;  %1734 = vmatprep.mubr.bf16.mxu0 %v2208_v2  ;;  %v81_v60 = vld [vmem:[%s3628_s0 + $0x1f8] sm:$0xff]  ;;  %v2211_v61 = vcombine.low %v56_v46, %v64_v47  ;;  %v2039_v2 = vld [vmem:[%s3629_s2 + $0x20] sm:$0xff] }
  0x6f   :  { %1799 = vmatprep.mubr.bf16.mxu1 %v2210_v6  ;;  %2681 = vset.pattern.permute.xlu1 %v2826_v53  ;;  %v2230_v0 = vcombine.high %v73_v59, %v81_v60  ;;  %v2229_v4 = vcombine.low %v73_v59, %v81_v60  ;;  %v2041_v6 = vld [vmem:[%s3629_s2 + $0x30] sm:$0xff] }
  0x70   :  { %2606 = vmatpush3.bf16.msra.mxu0 %v2792_v62  ;;  %2680 = vset.pattern.permute.xlu0 %v2826_v53  ;;  %v2213_v62 = vcombine.low %v57_v48, %v65_v49 }
  0x71   :  { %2646 = vmatpush3.bf16.msra.mxu1 %v2793_v63  ;;  %2607 = vmatprep.subr.bf16.mxu0 %v2794_v8  ;;  %v2228_v63 = vcombine.high %v72_v57, %v80_v58  ;;  %v2091_v8 = vld [vmem:[%s3630_s3] sm:$0xff] }
  0x72   :  { %2647 = vmatprep.subr.bf16.mxu1 %v2795_v9  ;;  %2050 = vperm.xlu1 %2681, %v2036_v54   ;;  %v2035_v9 = vld [vmem:[%s3629_s2] sm:$0xff] }
  0x73   :  { %1735 = vmatmul.mubr.bf16.gmra.mrb[40].mxu0 %v2207_v5  ;;  %v2040_v5 = vld [vmem:[%s3629_s2 + $0x28] sm:$0xff]  ;;  %2045 = vperm.xlu0 %2680, %v2035_v9  }
  0x74   :  { %1800 = vmatmul.mubr.bf16.gmra.mrb[40].mxu1 %v2209_v7  ;;  %2608 = vmatpush3.bf16.msra.mxu0 %v2796_v10  ;;  %v2042_v7 = vld [vmem:[%s3629_s2 + $0x38] sm:$0xff] }
  0x75   :  { %2648 = vmatpush3.bf16.msra.mxu1 %v2797_v11  ;;  %2609 = vmatprep.subr.bf16.mxu0 %v2798_v12 }
  0x76   :  { %2649 = vmatprep.subr.bf16.mxu1 %v2799_v13  ;;  %1742 = vmatprep.mubr.bf16.mxu0 %v2224_v20 }
  0x77   :  { %1807 = vmatprep.mubr.bf16.mxu1 %v2226_v21  ;;  %2055 = vperm.xlu1 %2681, %v2037_v56  }
  0x78   :  { %2610 = vmatpush3.bf16.msra.mxu0 %v2800_v14 }
  0x79   :  { %2650 = vmatpush3.bf16.msra.mxu1 %v2801_v15  ;;  %2611 = vmatprep.subr.bf16.mxu0 %v2802_v24 }
  0x7a   :  { %2651 = vmatprep.subr.bf16.mxu1 %v2803_v25 }
  0x7b   :  { %1743 = vmatmul.mubr.bf16.gmra.mrb[44].mxu0 %v2223_v22  ;;  %2060 = vperm.xlu1 %2681, %v2038_v1  }
  0x7c   :  { %1808 = vmatmul.mubr.bf16.gmra.mrb[44].mxu1 %v2225_v23  ;;  %2612 = vmatpush3.bf16.msra.mxu0 %v2804_v26 }
  0x7d   :  { %2652 = vmatpush3.bf16.msra.mxu1 %v2805_v27  ;;  %2613 = vmatprep.subr.bf16.mxu0 %v2806_v28 }
  0x7e   :  { %2653 = vmatprep.subr.bf16.mxu1 %v2807_v29  ;;  %1848 = vmatprep.mubr.bf16.mxu0 %v2180_v36 }
  0x7f   :  { %1913 = vmatprep.mubr.bf16.mxu1 %v2182_v41  ;;  %2065 = vperm.xlu1 %2681, %v2039_v2  }
  0x80   :  { %2614 = vmatpush3.bf16.msra.mxu0 %v2808_v30 }
  0x81   :  { %2654 = vmatpush3.bf16.msra.mxu1 %v2809_v31 }
  0x83   :  { %1849 = vmatmul.mubr.bf16.vlgmr.msra.gmra.mrb[48].mxu0 %v2179_v35  ;;  %2070 = vperm.xlu1 %2681, %v2040_v5  }
  0x84   :  { %1914 = vmatmul.mubr.bf16.vlgmr.msra.gmra.mrb[48].mxu1 %v2181_v40  ;;  %1856 = vmatprep.mubr.bf16.mxu0 %v2196_v42 }
  0x85   :  { %1921 = vmatprep.mubr.bf16.mxu1 %v2198_v45 }
  0x87   :  { %2075 = vperm.xlu1 %2681, %v2041_v6  }
  0x8b   :  { %1857 = vmatmul.mubr.bf16.gmra.mrb[52].mxu0 %v2195_v50  ;;  %2080 = vperm.xlu1 %2681, %v2042_v7  }
  0x8c   :  { %1922 = vmatmul.mubr.bf16.gmra.mrb[52].mxu1 %v2197_v51  ;;  %1864 = vmatprep.mubr.bf16.mxu0 %v2212_v52 }
  0x8d   :  { %1929 = vmatprep.mubr.bf16.mxu1 %v2214_v55 }
  0x8f   :  { %2101 = vperm.xlu1 %2681, %v2091_v8  }
  0x93   :  { %1865 = vmatmul.mubr.bf16.gmra.mrb[56].mxu0 %v2211_v61 }
  0x94   :  { %1930 = vmatmul.mubr.bf16.gmra.mrb[56].mxu1 %v2213_v62  ;;  %1872 = vmatprep.mubr.bf16.mxu0 %v2228_v63 }
  0x95   :  { %1937 = vmatprep.mubr.bf16.mxu1 %v2230_v0 }
  0x9b   :  { %1873 = vmatmul.mubr.bf16.gmra.mrb[60].mxu0 %v2227_v3 }
  0x9c   :  { %1938 = vmatmul.mubr.bf16.gmra.mrb[60].mxu1 %v2229_v4 }
  0xf6   :  { %v2375_v10 = vpop.f32.mrb[0].mxu0 }
  0xf7   :  { %v2415_v11 = vpop.f32.mrb[0].mxu1  ;;  %v2376_v12 = vpop.f32.mrb[1].mxu0 }
  0xf8   :  { %v2377_v13 = vadd.f32 %v2376_v12, %v2375_v10  ;;  %v2416_v14 = vpop.f32.mrb[1].mxu1  ;;  %v2378_v15 = vpop.f32.mrb[2].mxu0 }
  0xf9   :  { %v2417_v16 = vadd.f32 %v2416_v14, %v2415_v11  ;;  %v2418_v17 = vpop.f32.mrb[2].mxu1  ;;  %v2379_v18 = vpop.f32.mrb[3].mxu0 }
  0xfa   :  { %v2380_v19 = vadd.f32 %v2379_v18, %v2378_v15  ;;  %v2419_v20 = vpop.f32.mrb[3].mxu1 }
  0xfb   :  { %v1526_v21 = vadd.f32 %v2417_v16, %v2377_v13  ;;  %v2420_v22 = vadd.f32 %v2419_v20, %v2418_v17 }
  0xfd   :  { %v1529_v23 = vadd.f32 %v2420_v22, %v2380_v19 }
  0xfe   :  { %v2381_v24 = vpop.f32.mrb[4].mxu0 }
  0xff   :  { %v2421_v25 = vpop.f32.mrb[4].mxu1  ;;  %v2382_v26 = vpop.f32.mrb[5].mxu0 }
 0x100   :  { %v2383_v27 = vadd.f32 %v2382_v26, %v2381_v24  ;;  %v2422_v28 = vpop.f32.mrb[5].mxu1  ;;  %v2384_v29 = vpop.f32.mrb[6].mxu0 }
 0x101   :  { %v2423_v30 = vadd.f32 %v2422_v28, %v2421_v25  ;;  %v2424_v31 = vpop.f32.mrb[6].mxu1  ;;  %v2385_v32 = vpop.f32.mrb[7].mxu0 }
 0x102   :  { %v2386_v33 = vadd.f32 %v2385_v32, %v2384_v29  ;;  %v2425_v34 = vpop.f32.mrb[7].mxu1 }
 0x103   :  { %v1534_v35 = vadd.f32 %v2423_v30, %v2383_v27  ;;  %v2426_v36 = vadd.f32 %v2425_v34, %v2424_v31 }
 0x105   :  { %v1537_v37 = vadd.f32 %v2426_v36, %v2386_v33 }
 0x106   :  { %v2387_v38 = vpop.f32.mrb[8].mxu0 }
 0x107   :  { %v2427_v39 = vpop.f32.mrb[8].mxu1  ;;  %v2388_v40 = vpop.f32.mrb[9].mxu0 }
 0x108   :  { %v2428_v41 = vpop.f32.mrb[9].mxu1  ;;  %v2389_v42 = vadd.f32 %v2388_v40, %v2387_v38  ;;  %v2390_v44 = vpop.f32.mrb[10].mxu0 }
 0x109   :  { %v2429_v43 = vadd.f32 %v2428_v41, %v2427_v39  ;;  %v2430_v45 = vpop.f32.mrb[10].mxu1  ;;  %v2391_v46 = vpop.f32.mrb[11].mxu0 }
 0x10a   :  { %v2431_v47 = vpop.f32.mrb[11].mxu1  ;;  %v2392_v49 = vadd.f32 %v2391_v46, %v2390_v44 }
 0x10b   :  { %v1542_v48 = vadd.f32 %v2429_v43, %v2389_v42  ;;  %v2432_v50 = vadd.f32 %v2431_v47, %v2430_v45 }
 0x10d   :  { %v1545_v51 = vadd.f32 %v2432_v50, %v2392_v49 }
 0x10e   :  { %v2393_v52 = vpop.f32.mrb[12].mxu0 }
 0x10f   :  { %v2433_v53 = vpop.f32.mrb[12].mxu1  ;;  %v2394_v54 = vpop.f32.mrb[13].mxu0 }
 0x110   :  { %v2395_v55 = vadd.f32 %v2394_v54, %v2393_v52  ;;  %v2434_v56 = vpop.f32.mrb[13].mxu1  ;;  %v2396_v57 = vpop.f32.mrb[14].mxu0 }
 0x111   :  { %v2435_v58 = vadd.f32 %v2434_v56, %v2433_v53  ;;  %v2436_v59 = vpop.f32.mrb[14].mxu1  ;;  %v2397_v60 = vpop.f32.mrb[15].mxu0 }
 0x112   :  { %v2398_v61 = vadd.f32 %v2397_v60, %v2396_v57  ;;  %v2437_v62 = vpop.f32.mrb[15].mxu1 }
 0x113   :  { %v1550_v63 = vadd.f32 %v2435_v58, %v2395_v55  ;;  %v2438_v0 = vadd.f32 %v2437_v62, %v2436_v59 }
 0x115   :  { %v3455_v1 = vadd.f32 %v2438_v0, %v2398_v61 }
 0x116   :  { %v2455_v2 = vpop.f32.mrb[16].mxu0 }
 0x117   :  { %v2495_v3 = vpop.f32.mrb[16].mxu1  ;;  %v2456_v4 = vpop.f32.mrb[17].mxu0 }
 0x118   :  { %v2457_v5 = vadd.f32 %v2456_v4, %v2455_v2  ;;  %v2496_v6 = vpop.f32.mrb[17].mxu1  ;;  %v2458_v7 = vpop.f32.mrb[18].mxu0 }
 0x119   :  { %v2497_v8 = vadd.f32 %v2496_v6, %v2495_v3  ;;  %v2498_v9 = vpop.f32.mrb[18].mxu1  ;;  %v2459_v10 = vpop.f32.mrb[19].mxu0 }
 0x11a   :  { %v1591_v11 = vadd.f32 %v2457_v5, %v1526_v21  ;;  %v2460_v12 = vadd.f32 %v2459_v10, %v2458_v7  ;;  %v2499_v13 = vpop.f32.mrb[19].mxu1 }
 0x11b   :  { %v2500_v14 = vadd.f32 %v2499_v13, %v2498_v9 }
 0x11c   :  { %v1656_v15 = vadd.f32 %v2497_v8, %v1591_v11  ;;  %v1594_v16 = vadd.f32 %v2460_v12, %v1529_v23 }
 0x11e   :  { %v3457_v17 = vadd.f32 %v2500_v14, %v1594_v16  ;;  %v2461_v18 = vpop.f32.mrb[20].mxu0 }
 0x11f   :  { %v2501_v19 = vpop.f32.mrb[20].mxu1  ;;  %v2462_v20 = vpop.f32.mrb[21].mxu0 }
 0x120   :  { %v2502_v22 = vpop.f32.mrb[21].mxu1  ;;  %v2463_v24 = vadd.f32 %v2462_v20, %v2461_v18  ;;  %v2464_v26 = vpop.f32.mrb[22].mxu0 }
 0x121   :  { %v2503_v25 = vadd.f32 %v2502_v22, %v2501_v19  ;;  %v2504_v27 = vpop.f32.mrb[22].mxu1  ;;  %v2465_v28 = vpop.f32.mrb[23].mxu0 }
 0x122   :  { %v2505_v29 = vpop.f32.mrb[23].mxu1  ;;  %v1599_v30 = vadd.f32 %v2463_v24, %v1534_v35  ;;  %v2466_v31 = vadd.f32 %v2465_v28, %v2464_v26 }
 0x123   :  { %v2506_v21 = vadd.f32 %v2505_v29, %v2504_v27 }
 0x124   :  { %v1664_v32 = vadd.f32 %v2503_v25, %v1599_v30  ;;  %v1602_v33 = vadd.f32 %v2466_v31, %v1537_v37 }
 0x126   :  { %v3459_v34 = vadd.f32 %v2506_v21, %v1602_v33  ;;  %v2467_v23 = vpop.f32.mrb[24].mxu0 }
 0x127   :  { %v2507_v36 = vpop.f32.mrb[24].mxu1  ;;  %v2468_v38 = vpop.f32.mrb[25].mxu0 }
 0x128   :  { %v2469_v39 = vadd.f32 %v2468_v38, %v2467_v23  ;;  %v2508_v40 = vpop.f32.mrb[25].mxu1  ;;  %v2470_v41 = vpop.f32.mrb[26].mxu0 }
 0x129   :  { %v2509_v42 = vadd.f32 %v2508_v40, %v2507_v36  ;;  %v2510_v43 = vpop.f32.mrb[26].mxu1  ;;  %v2471_v44 = vpop.f32.mrb[27].mxu0 }
 0x12a   :  { %v1607_v45 = vadd.f32 %v2469_v39, %v1542_v48  ;;  %v2472_v46 = vadd.f32 %v2471_v44, %v2470_v41  ;;  %v2511_v47 = vpop.f32.mrb[27].mxu1 }
 0x12b   :  { %v2512_v49 = vadd.f32 %v2511_v47, %v2510_v43 }
 0x12c   :  { %v1672_v35 = vadd.f32 %v2509_v42, %v1607_v45  ;;  %v1610_v50 = vadd.f32 %v2472_v46, %v1545_v51 }
 0x12e   :  { %v3461_v52 = vadd.f32 %v2512_v49, %v1610_v50  ;;  %v2473_v37 = vpop.f32.mrb[28].mxu0 }
 0x12f   :  { %v2513_v53 = vpop.f32.mrb[28].mxu1  ;;  %v2474_v54 = vpop.f32.mrb[29].mxu0 }
 0x130   :  { %v2475_v55 = vadd.f32 %v2474_v54, %v2473_v37  ;;  %v2514_v56 = vpop.f32.mrb[29].mxu1  ;;  %v2476_v57 = vpop.f32.mrb[30].mxu0 }
 0x131   :  { %v2515_v58 = vadd.f32 %v2514_v56, %v2513_v53  ;;  %v2516_v59 = vpop.f32.mrb[30].mxu1  ;;  %v2477_v60 = vpop.f32.mrb[31].mxu0 }
 0x132   :  { %v1615_v61 = vadd.f32 %v2475_v55, %v1550_v63  ;;  %v2478_v62 = vadd.f32 %v2477_v60, %v2476_v57  ;;  %v2517_v0 = vpop.f32.mrb[31].mxu1 }
 0x133   :  { %v2518_v48 = vadd.f32 %v2517_v0, %v2516_v59 }
 0x134   :  { %v1680_v2 = vadd.f32 %v2515_v58, %v1615_v61  ;;  %v1618_v3 = vadd.f32 %v2478_v62, %v3455_v1 }
 0x136   :  { %v3464_v4 = vadd.f32 %v2518_v48, %v1618_v3  ;;  %v2535_v51 = vpop.f32.mrb[32].mxu0 }
 0x137   :  { %v2575_v5 = vpop.f32.mrb[32].mxu1  ;;  %v2536_v6 = vpop.f32.mrb[33].mxu0 }
 0x138   :  { %v2576_v7 = vpop.f32.mrb[33].mxu1  ;;  %v2537_v8 = vadd.f32 %v2536_v6, %v2535_v51  ;;  %v2538_v10 = vpop.f32.mrb[34].mxu0 }
 0x139   :  { %v2577_v9 = vadd.f32 %v2576_v7, %v2575_v5  ;;  %v2578_v11 = vpop.f32.mrb[34].mxu1  ;;  %v2539_v12 = vpop.f32.mrb[35].mxu0 }
 0x13a   :  { %v2579_v13 = vpop.f32.mrb[35].mxu1  ;;  %v1721_v14 = vadd.f32 %v2537_v8, %v1656_v15  ;;  %v2540_v63 = vadd.f32 %v2539_v12, %v2538_v10 }
 0x13b   :  { %v2580_v16 = vadd.f32 %v2579_v13, %v2578_v11 }
 0x13c   :  { %v1786_v18 = vadd.f32 %v2577_v9, %v1721_v14  ;;  %v1724_v19 = vadd.f32 %v2540_v63, %v3457_v17 }
 0x13e   :  { %v1789_v20 = vadd.f32 %v2580_v16, %v1724_v19  ;;  %v2541_v1 = vpop.f32.mrb[36].mxu0 }
 0x13f   :  { %v2581_v22 = vpop.f32.mrb[36].mxu1  ;;  %v2542_v24 = vpop.f32.mrb[37].mxu0 }
 0x140   :  { %v2543_v25 = vadd.f32 %v2542_v24, %v2541_v1  ;;  %v2582_v26 = vpop.f32.mrb[37].mxu1  ;;  %v2544_v27 = vpop.f32.mrb[38].mxu0 }
 0x141   :  { %v2583_v28 = vadd.f32 %v2582_v26, %v2581_v22  ;;  %v2584_v29 = vpop.f32.mrb[38].mxu1  ;;  %v2545_v30 = vpop.f32.mrb[39].mxu0 }
 0x142   :  { %v1729_v31 = vadd.f32 %v2543_v25, %v1664_v32  ;;  %v2546_v21 = vadd.f32 %v2545_v30, %v2544_v27  ;;  %v2585_v33 = vpop.f32.mrb[39].mxu1 }
 0x143   :  { %v2586_v23 = vadd.f32 %v2585_v33, %v2584_v29 }
 0x144   :  { %v1794_v15 = vadd.f32 %v2583_v28, %v1729_v31  ;;  %v1732_v36 = vadd.f32 %v2546_v21, %v3459_v34 }
 0x146   :  { %v3468_v38 = vadd.f32 %v2586_v23, %v1732_v36  ;;  %v2547_v17 = vpop.f32.mrb[40].mxu0 }
 0x147   :  { %v2587_v39 = vpop.f32.mrb[40].mxu1  ;;  %v2548_v40 = vpop.f32.mrb[41].mxu0 }
 0x148   :  { %v2549_v41 = vadd.f32 %v2548_v40, %v2547_v17  ;;  %v2588_v42 = vpop.f32.mrb[41].mxu1  ;;  %v2550_v43 = vpop.f32.mrb[42].mxu0 }
 0x149   :  { %v2589_v44 = vadd.f32 %v2588_v42, %v2587_v39  ;;  %v2590_v45 = vpop.f32.mrb[42].mxu1  ;;  %v2551_v46 = vpop.f32.mrb[43].mxu0 }
 0x14a   :  { %v1737_v47 = vadd.f32 %v2549_v41, %v1672_v35  ;;  %v2552_v49 = vadd.f32 %v2551_v46, %v2550_v43  ;;  %v2591_v32 = vpop.f32.mrb[43].mxu1 }
 0x14b   :  { %v2592_v50 = vadd.f32 %v2591_v32, %v2590_v45 }
 0x14c   :  { %v3470_v37 = vadd.f32 %v2589_v44, %v1737_v47  ;;  %v1740_v53 = vadd.f32 %v2552_v49, %v3461_v52 }
 0x14e   :  { %v3473_v34 = vadd.f32 %v2592_v50, %v1740_v53  ;;  %v2553_v54 = vpop.f32.mrb[44].mxu0 }
 0x14f   :  { %v2593_v55 = vpop.f32.mrb[44].mxu1  ;;  %v2554_v56 = vpop.f32.mrb[45].mxu0 }
 0x150   :  { %v2594_v57 = vpop.f32.mrb[45].mxu1  ;;  %v2555_v58 = vadd.f32 %v2554_v56, %v2553_v54  ;;  %v2556_v60 = vpop.f32.mrb[46].mxu0 }
 0x151   :  { %v2595_v59 = vadd.f32 %v2594_v57, %v2593_v55  ;;  %v2596_v61 = vpop.f32.mrb[46].mxu1  ;;  %v2557_v62 = vpop.f32.mrb[47].mxu0 }
 0x152   :  { %v2597_v0 = vpop.f32.mrb[47].mxu1  ;;  %v1745_v35 = vadd.f32 %v2555_v58, %v1680_v2  ;;  %v2558_v48 = vadd.f32 %v2557_v62, %v2556_v60 }
 0x153   :  { %v2598_v3 = vadd.f32 %v2597_v0, %v2596_v61 }
 0x154   :  { %v3475_v51 = vadd.f32 %v2595_v59, %v1745_v35  ;;  %v1748_v5 = vadd.f32 %v2558_v48, %v3464_v4 }
 0x156   :  { %v3478_v52 = vadd.f32 %v2598_v3, %v1748_v5  ;;  %v2615_v6 = vpop.f32.mrb[48].mxu0 }
 0x157   :  { %v2655_v7 = vpop.f32.mrb[48].mxu1  ;;  %v2616_v8 = vpop.f32.mrb[49].mxu0 }
 0x158   :  { %v2617_v9 = vadd.f32 %v2616_v8, %v2615_v6  ;;  %v2656_v10 = vpop.f32.mrb[49].mxu1  ;;  %v2618_v11 = vpop.f32.mrb[50].mxu0  ;;  %v2093_v8 = vld [vmem:[%s3630_s3 + $0x10] sm:$0xff] }
 0x159   :  { %v2657_v12 = vadd.f32 %v2656_v10, %v2655_v7  ;;  %v2658_v13 = vpop.f32.mrb[50].mxu1  ;;  %v2619_v14 = vpop.f32.mrb[51].mxu0  ;;  %v2096_v10 = vld [vmem:[%s3630_s3 + $0x28] sm:$0xff] }
 0x15a   :  { %v1851_v63 = vadd.f32 %v2617_v9, %v1786_v18  ;;  %v2620_v16 = vadd.f32 %v2619_v14, %v2618_v11  ;;  %v2659_v2 = vpop.f32.mrb[51].mxu1  ;;  %v2092_v9 = vld [vmem:[%s3630_s3 + $0x8] sm:$0xff]  ;;  %v3518_v11 = vpop.permute.xlu1 %2050 }
 0x15b   :  { %v2660_v19 = vadd.f32 %v2659_v2, %v2658_v13  ;;  %v3530_v2 = vpop.permute.xlu0 %2045 }
 0x15c   :  { %v1854_v1 = vadd.f32 %v2620_v16, %v1789_v20  ;;  %v3480_v22 = vadd.f32 %v2657_v12, %v1851_v63 }
 0x15e   :  { %v2621_v24 = vpop.f32.mrb[52].mxu0  ;;  %1946 = vadd.xlane.f32.xlu0 %v3480_v22  ;;  %v3483_v4 = vadd.f32 %v2660_v19, %v1854_v1  ;;  %v3520_v12 = vpop.permute.xlu1 %2055 }
 0x15f   :  { %v2661_v25 = vpop.f32.mrb[52].mxu1  ;;  %v2622_v26 = vpop.f32.mrb[53].mxu0 }
 0x160   :  { %v2623_v27 = vadd.f32 %v2622_v26, %v2621_v24  ;;  %v2662_v28 = vpop.f32.mrb[53].mxu1  ;;  %v2624_v29 = vpop.f32.mrb[54].mxu0 }
 0x161   :  { %v2663_v30 = vadd.f32 %v2662_v28, %v2661_v25  ;;  %v2664_v31 = vpop.f32.mrb[54].mxu1  ;;  %v2625_v21 = vpop.f32.mrb[55].mxu0 }
 0x162   :  { %v1859_v18 = vadd.f32 %v2623_v27, %v1794_v15  ;;  %v2626_v33 = vadd.f32 %v2625_v21, %v2624_v29  ;;  %v2665_v23 = vpop.f32.mrb[55].mxu1  ;;  %1948 = vadd.xlane.f32.xlu0 %v3483_v4  ;;  %v3522_v13 = vpop.permute.xlu1 %2060 }
 0x163   :  { %v2666_v20 = vadd.f32 %v2665_v23, %v2664_v31 }
 0x164   :  { %v1862_v36 = vadd.f32 %v2626_v33, %v3468_v38  ;;  %v3487_v17 = vadd.f32 %v2663_v30, %v1859_v18 }
 0x166   :  { %v2627_v39 = vpop.f32.mrb[56].mxu0  ;;  %1950 = vadd.xlane.f32.xlu1 %v3487_v17  ;;  %v3490_v40 = vadd.f32 %v2666_v20, %v1862_v36  ;;  %v3524_v14 = vpop.permute.xlu1 %2065 }
 0x167   :  { %v2667_v41 = vpop.f32.mrb[56].mxu1  ;;  %v2628_v42 = vpop.f32.mrb[57].mxu0 }
 0x168   :  { %v2629_v43 = vadd.f32 %v2628_v42, %v2627_v39  ;;  %v2668_v44 = vpop.f32.mrb[57].mxu1  ;;  %v2630_v45 = vpop.f32.mrb[58].mxu0 }
 0x169   :  { %v2669_v15 = vadd.f32 %v2668_v44, %v2667_v41  ;;  %v2670_v46 = vpop.f32.mrb[58].mxu1  ;;  %v2631_v47 = vpop.f32.mrb[59].mxu0 }
 0x16a   :  { %v1867_v49 = vadd.f32 %v2629_v43, %v3470_v37  ;;  %v2632_v32 = vadd.f32 %v2631_v47, %v2630_v45  ;;  %v2671_v50 = vpop.f32.mrb[59].mxu1  ;;  %1952 = vadd.xlane.f32.xlu1 %v3490_v40  ;;  %v3526_v63 = vpop.permute.xlu1 %2070 }
 0x16b   :  { %v2672_v38 = vadd.f32 %v2671_v50, %v2670_v46 }
 0x16c   :  { %v1870_v53 = vadd.f32 %v2632_v32, %v3473_v34  ;;  %v3495_v54 = vadd.f32 %v2669_v15, %v1867_v49 }
 0x16e   :  { %v2633_v55 = vpop.f32.mrb[60].mxu0  ;;  %1954 = vadd.xlane.f32.xlu0 %v3495_v54  ;;  %v3498_v56 = vadd.f32 %v2672_v38, %v1870_v53  ;;  %v3528_v16 = vpop.permute.xlu1 %2075 }
 0x16f   :  { %v2673_v57 = vpop.f32.mrb[60].mxu1  ;;  %v2634_v58 = vpop.f32.mrb[61].mxu0 }
 0x170   :  { %v2635_v59 = vadd.f32 %v2634_v58, %v2633_v55  ;;  %v2674_v60 = vpop.f32.mrb[61].mxu1  ;;  %v2636_v61 = vpop.f32.mrb[62].mxu0  ;;  %1956 = vadd.xlane.f32.xlu1 %v3498_v56  ;;  %v2098_v55 = vld [vmem:[%s3630_s3 + $0x38] sm:$0xff] }
 0x171   :  { %v2675_v37 = vadd.f32 %v2674_v60, %v2673_v57  ;;  %v2676_v62 = vpop.f32.mrb[62].mxu1  ;;  %v2637_v0 = vpop.f32.mrb[63].mxu0 }
 0x172   :  { %v1875_v35 = vadd.f32 %v2635_v59, %v3475_v51  ;;  %v2638_v34 = vadd.f32 %v2637_v0, %v2636_v61  ;;  %v2677_v48 = vpop.f32.mrb[63].mxu1  ;;  %v2095_v51 = vld [vmem:[%s3630_s3 + $0x20] sm:$0xff]  ;;  %v3532_v19 = vpop.permute.xlu1 %2080 }
 0x173   :  { %v2678_v3 = vadd.f32 %v2677_v48, %v2676_v62 }
 0x174   :  { %v1878_v5 = vadd.f32 %v2638_v34, %v3478_v52  ;;  %v1940_v6 = vadd.f32 %v2675_v37, %v1875_v35  ;;  %v2094_v52 = vld [vmem:[%s3630_s3 + $0x18] sm:$0xff] }
 0x176   :  { %1958 = vadd.xlane.f32.xlu0 %v1940_v6  ;;  %v1943_v7 = vadd.f32 %v2678_v3, %v1878_v5  ;;  %v3537_v26 = vpop.permute.xlu1 %2101 }
 0x178   :  { %1960 = vadd.xlane.f32.xlu1 %v1943_v7 }
 0x189   :  { %2111 = vperm.xlu1 %2681, %v2093_v8  }
 0x18c   :  { %2106 = vperm.xlu0 %2680, %v2092_v9  }
 0x18d   :  { %2121 = vperm.xlu1 %2681, %v2095_v51  }
 0x190   :  { %2116 = vperm.xlu0 %2680, %v2094_v52  }
 0x194   :  { %2126 = vperm.xlu0 %2680, %v2096_v10  }
 0x1eb   :  { %v1947_v1 = vpop.xlane.xlu0 %1946 }
 0x1ec   :  { %v1963_v24 = vmul.f32 0.0078125, %v1947_v1 }
 0x1ee   :  { %v3535_v25 = vsub.f32 %v3480_v22, %v1963_v24 }
 0x1ef   :  { %v1949_v27 = vpop.xlane.xlu0 %1948 }
 0x1f0   :  { %v1964_v28 = vmul.f32 0.0078125, %v1949_v27  ;;  %v1979_v29 = vmul.f32 %v3535_v25, %v3535_v25 }
 0x1f2   :  { %v3542_v30 = vsub.f32 %v3483_v4, %v1964_v28  ;;  %1987 = vadd.xlane.f32.xlu0 %v1979_v29 }
 0x1f3   :  { %v1951_v31 = vpop.xlane.xlu1 %1950 }
 0x1f4   :  { %v1965_v21 = vmul.f32 0.0078125, %v1951_v31  ;;  %v1980_v18 = vmul.f32 %v3542_v30, %v3542_v30 }
 0x1f6   :  { %v3547_v33 = vsub.f32 %v3487_v17, %v1965_v21  ;;  %1989 = vadd.xlane.f32.xlu1 %v1980_v18 }
 0x1f7   :  { %v1953_v22 = vpop.xlane.xlu1 %1952 }
 0x1f8   :  { %v1966_v23 = vmul.f32 0.0078125, %v1953_v22  ;;  %v1981_v20 = vmul.f32 %v3547_v33, %v3547_v33 }
 0x1fa   :  { %v3552_v36 = vsub.f32 %v3490_v40, %v1966_v23  ;;  %1991 = vadd.xlane.f32.xlu0 %v1981_v20 }
 0x1fb   :  { %v1955_v4 = vpop.xlane.xlu0 %1954 }
 0x1fc   :  { %v1967_v39 = vmul.f32 0.0078125, %v1955_v4  ;;  %v1982_v41 = vmul.f32 %v3552_v36, %v3552_v36 }
 0x1fd   :  { %v1957_v42 = vpop.xlane.xlu1 %1956 }
 0x1fe   :  { %v3557_v43 = vsub.f32 %v3495_v54, %v1967_v39  ;;  %v1968_v17 = vmul.f32 0.0078125, %v1957_v42  ;;  %1993 = vadd.xlane.f32.xlu1 %v1982_v41  ;;  %v2097_v54 = vld [vmem:[%s3630_s3 + $0x30] sm:$0xff] }
 0x200   :  { %v3560_v44 = vsub.f32 %v3498_v56, %v1968_v17  ;;  %v1983_v45 = vmul.f32 %v3557_v43, %v3557_v43 }
 0x202   :  { %1995 = vadd.xlane.f32.xlu0 %v1983_v45  ;;  %v1984_v40 = vmul.f32 %v3560_v44, %v3560_v44 }
 0x203   :  { %v1959_v15 = vpop.xlane.xlu0 %1958 }
 0x204   :  { %v1969_v46 = vmul.f32 0.0078125, %v1959_v15  ;;  %1997 = vadd.xlane.f32.xlu1 %v1984_v40 }
 0x205   :  { %v1961_v47 = vpop.xlane.xlu1 %1960 }
 0x206   :  { %v3566_v49 = vsub.f32 %v1940_v6, %v1969_v46  ;;  %v1970_v32 = vmul.f32 0.0078125, %v1961_v47 }
 0x208   :  { %v3568_v50 = vsub.f32 %v1943_v7, %v1970_v32  ;;  %v1985_v38 = vmul.f32 %v3566_v49, %v3566_v49 }
 0x209   :  { %v2112_v58 = vpop.permute.xlu1 %2111 }
 0x20a   :  { %1999 = vadd.xlane.f32.xlu0 %v1985_v38  ;;  %v1986_v53 = vmul.f32 %v3568_v50, %v3568_v50 }
 0x20b   :  { %v2107_v56 = vpop.permute.xlu0 %2106 }
 0x20c   :  { %2001 = vadd.xlane.f32.xlu1 %v1986_v53 }
 0x20d   :  { %v3582_v60 = vpop.permute.xlu1 %2121 }
 0x20f   :  { %v2117_v57 = vpop.permute.xlu0 %2116 }
 0x213   :  { %v3580_v59 = vpop.permute.xlu0 %2126 }
 0x21d   :  { %2131 = vperm.xlu1 %2681, %v2097_v54  }
 0x220   :  { %2136 = vperm.xlu0 %2680, %v2098_v55  }
 0x27f   :  { %v1988_v61 = vpop.xlane.xlu0 %1987 }
 0x280   :  { %v2003_v37 = vmul.f32 0.0078125, %v1988_v61 }
 0x282   :  { %v2011_v62 = vadd.f32 1e-05, %v2003_v37 }
 0x283   :  { %v1990_v0 = vpop.xlane.xlu1 %1989 }
 0x284   :  { %2810 = vrsqrt.f32 %v2011_v62  ;;  %v2004_v35 = vmul.f32 0.0078125, %v1990_v0 }
 0x286   :  { %v2012_v34 = vadd.f32 1e-05, %v2004_v35 }
 0x287   :  { %v1992_v48 = vpop.xlane.xlu0 %1991 }
 0x288   :  { %2812 = vrsqrt.f32 %v2012_v34  ;;  %v2005_v3 = vmul.f32 0.0078125, %v1992_v48 }
 0x28a   :  { %v2013_v5 = vadd.f32 1e-05, %v2005_v3 }
 0x28b   :  { %v1994_v6 = vpop.xlane.xlu1 %1993 }
 0x28c   :  { %2814 = vrsqrt.f32 %v2013_v5  ;;  %v2006_v7 = vmul.f32 0.0078125, %v1994_v6 }
 0x28e   :  { %v2811_v8 = vpop.eup %2810  ;;  %v2014_v9 = vadd.f32 1e-05, %v2006_v7 }
 0x28f   :  { %v2027_v51 = vmul.f32 %v2811_v8, %v3535_v25  ;;  %v1996_v52 = vpop.xlane.xlu0 %1995 }
 0x290   :  { %2816 = vrsqrt.f32 %v2014_v9  ;;  %v2007_v10 = vmul.f32 0.0078125, %v1996_v52 }
 0x291   :  { %v2083_v1 = vmul.f32 %v3530_v2, %v2027_v51  ;;  %v1998_v24 = vpop.xlane.xlu1 %1997 }
 0x292   :  { %v2813_v27 = vpop.eup %2812  ;;  %v2015_v28 = vadd.f32 1e-05, %v2007_v10  ;;  %v2008_v29 = vmul.f32 0.0078125, %v1998_v24 }
 0x293   :  { %v2139_v31 = vadd.f32 %v3537_v26, %v2083_v1  ;;  %v2028_v21 = vmul.f32 %v2813_v27, %v3542_v30 }
 0x294   :  { %2818 = vrsqrt.f32 %v2015_v28  ;;  %v2016_v18 = vadd.f32 1e-05, %v2008_v29 }
 0x295   :  { %v2147_v22 = vmax.f32 %v2139_v31, 0.0  ;;  %v2084_v23 = vmul.f32 %v3518_v11, %v2028_v21 }
 0x296   :  { %v2815_v20 = vpop.eup %2814  ;;  %2820 = vrsqrt.f32 %v2016_v18 }
 0x297   :  { %2155 = vst [vmem:[%s3631_s4] sm:$0xff] %v2147_v22  ;;  %v2140_v2 = vadd.f32 %v2107_v56, %v2084_v23  ;;  %v2029_v25 = vmul.f32 %v2815_v20, %v3547_v33  ;;  %v2000_v4 = vpop.xlane.xlu0 %1999 }
 0x298   :  { %v2009_v39 = vmul.f32 0.0078125, %v2000_v4 }
 0x299   :  { %v2148_v41 = vmax.f32 %v2140_v2, 0.0  ;;  %v2085_v26 = vmul.f32 %v3520_v12, %v2029_v25  ;;  %v2002_v30 = vpop.xlane.xlu1 %2001 }
 0x29a   :  { %v2817_v42 = vpop.eup %2816  ;;  %v2017_v17 = vadd.f32 1e-05, %v2009_v39  ;;  %v2010_v45 = vmul.f32 0.0078125, %v2002_v30 }
 0x29b   :  { %2156 = vst [vmem:[%s3631_s4 + $0x8] sm:$0xff] %v2148_v41  ;;  %v2141_v11 = vadd.f32 %v2112_v58, %v2085_v26  ;;  %v2030_v40 = vmul.f32 %v2817_v42, %v3552_v36 }
 0x29c   :  { %2822 = vrsqrt.f32 %v2017_v17  ;;  %v2018_v15 = vadd.f32 1e-05, %v2010_v45 }
 0x29d   :  { %v2149_v46 = vmax.f32 %v2141_v11, 0.0  ;;  %v2086_v33 = vmul.f32 %v3522_v13, %v2030_v40  ;;  %v2132_v61 = vpop.permute.xlu1 %2131 }
 0x29e   :  { %v2819_v47 = vpop.eup %2818  ;;  %2824 = vrsqrt.f32 %v2018_v15 }
 0x29f   :  { %2157 = vst [vmem:[%s3631_s4 + $0x10] sm:$0xff] %v2149_v46  ;;  %v2142_v12 = vadd.f32 %v2117_v57, %v2086_v33  ;;  %v2031_v32 = vmul.f32 %v2819_v47, %v3557_v43  ;;  %v2137_v62 = vpop.permute.xlu0 %2136 }
 0x2a0   :  { %v2821_v38 = vpop.eup %2820 }
 0x2a1   :  { %v2150_v53 = vmax.f32 %v2142_v12, 0.0  ;;  %v2087_v54 = vmul.f32 %v3524_v14, %v2031_v32  ;;  %v2032_v36 = vmul.f32 %v2821_v38, %v3560_v44 }
 0x2a3   :  { %2158 = vst [vmem:[%s3631_s4 + $0x18] sm:$0xff] %v2150_v53  ;;  %v2143_v13 = vadd.f32 %v3582_v60, %v2087_v54  ;;  %v2088_v55 = vmul.f32 %v3526_v63, %v2032_v36 }
 0x2a5   :  { %v2151_v56 = vmax.f32 %v2143_v13, 0.0  ;;  %v2144_v58 = vadd.f32 %v3580_v59, %v2088_v55 }
 0x2a6   :  { %v2823_v57 = vpop.eup %2822 }
 0x2a7   :  { %2159 = vst [vmem:[%s3631_s4 + $0x20] sm:$0xff] %v2151_v56  ;;  %v2152_v43 = vmax.f32 %v2144_v58, 0.0  ;;  %v2033_v14 = vmul.f32 %v2823_v57, %v3566_v49 }
 0x2a8   :  { %v2825_v44 = vpop.eup %2824 }
 0x2a9   :  { %2160 = vst [vmem:[%s3631_s4 + $0x28] sm:$0xff] %v2152_v43  ;;  %v2089_v60 = vmul.f32 %v3528_v16, %v2033_v14  ;;  %v2034_v63 = vmul.f32 %v2825_v44, %v3568_v50 }
 0x2ab   :  { %v2145_v37 = vadd.f32 %v2132_v61, %v2089_v60  ;;  %v2090_v59 = vmul.f32 %v3532_v19, %v2034_v63 }
 0x2ad   :  { %v2153_v0 = vmax.f32 %v2145_v37, 0.0  ;;  %v2146_v35 = vadd.f32 %v2137_v62, %v2090_v59 }
 0x2af   :  { %2161 = vst [vmem:[%s3631_s4 + $0x30] sm:$0xff] %v2153_v0  ;;  %v2154_v49 = vmax.f32 %v2146_v35, 0.0 }
 0x2b1   :  { %2162 = vst [vmem:[%s3631_s4 + $0x38] sm:$0xff] %v2154_v49 }

// kernel: generator_forward.7
= control target key start
LH: loop header
LB: loop body
LE: loop exit
PB: predicated region body
PF: predicated region fallthrough
CT: control target
= control target key end

     0   :  { %s4049_s1 = inlined_call_operand.vmem [shape: bf16[1024,512], index: 1, kind: input, shape index: {}]   ;;  %s4050_s0 = inlined_call_operand.vmem [shape: bf16[32,1024], index: 0, kind: input, shape index: {}]   ;;  %s4051_s2 = inlined_call_operand.vmem [shape: f32[32,1], index: 2, kind: input, shape index: {}]   ;;  %s4052_s3 = inlined_call_operand.vmem [shape: f32[32,1], index: 3, kind: input, shape index: {}]   ;;  %s4053_s4 = inlined_call_operand.vmem [shape: f32[32,512], index: 4, kind: output, shape index: {}]  }
   0x1   :  { %v2617_v0 = vld [vmem:[%s4049_s1 + $0x4] ss:$16 sps:$4 sm:$0xff]   ;;  %v2619_v1 = vld [vmem:[%s4049_s1 + $0xc] ss:$16 sps:$4 sm:$0xff]   ;;  %v2621_v2 = vld [vmem:[%s4049_s1] ss:$16 sps:$4 sm:$0xff]  }
   0x2   :  { %1649 = vmatprep.subr.bf16.mxu0 %v2617_v0  ;;  %v2622_v3 = vld [vmem:[%s4049_s1 + $0x8] ss:$16 sps:$4 sm:$0xff]   ;;  %1861 = vmatprep.subr.bf16.mxu1 %v2619_v1  ;;  %v2623_v4 = vld [vmem:[%s4049_s1 + $0x24] ss:$16 sps:$4 sm:$0xff]   ;;  %v2625_v5 = vld [vmem:[%s4049_s1 + $0x2c] ss:$16 sps:$4 sm:$0xff]  }
   0x3   :  { %1650 = vmatpush1.bf16.msra.mxu0 %v2621_v2  ;;  %1862 = vmatpush1.bf16.msra.mxu1 %v2622_v3  ;;  %v2627_v6 = vld [vmem:[%s4049_s1 + $0x20] ss:$16 sps:$4 sm:$0xff]   ;;  %v2628_v7 = vld [vmem:[%s4049_s1 + $0x28] ss:$16 sps:$4 sm:$0xff]   ;;  %v2629_v8 = vld [vmem:[%s4049_s1 + $0x44] ss:$16 sps:$4 sm:$0xff]  }
   0x4   :  { %1651 = vmatprep.subr.bf16.mxu0 %v2623_v4  ;;  %1863 = vmatprep.subr.bf16.mxu1 %v2625_v5  ;;  %v2631_v9 = vld [vmem:[%s4049_s1 + $0x4c] ss:$16 sps:$4 sm:$0xff]   ;;  %v2633_v10 = vld [vmem:[%s4049_s1 + $0x40] ss:$16 sps:$4 sm:$0xff]   ;;  %v2634_v11 = vld [vmem:[%s4049_s1 + $0x48] ss:$16 sps:$4 sm:$0xff]  }
   0x5   :  { %v2635_v12 = vld [vmem:[%s4049_s1 + $0x64] ss:$16 sps:$4 sm:$0xff]   ;;  %v2637_v13 = vld [vmem:[%s4049_s1 + $0x6c] ss:$16 sps:$4 sm:$0xff]   ;;  %v2639_v14 = vld [vmem:[%s4049_s1 + $0x60] ss:$16 sps:$4 sm:$0xff]  }
   0x6   :  { %v2640_v15 = vld [vmem:[%s4049_s1 + $0x68] ss:$16 sps:$4 sm:$0xff]   ;;  %v2641_v16 = vld [vmem:[%s4049_s1 + $0x84] ss:$16 sps:$4 sm:$0xff]   ;;  %v2643_v17 = vld [vmem:[%s4049_s1 + $0x8c] ss:$16 sps:$4 sm:$0xff]  }
   0x7   :  { %1652 = vmatpush1.bf16.msra.mxu0 %v2627_v6  ;;  %1864 = vmatpush1.bf16.msra.mxu1 %v2628_v7  ;;  %v2645_v18 = vld [vmem:[%s4049_s1 + $0x80] ss:$16 sps:$4 sm:$0xff]   ;;  %v2646_v19 = vld [vmem:[%s4049_s1 + $0x88] ss:$16 sps:$4 sm:$0xff]   ;;  %v2647_v20 = vld [vmem:[%s4049_s1 + $0xa4] ss:$16 sps:$4 sm:$0xff]  }
   0x8   :  { %1653 = vmatprep.subr.bf16.mxu0 %v2629_v8  ;;  %1865 = vmatprep.subr.bf16.mxu1 %v2631_v9  ;;  %v2649_v21 = vld [vmem:[%s4049_s1 + $0xac] ss:$16 sps:$4 sm:$0xff]   ;;  %v2651_v22 = vld [vmem:[%s4049_s1 + $0xa0] ss:$16 sps:$4 sm:$0xff]   ;;  %v2652_v23 = vld [vmem:[%s4049_s1 + $0xa8] ss:$16 sps:$4 sm:$0xff]  }
   0x9   :  { %v2653_v24 = vld [vmem:[%s4049_s1 + $0xc4] ss:$16 sps:$4 sm:$0xff]   ;;  %v2655_v25 = vld [vmem:[%s4049_s1 + $0xcc] ss:$16 sps:$4 sm:$0xff]   ;;  %v2657_v26 = vld [vmem:[%s4049_s1 + $0xc0] ss:$16 sps:$4 sm:$0xff]  }
   0xa   :  { %v2658_v27 = vld [vmem:[%s4049_s1 + $0xc8] ss:$16 sps:$4 sm:$0xff]   ;;  %v2659_v28 = vld [vmem:[%s4049_s1 + $0xe4] ss:$16 sps:$4 sm:$0xff]   ;;  %v2661_v29 = vld [vmem:[%s4049_s1 + $0xec] ss:$16 sps:$4 sm:$0xff]  }
   0xb   :  { %1654 = vmatpush1.bf16.msra.mxu0 %v2633_v10  ;;  %1866 = vmatpush1.bf16.msra.mxu1 %v2634_v11  ;;  %v2663_v30 = vld [vmem:[%s4049_s1 + $0xe0] ss:$16 sps:$4 sm:$0xff]   ;;  %v2664_v31 = vld [vmem:[%s4049_s1 + $0xe8] ss:$16 sps:$4 sm:$0xff]   ;;  %v2665_v32 = vld [vmem:[%s4049_s1 + $0x104] ss:$16 sps:$4 sm:$0xff]  }
   0xc   :  { %1655 = vmatprep.subr.bf16.mxu0 %v2635_v12  ;;  %1867 = vmatprep.subr.bf16.mxu1 %v2637_v13  ;;  %v2667_v33 = vld [vmem:[%s4049_s1 + $0x10c] ss:$16 sps:$4 sm:$0xff]   ;;  %v2669_v34 = vld [vmem:[%s4049_s1 + $0x100] ss:$16 sps:$4 sm:$0xff]   ;;  %v2670_v35 = vld [vmem:[%s4049_s1 + $0x108] ss:$16 sps:$4 sm:$0xff]  }
   0xd   :  { %v2671_v36 = vld [vmem:[%s4049_s1 + $0x124] ss:$16 sps:$4 sm:$0xff]   ;;  %v2673_v37 = vld [vmem:[%s4049_s1 + $0x12c] ss:$16 sps:$4 sm:$0xff]   ;;  %v2675_v38 = vld [vmem:[%s4049_s1 + $0x120] ss:$16 sps:$4 sm:$0xff]  }
   0xe   :  { %v2676_v39 = vld [vmem:[%s4049_s1 + $0x128] ss:$16 sps:$4 sm:$0xff]   ;;  %v2677_v40 = vld [vmem:[%s4049_s1 + $0x144] ss:$16 sps:$4 sm:$0xff]   ;;  %v2679_v41 = vld [vmem:[%s4049_s1 + $0x14c] ss:$16 sps:$4 sm:$0xff]  }
   0xf   :  { %1656 = vmatpush1.bf16.msra.mxu0 %v2639_v14  ;;  %1868 = vmatpush1.bf16.msra.mxu1 %v2640_v15  ;;  %v2681_v42 = vld [vmem:[%s4049_s1 + $0x140] ss:$16 sps:$4 sm:$0xff]   ;;  %v2682_v43 = vld [vmem:[%s4049_s1 + $0x148] ss:$16 sps:$4 sm:$0xff]   ;;  %v2683_v44 = vld [vmem:[%s4049_s1 + $0x164] ss:$16 sps:$4 sm:$0xff]  }
  0x10   :  { %1657 = vmatprep.subr.bf16.mxu0 %v2641_v16  ;;  %1869 = vmatprep.subr.bf16.mxu1 %v2643_v17  ;;  %v2685_v45 = vld [vmem:[%s4049_s1 + $0x16c] ss:$16 sps:$4 sm:$0xff]   ;;  %v17_v46 = vld [vmem:[%s4050_s0] sm:$0xff]  ;;  %v2688_v49 = vld [vmem:[%s4049_s1 + $0x168] ss:$16 sps:$4 sm:$0xff]  }
  0x11   :  { %v21_v47 = vld [vmem:[%s4050_s0 + $0x20] sm:$0xff]  ;;  %v2691_v52 = vld [vmem:[%s4049_s1 + $0x18c] ss:$16 sps:$4 sm:$0xff]   ;;  %v2694_v54 = vld [vmem:[%s4049_s1 + $0x188] ss:$16 sps:$4 sm:$0xff]  }
  0x12   :  { %v2687_v48 = vld [vmem:[%s4049_s1 + $0x160] ss:$16 sps:$4 sm:$0xff]   ;;  %v2295_v50 = vcombine.high %v17_v46, %v21_v47  ;;  %v2689_v51 = vld [vmem:[%s4049_s1 + $0x184] ss:$16 sps:$4 sm:$0xff]   ;;  %v2697_v56 = vld [vmem:[%s4049_s1 + $0x1ac] ss:$16 sps:$4 sm:$0xff]   ;;  %v2294_v5 = vcombine.low %v17_v46, %v21_v47 }
  0x13   :  { %1658 = vmatpush1.bf16.msra.mxu0 %v2645_v18  ;;  %1870 = vmatpush1.bf16.msra.mxu1 %v2646_v19  ;;  %v2693_v53 = vld [vmem:[%s4049_s1 + $0x180] ss:$16 sps:$4 sm:$0xff]   ;;  %v2695_v55 = vld [vmem:[%s4049_s1 + $0x1a4] ss:$16 sps:$4 sm:$0xff]   ;;  %v2700_v58 = vld [vmem:[%s4049_s1 + $0x1a8] ss:$16 sps:$4 sm:$0xff]  }
  0x14   :  { %1659 = vmatprep.subr.bf16.mxu0 %v2647_v20  ;;  %1871 = vmatprep.subr.bf16.mxu1 %v2649_v21  ;;  %v2699_v57 = vld [vmem:[%s4049_s1 + $0x1a0] ss:$16 sps:$4 sm:$0xff]   ;;  %v2701_v59 = vld [vmem:[%s4049_s1 + $0x1c4] ss:$16 sps:$4 sm:$0xff]   ;;  %v2703_v60 = vld [vmem:[%s4049_s1 + $0x1cc] ss:$16 sps:$4 sm:$0xff]  }
  0x15   :  { %1681 = vmatprep.mubr.bf16.mxu0 %v2295_v50  ;;  %1893 = vmatprep.mubr.bf16.mxu1 %v2295_v50  ;;  %v2705_v61 = vld [vmem:[%s4049_s1 + $0x1c0] ss:$16 sps:$4 sm:$0xff]   ;;  %v2706_v62 = vld [vmem:[%s4049_s1 + $0x1c8] ss:$16 sps:$4 sm:$0xff]   ;;  %v2707_v63 = vld [vmem:[%s4049_s1 + $0x1e4] ss:$16 sps:$4 sm:$0xff]  }
  0x16   :  { %v2709_v0 = vld [vmem:[%s4049_s1 + $0x1ec] ss:$16 sps:$4 sm:$0xff]   ;;  %v2711_v1 = vld [vmem:[%s4049_s1 + $0x1e0] ss:$16 sps:$4 sm:$0xff]   ;;  %v2712_v2 = vld [vmem:[%s4049_s1 + $0x1e8] ss:$16 sps:$4 sm:$0xff]  }
  0x17   :  { %1660 = vmatpush1.bf16.msra.mxu0 %v2651_v22  ;;  %1872 = vmatpush1.bf16.msra.mxu1 %v2652_v23  ;;  %v2715_v3 = vld [vmem:[%s4049_s1 + $0x204] ss:$16 sps:$4 sm:$0xff]   ;;  %v2718_v4 = vld [vmem:[%s4049_s1 + $0x20c] ss:$16 sps:$4 sm:$0xff]   ;;  %v2713_v6 = vld [vmem:[%s4049_s1 + $0x200] ss:$16 sps:$4 sm:$0xff]  }
  0x18   :  { %1661 = vmatprep.subr.bf16.mxu0 %v2653_v24  ;;  %1873 = vmatprep.subr.bf16.mxu1 %v2655_v25  ;;  %v2716_v7 = vld [vmem:[%s4049_s1 + $0x208] ss:$16 sps:$4 sm:$0xff]   ;;  %v2721_v8 = vld [vmem:[%s4049_s1 + $0x224] ss:$16 sps:$4 sm:$0xff]   ;;  %v2724_v9 = vld [vmem:[%s4049_s1 + $0x22c] ss:$16 sps:$4 sm:$0xff]  }
  0x19   :  { %v2719_v10 = vld [vmem:[%s4049_s1 + $0x220] ss:$16 sps:$4 sm:$0xff]   ;;  %v2722_v11 = vld [vmem:[%s4049_s1 + $0x228] ss:$16 sps:$4 sm:$0xff]   ;;  %v2727_v12 = vld [vmem:[%s4049_s1 + $0x244] ss:$16 sps:$4 sm:$0xff]  }
  0x1a   :  { %v2730_v13 = vld [vmem:[%s4049_s1 + $0x24c] ss:$16 sps:$4 sm:$0xff]   ;;  %v2725_v14 = vld [vmem:[%s4049_s1 + $0x240] ss:$16 sps:$4 sm:$0xff]   ;;  %v2728_v15 = vld [vmem:[%s4049_s1 + $0x248] ss:$16 sps:$4 sm:$0xff]  }
  0x1b   :  { %1662 = vmatpush1.bf16.msra.mxu0 %v2657_v26  ;;  %1874 = vmatpush1.bf16.msra.mxu1 %v2658_v27  ;;  %v2733_v16 = vld [vmem:[%s4049_s1 + $0x264] ss:$16 sps:$4 sm:$0xff]   ;;  %v2736_v17 = vld [vmem:[%s4049_s1 + $0x26c] ss:$16 sps:$4 sm:$0xff]   ;;  %v2731_v18 = vld [vmem:[%s4049_s1 + $0x260] ss:$16 sps:$4 sm:$0xff]  }
  0x1c   :  { %1663 = vmatprep.subr.bf16.mxu0 %v2659_v28  ;;  %1875 = vmatprep.subr.bf16.mxu1 %v2661_v29  ;;  %v2734_v19 = vld [vmem:[%s4049_s1 + $0x268] ss:$16 sps:$4 sm:$0xff]   ;;  %v2739_v20 = vld [vmem:[%s4049_s1 + $0x284] ss:$16 sps:$4 sm:$0xff]   ;;  %v2742_v21 = vld [vmem:[%s4049_s1 + $0x28c] ss:$16 sps:$4 sm:$0xff]  }
  0x1d   :  { %v2737_v22 = vld [vmem:[%s4049_s1 + $0x280] ss:$16 sps:$4 sm:$0xff]   ;;  %v2740_v23 = vld [vmem:[%s4049_s1 + $0x288] ss:$16 sps:$4 sm:$0xff]   ;;  %v2745_v24 = vld [vmem:[%s4049_s1 + $0x2a4] ss:$16 sps:$4 sm:$0xff]  }
  0x1e   :  { %v2748_v25 = vld [vmem:[%s4049_s1 + $0x2ac] ss:$16 sps:$4 sm:$0xff]   ;;  %v25_v26 = vld [vmem:[%s4050_s0 + $0x40] sm:$0xff]  ;;  %v2764_v46 = vld [vmem:[%s4049_s1 + $0x308] ss:$16 sps:$4 sm:$0xff]  }
  0x1f   :  { %1664 = vmatpush1.bf16.msra.mxu0 %v2663_v30  ;;  %1876 = vmatpush1.bf16.msra.mxu1 %v2664_v31  ;;  %v29_v27 = vld [vmem:[%s4050_s0 + $0x60] sm:$0xff]  ;;  %v2746_v30 = vld [vmem:[%s4049_s1 + $0x2a8] ss:$16 sps:$4 sm:$0xff]  }
  0x20   :  { %1665 = vmatprep.subr.bf16.mxu0 %v2665_v32  ;;  %1877 = vmatprep.subr.bf16.mxu1 %v2667_v33  ;;  %v2303_v28 = vcombine.high %v25_v26, %v29_v27  ;;  %v2743_v29 = vld [vmem:[%s4049_s1 + $0x2a0] ss:$16 sps:$4 sm:$0xff]   ;;  %v2302_v31 = vcombine.low %v25_v26, %v29_v27  ;;  %v2751_v32 = vld [vmem:[%s4049_s1 + $0x2c4] ss:$16 sps:$4 sm:$0xff]   ;;  %v2754_v33 = vld [vmem:[%s4049_s1 + $0x2cc] ss:$16 sps:$4 sm:$0xff]  }
  0x21   :  { %v2769_v47 = vld [vmem:[%s4049_s1 + $0x324] ss:$16 sps:$4 sm:$0xff]   ;;  %v2770_v50 = vld [vmem:[%s4049_s1 + $0x328] ss:$16 sps:$4 sm:$0xff]  }
  0x22   :  { %v3489_v27 = vld [vmem:[%s4050_s0 + $0x30] sm:$0xff] }
  0x23   :  { %1666 = vmatpush1.bf16.msra.mxu0 %v2669_v34  ;;  %1878 = vmatpush1.bf16.msra.mxu1 %v2670_v35  ;;  %v3320_v34 = vld [vmem:[%s4050_s0 + $0x8] sm:$0xff] }
  0x24   :  { %1667 = vmatprep.subr.bf16.mxu0 %v2671_v36  ;;  %1879 = vmatprep.subr.bf16.mxu1 %v2673_v37  ;;  %v3325_v35 = vld [vmem:[%s4050_s0 + $0x28] sm:$0xff]  ;;  %v2749_v36 = vld [vmem:[%s4049_s1 + $0x2c0] ss:$16 sps:$4 sm:$0xff]  }
  0x25   :  { %v2752_v37 = vld [vmem:[%s4049_s1 + $0x2c8] ss:$16 sps:$4 sm:$0xff]  }
  0x27   :  { %1668 = vmatpush1.bf16.msra.mxu0 %v2675_v38  ;;  %1880 = vmatpush1.bf16.msra.mxu1 %v2676_v39  ;;  %v2297_v38 = vcombine.high %v3320_v34, %v3325_v35  ;;  %v2757_v39 = vld [vmem:[%s4049_s1 + $0x2e4] ss:$16 sps:$4 sm:$0xff]  }
  0x28   :  { %1669 = vmatprep.subr.bf16.mxu0 %v2677_v40  ;;  %1881 = vmatprep.subr.bf16.mxu1 %v2679_v41  ;;  %v2760_v40 = vld [vmem:[%s4049_s1 + $0x2ec] ss:$16 sps:$4 sm:$0xff]   ;;  %v2755_v41 = vld [vmem:[%s4049_s1 + $0x2e0] ss:$16 sps:$4 sm:$0xff]  }
  0x2b   :  { %1670 = vmatpush1.bf16.msra.mxu0 %v2681_v42  ;;  %1882 = vmatpush1.bf16.msra.mxu1 %v2682_v43  ;;  %v2758_v42 = vld [vmem:[%s4049_s1 + $0x2e8] ss:$16 sps:$4 sm:$0xff]   ;;  %v2763_v43 = vld [vmem:[%s4049_s1 + $0x304] ss:$16 sps:$4 sm:$0xff]  }
  0x2c   :  { %1671 = vmatprep.subr.bf16.mxu0 %v2683_v44  ;;  %1883 = vmatprep.subr.bf16.mxu1 %v2685_v45  ;;  %v2766_v44 = vld [vmem:[%s4049_s1 + $0x30c] ss:$16 sps:$4 sm:$0xff]   ;;  %v2761_v45 = vld [vmem:[%s4049_s1 + $0x300] ss:$16 sps:$4 sm:$0xff]  }
  0x2f   :  { %1672 = vmatpush1.bf16.msra.mxu0 %v2687_v48  ;;  %1884 = vmatpush1.bf16.msra.mxu1 %v2688_v49  ;;  %v2772_v48 = vld [vmem:[%s4049_s1 + $0x32c] ss:$16 sps:$4 sm:$0xff]   ;;  %v2767_v49 = vld [vmem:[%s4049_s1 + $0x320] ss:$16 sps:$4 sm:$0xff]  }
  0x30   :  { %1673 = vmatprep.subr.bf16.mxu0 %v2689_v51  ;;  %1885 = vmatprep.subr.bf16.mxu1 %v2691_v52  ;;  %v2775_v51 = vld [vmem:[%s4049_s1 + $0x344] ss:$16 sps:$4 sm:$0xff]   ;;  %v2778_v52 = vld [vmem:[%s4049_s1 + $0x34c] ss:$16 sps:$4 sm:$0xff]  }
  0x33   :  { %1674 = vmatpush1.bf16.msra.mxu0 %v2693_v53  ;;  %1886 = vmatpush1.bf16.msra.mxu1 %v2694_v54  ;;  %v2773_v53 = vld [vmem:[%s4049_s1 + $0x340] ss:$16 sps:$4 sm:$0xff]   ;;  %v2776_v54 = vld [vmem:[%s4049_s1 + $0x348] ss:$16 sps:$4 sm:$0xff]  }
  0x34   :  { %1675 = vmatprep.subr.bf16.mxu0 %v2695_v55  ;;  %1887 = vmatprep.subr.bf16.mxu1 %v2697_v56  ;;  %v2781_v55 = vld [vmem:[%s4049_s1 + $0x364] ss:$16 sps:$4 sm:$0xff]   ;;  %v2784_v56 = vld [vmem:[%s4049_s1 + $0x36c] ss:$16 sps:$4 sm:$0xff]  }
  0x37   :  { %1676 = vmatpush1.bf16.msra.mxu0 %v2699_v57  ;;  %1888 = vmatpush1.bf16.msra.mxu1 %v2700_v58  ;;  %v2779_v57 = vld [vmem:[%s4049_s1 + $0x360] ss:$16 sps:$4 sm:$0xff]   ;;  %v2782_v58 = vld [vmem:[%s4049_s1 + $0x368] ss:$16 sps:$4 sm:$0xff]  }
  0x38   :  { %1677 = vmatprep.subr.bf16.mxu0 %v2701_v59  ;;  %1889 = vmatprep.subr.bf16.mxu1 %v2703_v60  ;;  %v2787_v59 = vld [vmem:[%s4049_s1 + $0x384] ss:$16 sps:$4 sm:$0xff]   ;;  %v2790_v60 = vld [vmem:[%s4049_s1 + $0x38c] ss:$16 sps:$4 sm:$0xff]  }
  0x3b   :  { %1678 = vmatpush1.bf16.msra.mxu0 %v2705_v61  ;;  %1890 = vmatpush1.bf16.msra.mxu1 %v2706_v62  ;;  %v2785_v61 = vld [vmem:[%s4049_s1 + $0x380] ss:$16 sps:$4 sm:$0xff]   ;;  %v2788_v62 = vld [vmem:[%s4049_s1 + $0x388] ss:$16 sps:$4 sm:$0xff]  }
  0x3c   :  { %1679 = vmatprep.subr.bf16.mxu0 %v2707_v63  ;;  %1891 = vmatprep.subr.bf16.mxu1 %v2709_v0  ;;  %v2793_v63 = vld [vmem:[%s4049_s1 + $0x3a4] ss:$16 sps:$4 sm:$0xff]   ;;  %v2796_v0 = vld [vmem:[%s4049_s1 + $0x3ac] ss:$16 sps:$4 sm:$0xff]  }
  0x3f   :  { %1680 = vmatpush1.bf16.msra.mxu0 %v2711_v1  ;;  %1892 = vmatpush1.bf16.msra.mxu1 %v2712_v2  ;;  %v2791_v1 = vld [vmem:[%s4049_s1 + $0x3a0] ss:$16 sps:$4 sm:$0xff]   ;;  %v2794_v2 = vld [vmem:[%s4049_s1 + $0x3a8] ss:$16 sps:$4 sm:$0xff]  }
  0x40   :  { %1702 = vmatprep.subr.bf16.mxu0 %v2715_v3  ;;  %1914 = vmatprep.subr.bf16.mxu1 %v2718_v4  ;;  %v2799_v3 = vld [vmem:[%s4049_s1 + $0x3c4] ss:$16 sps:$4 sm:$0xff]   ;;  %v2802_v4 = vld [vmem:[%s4049_s1 + $0x3cc] ss:$16 sps:$4 sm:$0xff]  }
  0x42   :  { %1682 = vmatmul.mubr.bf16.vlgmr.msra.gmra.mrb[0].mxu0 %v2294_v5  ;;  %1894 = vmatmul.mubr.bf16.vlgmr.msra.gmra.mrb[0].mxu1 %v2294_v5  ;;  %v2797_v5 = vld [vmem:[%s4049_s1 + $0x3c0] ss:$16 sps:$4 sm:$0xff]  }
  0x43   :  { %1703 = vmatpush1.bf16.msra.mxu0 %v2713_v6  ;;  %1915 = vmatpush1.bf16.msra.mxu1 %v2716_v7  ;;  %v2800_v6 = vld [vmem:[%s4049_s1 + $0x3c8] ss:$16 sps:$4 sm:$0xff]   ;;  %v2805_v7 = vld [vmem:[%s4049_s1 + $0x3e4] ss:$16 sps:$4 sm:$0xff]  }
  0x44   :  { %1704 = vmatprep.subr.bf16.mxu0 %v2721_v8  ;;  %1916 = vmatprep.subr.bf16.mxu1 %v2724_v9  ;;  %v2808_v8 = vld [vmem:[%s4049_s1 + $0x3ec] ss:$16 sps:$4 sm:$0xff]   ;;  %v2803_v9 = vld [vmem:[%s4049_s1 + $0x3e0] ss:$16 sps:$4 sm:$0xff]  }
  0x45   :  { %1691 = vmatprep.mubr.bf16.mxu0 %v2303_v28  ;;  %1903 = vmatprep.mubr.bf16.mxu1 %v2303_v28  ;;  %v2821_v28 = vld [vmem:[%s4049_s1 + $0x440] ss:$16 sps:$4 sm:$0xff]  }
  0x47   :  { %1705 = vmatpush1.bf16.msra.mxu0 %v2719_v10  ;;  %1917 = vmatpush1.bf16.msra.mxu1 %v2722_v11  ;;  %v2806_v10 = vld [vmem:[%s4049_s1 + $0x3e8] ss:$16 sps:$4 sm:$0xff]   ;;  %v2811_v11 = vld [vmem:[%s4049_s1 + $0x404] ss:$16 sps:$4 sm:$0xff]  }
  0x48   :  { %1706 = vmatprep.subr.bf16.mxu0 %v2727_v12  ;;  %1918 = vmatprep.subr.bf16.mxu1 %v2730_v13  ;;  %v2814_v12 = vld [vmem:[%s4049_s1 + $0x40c] ss:$16 sps:$4 sm:$0xff]   ;;  %v2809_v13 = vld [vmem:[%s4049_s1 + $0x400] ss:$16 sps:$4 sm:$0xff]  }
  0x4a   :  { %1692 = vmatmul.mubr.bf16.gmra.mrb[4].mxu0 %v2302_v31  ;;  %1904 = vmatmul.mubr.bf16.gmra.mrb[4].mxu1 %v2302_v31  ;;  %v2832_v31 = vld [vmem:[%s4049_s1 + $0x46c] ss:$16 sps:$4 sm:$0xff]  }
  0x4b   :  { %1707 = vmatpush1.bf16.msra.mxu0 %v2725_v14  ;;  %1919 = vmatpush1.bf16.msra.mxu1 %v2728_v15  ;;  %v2812_v14 = vld [vmem:[%s4049_s1 + $0x408] ss:$16 sps:$4 sm:$0xff]   ;;  %v2296_v15 = vcombine.low %v3320_v34, %v3325_v35  ;;  %v2835_v35 = vld [vmem:[%s4049_s1 + $0x484] ss:$16 sps:$4 sm:$0xff]  }
  0x4c   :  { %1708 = vmatprep.subr.bf16.mxu0 %v2733_v16  ;;  %1920 = vmatprep.subr.bf16.mxu1 %v2736_v17  ;;  %v26_v16 = vld [vmem:[%s4050_s0 + $0x48] sm:$0xff] }
  0x4d   :  { %1734 = vmatprep.mubr.bf16.mxu0 %v2297_v38  ;;  %1946 = vmatprep.mubr.bf16.mxu1 %v2297_v38  ;;  %v30_v17 = vld [vmem:[%s4050_s0 + $0x68] sm:$0xff] }
  0x4e   :  { %v2304_v26 = vcombine.low %v26_v16, %v30_v17  ;;  %v2830_v34 = vld [vmem:[%s4049_s1 + $0x468] ss:$16 sps:$4 sm:$0xff]  }
  0x4f   :  { %1709 = vmatpush1.bf16.msra.mxu0 %v2731_v18  ;;  %1921 = vmatpush1.bf16.msra.mxu1 %v2734_v19  ;;  %v2817_v18 = vld [vmem:[%s4049_s1 + $0x424] ss:$16 sps:$4 sm:$0xff]   ;;  %v2820_v19 = vld [vmem:[%s4049_s1 + $0x42c] ss:$16 sps:$4 sm:$0xff]   ;;  %v2836_v38 = vld [vmem:[%s4049_s1 + $0x488] ss:$16 sps:$4 sm:$0xff]  }
  0x50   :  { %1710 = vmatprep.subr.bf16.mxu0 %v2739_v20  ;;  %1922 = vmatprep.subr.bf16.mxu1 %v2742_v21  ;;  %v2305_v20 = vcombine.high %v26_v16, %v30_v17  ;;  %v2815_v21 = vld [vmem:[%s4049_s1 + $0x420] ss:$16 sps:$4 sm:$0xff]   ;;  %v2904_v16 = vld [vmem:[%s4049_s1 + $0x5ec] ss:$16 sps:$4 sm:$0xff]  }
  0x51   :  { %v2899_v17 = vld [vmem:[%s4049_s1 + $0x5e0] ss:$16 sps:$4 sm:$0xff]  }
  0x53   :  { %1711 = vmatpush1.bf16.msra.mxu0 %v2737_v22  ;;  %1923 = vmatpush1.bf16.msra.mxu1 %v2740_v23  ;;  %v2818_v22 = vld [vmem:[%s4049_s1 + $0x428] ss:$16 sps:$4 sm:$0xff]   ;;  %v2823_v23 = vld [vmem:[%s4049_s1 + $0x444] ss:$16 sps:$4 sm:$0xff]  }
  0x54   :  { %1712 = vmatprep.subr.bf16.mxu0 %v2745_v24  ;;  %1924 = vmatprep.subr.bf16.mxu1 %v2748_v25  ;;  %v2826_v24 = vld [vmem:[%s4049_s1 + $0x44c] ss:$16 sps:$4 sm:$0xff]   ;;  %v3484_v25 = vld [vmem:[%s4050_s0 + $0x10] sm:$0xff] }
  0x57   :  { %1713 = vmatpush1.bf16.msra.mxu0 %v2743_v29  ;;  %1925 = vmatpush1.bf16.msra.mxu1 %v2746_v30  ;;  %v2824_v29 = vld [vmem:[%s4049_s1 + $0x448] ss:$16 sps:$4 sm:$0xff]   ;;  %v2829_v30 = vld [vmem:[%s4049_s1 + $0x464] ss:$16 sps:$4 sm:$0xff]  }
  0x58   :  { %1714 = vmatprep.subr.bf16.mxu0 %v2751_v32  ;;  %1926 = vmatprep.subr.bf16.mxu1 %v2754_v33  ;;  %v2299_v32 = vcombine.high %v3484_v25, %v3489_v27  ;;  %v2827_v33 = vld [vmem:[%s4049_s1 + $0x460] ss:$16 sps:$4 sm:$0xff]  }
  0x5b   :  { %1715 = vmatpush1.bf16.msra.mxu0 %v2749_v36  ;;  %1927 = vmatpush1.bf16.msra.mxu1 %v2752_v37  ;;  %v2838_v36 = vld [vmem:[%s4049_s1 + $0x48c] ss:$16 sps:$4 sm:$0xff]   ;;  %v2833_v37 = vld [vmem:[%s4049_s1 + $0x480] ss:$16 sps:$4 sm:$0xff]  }
  0x5c   :  { %1716 = vmatprep.subr.bf16.mxu0 %v2757_v39  ;;  %1928 = vmatprep.subr.bf16.mxu1 %v2760_v40  ;;  %v2841_v39 = vld [vmem:[%s4049_s1 + $0x4a4] ss:$16 sps:$4 sm:$0xff]   ;;  %v2844_v40 = vld [vmem:[%s4049_s1 + $0x4ac] ss:$16 sps:$4 sm:$0xff]  }
  0x5f   :  { %1717 = vmatpush1.bf16.msra.mxu0 %v2755_v41  ;;  %1929 = vmatpush1.bf16.msra.mxu1 %v2758_v42  ;;  %v2839_v41 = vld [vmem:[%s4049_s1 + $0x4a0] ss:$16 sps:$4 sm:$0xff]   ;;  %v2842_v42 = vld [vmem:[%s4049_s1 + $0x4a8] ss:$16 sps:$4 sm:$0xff]  }
  0x60   :  { %1718 = vmatprep.subr.bf16.mxu0 %v2763_v43  ;;  %1930 = vmatprep.subr.bf16.mxu1 %v2766_v44  ;;  %v2847_v43 = vld [vmem:[%s4049_s1 + $0x4c4] ss:$16 sps:$4 sm:$0xff]   ;;  %v2850_v44 = vld [vmem:[%s4049_s1 + $0x4cc] ss:$16 sps:$4 sm:$0xff]  }
  0x63   :  { %1719 = vmatpush1.bf16.msra.mxu0 %v2761_v45  ;;  %1931 = vmatpush1.bf16.msra.mxu1 %v2764_v46  ;;  %v2845_v45 = vld [vmem:[%s4049_s1 + $0x4c0] ss:$16 sps:$4 sm:$0xff]   ;;  %v2848_v46 = vld [vmem:[%s4049_s1 + $0x4c8] ss:$16 sps:$4 sm:$0xff]  }
  0x64   :  { %1720 = vmatprep.subr.bf16.mxu0 %v2769_v47  ;;  %1932 = vmatprep.subr.bf16.mxu1 %v2772_v48  ;;  %v2853_v47 = vld [vmem:[%s4049_s1 + $0x4e4] ss:$16 sps:$4 sm:$0xff]   ;;  %v2856_v48 = vld [vmem:[%s4049_s1 + $0x4ec] ss:$16 sps:$4 sm:$0xff]  }
  0x67   :  { %1721 = vmatpush1.bf16.msra.mxu0 %v2767_v49  ;;  %1933 = vmatpush1.bf16.msra.mxu1 %v2770_v50  ;;  %v2851_v49 = vld [vmem:[%s4049_s1 + $0x4e0] ss:$16 sps:$4 sm:$0xff]   ;;  %v2854_v50 = vld [vmem:[%s4049_s1 + $0x4e8] ss:$16 sps:$4 sm:$0xff]  }
  0x68   :  { %1722 = vmatprep.subr.bf16.mxu0 %v2775_v51  ;;  %1934 = vmatprep.subr.bf16.mxu1 %v2778_v52  ;;  %v2859_v51 = vld [vmem:[%s4049_s1 + $0x504] ss:$16 sps:$4 sm:$0xff]   ;;  %v2862_v52 = vld [vmem:[%s4049_s1 + $0x50c] ss:$16 sps:$4 sm:$0xff]  }
  0x6b   :  { %1723 = vmatpush1.bf16.msra.mxu0 %v2773_v53  ;;  %1935 = vmatpush1.bf16.msra.mxu1 %v2776_v54  ;;  %v2857_v53 = vld [vmem:[%s4049_s1 + $0x500] ss:$16 sps:$4 sm:$0xff]   ;;  %v2860_v54 = vld [vmem:[%s4049_s1 + $0x508] ss:$16 sps:$4 sm:$0xff]  }
  0x6c   :  { %1724 = vmatprep.subr.bf16.mxu0 %v2781_v55  ;;  %1936 = vmatprep.subr.bf16.mxu1 %v2784_v56  ;;  %v2865_v55 = vld [vmem:[%s4049_s1 + $0x524] ss:$16 sps:$4 sm:$0xff]   ;;  %v2868_v56 = vld [vmem:[%s4049_s1 + $0x52c] ss:$16 sps:$4 sm:$0xff]  }
  0x6f   :  { %1725 = vmatpush1.bf16.msra.mxu0 %v2779_v57  ;;  %1937 = vmatpush1.bf16.msra.mxu1 %v2782_v58  ;;  %v2863_v57 = vld [vmem:[%s4049_s1 + $0x520] ss:$16 sps:$4 sm:$0xff]   ;;  %v2866_v58 = vld [vmem:[%s4049_s1 + $0x528] ss:$16 sps:$4 sm:$0xff]  }
  0x70   :  { %1726 = vmatprep.subr.bf16.mxu0 %v2787_v59  ;;  %1938 = vmatprep.subr.bf16.mxu1 %v2790_v60  ;;  %v2871_v59 = vld [vmem:[%s4049_s1 + $0x544] ss:$16 sps:$4 sm:$0xff]   ;;  %v2874_v60 = vld [vmem:[%s4049_s1 + $0x54c] ss:$16 sps:$4 sm:$0xff]  }
  0x73   :  { %1727 = vmatpush1.bf16.msra.mxu0 %v2785_v61  ;;  %1939 = vmatpush1.bf16.msra.mxu1 %v2788_v62  ;;  %v2869_v61 = vld [vmem:[%s4049_s1 + $0x540] ss:$16 sps:$4 sm:$0xff]   ;;  %v2872_v62 = vld [vmem:[%s4049_s1 + $0x548] ss:$16 sps:$4 sm:$0xff]  }
  0x74   :  { %1728 = vmatprep.subr.bf16.mxu0 %v2793_v63  ;;  %1940 = vmatprep.subr.bf16.mxu1 %v2796_v0  ;;  %v2877_v63 = vld [vmem:[%s4049_s1 + $0x564] ss:$16 sps:$4 sm:$0xff]   ;;  %v2880_v0 = vld [vmem:[%s4049_s1 + $0x56c] ss:$16 sps:$4 sm:$0xff]  }
  0x77   :  { %1729 = vmatpush1.bf16.msra.mxu0 %v2791_v1  ;;  %1941 = vmatpush1.bf16.msra.mxu1 %v2794_v2  ;;  %v2875_v1 = vld [vmem:[%s4049_s1 + $0x560] ss:$16 sps:$4 sm:$0xff]   ;;  %v2878_v2 = vld [vmem:[%s4049_s1 + $0x568] ss:$16 sps:$4 sm:$0xff]  }
  0x78   :  { %1730 = vmatprep.subr.bf16.mxu0 %v2799_v3  ;;  %1942 = vmatprep.subr.bf16.mxu1 %v2802_v4  ;;  %v2883_v3 = vld [vmem:[%s4049_s1 + $0x584] ss:$16 sps:$4 sm:$0xff]   ;;  %v2886_v4 = vld [vmem:[%s4049_s1 + $0x58c] ss:$16 sps:$4 sm:$0xff]  }
  0x7b   :  { %1731 = vmatpush1.bf16.msra.mxu0 %v2797_v5  ;;  %1943 = vmatpush1.bf16.msra.mxu1 %v2800_v6  ;;  %v2881_v5 = vld [vmem:[%s4049_s1 + $0x580] ss:$16 sps:$4 sm:$0xff]   ;;  %v2884_v6 = vld [vmem:[%s4049_s1 + $0x588] ss:$16 sps:$4 sm:$0xff]  }
  0x7c   :  { %1732 = vmatprep.subr.bf16.mxu0 %v2805_v7  ;;  %1944 = vmatprep.subr.bf16.mxu1 %v2808_v8  ;;  %v2889_v7 = vld [vmem:[%s4049_s1 + $0x5a4] ss:$16 sps:$4 sm:$0xff]   ;;  %v2892_v8 = vld [vmem:[%s4049_s1 + $0x5ac] ss:$16 sps:$4 sm:$0xff]  }
  0x7f   :  { %1733 = vmatpush1.bf16.msra.mxu0 %v2803_v9  ;;  %1945 = vmatpush1.bf16.msra.mxu1 %v2806_v10  ;;  %v2887_v9 = vld [vmem:[%s4049_s1 + $0x5a0] ss:$16 sps:$4 sm:$0xff]   ;;  %v2890_v10 = vld [vmem:[%s4049_s1 + $0x5a8] ss:$16 sps:$4 sm:$0xff]  }
  0x80   :  { %1755 = vmatprep.subr.bf16.mxu0 %v2811_v11  ;;  %1967 = vmatprep.subr.bf16.mxu1 %v2814_v12  ;;  %v2895_v11 = vld [vmem:[%s4049_s1 + $0x5c4] ss:$16 sps:$4 sm:$0xff]   ;;  %v2898_v12 = vld [vmem:[%s4049_s1 + $0x5cc] ss:$16 sps:$4 sm:$0xff]  }
  0x82   :  { %1735 = vmatmul.mubr.bf16.vlgmr.msra.gmra.mrb[0].mxu0 %v2296_v15  ;;  %1947 = vmatmul.mubr.bf16.vlgmr.msra.gmra.mrb[0].mxu1 %v2296_v15  ;;  %v2901_v15 = vld [vmem:[%s4049_s1 + $0x5e4] ss:$16 sps:$4 sm:$0xff]  }
  0x83   :  { %1756 = vmatpush1.bf16.msra.mxu0 %v2809_v13  ;;  %1968 = vmatpush1.bf16.msra.mxu1 %v2812_v14  ;;  %v2893_v13 = vld [vmem:[%s4049_s1 + $0x5c0] ss:$16 sps:$4 sm:$0xff]   ;;  %v2896_v14 = vld [vmem:[%s4049_s1 + $0x5c8] ss:$16 sps:$4 sm:$0xff]  }
  0x84   :  { %1757 = vmatprep.subr.bf16.mxu0 %v2817_v18  ;;  %1969 = vmatprep.subr.bf16.mxu1 %v2820_v19  ;;  %v2902_v18 = vld [vmem:[%s4049_s1 + $0x5e8] ss:$16 sps:$4 sm:$0xff]   ;;  %v2907_v19 = vld [vmem:[%s4049_s1 + $0x604] ss:$16 sps:$4 sm:$0xff]  }
  0x85   :  { %1744 = vmatprep.mubr.bf16.mxu0 %v2305_v20  ;;  %1956 = vmatprep.mubr.bf16.mxu1 %v2305_v20  ;;  %v2910_v20 = vld [vmem:[%s4049_s1 + $0x60c] ss:$16 sps:$4 sm:$0xff]  }
  0x87   :  { %1758 = vmatpush1.bf16.msra.mxu0 %v2815_v21  ;;  %1970 = vmatpush1.bf16.msra.mxu1 %v2818_v22  ;;  %v2298_v21 = vcombine.low %v3484_v25, %v3489_v27  ;;  %v27_v22 = vld [vmem:[%s4050_s0 + $0x50] sm:$0xff]  ;;  %v2916_v27 = vld [vmem:[%s4049_s1 + $0x62c] ss:$16 sps:$4 sm:$0xff]  }
  0x88   :  { %1759 = vmatprep.subr.bf16.mxu0 %v2823_v23  ;;  %1971 = vmatprep.subr.bf16.mxu1 %v2826_v24  ;;  %v31_v23 = vld [vmem:[%s4050_s0 + $0x70] sm:$0xff] }
  0x89   :  { %v2905_v24 = vld [vmem:[%s4049_s1 + $0x600] ss:$16 sps:$4 sm:$0xff]   ;;  %v2913_v25 = vld [vmem:[%s4049_s1 + $0x624] ss:$16 sps:$4 sm:$0xff]  }
  0x8a   :  { %1745 = vmatmul.mubr.bf16.gmra.mrb[4].mxu0 %v2304_v26  ;;  %1957 = vmatmul.mubr.bf16.gmra.mrb[4].mxu1 %v2304_v26  ;;  %v2908_v26 = vld [vmem:[%s4049_s1 + $0x608] ss:$16 sps:$4 sm:$0xff]  }
  0x8b   :  { %1760 = vmatpush1.bf16.msra.mxu0 %v2821_v28  ;;  %1972 = vmatpush1.bf16.msra.mxu1 %v2824_v29  ;;  %v2307_v28 = vcombine.high %v27_v22, %v31_v23  ;;  %v2911_v29 = vld [vmem:[%s4049_s1 + $0x620] ss:$16 sps:$4 sm:$0xff]  }
  0x8c   :  { %1761 = vmatprep.subr.bf16.mxu0 %v2829_v30  ;;  %1973 = vmatprep.subr.bf16.mxu1 %v2832_v31  ;;  %v2914_v30 = vld [vmem:[%s4049_s1 + $0x628] ss:$16 sps:$4 sm:$0xff]   ;;  %v2919_v31 = vld [vmem:[%s4049_s1 + $0x644] ss:$16 sps:$4 sm:$0xff]  }
  0x8d   :  { %1787 = vmatprep.mubr.bf16.mxu0 %v2299_v32  ;;  %1999 = vmatprep.mubr.bf16.mxu1 %v2299_v32  ;;  %v2922_v32 = vld [vmem:[%s4049_s1 + $0x64c] ss:$16 sps:$4 sm:$0xff]  }
  0x8f   :  { %1762 = vmatpush1.bf16.msra.mxu0 %v2827_v33  ;;  %1974 = vmatpush1.bf16.msra.mxu1 %v2830_v34  ;;  %v2306_v33 = vcombine.low %v27_v22, %v31_v23  ;;  %v3696_v34 = vld [vmem:[%s4050_s0 + $0x18] sm:$0xff]  ;;  %v2997_v23 = vld [vmem:[%s4049_s1 + $0x7e4] ss:$16 sps:$4 sm:$0xff]  }
  0x90   :  { %1763 = vmatprep.subr.bf16.mxu0 %v2835_v35  ;;  %1975 = vmatprep.subr.bf16.mxu1 %v2838_v36  ;;  %v3701_v35 = vld [vmem:[%s4050_s0 + $0x38] sm:$0xff]  ;;  %v2917_v36 = vld [vmem:[%s4049_s1 + $0x640] ss:$16 sps:$4 sm:$0xff]  }
  0x91   :  { %v2992_v22 = vld [vmem:[%s4049_s1 + $0x7c8] ss:$16 sps:$4 sm:$0xff]  }
  0x93   :  { %1764 = vmatpush1.bf16.msra.mxu0 %v2833_v37  ;;  %1976 = vmatpush1.bf16.msra.mxu1 %v2836_v38  ;;  %v2920_v37 = vld [vmem:[%s4049_s1 + $0x648] ss:$16 sps:$4 sm:$0xff]   ;;  %v2925_v38 = vld [vmem:[%s4049_s1 + $0x664] ss:$16 sps:$4 sm:$0xff]  }
  0x94   :  { %1765 = vmatprep.subr.bf16.mxu0 %v2841_v39  ;;  %1977 = vmatprep.subr.bf16.mxu1 %v2844_v40  ;;  %v2928_v39 = vld [vmem:[%s4049_s1 + $0x66c] ss:$16 sps:$4 sm:$0xff]   ;;  %v2301_v40 = vcombine.high %v3696_v34, %v3701_v35 }
  0x97   :  { %1766 = vmatpush1.bf16.msra.mxu0 %v2839_v41  ;;  %1978 = vmatpush1.bf16.msra.mxu1 %v2842_v42  ;;  %v2923_v41 = vld [vmem:[%s4049_s1 + $0x660] ss:$16 sps:$4 sm:$0xff]   ;;  %v2926_v42 = vld [vmem:[%s4049_s1 + $0x668] ss:$16 sps:$4 sm:$0xff]  }
  0x98   :  { %1767 = vmatprep.subr.bf16.mxu0 %v2847_v43  ;;  %1979 = vmatprep.subr.bf16.mxu1 %v2850_v44  ;;  %v2931_v43 = vld [vmem:[%s4049_s1 + $0x684] ss:$16 sps:$4 sm:$0xff]   ;;  %v2934_v44 = vld [vmem:[%s4049_s1 + $0x68c] ss:$16 sps:$4 sm:$0xff]  }
  0x9b   :  { %1768 = vmatpush1.bf16.msra.mxu0 %v2845_v45  ;;  %1980 = vmatpush1.bf16.msra.mxu1 %v2848_v46  ;;  %v2929_v45 = vld [vmem:[%s4049_s1 + $0x680] ss:$16 sps:$4 sm:$0xff]   ;;  %v2932_v46 = vld [vmem:[%s4049_s1 + $0x688] ss:$16 sps:$4 sm:$0xff]  }
  0x9c   :  { %1769 = vmatprep.subr.bf16.mxu0 %v2853_v47  ;;  %1981 = vmatprep.subr.bf16.mxu1 %v2856_v48  ;;  %v2937_v47 = vld [vmem:[%s4049_s1 + $0x6a4] ss:$16 sps:$4 sm:$0xff]   ;;  %v2940_v48 = vld [vmem:[%s4049_s1 + $0x6ac] ss:$16 sps:$4 sm:$0xff]  }
  0x9f   :  { %1770 = vmatpush1.bf16.msra.mxu0 %v2851_v49  ;;  %1982 = vmatpush1.bf16.msra.mxu1 %v2854_v50  ;;  %v2935_v49 = vld [vmem:[%s4049_s1 + $0x6a0] ss:$16 sps:$4 sm:$0xff]   ;;  %v2938_v50 = vld [vmem:[%s4049_s1 + $0x6a8] ss:$16 sps:$4 sm:$0xff]  }
  0xa0   :  { %1771 = vmatprep.subr.bf16.mxu0 %v2859_v51  ;;  %1983 = vmatprep.subr.bf16.mxu1 %v2862_v52  ;;  %v2943_v51 = vld [vmem:[%s4049_s1 + $0x6c4] ss:$16 sps:$4 sm:$0xff]   ;;  %v2946_v52 = vld [vmem:[%s4049_s1 + $0x6cc] ss:$16 sps:$4 sm:$0xff]  }
  0xa3   :  { %1772 = vmatpush1.bf16.msra.mxu0 %v2857_v53  ;;  %1984 = vmatpush1.bf16.msra.mxu1 %v2860_v54  ;;  %v2941_v53 = vld [vmem:[%s4049_s1 + $0x6c0] ss:$16 sps:$4 sm:$0xff]   ;;  %v2944_v54 = vld [vmem:[%s4049_s1 + $0x6c8] ss:$16 sps:$4 sm:$0xff]  }
  0xa4   :  { %1773 = vmatprep.subr.bf16.mxu0 %v2865_v55  ;;  %1985 = vmatprep.subr.bf16.mxu1 %v2868_v56  ;;  %v2949_v55 = vld [vmem:[%s4049_s1 + $0x6e4] ss:$16 sps:$4 sm:$0xff]   ;;  %v2952_v56 = vld [vmem:[%s4049_s1 + $0x6ec] ss:$16 sps:$4 sm:$0xff]  }
  0xa7   :  { %1774 = vmatpush1.bf16.msra.mxu0 %v2863_v57  ;;  %1986 = vmatpush1.bf16.msra.mxu1 %v2866_v58  ;;  %v2947_v57 = vld [vmem:[%s4049_s1 + $0x6e0] ss:$16 sps:$4 sm:$0xff]   ;;  %v2950_v58 = vld [vmem:[%s4049_s1 + $0x6e8] ss:$16 sps:$4 sm:$0xff]  }
  0xa8   :  { %1775 = vmatprep.subr.bf16.mxu0 %v2871_v59  ;;  %1987 = vmatprep.subr.bf16.mxu1 %v2874_v60  ;;  %v2955_v59 = vld [vmem:[%s4049_s1 + $0x704] ss:$16 sps:$4 sm:$0xff]   ;;  %v2958_v60 = vld [vmem:[%s4049_s1 + $0x70c] ss:$16 sps:$4 sm:$0xff]  }
  0xab   :  { %1776 = vmatpush1.bf16.msra.mxu0 %v2869_v61  ;;  %1988 = vmatpush1.bf16.msra.mxu1 %v2872_v62  ;;  %v2953_v61 = vld [vmem:[%s4049_s1 + $0x700] ss:$16 sps:$4 sm:$0xff]   ;;  %v2956_v62 = vld [vmem:[%s4049_s1 + $0x708] ss:$16 sps:$4 sm:$0xff]  }
  0xac   :  { %1777 = vmatprep.subr.bf16.mxu0 %v2877_v63  ;;  %1989 = vmatprep.subr.bf16.mxu1 %v2880_v0  ;;  %v2961_v63 = vld [vmem:[%s4049_s1 + $0x724] ss:$16 sps:$4 sm:$0xff]   ;;  %v2964_v0 = vld [vmem:[%s4049_s1 + $0x72c] ss:$16 sps:$4 sm:$0xff]  }
  0xaf   :  { %1778 = vmatpush1.bf16.msra.mxu0 %v2875_v1  ;;  %1990 = vmatpush1.bf16.msra.mxu1 %v2878_v2  ;;  %v2959_v1 = vld [vmem:[%s4049_s1 + $0x720] ss:$16 sps:$4 sm:$0xff]   ;;  %v2962_v2 = vld [vmem:[%s4049_s1 + $0x728] ss:$16 sps:$4 sm:$0xff]  }
  0xb0   :  { %1779 = vmatprep.subr.bf16.mxu0 %v2883_v3  ;;  %1991 = vmatprep.subr.bf16.mxu1 %v2886_v4  ;;  %v2967_v3 = vld [vmem:[%s4049_s1 + $0x744] ss:$16 sps:$4 sm:$0xff]   ;;  %v2970_v4 = vld [vmem:[%s4049_s1 + $0x74c] ss:$16 sps:$4 sm:$0xff]  }
  0xb3   :  { %1780 = vmatpush1.bf16.msra.mxu0 %v2881_v5  ;;  %1992 = vmatpush1.bf16.msra.mxu1 %v2884_v6  ;;  %v2965_v5 = vld [vmem:[%s4049_s1 + $0x740] ss:$16 sps:$4 sm:$0xff]   ;;  %v2968_v6 = vld [vmem:[%s4049_s1 + $0x748] ss:$16 sps:$4 sm:$0xff]  }
  0xb4   :  { %1781 = vmatprep.subr.bf16.mxu0 %v2889_v7  ;;  %1993 = vmatprep.subr.bf16.mxu1 %v2892_v8  ;;  %v2973_v7 = vld [vmem:[%s4049_s1 + $0x764] ss:$16 sps:$4 sm:$0xff]   ;;  %v2976_v8 = vld [vmem:[%s4049_s1 + $0x76c] ss:$16 sps:$4 sm:$0xff]  }
  0xb7   :  { %1782 = vmatpush1.bf16.msra.mxu0 %v2887_v9  ;;  %1994 = vmatpush1.bf16.msra.mxu1 %v2890_v10  ;;  %v2971_v9 = vld [vmem:[%s4049_s1 + $0x760] ss:$16 sps:$4 sm:$0xff]   ;;  %v2974_v10 = vld [vmem:[%s4049_s1 + $0x768] ss:$16 sps:$4 sm:$0xff]  }
  0xb8   :  { %1783 = vmatprep.subr.bf16.mxu0 %v2895_v11  ;;  %1995 = vmatprep.subr.bf16.mxu1 %v2898_v12  ;;  %v2979_v11 = vld [vmem:[%s4049_s1 + $0x784] ss:$16 sps:$4 sm:$0xff]   ;;  %v2982_v12 = vld [vmem:[%s4049_s1 + $0x78c] ss:$16 sps:$4 sm:$0xff]  }
  0xbb   :  { %1784 = vmatpush1.bf16.msra.mxu0 %v2893_v13  ;;  %1996 = vmatpush1.bf16.msra.mxu1 %v2896_v14  ;;  %v2977_v13 = vld [vmem:[%s4049_s1 + $0x780] ss:$16 sps:$4 sm:$0xff]   ;;  %v2980_v14 = vld [vmem:[%s4049_s1 + $0x788] ss:$16 sps:$4 sm:$0xff]  }
  0xbc   :  { %1785 = vmatprep.subr.bf16.mxu0 %v2901_v15  ;;  %1997 = vmatprep.subr.bf16.mxu1 %v2904_v16  ;;  %v2985_v15 = vld [vmem:[%s4049_s1 + $0x7a4] ss:$16 sps:$4 sm:$0xff]   ;;  %v2988_v16 = vld [vmem:[%s4049_s1 + $0x7ac] ss:$16 sps:$4 sm:$0xff]  }
  0xbf   :  { %1786 = vmatpush1.bf16.msra.mxu0 %v2899_v17  ;;  %1998 = vmatpush1.bf16.msra.mxu1 %v2902_v18  ;;  %v2983_v17 = vld [vmem:[%s4049_s1 + $0x7a0] ss:$16 sps:$4 sm:$0xff]   ;;  %v2986_v18 = vld [vmem:[%s4049_s1 + $0x7a8] ss:$16 sps:$4 sm:$0xff]  }
  0xc0   :  { %1808 = vmatprep.subr.bf16.mxu0 %v2907_v19  ;;  %2020 = vmatprep.subr.bf16.mxu1 %v2910_v20  ;;  %v2991_v19 = vld [vmem:[%s4049_s1 + $0x7c4] ss:$16 sps:$4 sm:$0xff]   ;;  %v2994_v20 = vld [vmem:[%s4049_s1 + $0x7cc] ss:$16 sps:$4 sm:$0xff]  }
  0xc2   :  { %1788 = vmatmul.mubr.bf16.vlgmr.msra.gmra.mrb[0].mxu0 %v2298_v21  ;;  %2000 = vmatmul.mubr.bf16.vlgmr.msra.gmra.mrb[0].mxu1 %v2298_v21  ;;  %v2989_v21 = vld [vmem:[%s4049_s1 + $0x7c0] ss:$16 sps:$4 sm:$0xff]  }
  0xc3   :  { %1809 = vmatpush1.bf16.msra.mxu0 %v2905_v24  ;;  %2021 = vmatpush1.bf16.msra.mxu1 %v2908_v26  ;;  %v3000_v24 = vld [vmem:[%s4049_s1 + $0x7ec] ss:$16 sps:$4 sm:$0xff]   ;;  %v2995_v26 = vld [vmem:[%s4049_s1 + $0x7e0] ss:$16 sps:$4 sm:$0xff]  }
  0xc4   :  { %1810 = vmatprep.subr.bf16.mxu0 %v2913_v25  ;;  %2022 = vmatprep.subr.bf16.mxu1 %v2916_v27  ;;  %v2998_v25 = vld [vmem:[%s4049_s1 + $0x7e8] ss:$16 sps:$4 sm:$0xff]  }
  0xc5   :  { %1797 = vmatprep.mubr.bf16.mxu0 %v2307_v28  ;;  %2009 = vmatprep.mubr.bf16.mxu1 %v2307_v28  ;;  %v28_v27 = vld [vmem:[%s4050_s0 + $0x58] sm:$0xff] }
  0xc6   :  { %v32_v28 = vld [vmem:[%s4050_s0 + $0x78] sm:$0xff] }
  0xc7   :  { %1811 = vmatpush1.bf16.msra.mxu0 %v2911_v29  ;;  %2023 = vmatpush1.bf16.msra.mxu1 %v2914_v30  ;;  %v2300_v29 = vcombine.low %v3696_v34, %v3701_v35  ;;  %v2309_v30 = vcombine.high %v28_v27, %v32_v28 }
  0xc8   :  { %1812 = vmatprep.subr.bf16.mxu0 %v2919_v31  ;;  %2024 = vmatprep.subr.bf16.mxu1 %v2922_v32  ;;  %v2308_v31 = vcombine.low %v28_v27, %v32_v28 }
  0xca   :  { %1798 = vmatmul.mubr.bf16.gmra.mrb[4].mxu0 %v2306_v33  ;;  %2010 = vmatmul.mubr.bf16.gmra.mrb[4].mxu1 %v2306_v33 }
  0xcb   :  { %1813 = vmatpush1.bf16.msra.mxu0 %v2917_v36  ;;  %2025 = vmatpush1.bf16.msra.mxu1 %v2920_v37 }
  0xcc   :  { %1814 = vmatprep.subr.bf16.mxu0 %v2925_v38  ;;  %2026 = vmatprep.subr.bf16.mxu1 %v2928_v39 }
  0xcd   :  { %1840 = vmatprep.mubr.bf16.mxu0 %v2301_v40  ;;  %2052 = vmatprep.mubr.bf16.mxu1 %v2301_v40 }
  0xcf   :  { %1815 = vmatpush1.bf16.msra.mxu0 %v2923_v41  ;;  %2027 = vmatpush1.bf16.msra.mxu1 %v2926_v42 }
  0xd0   :  { %1816 = vmatprep.subr.bf16.mxu0 %v2931_v43  ;;  %2028 = vmatprep.subr.bf16.mxu1 %v2934_v44 }
  0xd3   :  { %1817 = vmatpush1.bf16.msra.mxu0 %v2929_v45  ;;  %2029 = vmatpush1.bf16.msra.mxu1 %v2932_v46 }
  0xd4   :  { %1818 = vmatprep.subr.bf16.mxu0 %v2937_v47  ;;  %2030 = vmatprep.subr.bf16.mxu1 %v2940_v48 }
  0xd7   :  { %1819 = vmatpush1.bf16.msra.mxu0 %v2935_v49  ;;  %2031 = vmatpush1.bf16.msra.mxu1 %v2938_v50 }
  0xd8   :  { %1820 = vmatprep.subr.bf16.mxu0 %v2943_v51  ;;  %2032 = vmatprep.subr.bf16.mxu1 %v2946_v52 }
  0xdb   :  { %1821 = vmatpush1.bf16.msra.mxu0 %v2941_v53  ;;  %2033 = vmatpush1.bf16.msra.mxu1 %v2944_v54 }
  0xdc   :  { %1822 = vmatprep.subr.bf16.mxu0 %v2949_v55  ;;  %2034 = vmatprep.subr.bf16.mxu1 %v2952_v56 }
  0xdf   :  { %1823 = vmatpush1.bf16.msra.mxu0 %v2947_v57  ;;  %2035 = vmatpush1.bf16.msra.mxu1 %v2950_v58 }
  0xe0   :  { %1824 = vmatprep.subr.bf16.mxu0 %v2955_v59  ;;  %2036 = vmatprep.subr.bf16.mxu1 %v2958_v60  ;;  %v3009_v60 = vmov 0  }
  0xe1   :  { %2616 = vset.pattern.permute.xlu1 %v3009_v60  ;;  %2615 = vset.pattern.permute.xlu0 %v3009_v60 }
  0xe3   :  { %1825 = vmatpush1.bf16.msra.mxu0 %v2953_v61  ;;  %2037 = vmatpush1.bf16.msra.mxu1 %v2956_v62 }
  0xe4   :  { %1826 = vmatprep.subr.bf16.mxu0 %v2961_v63  ;;  %2038 = vmatprep.subr.bf16.mxu1 %v2964_v0 }
  0xe7   :  { %1827 = vmatpush1.bf16.msra.mxu0 %v2959_v1  ;;  %2039 = vmatpush1.bf16.msra.mxu1 %v2962_v2 }
  0xe8   :  { %1828 = vmatprep.subr.bf16.mxu0 %v2967_v3  ;;  %2040 = vmatprep.subr.bf16.mxu1 %v2970_v4 }
  0xeb   :  { %1829 = vmatpush1.bf16.msra.mxu0 %v2965_v5  ;;  %2041 = vmatpush1.bf16.msra.mxu1 %v2968_v6 }
  0xec   :  { %1830 = vmatprep.subr.bf16.mxu0 %v2973_v7  ;;  %2042 = vmatprep.subr.bf16.mxu1 %v2976_v8 }
  0xef   :  { %1831 = vmatpush1.bf16.msra.mxu0 %v2971_v9  ;;  %2043 = vmatpush1.bf16.msra.mxu1 %v2974_v10 }
  0xf0   :  { %1832 = vmatprep.subr.bf16.mxu0 %v2979_v11  ;;  %2044 = vmatprep.subr.bf16.mxu1 %v2982_v12 }
  0xf3   :  { %1833 = vmatpush1.bf16.msra.mxu0 %v2977_v13  ;;  %2045 = vmatpush1.bf16.msra.mxu1 %v2980_v14 }
  0xf4   :  { %1834 = vmatprep.subr.bf16.mxu0 %v2985_v15  ;;  %2046 = vmatprep.subr.bf16.mxu1 %v2988_v16 }
  0xf7   :  { %1835 = vmatpush1.bf16.msra.mxu0 %v2983_v17  ;;  %2047 = vmatpush1.bf16.msra.mxu1 %v2986_v18 }
  0xf8   :  { %1836 = vmatprep.subr.bf16.mxu0 %v2991_v19  ;;  %2048 = vmatprep.subr.bf16.mxu1 %v2994_v20 }
  0xfb   :  { %1837 = vmatpush1.bf16.msra.mxu0 %v2989_v21  ;;  %2049 = vmatpush1.bf16.msra.mxu1 %v2992_v22 }
  0xfc   :  { %1838 = vmatprep.subr.bf16.mxu0 %v2997_v23  ;;  %2050 = vmatprep.subr.bf16.mxu1 %v3000_v24 }
  0xff   :  { %1839 = vmatpush1.bf16.msra.mxu0 %v2995_v26  ;;  %2051 = vmatpush1.bf16.msra.mxu1 %v2998_v25 }
 0x102   :  { %1841 = vmatmul.mubr.bf16.vlgmr.msra.gmra.mrb[0].mxu0 %v2300_v29  ;;  %2053 = vmatmul.mubr.bf16.vlgmr.msra.gmra.mrb[0].mxu1 %v2300_v29 }
 0x103   :  { %1850 = vmatprep.mubr.bf16.mxu0 %v2309_v30  ;;  %2062 = vmatprep.mubr.bf16.mxu1 %v2309_v30 }
 0x10a   :  { %1851 = vmatmul.mubr.bf16.gmra.mrb[4].mxu0 %v2308_v31  ;;  %2063 = vmatmul.mubr.bf16.gmra.mrb[4].mxu1 %v2308_v31 }
 0x1d5   :  { %v1842_v32 = vpop.f32.mrb[0].mxu0  ;;  %v2054_v33 = vpop.f32.mrb[0].mxu1 }
 0x1d6   :  { %v1844_v36 = vpop.f32.mrb[1].mxu0  ;;  %v2056_v37 = vpop.f32.mrb[1].mxu1 }
 0x1d7   :  { %v2073_v38 = vadd.f32 %v1844_v36, %v1842_v32  ;;  %v1846_v39 = vpop.f32.mrb[2].mxu0  ;;  %v2058_v40 = vpop.f32.mrb[2].mxu1 }
 0x1d8   :  { %v1848_v41 = vpop.f32.mrb[3].mxu0  ;;  %v2060_v42 = vpop.f32.mrb[3].mxu1 }
 0x1d9   :  { %v2078_v34 = vadd.f32 %v1848_v41, %v1846_v39  ;;  %v2074_v35 = vadd.f32 %v2073_v38, %v2054_v33  ;;  %v2179_v38 = vld [vmem:[%s4051_s2 + $0x8] sm:$0xff] }
 0x1db   :  { %v2075_v43 = vadd.f32 %v2074_v35, %v2056_v37  ;;  %v2079_v44 = vadd.f32 %v2078_v34, %v2058_v40  ;;  %v2219_v34 = vld [vmem:[%s4052_s3 + $0x8] sm:$0xff]  ;;  %v2220_v35 = vld [vmem:[%s4052_s3 + $0x10] sm:$0xff] }
 0x1dd   :  { %v2064_v45 = vpop.f32.mrb[4].mxu1  ;;  %2076 = vadd.xlane.f32.xlu0 %v2075_v43  ;;  %v1852_v46 = vpop.f32.mrb[4].mxu0  ;;  %v2080_v47 = vadd.f32 %v2079_v44, %v2060_v42 }
 0x1de   :  { %v1854_v48 = vpop.f32.mrb[5].mxu0  ;;  %v2066_v49 = vpop.f32.mrb[5].mxu1 }
 0x1df   :  { %v2083_v50 = vadd.f32 %v1854_v48, %v1852_v46  ;;  %v3875_v51 = vpop.f32.mrb[6].mxu0  ;;  %v3877_v52 = vpop.f32.mrb[6].mxu1 }
 0x1e0   :  { %v3879_v53 = vpop.f32.mrb[7].mxu0  ;;  %v3881_v54 = vpop.f32.mrb[7].mxu1 }
 0x1e1   :  { %v2088_v55 = vadd.f32 %v3879_v53, %v3875_v51  ;;  %2081 = vadd.xlane.f32.xlu0 %v2080_v47  ;;  %v2084_v56 = vadd.f32 %v2083_v50, %v2064_v45 }
 0x1e3   :  { %v2089_v57 = vadd.f32 %v2088_v55, %v3877_v52  ;;  %v2085_v58 = vadd.f32 %v2084_v56, %v2066_v49 }
 0x1e5   :  { %v2090_v59 = vadd.f32 %v2089_v57, %v3881_v54  ;;  %2086 = vadd.xlane.f32.xlu1 %v2085_v58  ;;  %v2221_v58 = vld [vmem:[%s4052_s3 + $0x18] sm:$0xff] }
 0x1e9   :  { %2091 = vadd.xlane.f32.xlu1 %v2090_v59 }
 0x26a   :  { %v2077_v61 = vpop.xlane.xlu0 %2076 }
 0x26b   :  { %v2094_v62 = vmul.f32 0.001953125, %v2077_v61 }
 0x26d   :  { %v3887_v63 = vsub.f32 %v1842_v32, %v2094_v62  ;;  %v3889_v0 = vsub.f32 %v1844_v36, %v2094_v62  ;;  %v3891_v1 = vsub.f32 %v2054_v33, %v2094_v62  ;;  %v3893_v3 = vsub.f32 %v2056_v37, %v2094_v62 }
 0x26e   :  { %v2082_v2 = vpop.xlane.xlu0 %2081 }
 0x26f   :  { %v2095_v4 = vmul.f32 0.001953125, %v2082_v2  ;;  %v2114_v5 = vmul.f32 %v3887_v63, %v3887_v63  ;;  %v2115_v6 = vmul.f32 %v3889_v0, %v3889_v0  ;;  %v2116_v7 = vmul.f32 %v3891_v1, %v3891_v1 }
 0x270   :  { %v2117_v13 = vmul.f32 %v3893_v3, %v3893_v3 }
 0x271   :  { %v3901_v8 = vsub.f32 %v1846_v39, %v2095_v4  ;;  %v3903_v9 = vsub.f32 %v1848_v41, %v2095_v4  ;;  %v2130_v10 = vadd.f32 %v2115_v6, %v2114_v5  ;;  %v3905_v11 = vsub.f32 %v2058_v40, %v2095_v4  ;;  %v2180_v39 = vld [vmem:[%s4051_s2 + $0x10] sm:$0xff]  ;;  %v2181_v40 = vld [vmem:[%s4051_s2 + $0x18] sm:$0xff]  ;;  %v2178_v41 = vld [vmem:[%s4051_s2] sm:$0xff] }
 0x272   :  { %v2087_v12 = vpop.xlane.xlu1 %2086  ;;  %v3909_v14 = vsub.f32 %v2060_v42, %v2095_v4  ;;  %v2218_v42 = vld [vmem:[%s4052_s3] sm:$0xff] }
 0x273   :  { %v2096_v15 = vmul.f32 0.001953125, %v2087_v12  ;;  %v2131_v16 = vadd.f32 %v2130_v10, %v2116_v7  ;;  %v2118_v17 = vmul.f32 %v3901_v8, %v3901_v8  ;;  %v2119_v18 = vmul.f32 %v3903_v9, %v3903_v9 }
 0x274   :  { %v2120_v19 = vmul.f32 %v3905_v11, %v3905_v11  ;;  %v2121_v24 = vmul.f32 %v3909_v14, %v3909_v14 }
 0x275   :  { %v3917_v20 = vsub.f32 %v1852_v46, %v2096_v15  ;;  %v3919_v21 = vsub.f32 %v1854_v48, %v2096_v15  ;;  %v2132_v22 = vadd.f32 %v2131_v16, %v2117_v13  ;;  %v2135_v23 = vadd.f32 %v2119_v18, %v2118_v17 }
 0x276   :  { %v3923_v26 = vsub.f32 %v2064_v45, %v2096_v15  ;;  %v3925_v27 = vsub.f32 %v2066_v49, %v2096_v15  ;;  %v2092_v43 = vpop.xlane.xlu1 %2091 }
 0x277   :  { %2133 = vadd.xlane.f32.xlu0 %v2132_v22  ;;  %v2136_v25 = vadd.f32 %v2135_v23, %v2120_v19  ;;  %v2122_v28 = vmul.f32 %v3917_v20, %v3917_v20  ;;  %v2123_v29 = vmul.f32 %v3919_v21, %v3919_v21  ;;  %v2097_v44 = vmul.f32 0.001953125, %v2092_v43 }
 0x278   :  { %v2124_v31 = vmul.f32 %v3923_v26, %v3923_v26  ;;  %v2125_v33 = vmul.f32 %v3925_v27, %v3925_v27 }
 0x279   :  { %v2137_v30 = vadd.f32 %v2136_v25, %v2121_v24  ;;  %v2140_v32 = vadd.f32 %v2123_v29, %v2122_v28  ;;  %v3957_v45 = vsub.f32 %v3875_v51, %v2097_v44  ;;  %v3960_v46 = vsub.f32 %v3879_v53, %v2097_v44 }
 0x27a   :  { %v3967_v49 = vsub.f32 %v3877_v52, %v2097_v44  ;;  %v3970_v55 = vsub.f32 %v3881_v54, %v2097_v44 }
 0x27b   :  { %2138 = vadd.xlane.f32.xlu1 %v2137_v30  ;;  %v2141_v36 = vadd.f32 %v2140_v32, %v2124_v31  ;;  %v2126_v47 = vmul.f32 %v3957_v45, %v3957_v45  ;;  %v2127_v48 = vmul.f32 %v3960_v46, %v3960_v46 }
 0x27c   :  { %v2128_v51 = vmul.f32 %v3967_v49, %v3967_v49  ;;  %v2129_v53 = vmul.f32 %v3970_v55, %v3970_v55 }
 0x27d   :  { %v2142_v37 = vadd.f32 %v2141_v36, %v2125_v33  ;;  %v2145_v50 = vadd.f32 %v2127_v48, %v2126_v47 }
 0x27f   :  { %2143 = vadd.xlane.f32.xlu0 %v2142_v37  ;;  %v2146_v56 = vadd.f32 %v2145_v50, %v2128_v51 }
 0x281   :  { %v2147_v57 = vadd.f32 %v2146_v56, %v2129_v53 }
 0x28c   :  { %2189 = vperm.xlu1 %2616, %v2179_v38  }
 0x290   :  { %2194 = vperm.xlu1 %2616, %v2180_v39  }
 0x294   :  { %2199 = vperm.xlu1 %2616, %v2181_v40  }
 0x295   :  { %2184 = vperm.xlu0 %2615, %v2178_v41  }
 0x298   :  { %2224 = vperm.xlu1 %2616, %v2218_v42  }
 0x29c   :  { %2229 = vperm.xlu1 %2616, %v2219_v34  }
 0x2a0   :  { %2234 = vperm.xlu1 %2616, %v2220_v35  }
 0x2c4   :  { %2148 = vadd.xlane.f32.xlu1 %v2147_v57 }
 0x2d5   :  { %2239 = vperm.xlu1 %2616, %v2221_v58  }
 0x304   :  { %v2134_v52 = vpop.xlane.xlu0 %2133 }
 0x305   :  { %v2150_v59 = vmul.f32 0.001953125, %v2134_v52 }
 0x307   :  { %v2154_v60 = vadd.f32 1e-05, %v2150_v59 }
 0x308   :  { %v2139_v61 = vpop.xlane.xlu1 %2138 }
 0x309   :  { %3001 = vrsqrt.f32 %v2154_v60  ;;  %v2151_v54 = vmul.f32 0.001953125, %v2139_v61 }
 0x30b   :  { %v2155_v62 = vadd.f32 1e-05, %v2151_v54 }
 0x30c   :  { %v2144_v2 = vpop.xlane.xlu0 %2143  ;;  %v2190_v4 = vpop.permute.xlu1 %2189 }
 0x30d   :  { %3003 = vrsqrt.f32 %v2155_v62  ;;  %v2152_v5 = vmul.f32 0.001953125, %v2144_v2 }
 0x30f   :  { %v2156_v6 = vadd.f32 1e-05, %v2152_v5 }
 0x310   :  { %v2195_v7 = vpop.permute.xlu1 %2194 }
 0x311   :  { %3005 = vrsqrt.f32 %v2156_v6 }
 0x313   :  { %v3002_v10 = vpop.eup %3001 }
 0x314   :  { %v3979_v12 = vpop.permute.xlu1 %2199  ;;  %v2162_v13 = vmul.f32 %v3002_v10, %v3887_v63  ;;  %v2163_v15 = vmul.f32 %v3002_v10, %v3889_v0  ;;  %v2164_v16 = vmul.f32 %v3002_v10, %v3891_v1  ;;  %v2165_v17 = vmul.f32 %v3002_v10, %v3893_v3  ;;  %v2185_v18 = vpop.permute.xlu0 %2184 }
 0x316   :  { %v2202_v19 = vmul.f32 %v2185_v18, %v2162_v13  ;;  %v2203_v22 = vmul.f32 %v2185_v18, %v2163_v15  ;;  %v2204_v23 = vmul.f32 %v2185_v18, %v2164_v16  ;;  %v2205_v24 = vmul.f32 %v2185_v18, %v2165_v17 }
 0x317   :  { %v3004_v25 = vpop.eup %3003 }
 0x318   :  { %v2166_v28 = vmul.f32 %v3004_v25, %v3901_v8  ;;  %v2167_v29 = vmul.f32 %v3004_v25, %v3903_v9  ;;  %v2168_v30 = vmul.f32 %v3004_v25, %v3905_v11  ;;  %v2169_v63 = vmul.f32 %v3004_v25, %v3909_v14  ;;  %v2225_v31 = vpop.permute.xlu1 %2224 }
 0x319   :  { %v2242_v0 = vadd.f32 %v2225_v31, %v2202_v19  ;;  %v2243_v32 = vadd.f32 %v2225_v31, %v2203_v22  ;;  %v2244_v1 = vadd.f32 %v2225_v31, %v2204_v23  ;;  %v2245_v33 = vadd.f32 %v2225_v31, %v2205_v24 }
 0x31a   :  { %v2206_v3 = vmul.f32 %v2190_v4, %v2166_v28  ;;  %v2207_v36 = vmul.f32 %v2190_v4, %v2167_v29  ;;  %v2208_v37 = vmul.f32 %v2190_v4, %v2168_v30  ;;  %v2209_v38 = vmul.f32 %v2190_v4, %v2169_v63 }
 0x31b   :  { %v3006_v39 = vpop.eup %3005  ;;  %v2258_v40 = vmax.f32 %v2242_v0, 0.0  ;;  %v2259_v41 = vmax.f32 %v2243_v32, 0.0  ;;  %v2260_v42 = vmax.f32 %v2244_v1, 0.0  ;;  %v2261_v8 = vmax.f32 %v2245_v33, 0.0 }
 0x31c   :  { %v2170_v9 = vmul.f32 %v3006_v39, %v3917_v20  ;;  %v2171_v11 = vmul.f32 %v3006_v39, %v3919_v21  ;;  %v2172_v14 = vmul.f32 %v3006_v39, %v3923_v26  ;;  %v2173_v34 = vmul.f32 %v3006_v39, %v3925_v27  ;;  %v2230_v35 = vpop.permute.xlu1 %2229 }
 0x31d   :  { %2274 = vst [vmem:[%s4053_s4] sm:$0xff] %v2258_v40  ;;  %2275 = vst [vmem:[%s4053_s4 + $0x8] sm:$0xff] %v2259_v41  ;;  %v2246_v20 = vadd.f32 %v2230_v35, %v2206_v3  ;;  %v2247_v21 = vadd.f32 %v2230_v35, %v2207_v36  ;;  %v2248_v26 = vadd.f32 %v2230_v35, %v2208_v37 }
 0x31e   :  { %2276 = vst [vmem:[%s4053_s4 + $0x10] sm:$0xff] %v2260_v42  ;;  %2277 = vst [vmem:[%s4053_s4 + $0x18] sm:$0xff] %v2261_v8  ;;  %v2249_v27 = vadd.f32 %v2230_v35, %v2209_v38  ;;  %v2210_v43 = vmul.f32 %v2195_v7, %v2170_v9  ;;  %v2211_v44 = vmul.f32 %v2195_v7, %v2171_v11 }
 0x31f   :  { %v2212_v47 = vmul.f32 %v2195_v7, %v2172_v14  ;;  %v2213_v48 = vmul.f32 %v2195_v7, %v2173_v34  ;;  %v2262_v50 = vmax.f32 %v2246_v20, 0.0  ;;  %v2263_v51 = vmax.f32 %v2247_v21, 0.0 }
 0x320   :  { %v2264_v56 = vmax.f32 %v2248_v26, 0.0  ;;  %v2265_v53 = vmax.f32 %v2249_v27, 0.0  ;;  %v2235_v57 = vpop.permute.xlu1 %2234 }
 0x321   :  { %2278 = vst [vmem:[%s4053_s4 + $0x20] sm:$0xff] %v2262_v50  ;;  %2279 = vst [vmem:[%s4053_s4 + $0x28] sm:$0xff] %v2263_v51  ;;  %v2250_v58 = vadd.f32 %v2235_v57, %v2210_v43  ;;  %v2251_v52 = vadd.f32 %v2235_v57, %v2211_v44  ;;  %v2252_v59 = vadd.f32 %v2235_v57, %v2212_v47 }
 0x322   :  { %2280 = vst [vmem:[%s4053_s4 + $0x30] sm:$0xff] %v2264_v56  ;;  %2281 = vst [vmem:[%s4053_s4 + $0x38] sm:$0xff] %v2265_v53  ;;  %v2253_v60 = vadd.f32 %v2235_v57, %v2213_v48 }
 0x323   :  { %v2266_v61 = vmax.f32 %v2250_v58, 0.0  ;;  %v2267_v54 = vmax.f32 %v2251_v52, 0.0  ;;  %v2268_v62 = vmax.f32 %v2252_v59, 0.0 }
 0x324   :  { %v2269_v2 = vmax.f32 %v2253_v60, 0.0 }
 0x325   :  { %2282 = vst [vmem:[%s4053_s4 + $0x40] sm:$0xff] %v2266_v61  ;;  %2283 = vst [vmem:[%s4053_s4 + $0x48] sm:$0xff] %v2267_v54 }
 0x326   :  { %2284 = vst [vmem:[%s4053_s4 + $0x50] sm:$0xff] %v2268_v62  ;;  %2285 = vst [vmem:[%s4053_s4 + $0x58] sm:$0xff] %v2269_v2 }
 0x351   :  { %v2149_v4 = vpop.xlane.xlu1 %2148 }
 0x352   :  { %v2153_v5 = vmul.f32 0.001953125, %v2149_v4 }
 0x354   :  { %v2157_v6 = vadd.f32 1e-05, %v2153_v5 }
 0x355   :  { %v2240_v23 = vpop.permute.xlu1 %2239 }
 0x356   :  { %3007 = vrsqrt.f32 %v2157_v6 }
 0x360   :  { %v3008_v7 = vpop.eup %3007 }
 0x361   :  { %v2174_v10 = vmul.f32 %v3008_v7, %v3957_v45  ;;  %v2175_v13 = vmul.f32 %v3008_v7, %v3960_v46  ;;  %v2176_v15 = vmul.f32 %v3008_v7, %v3967_v49  ;;  %v2177_v16 = vmul.f32 %v3008_v7, %v3970_v55 }
 0x363   :  { %v2214_v17 = vmul.f32 %v3979_v12, %v2174_v10  ;;  %v2215_v18 = vmul.f32 %v3979_v12, %v2175_v13  ;;  %v2216_v19 = vmul.f32 %v3979_v12, %v2176_v15  ;;  %v2217_v22 = vmul.f32 %v3979_v12, %v2177_v16 }
 0x365   :  { %v2254_v24 = vadd.f32 %v2240_v23, %v2214_v17  ;;  %v2255_v25 = vadd.f32 %v2240_v23, %v2215_v18  ;;  %v2256_v28 = vadd.f32 %v2240_v23, %v2216_v19  ;;  %v2257_v29 = vadd.f32 %v2240_v23, %v2217_v22 }
 0x367   :  { %v2270_v45 = vmax.f32 %v2254_v24, 0.0  ;;  %v2271_v30 = vmax.f32 %v2255_v25, 0.0  ;;  %v2272_v46 = vmax.f32 %v2256_v28, 0.0  ;;  %v2273_v63 = vmax.f32 %v2257_v29, 0.0 }
 0x369   :  { %2286 = vst [vmem:[%s4053_s4 + $0x60] sm:$0xff] %v2270_v45  ;;  %2287 = vst [vmem:[%s4053_s4 + $0x68] sm:$0xff] %v2271_v30 }
 0x36a   :  { %2288 = vst [vmem:[%s4053_s4 + $0x70] sm:$0xff] %v2272_v46  ;;  %2289 = vst [vmem:[%s4053_s4 + $0x78] sm:$0xff] %v2273_v63 }

// kernel: generator_forward.8
= control target key start
LH: loop header
LB: loop body
LE: loop exit
PB: predicated region body
PF: predicated region fallthrough
CT: control target
= control target key end

     0   :  { %s6852_s1 = inlined_call_operand.vmem [shape: bf16[512,2048], index: 1, kind: input, shape index: {}]   ;;  %s6853_s0 = inlined_call_operand.vmem [shape: bf16[16,512], index: 0, kind: input, shape index: {}]   ;;  %s6854_s2 = inlined_call_operand.vmem [shape: f32[16,1], index: 2, kind: input, shape index: {}]   ;;  %s6855_s3 = inlined_call_operand.vmem [shape: f32[16,1], index: 3, kind: input, shape index: {}]   ;;  %s6856_s4 = inlined_call_operand.vmem [shape: f32[16,2048], index: 4, kind: output, shape index: {}]  }
   0x1   :  { %v21_v0 = vld [vmem:[%s6852_s1] sm:$0xff]  ;;  %v22_v2 = vld [vmem:[%s6852_s1 + $0x8] sm:$0xff] }
   0x2   :  { %v29_v1 = vld [vmem:[%s6852_s1 + $0x40] sm:$0xff]  ;;  %v30_v4 = vld [vmem:[%s6852_s1 + $0x48] sm:$0xff] }
   0x3   :  { %v4135_v3 = vcombine.high %v21_v0, %v29_v1  ;;  %v4134_v5 = vcombine.low %v21_v0, %v29_v1  ;;  %v37_v6 = vld [vmem:[%s6852_s1 + $0x80] sm:$0xff]  ;;  %v4137_v8 = vcombine.high %v22_v2, %v30_v4  ;;  %v4136_v9 = vcombine.low %v22_v2, %v30_v4  ;;  %v38_v11 = vld [vmem:[%s6852_s1 + $0x88] sm:$0xff] }
   0x4   :  { %v45_v7 = vld [vmem:[%s6852_s1 + $0xc0] sm:$0xff]  ;;  %v46_v12 = vld [vmem:[%s6852_s1 + $0xc8] sm:$0xff] }
   0x5   :  { %v4151_v10 = vcombine.high %v37_v6, %v45_v7  ;;  %v53_v13 = vld [vmem:[%s6852_s1 + $0x100] sm:$0xff]  ;;  %3113 = vmatprep.subr.bf16.mxu0 %v4135_v3  ;;  %v4153_v14 = vcombine.high %v38_v11, %v46_v12  ;;  %v54_v16 = vld [vmem:[%s6852_s1 + $0x108] sm:$0xff]  ;;  %3199 = vmatprep.subr.bf16.mxu1 %v4137_v8  ;;  %v4150_v18 = vcombine.low %v37_v6, %v45_v7 }
   0x6   :  { %v61_v15 = vld [vmem:[%s6852_s1 + $0x140] sm:$0xff]  ;;  %v62_v17 = vld [vmem:[%s6852_s1 + $0x148] sm:$0xff]  ;;  %3114 = vmatpush1.bf16.msra.mxu0 %v4134_v5  ;;  %3200 = vmatpush1.bf16.msra.mxu1 %v4136_v9  ;;  %v4152_v19 = vcombine.low %v38_v11, %v46_v12 }
   0x7   :  { %3115 = vmatprep.subr.bf16.mxu0 %v4151_v10  ;;  %v4167_v20 = vcombine.high %v53_v13, %v61_v15  ;;  %3201 = vmatprep.subr.bf16.mxu1 %v4153_v14  ;;  %v4169_v21 = vcombine.high %v54_v16, %v62_v17  ;;  %v69_v22 = vld [vmem:[%s6852_s1 + $0x180] sm:$0xff]  ;;  %v70_v24 = vld [vmem:[%s6852_s1 + $0x188] sm:$0xff]  ;;  %v4166_v26 = vcombine.low %v53_v13, %v61_v15 }
   0x8   :  { %v77_v23 = vld [vmem:[%s6852_s1 + $0x1c0] sm:$0xff]  ;;  %v78_v25 = vld [vmem:[%s6852_s1 + $0x1c8] sm:$0xff]  ;;  %v4168_v27 = vcombine.low %v54_v16, %v62_v17 }
   0x9   :  { %v4183_v28 = vcombine.high %v69_v22, %v77_v23  ;;  %v4185_v29 = vcombine.high %v70_v24, %v78_v25  ;;  %v85_v30 = vld [vmem:[%s6852_s1 + $0x200] sm:$0xff]  ;;  %v86_v32 = vld [vmem:[%s6852_s1 + $0x208] sm:$0xff]  ;;  %v4182_v34 = vcombine.low %v69_v22, %v77_v23  ;;  %v4184_v35 = vcombine.low %v70_v24, %v78_v25 }
   0xa   :  { %3116 = vmatpush1.bf16.msra.mxu0 %v4150_v18  ;;  %3202 = vmatpush1.bf16.msra.mxu1 %v4152_v19  ;;  %v93_v31 = vld [vmem:[%s6852_s1 + $0x240] sm:$0xff]  ;;  %v94_v33 = vld [vmem:[%s6852_s1 + $0x248] sm:$0xff] }
   0xb   :  { %3117 = vmatprep.subr.bf16.mxu0 %v4167_v20  ;;  %3203 = vmatprep.subr.bf16.mxu1 %v4169_v21  ;;  %v4199_v36 = vcombine.high %v85_v30, %v93_v31  ;;  %v4201_v37 = vcombine.high %v86_v32, %v94_v33  ;;  %v101_v38 = vld [vmem:[%s6852_s1 + $0x280] sm:$0xff]  ;;  %v102_v40 = vld [vmem:[%s6852_s1 + $0x288] sm:$0xff]  ;;  %v4198_v42 = vcombine.low %v85_v30, %v93_v31 }
   0xc   :  { %v109_v39 = vld [vmem:[%s6852_s1 + $0x2c0] sm:$0xff]  ;;  %v110_v41 = vld [vmem:[%s6852_s1 + $0x2c8] sm:$0xff]  ;;  %v4200_v43 = vcombine.low %v86_v32, %v94_v33 }
   0xd   :  { %v4215_v44 = vcombine.high %v101_v38, %v109_v39  ;;  %v4217_v45 = vcombine.high %v102_v40, %v110_v41  ;;  %v117_v46 = vld [vmem:[%s6852_s1 + $0x300] sm:$0xff]  ;;  %v118_v48 = vld [vmem:[%s6852_s1 + $0x308] sm:$0xff]  ;;  %v4214_v50 = vcombine.low %v101_v38, %v109_v39  ;;  %v4216_v51 = vcombine.low %v102_v40, %v110_v41 }
   0xe   :  { %3118 = vmatpush1.bf16.msra.mxu0 %v4166_v26  ;;  %3204 = vmatpush1.bf16.msra.mxu1 %v4168_v27  ;;  %v125_v47 = vld [vmem:[%s6852_s1 + $0x340] sm:$0xff]  ;;  %v126_v49 = vld [vmem:[%s6852_s1 + $0x348] sm:$0xff] }
   0xf   :  { %3119 = vmatprep.subr.bf16.mxu0 %v4183_v28  ;;  %3205 = vmatprep.subr.bf16.mxu1 %v4185_v29  ;;  %v4231_v52 = vcombine.high %v117_v46, %v125_v47  ;;  %v4233_v53 = vcombine.high %v118_v48, %v126_v49  ;;  %v133_v54 = vld [vmem:[%s6852_s1 + $0x380] sm:$0xff]  ;;  %v134_v57 = vld [vmem:[%s6852_s1 + $0x388] sm:$0xff]  ;;  %v4230_v59 = vcombine.low %v117_v46, %v125_v47 }
  0x10   :  { %v141_v55 = vld [vmem:[%s6852_s1 + $0x3c0] sm:$0xff]  ;;  %v142_v58 = vld [vmem:[%s6852_s1 + $0x3c8] sm:$0xff]  ;;  %v4232_v60 = vcombine.low %v118_v48, %v126_v49 }
  0x11   :  { %v4814_v56 = vld [vmem:[%s6853_s0 + $0x4] ss:$16 sps:$4 sm:$0xff]   ;;  %v4247_v61 = vcombine.high %v133_v54, %v141_v55  ;;  %v4249_v62 = vcombine.high %v134_v57, %v142_v58  ;;  %v150_v1 = vld [vmem:[%s6852_s1 + $0x408] sm:$0xff]  ;;  %v4246_v3 = vcombine.low %v133_v54, %v141_v55  ;;  %v4248_v4 = vcombine.low %v134_v57, %v142_v58 }
  0x12   :  { %3120 = vmatpush1.bf16.msra.mxu0 %v4182_v34  ;;  %3206 = vmatpush1.bf16.msra.mxu1 %v4184_v35  ;;  %v149_v63 = vld [vmem:[%s6852_s1 + $0x400] sm:$0xff]  ;;  %v158_v2 = vld [vmem:[%s6852_s1 + $0x448] sm:$0xff] }
  0x13   :  { %3121 = vmatprep.subr.bf16.mxu0 %v4199_v36  ;;  %3207 = vmatprep.subr.bf16.mxu1 %v4201_v37  ;;  %v157_v0 = vld [vmem:[%s6852_s1 + $0x440] sm:$0xff]  ;;  %v4265_v6 = vcombine.high %v150_v1, %v158_v2  ;;  %v166_v9 = vld [vmem:[%s6852_s1 + $0x488] sm:$0xff]  ;;  %v4264_v12 = vcombine.low %v150_v1, %v158_v2 }
  0x14   :  { %3145 = vmatprep.mubr.bf16.mxu0 %v4814_v56  ;;  %3231 = vmatprep.mubr.bf16.mxu1 %v4814_v56  ;;  %v4263_v5 = vcombine.high %v149_v63, %v157_v0  ;;  %v165_v7 = vld [vmem:[%s6852_s1 + $0x480] sm:$0xff]  ;;  %v174_v10 = vld [vmem:[%s6852_s1 + $0x4c8] sm:$0xff]  ;;  %v4262_v11 = vcombine.low %v149_v63, %v157_v0 }
  0x15   :  { %v173_v8 = vld [vmem:[%s6852_s1 + $0x4c0] sm:$0xff]  ;;  %v4281_v14 = vcombine.high %v166_v9, %v174_v10  ;;  %v182_v17 = vld [vmem:[%s6852_s1 + $0x508] sm:$0xff]  ;;  %v4280_v20 = vcombine.low %v166_v9, %v174_v10 }
  0x16   :  { %3122 = vmatpush1.bf16.msra.mxu0 %v4198_v42  ;;  %3208 = vmatpush1.bf16.msra.mxu1 %v4200_v43  ;;  %v4279_v13 = vcombine.high %v165_v7, %v173_v8  ;;  %v181_v15 = vld [vmem:[%s6852_s1 + $0x500] sm:$0xff]  ;;  %v190_v18 = vld [vmem:[%s6852_s1 + $0x548] sm:$0xff]  ;;  %v4278_v19 = vcombine.low %v165_v7, %v173_v8 }
  0x17   :  { %3123 = vmatprep.subr.bf16.mxu0 %v4215_v44  ;;  %3209 = vmatprep.subr.bf16.mxu1 %v4217_v45  ;;  %v189_v16 = vld [vmem:[%s6852_s1 + $0x540] sm:$0xff]  ;;  %v4297_v22 = vcombine.high %v182_v17, %v190_v18  ;;  %v198_v25 = vld [vmem:[%s6852_s1 + $0x588] sm:$0xff]  ;;  %v4296_v28 = vcombine.low %v182_v17, %v190_v18 }
  0x18   :  { %v4295_v21 = vcombine.high %v181_v15, %v189_v16  ;;  %v197_v23 = vld [vmem:[%s6852_s1 + $0x580] sm:$0xff]  ;;  %v206_v26 = vld [vmem:[%s6852_s1 + $0x5c8] sm:$0xff]  ;;  %v4294_v27 = vcombine.low %v181_v15, %v189_v16 }
  0x19   :  { %v205_v24 = vld [vmem:[%s6852_s1 + $0x5c0] sm:$0xff]  ;;  %v4313_v30 = vcombine.high %v198_v25, %v206_v26  ;;  %v214_v33 = vld [vmem:[%s6852_s1 + $0x608] sm:$0xff]  ;;  %v4312_v36 = vcombine.low %v198_v25, %v206_v26 }
  0x1a   :  { %3124 = vmatpush1.bf16.msra.mxu0 %v4214_v50  ;;  %3210 = vmatpush1.bf16.msra.mxu1 %v4216_v51  ;;  %v4311_v29 = vcombine.high %v197_v23, %v205_v24  ;;  %v213_v31 = vld [vmem:[%s6852_s1 + $0x600] sm:$0xff]  ;;  %v222_v34 = vld [vmem:[%s6852_s1 + $0x648] sm:$0xff]  ;;  %v4310_v35 = vcombine.low %v197_v23, %v205_v24 }
  0x1b   :  { %3125 = vmatprep.subr.bf16.mxu0 %v4231_v52  ;;  %3211 = vmatprep.subr.bf16.mxu1 %v4233_v53  ;;  %v221_v32 = vld [vmem:[%s6852_s1 + $0x640] sm:$0xff]  ;;  %v4329_v38 = vcombine.high %v214_v33, %v222_v34  ;;  %v230_v41 = vld [vmem:[%s6852_s1 + $0x688] sm:$0xff]  ;;  %v4328_v44 = vcombine.low %v214_v33, %v222_v34 }
  0x1c   :  { %v4327_v37 = vcombine.high %v213_v31, %v221_v32  ;;  %v229_v39 = vld [vmem:[%s6852_s1 + $0x680] sm:$0xff]  ;;  %v238_v42 = vld [vmem:[%s6852_s1 + $0x6c8] sm:$0xff]  ;;  %v4326_v43 = vcombine.low %v213_v31, %v221_v32 }
  0x1d   :  { %v237_v40 = vld [vmem:[%s6852_s1 + $0x6c0] sm:$0xff]  ;;  %v4345_v46 = vcombine.high %v230_v41, %v238_v42  ;;  %v246_v49 = vld [vmem:[%s6852_s1 + $0x708] sm:$0xff]  ;;  %v4344_v52 = vcombine.low %v230_v41, %v238_v42 }
  0x1e   :  { %3126 = vmatpush1.bf16.msra.mxu0 %v4230_v59  ;;  %3212 = vmatpush1.bf16.msra.mxu1 %v4232_v60  ;;  %v4343_v45 = vcombine.high %v229_v39, %v237_v40  ;;  %v245_v47 = vld [vmem:[%s6852_s1 + $0x700] sm:$0xff]  ;;  %v254_v50 = vld [vmem:[%s6852_s1 + $0x748] sm:$0xff]  ;;  %v4342_v51 = vcombine.low %v229_v39, %v237_v40 }
  0x1f   :  { %3127 = vmatprep.subr.bf16.mxu0 %v4247_v61  ;;  %3213 = vmatprep.subr.bf16.mxu1 %v4249_v62  ;;  %v253_v48 = vld [vmem:[%s6852_s1 + $0x740] sm:$0xff]  ;;  %v4361_v54 = vcombine.high %v246_v49, %v254_v50  ;;  %v262_v58 = vld [vmem:[%s6852_s1 + $0x788] sm:$0xff]  ;;  %v4360_v61 = vcombine.low %v246_v49, %v254_v50 }
  0x20   :  { %v4359_v53 = vcombine.high %v245_v47, %v253_v48  ;;  %v261_v55 = vld [vmem:[%s6852_s1 + $0x780] sm:$0xff]  ;;  %v270_v59 = vld [vmem:[%s6852_s1 + $0x7c8] sm:$0xff]  ;;  %v4358_v60 = vcombine.low %v245_v47, %v253_v48 }
  0x21   :  { %v269_v57 = vld [vmem:[%s6852_s1 + $0x7c0] sm:$0xff]  ;;  %v4377_v63 = vcombine.high %v262_v58, %v270_v59  ;;  %v278_v2 = vld [vmem:[%s6852_s1 + $0x808] sm:$0xff] }
  0x22   :  { %3128 = vmatpush1.bf16.msra.mxu0 %v4246_v3  ;;  %3214 = vmatpush1.bf16.msra.mxu1 %v4248_v4  ;;  %v4375_v62 = vcombine.high %v261_v55, %v269_v57  ;;  %v277_v0 = vld [vmem:[%s6852_s1 + $0x800] sm:$0xff]  ;;  %v286_v3 = vld [vmem:[%s6852_s1 + $0x848] sm:$0xff]  ;;  %v4374_v4 = vcombine.low %v261_v55, %v269_v57 }
  0x23   :  { %3129 = vmatprep.subr.bf16.mxu0 %v4263_v5  ;;  %3215 = vmatprep.subr.bf16.mxu1 %v4265_v6  ;;  %v285_v1 = vld [vmem:[%s6852_s1 + $0x840] sm:$0xff]  ;;  %v4376_v5 = vcombine.low %v262_v58, %v270_v59  ;;  %v4393_v7 = vcombine.high %v278_v2, %v286_v3 }
  0x24   :  { %v4391_v6 = vcombine.high %v277_v0, %v285_v1  ;;  %v293_v8 = vld [vmem:[%s6852_s1 + $0x880] sm:$0xff] }
  0x25   :  { %v301_v9 = vld [vmem:[%s6852_s1 + $0x8c0] sm:$0xff] }
  0x26   :  { %3130 = vmatpush1.bf16.msra.mxu0 %v4262_v11  ;;  %3216 = vmatpush1.bf16.msra.mxu1 %v4264_v12  ;;  %v4941_v10 = vld [vmem:[%s6853_s0] ss:$16 sps:$4 sm:$0xff]   ;;  %v294_v11 = vld [vmem:[%s6852_s1 + $0x888] sm:$0xff]  ;;  %v4407_v15 = vcombine.high %v293_v8, %v301_v9 }
  0x27   :  { %3131 = vmatprep.subr.bf16.mxu0 %v4279_v13  ;;  %3217 = vmatprep.subr.bf16.mxu1 %v4281_v14  ;;  %v302_v12 = vld [vmem:[%s6852_s1 + $0x8c8] sm:$0xff]  ;;  %v4390_v13 = vcombine.low %v277_v0, %v285_v1  ;;  %v4392_v14 = vcombine.low %v278_v2, %v286_v3  ;;  %v309_v17 = vld [vmem:[%s6852_s1 + $0x900] sm:$0xff] }
  0x28   :  { %v4409_v16 = vcombine.high %v294_v11, %v302_v12  ;;  %v317_v18 = vld [vmem:[%s6852_s1 + $0x940] sm:$0xff]  ;;  %v4408_v23 = vcombine.low %v294_v11, %v302_v12 }
  0x29   :  { %v4423_v24 = vcombine.high %v309_v17, %v317_v18  ;;  %v325_v26 = vld [vmem:[%s6852_s1 + $0x980] sm:$0xff] }
  0x2a   :  { %3132 = vmatpush1.bf16.msra.mxu0 %v4278_v19  ;;  %3218 = vmatpush1.bf16.msra.mxu1 %v4280_v20  ;;  %v4958_v19 = vld [vmem:[%s6853_s0 + $0xc] ss:$16 sps:$4 sm:$0xff]   ;;  %v341_v34 = vld [vmem:[%s6852_s1 + $0xa00] sm:$0xff] }
  0x2b   :  { %3133 = vmatprep.subr.bf16.mxu0 %v4295_v21  ;;  %3219 = vmatprep.subr.bf16.mxu1 %v4297_v22  ;;  %v310_v20 = vld [vmem:[%s6852_s1 + $0x908] sm:$0xff]  ;;  %v4406_v22 = vcombine.low %v293_v8, %v301_v9  ;;  %v357_v42 = vld [vmem:[%s6852_s1 + $0xa80] sm:$0xff] }
  0x2c   :  { %v318_v21 = vld [vmem:[%s6852_s1 + $0x948] sm:$0xff]  ;;  %v373_v50 = vld [vmem:[%s6852_s1 + $0xb00] sm:$0xff] }
  0x2d   :  { %v4425_v25 = vcombine.high %v310_v20, %v318_v21  ;;  %v4424_v31 = vcombine.low %v310_v20, %v318_v21  ;;  %v389_v59 = vld [vmem:[%s6852_s1 + $0xb80] sm:$0xff] }
  0x2e   :  { %3134 = vmatpush1.bf16.msra.mxu0 %v4294_v27  ;;  %3220 = vmatpush1.bf16.msra.mxu1 %v4296_v28  ;;  %v333_v27 = vld [vmem:[%s6852_s1 + $0x9c0] sm:$0xff]  ;;  %v326_v28 = vld [vmem:[%s6852_s1 + $0x988] sm:$0xff] }
  0x2f   :  { %3135 = vmatprep.subr.bf16.mxu0 %v4311_v29  ;;  %3221 = vmatprep.subr.bf16.mxu1 %v4313_v30  ;;  %v334_v29 = vld [vmem:[%s6852_s1 + $0x9c8] sm:$0xff]  ;;  %v4422_v30 = vcombine.low %v309_v17, %v317_v18  ;;  %v4439_v32 = vcombine.high %v325_v26, %v333_v27  ;;  %v405_v3 = vld [vmem:[%s6852_s1 + $0xc00] sm:$0xff] }
  0x30   :  { %v4441_v33 = vcombine.high %v326_v28, %v334_v29  ;;  %v4440_v39 = vcombine.low %v326_v28, %v334_v29  ;;  %v421_v12 = vld [vmem:[%s6852_s1 + $0xc80] sm:$0xff] }
  0x31   :  { %v437_v21 = vld [vmem:[%s6852_s1 + $0xd00] sm:$0xff] }
  0x32   :  { %3136 = vmatpush1.bf16.msra.mxu0 %v4310_v35  ;;  %3222 = vmatpush1.bf16.msra.mxu1 %v4312_v36  ;;  %v349_v35 = vld [vmem:[%s6852_s1 + $0xa40] sm:$0xff]  ;;  %v342_v36 = vld [vmem:[%s6852_s1 + $0xa08] sm:$0xff] }
  0x33   :  { %3137 = vmatprep.subr.bf16.mxu0 %v4327_v37  ;;  %3223 = vmatprep.subr.bf16.mxu1 %v4329_v38  ;;  %v350_v37 = vld [vmem:[%s6852_s1 + $0xa48] sm:$0xff]  ;;  %v4438_v38 = vcombine.low %v325_v26, %v333_v27  ;;  %v4455_v40 = vcombine.high %v341_v34, %v349_v35  ;;  %v453_v29 = vld [vmem:[%s6852_s1 + $0xd80] sm:$0xff] }
  0x34   :  { %v4457_v41 = vcombine.high %v342_v36, %v350_v37  ;;  %v4456_v47 = vcombine.low %v342_v36, %v350_v37  ;;  %v469_v37 = vld [vmem:[%s6852_s1 + $0xe00] sm:$0xff] }
  0x36   :  { %3138 = vmatpush1.bf16.msra.mxu0 %v4326_v43  ;;  %3224 = vmatpush1.bf16.msra.mxu1 %v4328_v44  ;;  %v365_v43 = vld [vmem:[%s6852_s1 + $0xac0] sm:$0xff]  ;;  %v358_v44 = vld [vmem:[%s6852_s1 + $0xa88] sm:$0xff] }
  0x37   :  { %3139 = vmatprep.subr.bf16.mxu0 %v4343_v45  ;;  %3225 = vmatprep.subr.bf16.mxu1 %v4345_v46  ;;  %v366_v45 = vld [vmem:[%s6852_s1 + $0xac8] sm:$0xff]  ;;  %v4454_v46 = vcombine.low %v341_v34, %v349_v35  ;;  %v4471_v48 = vcombine.high %v357_v42, %v365_v43 }
  0x38   :  { %v4473_v49 = vcombine.high %v358_v44, %v366_v45  ;;  %v4472_v55 = vcombine.low %v358_v44, %v366_v45  ;;  %v485_v45 = vld [vmem:[%s6852_s1 + $0xe80] sm:$0xff] }
  0x3a   :  { %3140 = vmatpush1.bf16.msra.mxu0 %v4342_v51  ;;  %3226 = vmatpush1.bf16.msra.mxu1 %v4344_v52  ;;  %v381_v51 = vld [vmem:[%s6852_s1 + $0xb40] sm:$0xff]  ;;  %v374_v52 = vld [vmem:[%s6852_s1 + $0xb08] sm:$0xff] }
  0x3b   :  { %3141 = vmatprep.subr.bf16.mxu0 %v4359_v53  ;;  %3227 = vmatprep.subr.bf16.mxu1 %v4361_v54  ;;  %v382_v53 = vld [vmem:[%s6852_s1 + $0xb48] sm:$0xff]  ;;  %v4470_v54 = vcombine.low %v357_v42, %v365_v43  ;;  %v4487_v57 = vcombine.high %v373_v50, %v381_v51 }
  0x3c   :  { %v4489_v58 = vcombine.high %v374_v52, %v382_v53  ;;  %v4488_v0 = vcombine.low %v374_v52, %v382_v53  ;;  %v501_v53 = vld [vmem:[%s6852_s1 + $0xf00] sm:$0xff] }
  0x3e   :  { %3142 = vmatpush1.bf16.msra.mxu0 %v4358_v60  ;;  %3228 = vmatpush1.bf16.msra.mxu1 %v4360_v61  ;;  %v397_v60 = vld [vmem:[%s6852_s1 + $0xbc0] sm:$0xff]  ;;  %v390_v61 = vld [vmem:[%s6852_s1 + $0xb88] sm:$0xff] }
  0x3f   :  { %3143 = vmatprep.subr.bf16.mxu0 %v4375_v62  ;;  %3229 = vmatprep.subr.bf16.mxu1 %v4377_v63  ;;  %v398_v62 = vld [vmem:[%s6852_s1 + $0xbc8] sm:$0xff]  ;;  %v4486_v63 = vcombine.low %v373_v50, %v381_v51  ;;  %v4503_v1 = vcombine.high %v389_v59, %v397_v60 }
  0x40   :  { %v4505_v2 = vcombine.high %v390_v61, %v398_v62  ;;  %v4504_v8 = vcombine.low %v390_v61, %v398_v62  ;;  %v517_v62 = vld [vmem:[%s6852_s1 + $0xf80] sm:$0xff] }
  0x42   :  { %3144 = vmatpush1.bf16.msra.mxu0 %v4374_v4  ;;  %3230 = vmatpush1.bf16.msra.mxu1 %v4376_v5  ;;  %v413_v4 = vld [vmem:[%s6852_s1 + $0xc40] sm:$0xff]  ;;  %v406_v5 = vld [vmem:[%s6852_s1 + $0xc08] sm:$0xff] }
  0x43   :  { %3156 = vmatprep.subr.bf16.mxu0 %v4391_v6  ;;  %3242 = vmatprep.subr.bf16.mxu1 %v4393_v7  ;;  %v414_v6 = vld [vmem:[%s6852_s1 + $0xc48] sm:$0xff]  ;;  %v4502_v7 = vcombine.low %v389_v59, %v397_v60  ;;  %v4519_v9 = vcombine.high %v405_v3, %v413_v4 }
  0x44   :  { %v4521_v11 = vcombine.high %v406_v5, %v414_v6  ;;  %v4520_v17 = vcombine.low %v406_v5, %v414_v6  ;;  %v23_v6 = vld [vmem:[%s6852_s1 + $0x10] sm:$0xff] }
  0x45   :  { %3146 = vmatmul.mubr.bf16.vlgmr.msra.gmra.mrb[0].mxu0 %v4941_v10  ;;  %3232 = vmatmul.mubr.bf16.vlgmr.msra.gmra.mrb[0].mxu1 %v4941_v10 }
  0x46   :  { %3157 = vmatpush1.bf16.msra.mxu0 %v4390_v13  ;;  %3243 = vmatpush1.bf16.msra.mxu1 %v4392_v14  ;;  %v429_v13 = vld [vmem:[%s6852_s1 + $0xcc0] sm:$0xff]  ;;  %v422_v14 = vld [vmem:[%s6852_s1 + $0xc88] sm:$0xff] }
  0x47   :  { %3158 = vmatprep.subr.bf16.mxu0 %v4407_v15  ;;  %3244 = vmatprep.subr.bf16.mxu1 %v4409_v16  ;;  %v430_v15 = vld [vmem:[%s6852_s1 + $0xcc8] sm:$0xff]  ;;  %v4518_v16 = vcombine.low %v405_v3, %v413_v4  ;;  %v4535_v18 = vcombine.high %v421_v12, %v429_v13 }
  0x48   :  { %3188 = vmatprep.mubr.bf16.mxu0 %v4958_v19  ;;  %3274 = vmatprep.mubr.bf16.mxu1 %v4958_v19  ;;  %v4537_v20 = vcombine.high %v422_v14, %v430_v15  ;;  %v4536_v26 = vcombine.low %v422_v14, %v430_v15  ;;  %v39_v15 = vld [vmem:[%s6852_s1 + $0x90] sm:$0xff] }
  0x4a   :  { %3159 = vmatpush1.bf16.msra.mxu0 %v4406_v22  ;;  %3245 = vmatpush1.bf16.msra.mxu1 %v4408_v23  ;;  %v445_v22 = vld [vmem:[%s6852_s1 + $0xd40] sm:$0xff]  ;;  %v438_v23 = vld [vmem:[%s6852_s1 + $0xd08] sm:$0xff] }
  0x4b   :  { %3160 = vmatprep.subr.bf16.mxu0 %v4423_v24  ;;  %3246 = vmatprep.subr.bf16.mxu1 %v4425_v25  ;;  %v446_v24 = vld [vmem:[%s6852_s1 + $0xd48] sm:$0xff]  ;;  %v4534_v25 = vcombine.low %v421_v12, %v429_v13  ;;  %v4551_v27 = vcombine.high %v437_v21, %v445_v22 }
  0x4c   :  { %v4553_v28 = vcombine.high %v438_v23, %v446_v24  ;;  %v4552_v34 = vcombine.low %v438_v23, %v446_v24 }
  0x4e   :  { %3161 = vmatpush1.bf16.msra.mxu0 %v4422_v30  ;;  %3247 = vmatpush1.bf16.msra.mxu1 %v4424_v31  ;;  %v461_v30 = vld [vmem:[%s6852_s1 + $0xdc0] sm:$0xff]  ;;  %v454_v31 = vld [vmem:[%s6852_s1 + $0xd88] sm:$0xff] }
  0x4f   :  { %3162 = vmatprep.subr.bf16.mxu0 %v4439_v32  ;;  %3248 = vmatprep.subr.bf16.mxu1 %v4441_v33  ;;  %v462_v32 = vld [vmem:[%s6852_s1 + $0xdc8] sm:$0xff]  ;;  %v4550_v33 = vcombine.low %v437_v21, %v445_v22  ;;  %v4567_v35 = vcombine.high %v453_v29, %v461_v30 }
  0x50   :  { %v4569_v36 = vcombine.high %v454_v31, %v462_v32  ;;  %v4568_v42 = vcombine.low %v454_v31, %v462_v32 }
  0x52   :  { %3163 = vmatpush1.bf16.msra.mxu0 %v4438_v38  ;;  %3249 = vmatpush1.bf16.msra.mxu1 %v4440_v39  ;;  %v477_v38 = vld [vmem:[%s6852_s1 + $0xe40] sm:$0xff]  ;;  %v470_v39 = vld [vmem:[%s6852_s1 + $0xe08] sm:$0xff] }
  0x53   :  { %3164 = vmatprep.subr.bf16.mxu0 %v4455_v40  ;;  %3250 = vmatprep.subr.bf16.mxu1 %v4457_v41  ;;  %v478_v40 = vld [vmem:[%s6852_s1 + $0xe48] sm:$0xff]  ;;  %v4566_v41 = vcombine.low %v453_v29, %v461_v30  ;;  %v4583_v43 = vcombine.high %v469_v37, %v477_v38 }
  0x54   :  { %v4585_v44 = vcombine.high %v470_v39, %v478_v40  ;;  %v4584_v50 = vcombine.low %v470_v39, %v478_v40 }
  0x56   :  { %3165 = vmatpush1.bf16.msra.mxu0 %v4454_v46  ;;  %3251 = vmatpush1.bf16.msra.mxu1 %v4456_v47  ;;  %v493_v46 = vld [vmem:[%s6852_s1 + $0xec0] sm:$0xff]  ;;  %v486_v47 = vld [vmem:[%s6852_s1 + $0xe88] sm:$0xff] }
  0x57   :  { %3166 = vmatprep.subr.bf16.mxu0 %v4471_v48  ;;  %3252 = vmatprep.subr.bf16.mxu1 %v4473_v49  ;;  %v494_v48 = vld [vmem:[%s6852_s1 + $0xec8] sm:$0xff]  ;;  %v4582_v49 = vcombine.low %v469_v37, %v477_v38  ;;  %v4599_v51 = vcombine.high %v485_v45, %v493_v46 }
  0x58   :  { %v4601_v52 = vcombine.high %v486_v47, %v494_v48  ;;  %v4600_v59 = vcombine.low %v486_v47, %v494_v48  ;;  %v103_v48 = vld [vmem:[%s6852_s1 + $0x290] sm:$0xff] }
  0x5a   :  { %3167 = vmatpush1.bf16.msra.mxu0 %v4470_v54  ;;  %3253 = vmatpush1.bf16.msra.mxu1 %v4472_v55  ;;  %v509_v54 = vld [vmem:[%s6852_s1 + $0xf40] sm:$0xff]  ;;  %v502_v55 = vld [vmem:[%s6852_s1 + $0xf08] sm:$0xff] }
  0x5b   :  { %3168 = vmatprep.subr.bf16.mxu0 %v4487_v57  ;;  %3254 = vmatprep.subr.bf16.mxu1 %v4489_v58  ;;  %v510_v57 = vld [vmem:[%s6852_s1 + $0xf48] sm:$0xff]  ;;  %v4598_v58 = vcombine.low %v485_v45, %v493_v46  ;;  %v4615_v60 = vcombine.high %v501_v53, %v509_v54 }
  0x5c   :  { %v4617_v61 = vcombine.high %v502_v55, %v510_v57  ;;  %v4616_v3 = vcombine.low %v502_v55, %v510_v57  ;;  %v119_v57 = vld [vmem:[%s6852_s1 + $0x310] sm:$0xff] }
  0x5e   :  { %3169 = vmatpush1.bf16.msra.mxu0 %v4486_v63  ;;  %3255 = vmatpush1.bf16.msra.mxu1 %v4488_v0  ;;  %v525_v63 = vld [vmem:[%s6852_s1 + $0xfc0] sm:$0xff]  ;;  %v518_v0 = vld [vmem:[%s6852_s1 + $0xf88] sm:$0xff] }
  0x5f   :  { %3170 = vmatprep.subr.bf16.mxu0 %v4503_v1  ;;  %3256 = vmatprep.subr.bf16.mxu1 %v4505_v2  ;;  %v526_v1 = vld [vmem:[%s6852_s1 + $0xfc8] sm:$0xff]  ;;  %v4614_v2 = vcombine.low %v501_v53, %v509_v54  ;;  %v4631_v4 = vcombine.high %v517_v62, %v525_v63 }
  0x60   :  { %v4633_v5 = vcombine.high %v518_v0, %v526_v1  ;;  %v4632_v12 = vcombine.low %v518_v0, %v526_v1  ;;  %v135_v1 = vld [vmem:[%s6852_s1 + $0x390] sm:$0xff] }
  0x62   :  { %3171 = vmatpush1.bf16.msra.mxu0 %v4502_v7  ;;  %3257 = vmatpush1.bf16.msra.mxu1 %v4504_v8  ;;  %v31_v7 = vld [vmem:[%s6852_s1 + $0x50] sm:$0xff]  ;;  %v24_v8 = vld [vmem:[%s6852_s1 + $0x18] sm:$0xff] }
  0x63   :  { %3172 = vmatprep.subr.bf16.mxu0 %v4519_v9  ;;  %3258 = vmatprep.subr.bf16.mxu1 %v4521_v11  ;;  %v32_v9 = vld [vmem:[%s6852_s1 + $0x58] sm:$0xff]  ;;  %v4630_v11 = vcombine.low %v517_v62, %v525_v63  ;;  %v4139_v13 = vcombine.high %v23_v6, %v31_v7  ;;  %v4138_v21 = vcombine.low %v23_v6, %v31_v7 }
  0x64   :  { %v4141_v14 = vcombine.high %v24_v8, %v32_v9  ;;  %v4140_v22 = vcombine.low %v24_v8, %v32_v9  ;;  %v151_v9 = vld [vmem:[%s6852_s1 + $0x410] sm:$0xff] }
  0x66   :  { %3173 = vmatpush1.bf16.msra.mxu0 %v4518_v16  ;;  %3259 = vmatpush1.bf16.msra.mxu1 %v4520_v17  ;;  %v47_v16 = vld [vmem:[%s6852_s1 + $0xd0] sm:$0xff]  ;;  %v5147_v17 = vld [vmem:[%s6853_s0 + $0x8] ss:$16 sps:$4 sm:$0xff]  }
  0x67   :  { %3174 = vmatprep.subr.bf16.mxu0 %v4535_v18  ;;  %3260 = vmatprep.subr.bf16.mxu1 %v4537_v20  ;;  %v40_v18 = vld [vmem:[%s6852_s1 + $0x98] sm:$0xff]  ;;  %v4155_v23 = vcombine.high %v39_v15, %v47_v16  ;;  %v4154_v29 = vcombine.low %v39_v15, %v47_v16 }
  0x68   :  { %v48_v20 = vld [vmem:[%s6852_s1 + $0xd8] sm:$0xff] }
  0x69   :  { %v4157_v24 = vcombine.high %v40_v18, %v48_v20  ;;  %v4156_v30 = vcombine.low %v40_v18, %v48_v20  ;;  %v167_v20 = vld [vmem:[%s6852_s1 + $0x490] sm:$0xff] }
  0x6a   :  { %3175 = vmatpush1.bf16.msra.mxu0 %v4534_v25  ;;  %3261 = vmatpush1.bf16.msra.mxu1 %v4536_v26  ;;  %v55_v25 = vld [vmem:[%s6852_s1 + $0x110] sm:$0xff] }
  0x6b   :  { %3176 = vmatprep.subr.bf16.mxu0 %v4551_v27  ;;  %3262 = vmatprep.subr.bf16.mxu1 %v4553_v28  ;;  %v63_v26 = vld [vmem:[%s6852_s1 + $0x150] sm:$0xff]  ;;  %v56_v27 = vld [vmem:[%s6852_s1 + $0x118] sm:$0xff] }
  0x6c   :  { %v64_v28 = vld [vmem:[%s6852_s1 + $0x158] sm:$0xff]  ;;  %v4171_v31 = vcombine.high %v55_v25, %v63_v26  ;;  %v4170_v37 = vcombine.low %v55_v25, %v63_v26 }
  0x6d   :  { %v4173_v32 = vcombine.high %v56_v27, %v64_v28  ;;  %v4172_v38 = vcombine.low %v56_v27, %v64_v28  ;;  %v183_v28 = vld [vmem:[%s6852_s1 + $0x510] sm:$0xff] }
  0x6e   :  { %3177 = vmatpush1.bf16.msra.mxu0 %v4550_v33  ;;  %3263 = vmatpush1.bf16.msra.mxu1 %v4552_v34  ;;  %v71_v33 = vld [vmem:[%s6852_s1 + $0x190] sm:$0xff] }
  0x6f   :  { %3178 = vmatprep.subr.bf16.mxu0 %v4567_v35  ;;  %3264 = vmatprep.subr.bf16.mxu1 %v4569_v36  ;;  %v79_v34 = vld [vmem:[%s6852_s1 + $0x1d0] sm:$0xff]  ;;  %v72_v35 = vld [vmem:[%s6852_s1 + $0x198] sm:$0xff] }
  0x70   :  { %v80_v36 = vld [vmem:[%s6852_s1 + $0x1d8] sm:$0xff]  ;;  %v4187_v39 = vcombine.high %v71_v33, %v79_v34 }
  0x71   :  { %v4189_v40 = vcombine.high %v72_v35, %v80_v36  ;;  %v4188_v45 = vcombine.low %v72_v35, %v80_v36  ;;  %v199_v36 = vld [vmem:[%s6852_s1 + $0x590] sm:$0xff] }
  0x72   :  { %3179 = vmatpush1.bf16.msra.mxu0 %v4566_v41  ;;  %3265 = vmatpush1.bf16.msra.mxu1 %v4568_v42  ;;  %v87_v41 = vld [vmem:[%s6852_s1 + $0x210] sm:$0xff] }
  0x73   :  { %3180 = vmatprep.subr.bf16.mxu0 %v4583_v43  ;;  %3266 = vmatprep.subr.bf16.mxu1 %v4585_v44  ;;  %v95_v42 = vld [vmem:[%s6852_s1 + $0x250] sm:$0xff]  ;;  %v96_v43 = vld [vmem:[%s6852_s1 + $0x258] sm:$0xff]  ;;  %v4186_v44 = vcombine.low %v71_v33, %v79_v34 }
  0x74   :  { %v4203_v46 = vcombine.high %v87_v41, %v95_v42 }
  0x76   :  { %3181 = vmatpush1.bf16.msra.mxu0 %v4582_v49  ;;  %3267 = vmatpush1.bf16.msra.mxu1 %v4584_v50  ;;  %v111_v49 = vld [vmem:[%s6852_s1 + $0x2d0] sm:$0xff]  ;;  %v104_v50 = vld [vmem:[%s6852_s1 + $0x298] sm:$0xff] }
  0x77   :  { %3182 = vmatprep.subr.bf16.mxu0 %v4599_v51  ;;  %3268 = vmatprep.subr.bf16.mxu1 %v4601_v52  ;;  %v112_v51 = vld [vmem:[%s6852_s1 + $0x2d8] sm:$0xff]  ;;  %v4202_v52 = vcombine.low %v87_v41, %v95_v42  ;;  %v4219_v54 = vcombine.high %v103_v48, %v111_v49 }
  0x78   :  { %v4221_v55 = vcombine.high %v104_v50, %v112_v51  ;;  %v4220_v62 = vcombine.low %v104_v50, %v112_v51  ;;  %v231_v51 = vld [vmem:[%s6852_s1 + $0x690] sm:$0xff] }
  0x7a   :  { %3183 = vmatpush1.bf16.msra.mxu0 %v4598_v58  ;;  %3269 = vmatpush1.bf16.msra.mxu1 %v4600_v59  ;;  %v127_v58 = vld [vmem:[%s6852_s1 + $0x350] sm:$0xff]  ;;  %v120_v59 = vld [vmem:[%s6852_s1 + $0x318] sm:$0xff] }
  0x7b   :  { %3184 = vmatprep.subr.bf16.mxu0 %v4615_v60  ;;  %3270 = vmatprep.subr.bf16.mxu1 %v4617_v61  ;;  %v128_v60 = vld [vmem:[%s6852_s1 + $0x358] sm:$0xff]  ;;  %v4218_v61 = vcombine.low %v103_v48, %v111_v49  ;;  %v4235_v63 = vcombine.high %v119_v57, %v127_v58 }
  0x7c   :  { %v4237_v0 = vcombine.high %v120_v59, %v128_v60  ;;  %v4236_v6 = vcombine.low %v120_v59, %v128_v60  ;;  %v247_v60 = vld [vmem:[%s6852_s1 + $0x710] sm:$0xff] }
  0x7e   :  { %3185 = vmatpush1.bf16.msra.mxu0 %v4614_v2  ;;  %3271 = vmatpush1.bf16.msra.mxu1 %v4616_v3  ;;  %v143_v2 = vld [vmem:[%s6852_s1 + $0x3d0] sm:$0xff]  ;;  %v136_v3 = vld [vmem:[%s6852_s1 + $0x398] sm:$0xff] }
  0x7f   :  { %3186 = vmatprep.subr.bf16.mxu0 %v4631_v4  ;;  %3272 = vmatprep.subr.bf16.mxu1 %v4633_v5  ;;  %v144_v4 = vld [vmem:[%s6852_s1 + $0x3d8] sm:$0xff]  ;;  %v4234_v5 = vcombine.low %v119_v57, %v127_v58  ;;  %v4251_v7 = vcombine.high %v135_v1, %v143_v2 }
  0x80   :  { %v4253_v8 = vcombine.high %v136_v3, %v144_v4  ;;  %v4252_v15 = vcombine.low %v136_v3, %v144_v4  ;;  %v263_v4 = vld [vmem:[%s6852_s1 + $0x790] sm:$0xff] }
  0x82   :  { %3187 = vmatpush1.bf16.msra.mxu0 %v4630_v11  ;;  %3273 = vmatpush1.bf16.msra.mxu1 %v4632_v12  ;;  %v159_v11 = vld [vmem:[%s6852_s1 + $0x450] sm:$0xff]  ;;  %v152_v12 = vld [vmem:[%s6852_s1 + $0x418] sm:$0xff] }
  0x83   :  { %3285 = vmatprep.subr.bf16.mxu0 %v4139_v13  ;;  %3371 = vmatprep.subr.bf16.mxu1 %v4141_v14  ;;  %v160_v13 = vld [vmem:[%s6852_s1 + $0x458] sm:$0xff]  ;;  %v4250_v14 = vcombine.low %v135_v1, %v143_v2  ;;  %v4267_v16 = vcombine.high %v151_v9, %v159_v11 }
  0x84   :  { %v4269_v18 = vcombine.high %v152_v12, %v160_v13  ;;  %v4268_v25 = vcombine.low %v152_v12, %v160_v13  ;;  %v279_v13 = vld [vmem:[%s6852_s1 + $0x810] sm:$0xff] }
  0x85   :  { %3189 = vmatmul.mubr.bf16.vlgmr.msra.gmra.mrb[0].mxu0 %v5147_v17  ;;  %3275 = vmatmul.mubr.bf16.vlgmr.msra.gmra.mrb[0].mxu1 %v5147_v17 }
  0x86   :  { %3286 = vmatpush1.bf16.msra.mxu0 %v4138_v21  ;;  %3372 = vmatpush1.bf16.msra.mxu1 %v4140_v22  ;;  %v175_v21 = vld [vmem:[%s6852_s1 + $0x4d0] sm:$0xff]  ;;  %v168_v22 = vld [vmem:[%s6852_s1 + $0x498] sm:$0xff] }
  0x87   :  { %3287 = vmatprep.subr.bf16.mxu0 %v4155_v23  ;;  %3373 = vmatprep.subr.bf16.mxu1 %v4157_v24  ;;  %v176_v23 = vld [vmem:[%s6852_s1 + $0x4d8] sm:$0xff]  ;;  %v4266_v24 = vcombine.low %v151_v9, %v159_v11  ;;  %v4283_v26 = vcombine.high %v167_v20, %v175_v21 }
  0x88   :  { %3317 = vmatprep.mubr.bf16.mxu0 %v4814_v56  ;;  %3403 = vmatprep.mubr.bf16.mxu1 %v4814_v56  ;;  %v88_v56 = vld [vmem:[%s6852_s1 + $0x218] sm:$0xff]  ;;  %v4285_v27 = vcombine.high %v168_v22, %v176_v23  ;;  %v4284_v33 = vcombine.low %v168_v22, %v176_v23  ;;  %v295_v23 = vld [vmem:[%s6852_s1 + $0x890] sm:$0xff] }
  0x89   :  { %v4205_v47 = vcombine.high %v88_v56, %v96_v43  ;;  %v4204_v53 = vcombine.low %v88_v56, %v96_v43  ;;  %v215_v43 = vld [vmem:[%s6852_s1 + $0x610] sm:$0xff] }
  0x8a   :  { %3288 = vmatpush1.bf16.msra.mxu0 %v4154_v29  ;;  %3374 = vmatpush1.bf16.msra.mxu1 %v4156_v30  ;;  %v191_v29 = vld [vmem:[%s6852_s1 + $0x550] sm:$0xff]  ;;  %v184_v30 = vld [vmem:[%s6852_s1 + $0x518] sm:$0xff] }
  0x8b   :  { %3289 = vmatprep.subr.bf16.mxu0 %v4171_v31  ;;  %3375 = vmatprep.subr.bf16.mxu1 %v4173_v32  ;;  %v192_v31 = vld [vmem:[%s6852_s1 + $0x558] sm:$0xff]  ;;  %v4282_v32 = vcombine.low %v167_v20, %v175_v21  ;;  %v4299_v34 = vcombine.high %v183_v28, %v191_v29 }
  0x8c   :  { %v4301_v35 = vcombine.high %v184_v30, %v192_v31  ;;  %v4300_v41 = vcombine.low %v184_v30, %v192_v31  ;;  %v311_v31 = vld [vmem:[%s6852_s1 + $0x910] sm:$0xff] }
  0x8e   :  { %3290 = vmatpush1.bf16.msra.mxu0 %v4170_v37  ;;  %3376 = vmatpush1.bf16.msra.mxu1 %v4172_v38  ;;  %v207_v37 = vld [vmem:[%s6852_s1 + $0x5d0] sm:$0xff]  ;;  %v200_v38 = vld [vmem:[%s6852_s1 + $0x598] sm:$0xff] }
  0x8f   :  { %3291 = vmatprep.subr.bf16.mxu0 %v4187_v39  ;;  %3377 = vmatprep.subr.bf16.mxu1 %v4189_v40  ;;  %v208_v39 = vld [vmem:[%s6852_s1 + $0x5d8] sm:$0xff]  ;;  %v4298_v40 = vcombine.low %v183_v28, %v191_v29  ;;  %v4315_v42 = vcombine.high %v199_v36, %v207_v37 }
  0x90   :  { %v4317_v56 = vcombine.high %v200_v38, %v208_v39  ;;  %v4316_v48 = vcombine.low %v200_v38, %v208_v39  ;;  %v327_v39 = vld [vmem:[%s6852_s1 + $0x990] sm:$0xff] }
  0x92   :  { %3292 = vmatpush1.bf16.msra.mxu0 %v4186_v44  ;;  %3378 = vmatpush1.bf16.msra.mxu1 %v4188_v45  ;;  %v223_v44 = vld [vmem:[%s6852_s1 + $0x650] sm:$0xff]  ;;  %v216_v45 = vld [vmem:[%s6852_s1 + $0x618] sm:$0xff] }
  0x93   :  { %3293 = vmatprep.subr.bf16.mxu0 %v4203_v46  ;;  %3379 = vmatprep.subr.bf16.mxu1 %v4205_v47  ;;  %v224_v46 = vld [vmem:[%s6852_s1 + $0x658] sm:$0xff]  ;;  %v4314_v47 = vcombine.low %v199_v36, %v207_v37  ;;  %v4331_v49 = vcombine.high %v215_v43, %v223_v44 }
  0x94   :  { %v4333_v50 = vcombine.high %v216_v45, %v224_v46  ;;  %v4332_v57 = vcombine.low %v216_v45, %v224_v46  ;;  %v343_v45 = vld [vmem:[%s6852_s1 + $0xa10] sm:$0xff] }
  0x95   :  { %v351_v46 = vld [vmem:[%s6852_s1 + $0xa50] sm:$0xff] }
  0x96   :  { %3294 = vmatpush1.bf16.msra.mxu0 %v4202_v52  ;;  %3380 = vmatpush1.bf16.msra.mxu1 %v4204_v53  ;;  %v239_v52 = vld [vmem:[%s6852_s1 + $0x6d0] sm:$0xff]  ;;  %v232_v53 = vld [vmem:[%s6852_s1 + $0x698] sm:$0xff] }
  0x97   :  { %3295 = vmatprep.subr.bf16.mxu0 %v4219_v54  ;;  %3381 = vmatprep.subr.bf16.mxu1 %v4221_v55  ;;  %v240_v54 = vld [vmem:[%s6852_s1 + $0x6d8] sm:$0xff]  ;;  %v4330_v55 = vcombine.low %v215_v43, %v223_v44  ;;  %v4347_v58 = vcombine.high %v231_v51, %v239_v52 }
  0x98   :  { %v4349_v59 = vcombine.high %v232_v53, %v240_v54  ;;  %v4348_v1 = vcombine.low %v232_v53, %v240_v54  ;;  %v367_v53 = vld [vmem:[%s6852_s1 + $0xad0] sm:$0xff]  ;;  %v360_v54 = vld [vmem:[%s6852_s1 + $0xa98] sm:$0xff] }
  0x9a   :  { %3296 = vmatpush1.bf16.msra.mxu0 %v4218_v61  ;;  %3382 = vmatpush1.bf16.msra.mxu1 %v4220_v62  ;;  %v255_v61 = vld [vmem:[%s6852_s1 + $0x750] sm:$0xff]  ;;  %v248_v62 = vld [vmem:[%s6852_s1 + $0x718] sm:$0xff] }
  0x9b   :  { %3297 = vmatprep.subr.bf16.mxu0 %v4235_v63  ;;  %3383 = vmatprep.subr.bf16.mxu1 %v4237_v0  ;;  %v256_v63 = vld [vmem:[%s6852_s1 + $0x758] sm:$0xff]  ;;  %v4346_v0 = vcombine.low %v231_v51, %v239_v52  ;;  %v4363_v2 = vcombine.high %v247_v60, %v255_v61  ;;  %v359_v52 = vld [vmem:[%s6852_s1 + $0xa90] sm:$0xff] }
  0x9c   :  { %v4365_v3 = vcombine.high %v248_v62, %v256_v63  ;;  %v4364_v9 = vcombine.low %v248_v62, %v256_v63  ;;  %v383_v62 = vld [vmem:[%s6852_s1 + $0xb50] sm:$0xff]  ;;  %v376_v63 = vld [vmem:[%s6852_s1 + $0xb18] sm:$0xff] }
  0x9e   :  { %3298 = vmatpush1.bf16.msra.mxu0 %v4234_v5  ;;  %3384 = vmatpush1.bf16.msra.mxu1 %v4236_v6  ;;  %v271_v5 = vld [vmem:[%s6852_s1 + $0x7d0] sm:$0xff]  ;;  %v264_v6 = vld [vmem:[%s6852_s1 + $0x798] sm:$0xff] }
  0x9f   :  { %3299 = vmatprep.subr.bf16.mxu0 %v4251_v7  ;;  %3385 = vmatprep.subr.bf16.mxu1 %v4253_v8  ;;  %v272_v7 = vld [vmem:[%s6852_s1 + $0x7d8] sm:$0xff]  ;;  %v4362_v8 = vcombine.low %v247_v60, %v255_v61  ;;  %v4379_v11 = vcombine.high %v263_v4, %v271_v5  ;;  %v375_v61 = vld [vmem:[%s6852_s1 + $0xb10] sm:$0xff] }
  0xa0   :  { %v4381_v12 = vcombine.high %v264_v6, %v272_v7  ;;  %v4380_v20 = vcombine.low %v264_v6, %v272_v7  ;;  %v399_v6 = vld [vmem:[%s6852_s1 + $0xbd0] sm:$0xff]  ;;  %v392_v7 = vld [vmem:[%s6852_s1 + $0xb98] sm:$0xff] }
  0xa2   :  { %3300 = vmatpush1.bf16.msra.mxu0 %v4250_v14  ;;  %3386 = vmatpush1.bf16.msra.mxu1 %v4252_v15  ;;  %v287_v14 = vld [vmem:[%s6852_s1 + $0x850] sm:$0xff]  ;;  %v280_v15 = vld [vmem:[%s6852_s1 + $0x818] sm:$0xff] }
  0xa3   :  { %3301 = vmatprep.subr.bf16.mxu0 %v4267_v16  ;;  %3387 = vmatprep.subr.bf16.mxu1 %v4269_v18  ;;  %v288_v16 = vld [vmem:[%s6852_s1 + $0x858] sm:$0xff]  ;;  %v4378_v18 = vcombine.low %v263_v4, %v271_v5  ;;  %v4395_v21 = vcombine.high %v279_v13, %v287_v14  ;;  %v391_v5 = vld [vmem:[%s6852_s1 + $0xb90] sm:$0xff] }
  0xa4   :  { %v4397_v22 = vcombine.high %v280_v15, %v288_v16  ;;  %v4396_v28 = vcombine.low %v280_v15, %v288_v16  ;;  %v415_v15 = vld [vmem:[%s6852_s1 + $0xc50] sm:$0xff]  ;;  %v408_v16 = vld [vmem:[%s6852_s1 + $0xc18] sm:$0xff] }
  0xa6   :  { %3302 = vmatpush1.bf16.msra.mxu0 %v4266_v24  ;;  %3388 = vmatpush1.bf16.msra.mxu1 %v4268_v25  ;;  %v303_v24 = vld [vmem:[%s6852_s1 + $0x8d0] sm:$0xff]  ;;  %v296_v25 = vld [vmem:[%s6852_s1 + $0x898] sm:$0xff] }
  0xa7   :  { %3303 = vmatprep.subr.bf16.mxu0 %v4283_v26  ;;  %3389 = vmatprep.subr.bf16.mxu1 %v4285_v27  ;;  %v304_v26 = vld [vmem:[%s6852_s1 + $0x8d8] sm:$0xff]  ;;  %v4394_v27 = vcombine.low %v279_v13, %v287_v14  ;;  %v4411_v29 = vcombine.high %v295_v23, %v303_v24  ;;  %v407_v14 = vld [vmem:[%s6852_s1 + $0xc10] sm:$0xff] }
  0xa8   :  { %v4413_v30 = vcombine.high %v296_v25, %v304_v26  ;;  %v4412_v36 = vcombine.low %v296_v25, %v304_v26  ;;  %v431_v25 = vld [vmem:[%s6852_s1 + $0xcd0] sm:$0xff]  ;;  %v424_v26 = vld [vmem:[%s6852_s1 + $0xc98] sm:$0xff] }
  0xaa   :  { %3304 = vmatpush1.bf16.msra.mxu0 %v4282_v32  ;;  %3390 = vmatpush1.bf16.msra.mxu1 %v4284_v33  ;;  %v319_v32 = vld [vmem:[%s6852_s1 + $0x950] sm:$0xff]  ;;  %v312_v33 = vld [vmem:[%s6852_s1 + $0x918] sm:$0xff] }
  0xab   :  { %3305 = vmatprep.subr.bf16.mxu0 %v4299_v34  ;;  %3391 = vmatprep.subr.bf16.mxu1 %v4301_v35  ;;  %v320_v34 = vld [vmem:[%s6852_s1 + $0x958] sm:$0xff]  ;;  %v4410_v35 = vcombine.low %v295_v23, %v303_v24  ;;  %v4427_v37 = vcombine.high %v311_v31, %v319_v32  ;;  %v423_v24 = vld [vmem:[%s6852_s1 + $0xc90] sm:$0xff] }
  0xac   :  { %v4429_v38 = vcombine.high %v312_v33, %v320_v34 }
  0xae   :  { %3306 = vmatpush1.bf16.msra.mxu0 %v4298_v40  ;;  %3392 = vmatpush1.bf16.msra.mxu1 %v4300_v41  ;;  %v335_v40 = vld [vmem:[%s6852_s1 + $0x9d0] sm:$0xff]  ;;  %v336_v41 = vld [vmem:[%s6852_s1 + $0x9d8] sm:$0xff] }
  0xaf   :  { %3307 = vmatprep.subr.bf16.mxu0 %v4315_v42  ;;  %3393 = vmatprep.subr.bf16.mxu1 %v4317_v56  ;;  %v4426_v42 = vcombine.low %v311_v31, %v319_v32  ;;  %v4428_v56 = vcombine.low %v312_v33, %v320_v34  ;;  %v4443_v43 = vcombine.high %v327_v39, %v335_v40  ;;  %v439_v32 = vld [vmem:[%s6852_s1 + $0xd10] sm:$0xff]  ;;  %v440_v34 = vld [vmem:[%s6852_s1 + $0xd18] sm:$0xff] }
  0xb0   :  { %v447_v33 = vld [vmem:[%s6852_s1 + $0xd50] sm:$0xff] }
  0xb2   :  { %3308 = vmatpush1.bf16.msra.mxu0 %v4314_v47  ;;  %3394 = vmatpush1.bf16.msra.mxu1 %v4316_v48  ;;  %v352_v47 = vld [vmem:[%s6852_s1 + $0xa58] sm:$0xff]  ;;  %v4442_v48 = vcombine.low %v327_v39, %v335_v40  ;;  %v455_v40 = vld [vmem:[%s6852_s1 + $0xd90] sm:$0xff] }
  0xb3   :  { %3309 = vmatprep.subr.bf16.mxu0 %v4331_v49  ;;  %3395 = vmatprep.subr.bf16.mxu1 %v4333_v50  ;;  %v4459_v50 = vcombine.high %v343_v45, %v351_v46 }
  0xb6   :  { %3310 = vmatpush1.bf16.msra.mxu0 %v4330_v55  ;;  %3396 = vmatpush1.bf16.msra.mxu1 %v4332_v57  ;;  %v368_v55 = vld [vmem:[%s6852_s1 + $0xad8] sm:$0xff]  ;;  %v4458_v57 = vcombine.low %v343_v45, %v351_v46  ;;  %v471_v46 = vld [vmem:[%s6852_s1 + $0xe10] sm:$0xff] }
  0xb7   :  { %3311 = vmatprep.subr.bf16.mxu0 %v4347_v58  ;;  %3397 = vmatprep.subr.bf16.mxu1 %v4349_v59  ;;  %v4475_v59 = vcombine.high %v359_v52, %v367_v53  ;;  %v4477_v60 = vcombine.high %v360_v54, %v368_v55 }
  0xba   :  { %3312 = vmatpush1.bf16.msra.mxu0 %v4346_v0  ;;  %3398 = vmatpush1.bf16.msra.mxu1 %v4348_v1  ;;  %v384_v0 = vld [vmem:[%s6852_s1 + $0xb58] sm:$0xff]  ;;  %v4474_v1 = vcombine.low %v359_v52, %v367_v53  ;;  %v487_v53 = vld [vmem:[%s6852_s1 + $0xe90] sm:$0xff] }
  0xbb   :  { %3313 = vmatprep.subr.bf16.mxu0 %v4363_v2  ;;  %3399 = vmatprep.subr.bf16.mxu1 %v4365_v3  ;;  %v4476_v2 = vcombine.low %v360_v54, %v368_v55  ;;  %v4491_v3 = vcombine.high %v375_v61, %v383_v62  ;;  %v4493_v4 = vcombine.high %v376_v63, %v384_v0  ;;  %v495_v54 = vld [vmem:[%s6852_s1 + $0xed0] sm:$0xff]  ;;  %v488_v55 = vld [vmem:[%s6852_s1 + $0xe98] sm:$0xff] }
  0xbe   :  { %3314 = vmatpush1.bf16.msra.mxu0 %v4362_v8  ;;  %3400 = vmatpush1.bf16.msra.mxu1 %v4364_v9  ;;  %v400_v8 = vld [vmem:[%s6852_s1 + $0xbd8] sm:$0xff]  ;;  %v4490_v9 = vcombine.low %v375_v61, %v383_v62  ;;  %v503_v62 = vld [vmem:[%s6852_s1 + $0xf10] sm:$0xff] }
  0xbf   :  { %3315 = vmatprep.subr.bf16.mxu0 %v4379_v11  ;;  %3401 = vmatprep.subr.bf16.mxu1 %v4381_v12  ;;  %v4492_v11 = vcombine.low %v376_v63, %v384_v0  ;;  %v4507_v12 = vcombine.high %v391_v5, %v399_v6  ;;  %v4509_v13 = vcombine.high %v392_v7, %v400_v8  ;;  %v511_v63 = vld [vmem:[%s6852_s1 + $0xf50] sm:$0xff]  ;;  %v504_v0 = vld [vmem:[%s6852_s1 + $0xf18] sm:$0xff] }
  0xc2   :  { %3316 = vmatpush1.bf16.msra.mxu0 %v4378_v18  ;;  %3402 = vmatpush1.bf16.msra.mxu1 %v4380_v20  ;;  %v416_v18 = vld [vmem:[%s6852_s1 + $0xc58] sm:$0xff]  ;;  %v4506_v20 = vcombine.low %v391_v5, %v399_v6  ;;  %v519_v6 = vld [vmem:[%s6852_s1 + $0xf90] sm:$0xff] }
  0xc3   :  { %3328 = vmatprep.subr.bf16.mxu0 %v4395_v21  ;;  %3414 = vmatprep.subr.bf16.mxu1 %v4397_v22  ;;  %v4508_v21 = vcombine.low %v392_v7, %v400_v8  ;;  %v4523_v22 = vcombine.high %v407_v14, %v415_v15  ;;  %v4525_v23 = vcombine.high %v408_v16, %v416_v18  ;;  %v527_v7 = vld [vmem:[%s6852_s1 + $0xfd0] sm:$0xff]  ;;  %v520_v8 = vld [vmem:[%s6852_s1 + $0xf98] sm:$0xff] }
  0xc5   :  { %3318 = vmatmul.mubr.bf16.vlgmr.msra.gmra.mrb[4].mxu0 %v4941_v10  ;;  %3404 = vmatmul.mubr.bf16.vlgmr.msra.gmra.mrb[4].mxu1 %v4941_v10  ;;  %v328_v10 = vld [vmem:[%s6852_s1 + $0x998] sm:$0xff] }
  0xc6   :  { %3329 = vmatpush1.bf16.msra.mxu0 %v4394_v27  ;;  %3415 = vmatpush1.bf16.msra.mxu1 %v4396_v28  ;;  %v4445_v44 = vcombine.high %v328_v10, %v336_v41  ;;  %v4444_v49 = vcombine.low %v328_v10, %v336_v41  ;;  %v432_v27 = vld [vmem:[%s6852_s1 + $0xcd8] sm:$0xff]  ;;  %v4522_v28 = vcombine.low %v407_v14, %v415_v15  ;;  %v463_v10 = vld [vmem:[%s6852_s1 + $0xdd0] sm:$0xff]  ;;  %v25_v15 = vld [vmem:[%s6852_s1 + $0x20] sm:$0xff] }
  0xc7   :  { %3330 = vmatprep.subr.bf16.mxu0 %v4411_v29  ;;  %3416 = vmatprep.subr.bf16.mxu1 %v4413_v30  ;;  %v4524_v29 = vcombine.low %v408_v16, %v416_v18  ;;  %v4539_v30 = vcombine.high %v423_v24, %v431_v25  ;;  %v4541_v31 = vcombine.high %v424_v26, %v432_v27  ;;  %v456_v41 = vld [vmem:[%s6852_s1 + $0xd98] sm:$0xff]  ;;  %v33_v16 = vld [vmem:[%s6852_s1 + $0x60] sm:$0xff]  ;;  %v26_v18 = vld [vmem:[%s6852_s1 + $0x28] sm:$0xff] }
  0xc8   :  { %3360 = vmatprep.mubr.bf16.mxu0 %v4958_v19  ;;  %3446 = vmatprep.mubr.bf16.mxu1 %v4958_v19  ;;  %v344_v19 = vld [vmem:[%s6852_s1 + $0xa18] sm:$0xff] }
  0xc9   :  { %v4461_v51 = vcombine.high %v344_v19, %v352_v47  ;;  %v4460_v58 = vcombine.low %v344_v19, %v352_v47  ;;  %v479_v19 = vld [vmem:[%s6852_s1 + $0xe50] sm:$0xff]  ;;  %v472_v47 = vld [vmem:[%s6852_s1 + $0xe18] sm:$0xff] }
  0xca   :  { %3331 = vmatpush1.bf16.msra.mxu0 %v4410_v35  ;;  %3417 = vmatpush1.bf16.msra.mxu1 %v4412_v36  ;;  %v448_v35 = vld [vmem:[%s6852_s1 + $0xd58] sm:$0xff]  ;;  %v4538_v36 = vcombine.low %v423_v24, %v431_v25  ;;  %v41_v25 = vld [vmem:[%s6852_s1 + $0xa0] sm:$0xff] }
  0xcb   :  { %3332 = vmatprep.subr.bf16.mxu0 %v4427_v37  ;;  %3418 = vmatprep.subr.bf16.mxu1 %v4429_v38  ;;  %v4540_v37 = vcombine.low %v424_v26, %v432_v27  ;;  %v4555_v38 = vcombine.high %v439_v32, %v447_v33  ;;  %v4557_v39 = vcombine.high %v440_v34, %v448_v35  ;;  %v49_v26 = vld [vmem:[%s6852_s1 + $0xe0] sm:$0xff]  ;;  %v42_v27 = vld [vmem:[%s6852_s1 + $0xa8] sm:$0xff] }
  0xce   :  { %3333 = vmatpush1.bf16.msra.mxu0 %v4426_v42  ;;  %3419 = vmatpush1.bf16.msra.mxu1 %v4428_v56  ;;  %v464_v42 = vld [vmem:[%s6852_s1 + $0xdd8] sm:$0xff]  ;;  %v4554_v56 = vcombine.low %v439_v32, %v447_v33  ;;  %v57_v33 = vld [vmem:[%s6852_s1 + $0x120] sm:$0xff] }
  0xcf   :  { %3334 = vmatprep.subr.bf16.mxu0 %v4443_v43  ;;  %3420 = vmatprep.subr.bf16.mxu1 %v4445_v44  ;;  %v4556_v43 = vcombine.low %v440_v34, %v448_v35  ;;  %v4571_v44 = vcombine.high %v455_v40, %v463_v10  ;;  %v4573_v45 = vcombine.high %v456_v41, %v464_v42  ;;  %v65_v34 = vld [vmem:[%s6852_s1 + $0x160] sm:$0xff]  ;;  %v58_v35 = vld [vmem:[%s6852_s1 + $0x128] sm:$0xff] }
  0xd2   :  { %3335 = vmatpush1.bf16.msra.mxu0 %v4442_v48  ;;  %3421 = vmatpush1.bf16.msra.mxu1 %v4444_v49  ;;  %v480_v48 = vld [vmem:[%s6852_s1 + $0xe58] sm:$0xff]  ;;  %v4570_v49 = vcombine.low %v455_v40, %v463_v10  ;;  %v73_v10 = vld [vmem:[%s6852_s1 + $0x1a0] sm:$0xff] }
  0xd3   :  { %3336 = vmatprep.subr.bf16.mxu0 %v4459_v50  ;;  %3422 = vmatprep.subr.bf16.mxu1 %v4461_v51  ;;  %v4572_v50 = vcombine.low %v456_v41, %v464_v42  ;;  %v4587_v51 = vcombine.high %v471_v46, %v479_v19  ;;  %v4589_v52 = vcombine.high %v472_v47, %v480_v48  ;;  %v81_v41 = vld [vmem:[%s6852_s1 + $0x1e0] sm:$0xff]  ;;  %v74_v42 = vld [vmem:[%s6852_s1 + $0x1a8] sm:$0xff] }
  0xd6   :  { %3337 = vmatpush1.bf16.msra.mxu0 %v4458_v57  ;;  %3423 = vmatpush1.bf16.msra.mxu1 %v4460_v58  ;;  %v496_v57 = vld [vmem:[%s6852_s1 + $0xed8] sm:$0xff]  ;;  %v4586_v58 = vcombine.low %v471_v46, %v479_v19  ;;  %v89_v19 = vld [vmem:[%s6852_s1 + $0x220] sm:$0xff] }
  0xd7   :  { %3338 = vmatprep.subr.bf16.mxu0 %v4475_v59  ;;  %3424 = vmatprep.subr.bf16.mxu1 %v4477_v60  ;;  %v4588_v59 = vcombine.low %v472_v47, %v480_v48  ;;  %v4603_v60 = vcombine.high %v487_v53, %v495_v54  ;;  %v4605_v61 = vcombine.high %v488_v55, %v496_v57  ;;  %v97_v47 = vld [vmem:[%s6852_s1 + $0x260] sm:$0xff]  ;;  %v90_v48 = vld [vmem:[%s6852_s1 + $0x228] sm:$0xff] }
  0xda   :  { %3339 = vmatpush1.bf16.msra.mxu0 %v4474_v1  ;;  %3425 = vmatpush1.bf16.msra.mxu1 %v4476_v2  ;;  %v512_v1 = vld [vmem:[%s6852_s1 + $0xf58] sm:$0xff]  ;;  %v4602_v2 = vcombine.low %v487_v53, %v495_v54  ;;  %v105_v54 = vld [vmem:[%s6852_s1 + $0x2a0] sm:$0xff] }
  0xdb   :  { %3340 = vmatprep.subr.bf16.mxu0 %v4491_v3  ;;  %3426 = vmatprep.subr.bf16.mxu1 %v4493_v4  ;;  %v4604_v3 = vcombine.low %v488_v55, %v496_v57  ;;  %v4619_v4 = vcombine.high %v503_v62, %v511_v63  ;;  %v4621_v5 = vcombine.high %v504_v0, %v512_v1  ;;  %v113_v55 = vld [vmem:[%s6852_s1 + $0x2e0] sm:$0xff]  ;;  %v106_v57 = vld [vmem:[%s6852_s1 + $0x2a8] sm:$0xff] }
  0xde   :  { %3341 = vmatpush1.bf16.msra.mxu0 %v4490_v9  ;;  %3427 = vmatpush1.bf16.msra.mxu1 %v4492_v11  ;;  %v528_v9 = vld [vmem:[%s6852_s1 + $0xfd8] sm:$0xff]  ;;  %v4618_v11 = vcombine.low %v503_v62, %v511_v63  ;;  %v121_v63 = vld [vmem:[%s6852_s1 + $0x320] sm:$0xff] }
  0xdf   :  { %3342 = vmatprep.subr.bf16.mxu0 %v4507_v12  ;;  %3428 = vmatprep.subr.bf16.mxu1 %v4509_v13  ;;  %v4620_v12 = vcombine.low %v504_v0, %v512_v1  ;;  %v4635_v13 = vcombine.high %v519_v6, %v527_v7  ;;  %v4637_v14 = vcombine.high %v520_v8, %v528_v9  ;;  %v129_v0 = vld [vmem:[%s6852_s1 + $0x360] sm:$0xff]  ;;  %v122_v1 = vld [vmem:[%s6852_s1 + $0x328] sm:$0xff] }
  0xe2   :  { %3343 = vmatpush1.bf16.msra.mxu0 %v4506_v20  ;;  %3429 = vmatpush1.bf16.msra.mxu1 %v4508_v21  ;;  %v34_v20 = vld [vmem:[%s6852_s1 + $0x68] sm:$0xff]  ;;  %v4634_v21 = vcombine.low %v519_v6, %v527_v7  ;;  %v137_v7 = vld [vmem:[%s6852_s1 + $0x3a0] sm:$0xff] }
  0xe3   :  { %3344 = vmatprep.subr.bf16.mxu0 %v4523_v22  ;;  %3430 = vmatprep.subr.bf16.mxu1 %v4525_v23  ;;  %v4636_v22 = vcombine.low %v520_v8, %v528_v9  ;;  %v4143_v23 = vcombine.high %v25_v15, %v33_v16  ;;  %v4145_v24 = vcombine.high %v26_v18, %v34_v20  ;;  %v145_v8 = vld [vmem:[%s6852_s1 + $0x3e0] sm:$0xff]  ;;  %v138_v9 = vld [vmem:[%s6852_s1 + $0x3a8] sm:$0xff] }
  0xe6   :  { %3345 = vmatpush1.bf16.msra.mxu0 %v4522_v28  ;;  %3431 = vmatpush1.bf16.msra.mxu1 %v4524_v29  ;;  %v50_v28 = vld [vmem:[%s6852_s1 + $0xe8] sm:$0xff]  ;;  %v4142_v29 = vcombine.low %v25_v15, %v33_v16  ;;  %v153_v16 = vld [vmem:[%s6852_s1 + $0x420] sm:$0xff] }
  0xe7   :  { %3346 = vmatprep.subr.bf16.mxu0 %v4539_v30  ;;  %3432 = vmatprep.subr.bf16.mxu1 %v4541_v31  ;;  %v4144_v30 = vcombine.low %v26_v18, %v34_v20  ;;  %v4159_v31 = vcombine.high %v41_v25, %v49_v26  ;;  %v4161_v32 = vcombine.high %v42_v27, %v50_v28  ;;  %v161_v18 = vld [vmem:[%s6852_s1 + $0x460] sm:$0xff]  ;;  %v154_v20 = vld [vmem:[%s6852_s1 + $0x428] sm:$0xff] }
  0xea   :  { %3347 = vmatpush1.bf16.msra.mxu0 %v4538_v36  ;;  %3433 = vmatpush1.bf16.msra.mxu1 %v4540_v37  ;;  %v66_v36 = vld [vmem:[%s6852_s1 + $0x168] sm:$0xff]  ;;  %v4158_v37 = vcombine.low %v41_v25, %v49_v26  ;;  %v169_v26 = vld [vmem:[%s6852_s1 + $0x4a0] sm:$0xff] }
  0xeb   :  { %3348 = vmatprep.subr.bf16.mxu0 %v4555_v38  ;;  %3434 = vmatprep.subr.bf16.mxu1 %v4557_v39  ;;  %v4160_v38 = vcombine.low %v42_v27, %v50_v28  ;;  %v4175_v39 = vcombine.high %v57_v33, %v65_v34  ;;  %v4177_v40 = vcombine.high %v58_v35, %v66_v36  ;;  %v177_v27 = vld [vmem:[%s6852_s1 + $0x4e0] sm:$0xff]  ;;  %v170_v28 = vld [vmem:[%s6852_s1 + $0x4a8] sm:$0xff] }
  0xee   :  { %3349 = vmatpush1.bf16.msra.mxu0 %v4554_v56  ;;  %3435 = vmatpush1.bf16.msra.mxu1 %v4556_v43  ;;  %v82_v56 = vld [vmem:[%s6852_s1 + $0x1e8] sm:$0xff]  ;;  %v4174_v43 = vcombine.low %v57_v33, %v65_v34  ;;  %v185_v34 = vld [vmem:[%s6852_s1 + $0x520] sm:$0xff] }
  0xef   :  { %3350 = vmatprep.subr.bf16.mxu0 %v4571_v44  ;;  %3436 = vmatprep.subr.bf16.mxu1 %v4573_v45  ;;  %v4176_v44 = vcombine.low %v58_v35, %v66_v36  ;;  %v4191_v45 = vcombine.high %v73_v10, %v81_v41  ;;  %v4193_v46 = vcombine.high %v74_v42, %v82_v56  ;;  %v193_v35 = vld [vmem:[%s6852_s1 + $0x560] sm:$0xff]  ;;  %v186_v36 = vld [vmem:[%s6852_s1 + $0x528] sm:$0xff] }
  0xf2   :  { %3351 = vmatpush1.bf16.msra.mxu0 %v4570_v49  ;;  %3437 = vmatpush1.bf16.msra.mxu1 %v4572_v50  ;;  %v98_v49 = vld [vmem:[%s6852_s1 + $0x268] sm:$0xff]  ;;  %v4190_v50 = vcombine.low %v73_v10, %v81_v41  ;;  %v201_v41 = vld [vmem:[%s6852_s1 + $0x5a0] sm:$0xff] }
  0xf3   :  { %3352 = vmatprep.subr.bf16.mxu0 %v4587_v51  ;;  %3438 = vmatprep.subr.bf16.mxu1 %v4589_v52  ;;  %v4192_v51 = vcombine.low %v74_v42, %v82_v56  ;;  %v4207_v52 = vcombine.high %v89_v19, %v97_v47  ;;  %v4209_v53 = vcombine.high %v90_v48, %v98_v49  ;;  %v209_v42 = vld [vmem:[%s6852_s1 + $0x5e0] sm:$0xff]  ;;  %v202_v56 = vld [vmem:[%s6852_s1 + $0x5a8] sm:$0xff] }
  0xf6   :  { %3353 = vmatpush1.bf16.msra.mxu0 %v4586_v58  ;;  %3439 = vmatpush1.bf16.msra.mxu1 %v4588_v59  ;;  %v114_v58 = vld [vmem:[%s6852_s1 + $0x2e8] sm:$0xff]  ;;  %v4206_v59 = vcombine.low %v89_v19, %v97_v47  ;;  %v217_v47 = vld [vmem:[%s6852_s1 + $0x620] sm:$0xff] }
  0xf7   :  { %3354 = vmatprep.subr.bf16.mxu0 %v4603_v60  ;;  %3440 = vmatprep.subr.bf16.mxu1 %v4605_v61  ;;  %v4208_v60 = vcombine.low %v90_v48, %v98_v49  ;;  %v4223_v61 = vcombine.high %v105_v54, %v113_v55  ;;  %v4225_v62 = vcombine.high %v106_v57, %v114_v58  ;;  %v225_v48 = vld [vmem:[%s6852_s1 + $0x660] sm:$0xff]  ;;  %v218_v49 = vld [vmem:[%s6852_s1 + $0x628] sm:$0xff] }
  0xfa   :  { %3355 = vmatpush1.bf16.msra.mxu0 %v4602_v2  ;;  %3441 = vmatpush1.bf16.msra.mxu1 %v4604_v3  ;;  %v130_v2 = vld [vmem:[%s6852_s1 + $0x368] sm:$0xff]  ;;  %v4222_v3 = vcombine.low %v105_v54, %v113_v55  ;;  %v233_v55 = vld [vmem:[%s6852_s1 + $0x6a0] sm:$0xff] }
  0xfb   :  { %3356 = vmatprep.subr.bf16.mxu0 %v4619_v4  ;;  %3442 = vmatprep.subr.bf16.mxu1 %v4621_v5  ;;  %v4224_v4 = vcombine.low %v106_v57, %v114_v58  ;;  %v4239_v5 = vcombine.high %v121_v63, %v129_v0  ;;  %v4241_v6 = vcombine.high %v122_v1, %v130_v2  ;;  %v241_v57 = vld [vmem:[%s6852_s1 + $0x6e0] sm:$0xff]  ;;  %v234_v58 = vld [vmem:[%s6852_s1 + $0x6a8] sm:$0xff] }
  0xfe   :  { %3357 = vmatpush1.bf16.msra.mxu0 %v4618_v11  ;;  %3443 = vmatpush1.bf16.msra.mxu1 %v4620_v12  ;;  %v146_v11 = vld [vmem:[%s6852_s1 + $0x3e8] sm:$0xff]  ;;  %v4238_v12 = vcombine.low %v121_v63, %v129_v0  ;;  %v249_v0 = vld [vmem:[%s6852_s1 + $0x720] sm:$0xff] }
  0xff   :  { %3358 = vmatprep.subr.bf16.mxu0 %v4635_v13  ;;  %3444 = vmatprep.subr.bf16.mxu1 %v4637_v14  ;;  %v4240_v13 = vcombine.low %v122_v1, %v130_v2  ;;  %v4255_v14 = vcombine.high %v137_v7, %v145_v8  ;;  %v4257_v15 = vcombine.high %v138_v9, %v146_v11  ;;  %v257_v1 = vld [vmem:[%s6852_s1 + $0x760] sm:$0xff]  ;;  %v250_v2 = vld [vmem:[%s6852_s1 + $0x728] sm:$0xff] }
 0x102   :  { %3359 = vmatpush1.bf16.msra.mxu0 %v4634_v21  ;;  %3445 = vmatpush1.bf16.msra.mxu1 %v4636_v22  ;;  %v162_v21 = vld [vmem:[%s6852_s1 + $0x468] sm:$0xff]  ;;  %v4254_v22 = vcombine.low %v137_v7, %v145_v8  ;;  %v265_v8 = vld [vmem:[%s6852_s1 + $0x7a0] sm:$0xff] }
 0x103   :  { %3457 = vmatprep.subr.bf16.mxu0 %v4143_v23  ;;  %3543 = vmatprep.subr.bf16.mxu1 %v4145_v24  ;;  %v4256_v23 = vcombine.low %v138_v9, %v146_v11  ;;  %v4271_v24 = vcombine.high %v153_v16, %v161_v18  ;;  %v4273_v25 = vcombine.high %v154_v20, %v162_v21  ;;  %v273_v9 = vld [vmem:[%s6852_s1 + $0x7e0] sm:$0xff]  ;;  %v266_v11 = vld [vmem:[%s6852_s1 + $0x7a8] sm:$0xff] }
 0x105   :  { %3361 = vmatmul.mubr.bf16.vlgmr.msra.gmra.mrb[4].mxu0 %v5147_v17  ;;  %3447 = vmatmul.mubr.bf16.vlgmr.msra.gmra.mrb[4].mxu1 %v5147_v17  ;;  %v5570_v17 = vld [vmem:[%s6853_s0 + $0x4] ss:$16 sps:$4 sm:$0xff]  }
 0x106   :  { %3458 = vmatpush1.bf16.msra.mxu0 %v4142_v29  ;;  %3544 = vmatpush1.bf16.msra.mxu1 %v4144_v30  ;;  %v178_v29 = vld [vmem:[%s6852_s1 + $0x4e8] sm:$0xff]  ;;  %v4270_v30 = vcombine.low %v153_v16, %v161_v18  ;;  %v281_v18 = vld [vmem:[%s6852_s1 + $0x820] sm:$0xff] }
 0x107   :  { %3459 = vmatprep.subr.bf16.mxu0 %v4159_v31  ;;  %3545 = vmatprep.subr.bf16.mxu1 %v4161_v32  ;;  %v4272_v31 = vcombine.low %v154_v20, %v162_v21  ;;  %v4287_v32 = vcombine.high %v169_v26, %v177_v27  ;;  %v4289_v33 = vcombine.high %v170_v28, %v178_v29  ;;  %v289_v20 = vld [vmem:[%s6852_s1 + $0x860] sm:$0xff]  ;;  %v282_v21 = vld [vmem:[%s6852_s1 + $0x828] sm:$0xff] }
 0x108   :  { %3489 = vmatprep.mubr.bf16.mxu0 %v5570_v17  ;;  %3575 = vmatprep.mubr.bf16.mxu1 %v5570_v17 }
 0x10a   :  { %3460 = vmatpush1.bf16.msra.mxu0 %v4158_v37  ;;  %3546 = vmatpush1.bf16.msra.mxu1 %v4160_v38  ;;  %v194_v37 = vld [vmem:[%s6852_s1 + $0x568] sm:$0xff]  ;;  %v4286_v38 = vcombine.low %v169_v26, %v177_v27  ;;  %v297_v27 = vld [vmem:[%s6852_s1 + $0x8a0] sm:$0xff] }
 0x10b   :  { %3461 = vmatprep.subr.bf16.mxu0 %v4175_v39  ;;  %3547 = vmatprep.subr.bf16.mxu1 %v4177_v40  ;;  %v4288_v39 = vcombine.low %v170_v28, %v178_v29  ;;  %v4303_v40 = vcombine.high %v185_v34, %v193_v35  ;;  %v4305_v10 = vcombine.high %v186_v36, %v194_v37  ;;  %v305_v28 = vld [vmem:[%s6852_s1 + $0x8e0] sm:$0xff]  ;;  %v298_v29 = vld [vmem:[%s6852_s1 + $0x8a8] sm:$0xff] }
 0x10e   :  { %3462 = vmatpush1.bf16.msra.mxu0 %v4174_v43  ;;  %3548 = vmatpush1.bf16.msra.mxu1 %v4176_v44  ;;  %v210_v43 = vld [vmem:[%s6852_s1 + $0x5e8] sm:$0xff]  ;;  %v4302_v44 = vcombine.low %v185_v34, %v193_v35  ;;  %v313_v35 = vld [vmem:[%s6852_s1 + $0x920] sm:$0xff] }
 0x10f   :  { %3463 = vmatprep.subr.bf16.mxu0 %v4191_v45  ;;  %3549 = vmatprep.subr.bf16.mxu1 %v4193_v46  ;;  %v4304_v45 = vcombine.low %v186_v36, %v194_v37  ;;  %v4319_v46 = vcombine.high %v201_v41, %v209_v42  ;;  %v4321_v19 = vcombine.high %v202_v56, %v210_v43  ;;  %v321_v36 = vld [vmem:[%s6852_s1 + $0x960] sm:$0xff] }
 0x110   :  { %v5757_v37 = vld [vmem:[%s6853_s0] ss:$16 sps:$4 sm:$0xff]  }
 0x112   :  { %3464 = vmatpush1.bf16.msra.mxu0 %v4190_v50  ;;  %3550 = vmatpush1.bf16.msra.mxu1 %v4192_v51  ;;  %v226_v50 = vld [vmem:[%s6852_s1 + $0x668] sm:$0xff]  ;;  %v4318_v51 = vcombine.low %v201_v41, %v209_v42  ;;  %v4431_v41 = vcombine.high %v313_v35, %v321_v36 }
 0x113   :  { %3465 = vmatprep.subr.bf16.mxu0 %v4207_v52  ;;  %3551 = vmatprep.subr.bf16.mxu1 %v4209_v53  ;;  %v4320_v52 = vcombine.low %v202_v56, %v210_v43  ;;  %v4335_v53 = vcombine.high %v217_v47, %v225_v48  ;;  %v4337_v54 = vcombine.high %v218_v49, %v226_v50  ;;  %v329_v56 = vld [vmem:[%s6852_s1 + $0x9a0] sm:$0xff] }
 0x114   :  { %v337_v43 = vld [vmem:[%s6852_s1 + $0x9e0] sm:$0xff] }
 0x116   :  { %3466 = vmatpush1.bf16.msra.mxu0 %v4206_v59  ;;  %3552 = vmatpush1.bf16.msra.mxu1 %v4208_v60  ;;  %v242_v59 = vld [vmem:[%s6852_s1 + $0x6e8] sm:$0xff]  ;;  %v4334_v60 = vcombine.low %v217_v47, %v225_v48  ;;  %v4447_v48 = vcombine.high %v329_v56, %v337_v43 }
 0x117   :  { %3467 = vmatprep.subr.bf16.mxu0 %v4223_v61  ;;  %3553 = vmatprep.subr.bf16.mxu1 %v4225_v62  ;;  %v4336_v61 = vcombine.low %v218_v49, %v226_v50  ;;  %v4351_v62 = vcombine.high %v233_v55, %v241_v57  ;;  %v4353_v63 = vcombine.high %v234_v58, %v242_v59  ;;  %v345_v50 = vld [vmem:[%s6852_s1 + $0xa20] sm:$0xff] }
 0x11a   :  { %3468 = vmatpush1.bf16.msra.mxu0 %v4222_v3  ;;  %3554 = vmatpush1.bf16.msra.mxu1 %v4224_v4  ;;  %v258_v3 = vld [vmem:[%s6852_s1 + $0x768] sm:$0xff]  ;;  %v4350_v4 = vcombine.low %v233_v55, %v241_v57 }
 0x11b   :  { %3469 = vmatprep.subr.bf16.mxu0 %v4239_v5  ;;  %3555 = vmatprep.subr.bf16.mxu1 %v4241_v6  ;;  %v4352_v5 = vcombine.low %v234_v58, %v242_v59  ;;  %v4367_v6 = vcombine.high %v249_v0, %v257_v1  ;;  %v4369_v7 = vcombine.high %v250_v2, %v258_v3  ;;  %v361_v59 = vld [vmem:[%s6852_s1 + $0xaa0] sm:$0xff] }
 0x11e   :  { %3470 = vmatpush1.bf16.msra.mxu0 %v4238_v12  ;;  %3556 = vmatpush1.bf16.msra.mxu1 %v4240_v13  ;;  %v274_v12 = vld [vmem:[%s6852_s1 + $0x7e8] sm:$0xff]  ;;  %v4366_v13 = vcombine.low %v249_v0, %v257_v1 }
 0x11f   :  { %3471 = vmatprep.subr.bf16.mxu0 %v4255_v14  ;;  %3557 = vmatprep.subr.bf16.mxu1 %v4257_v15  ;;  %v4368_v14 = vcombine.low %v250_v2, %v258_v3  ;;  %v4383_v15 = vcombine.high %v265_v8, %v273_v9  ;;  %v4385_v16 = vcombine.high %v266_v11, %v274_v12  ;;  %v377_v3 = vld [vmem:[%s6852_s1 + $0xb20] sm:$0xff] }
 0x122   :  { %3472 = vmatpush1.bf16.msra.mxu0 %v4254_v22  ;;  %3558 = vmatpush1.bf16.msra.mxu1 %v4256_v23  ;;  %v290_v22 = vld [vmem:[%s6852_s1 + $0x868] sm:$0xff]  ;;  %v4382_v23 = vcombine.low %v265_v8, %v273_v9 }
 0x123   :  { %3473 = vmatprep.subr.bf16.mxu0 %v4271_v24  ;;  %3559 = vmatprep.subr.bf16.mxu1 %v4273_v25  ;;  %v4384_v24 = vcombine.low %v266_v11, %v274_v12  ;;  %v4399_v25 = vcombine.high %v281_v18, %v289_v20  ;;  %v4401_v26 = vcombine.high %v282_v21, %v290_v22 }
 0x126   :  { %3474 = vmatpush1.bf16.msra.mxu0 %v4270_v30  ;;  %3560 = vmatpush1.bf16.msra.mxu1 %v4272_v31  ;;  %v306_v30 = vld [vmem:[%s6852_s1 + $0x8e8] sm:$0xff]  ;;  %v4398_v31 = vcombine.low %v281_v18, %v289_v20 }
 0x127   :  { %3475 = vmatprep.subr.bf16.mxu0 %v4287_v32  ;;  %3561 = vmatprep.subr.bf16.mxu1 %v4289_v33  ;;  %v4400_v32 = vcombine.low %v282_v21, %v290_v22  ;;  %v4415_v33 = vcombine.high %v297_v27, %v305_v28  ;;  %v4417_v34 = vcombine.high %v298_v29, %v306_v30  ;;  %v394_v18 = vld [vmem:[%s6852_s1 + $0xba8] sm:$0xff] }
 0x128   :  { %v402_v20 = vld [vmem:[%s6852_s1 + $0xbe8] sm:$0xff] }
 0x12a   :  { %3476 = vmatpush1.bf16.msra.mxu0 %v4286_v38  ;;  %3562 = vmatpush1.bf16.msra.mxu1 %v4288_v39  ;;  %v314_v38 = vld [vmem:[%s6852_s1 + $0x928] sm:$0xff] }
 0x12b   :  { %3477 = vmatprep.subr.bf16.mxu0 %v4303_v40  ;;  %3563 = vmatprep.subr.bf16.mxu1 %v4305_v10  ;;  %v322_v39 = vld [vmem:[%s6852_s1 + $0x968] sm:$0xff]  ;;  %v4414_v40 = vcombine.low %v297_v27, %v305_v28  ;;  %v4416_v10 = vcombine.low %v298_v29, %v306_v30 }
 0x12c   :  { %v4433_v42 = vcombine.high %v314_v38, %v322_v39  ;;  %v4432_v47 = vcombine.low %v314_v38, %v322_v39 }
 0x12e   :  { %3478 = vmatpush1.bf16.msra.mxu0 %v4302_v44  ;;  %3564 = vmatpush1.bf16.msra.mxu1 %v4304_v45  ;;  %v5776_v44 = vld [vmem:[%s6853_s0 + $0xc] ss:$16 sps:$4 sm:$0xff]  }
 0x12f   :  { %3479 = vmatprep.subr.bf16.mxu0 %v4319_v46  ;;  %3565 = vmatprep.subr.bf16.mxu1 %v4321_v19  ;;  %v330_v45 = vld [vmem:[%s6852_s1 + $0x9a8] sm:$0xff]  ;;  %v4430_v19 = vcombine.low %v313_v35, %v321_v36 }
 0x130   :  { %v338_v46 = vld [vmem:[%s6852_s1 + $0x9e8] sm:$0xff] }
 0x131   :  { %v4449_v49 = vcombine.high %v330_v45, %v338_v46  ;;  %v4448_v55 = vcombine.low %v330_v45, %v338_v46  ;;  %v410_v35 = vld [vmem:[%s6852_s1 + $0xc28] sm:$0xff]  ;;  %v433_v45 = vld [vmem:[%s6852_s1 + $0xce0] sm:$0xff] }
 0x132   :  { %3480 = vmatpush1.bf16.msra.mxu0 %v4318_v51  ;;  %3566 = vmatpush1.bf16.msra.mxu1 %v4320_v52  ;;  %v353_v51 = vld [vmem:[%s6852_s1 + $0xa60] sm:$0xff]  ;;  %v346_v52 = vld [vmem:[%s6852_s1 + $0xa28] sm:$0xff] }
 0x133   :  { %3481 = vmatprep.subr.bf16.mxu0 %v4335_v53  ;;  %3567 = vmatprep.subr.bf16.mxu1 %v4337_v54  ;;  %v354_v53 = vld [vmem:[%s6852_s1 + $0xa68] sm:$0xff]  ;;  %v4446_v54 = vcombine.low %v329_v56, %v337_v43  ;;  %v4463_v57 = vcombine.high %v345_v50, %v353_v51  ;;  %v425_v43 = vld [vmem:[%s6852_s1 + $0xca0] sm:$0xff] }
 0x134   :  { %v4465_v58 = vcombine.high %v346_v52, %v354_v53  ;;  %v4464_v0 = vcombine.low %v346_v52, %v354_v53  ;;  %v418_v36 = vld [vmem:[%s6852_s1 + $0xc68] sm:$0xff]  ;;  %v449_v52 = vld [vmem:[%s6852_s1 + $0xd60] sm:$0xff] }
 0x135   :  { %v4529_v56 = vcombine.high %v410_v35, %v418_v36  ;;  %v426_v46 = vld [vmem:[%s6852_s1 + $0xca8] sm:$0xff] }
 0x136   :  { %3482 = vmatpush1.bf16.msra.mxu0 %v4334_v60  ;;  %3568 = vmatpush1.bf16.msra.mxu1 %v4336_v61  ;;  %v369_v60 = vld [vmem:[%s6852_s1 + $0xae0] sm:$0xff]  ;;  %v362_v61 = vld [vmem:[%s6852_s1 + $0xaa8] sm:$0xff] }
 0x137   :  { %3483 = vmatprep.subr.bf16.mxu0 %v4351_v62  ;;  %3569 = vmatprep.subr.bf16.mxu1 %v4353_v63  ;;  %v370_v62 = vld [vmem:[%s6852_s1 + $0xae8] sm:$0xff]  ;;  %v4462_v63 = vcombine.low %v345_v50, %v353_v51  ;;  %v4479_v1 = vcombine.high %v361_v59, %v369_v60  ;;  %v441_v51 = vld [vmem:[%s6852_s1 + $0xd20] sm:$0xff] }
 0x138   :  { %v4481_v2 = vcombine.high %v362_v61, %v370_v62  ;;  %v4480_v8 = vcombine.low %v362_v61, %v370_v62  ;;  %v442_v53 = vld [vmem:[%s6852_s1 + $0xd28] sm:$0xff]  ;;  %v465_v61 = vld [vmem:[%s6852_s1 + $0xde0] sm:$0xff] }
 0x139   :  { %v458_v62 = vld [vmem:[%s6852_s1 + $0xda8] sm:$0xff] }
 0x13a   :  { %3484 = vmatpush1.bf16.msra.mxu0 %v4350_v4  ;;  %3570 = vmatpush1.bf16.msra.mxu1 %v4352_v5  ;;  %v385_v4 = vld [vmem:[%s6852_s1 + $0xb60] sm:$0xff]  ;;  %v378_v5 = vld [vmem:[%s6852_s1 + $0xb28] sm:$0xff] }
 0x13b   :  { %3485 = vmatprep.subr.bf16.mxu0 %v4367_v6  ;;  %3571 = vmatprep.subr.bf16.mxu1 %v4369_v7  ;;  %v386_v6 = vld [vmem:[%s6852_s1 + $0xb68] sm:$0xff]  ;;  %v4478_v7 = vcombine.low %v361_v59, %v369_v60  ;;  %v4495_v9 = vcombine.high %v377_v3, %v385_v4  ;;  %v457_v60 = vld [vmem:[%s6852_s1 + $0xda0] sm:$0xff] }
 0x13c   :  { %v4497_v12 = vcombine.high %v378_v5, %v386_v6  ;;  %v4496_v27 = vcombine.low %v378_v5, %v386_v6  ;;  %v481_v5 = vld [vmem:[%s6852_s1 + $0xe60] sm:$0xff]  ;;  %v474_v6 = vld [vmem:[%s6852_s1 + $0xe28] sm:$0xff] }
 0x13e   :  { %3486 = vmatpush1.bf16.msra.mxu0 %v4366_v13  ;;  %3572 = vmatpush1.bf16.msra.mxu1 %v4368_v14  ;;  %v393_v13 = vld [vmem:[%s6852_s1 + $0xba0] sm:$0xff] }
 0x13f   :  { %3487 = vmatprep.subr.bf16.mxu0 %v4383_v15  ;;  %3573 = vmatprep.subr.bf16.mxu1 %v4385_v16  ;;  %v401_v14 = vld [vmem:[%s6852_s1 + $0xbe0] sm:$0xff] }
 0x140   :  { %v4511_v28 = vcombine.high %v393_v13, %v401_v14 }
 0x142   :  { %3488 = vmatpush1.bf16.msra.mxu0 %v4382_v23  ;;  %3574 = vmatpush1.bf16.msra.mxu1 %v4384_v24  ;;  %v4494_v24 = vcombine.low %v377_v3, %v385_v4  ;;  %v473_v4 = vld [vmem:[%s6852_s1 + $0xe20] sm:$0xff] }
 0x143   :  { %3500 = vmatprep.subr.bf16.mxu0 %v4399_v25  ;;  %3586 = vmatprep.subr.bf16.mxu1 %v4401_v26 }
 0x145   :  { %3490 = vmatmul.mubr.bf16.vlgmr.msra.gmra.mrb[8].mxu0 %v5757_v37  ;;  %3576 = vmatmul.mubr.bf16.vlgmr.msra.gmra.mrb[8].mxu1 %v5757_v37 }
 0x146   :  { %3501 = vmatpush1.bf16.msra.mxu0 %v4398_v31  ;;  %3587 = vmatpush1.bf16.msra.mxu1 %v4400_v32  ;;  %v4513_v32 = vcombine.high %v394_v18, %v402_v20 }
 0x147   :  { %3502 = vmatprep.subr.bf16.mxu0 %v4415_v33  ;;  %3588 = vmatprep.subr.bf16.mxu1 %v4417_v34  ;;  %v409_v33 = vld [vmem:[%s6852_s1 + $0xc20] sm:$0xff] }
 0x148   :  { %3532 = vmatprep.mubr.bf16.mxu0 %v5776_v44  ;;  %3618 = vmatprep.mubr.bf16.mxu1 %v5776_v44  ;;  %v417_v34 = vld [vmem:[%s6852_s1 + $0xc60] sm:$0xff] }
 0x14a   :  { %3503 = vmatpush1.bf16.msra.mxu0 %v4414_v40  ;;  %3589 = vmatpush1.bf16.msra.mxu1 %v4416_v10  ;;  %v4510_v40 = vcombine.low %v393_v13, %v401_v14  ;;  %v4512_v10 = vcombine.low %v394_v18, %v402_v20  ;;  %v489_v14 = vld [vmem:[%s6852_s1 + $0xea0] sm:$0xff]  ;;  %v490_v20 = vld [vmem:[%s6852_s1 + $0xea8] sm:$0xff] }
 0x14b   :  { %3504 = vmatprep.subr.bf16.mxu0 %v4431_v41  ;;  %3590 = vmatprep.subr.bf16.mxu1 %v4433_v42  ;;  %v4527_v41 = vcombine.high %v409_v33, %v417_v34  ;;  %v497_v18 = vld [vmem:[%s6852_s1 + $0xee0] sm:$0xff] }
 0x14e   :  { %3505 = vmatpush1.bf16.msra.mxu0 %v4430_v19  ;;  %3591 = vmatpush1.bf16.msra.mxu1 %v4432_v47  ;;  %v434_v19 = vld [vmem:[%s6852_s1 + $0xce8] sm:$0xff]  ;;  %v4526_v47 = vcombine.low %v409_v33, %v417_v34 }
 0x14f   :  { %3506 = vmatprep.subr.bf16.mxu0 %v4447_v48  ;;  %3592 = vmatprep.subr.bf16.mxu1 %v4449_v49  ;;  %v4528_v48 = vcombine.low %v410_v35, %v418_v36  ;;  %v4543_v49 = vcombine.high %v425_v43, %v433_v45  ;;  %v4545_v50 = vcombine.high %v426_v46, %v434_v19  ;;  %v506_v33 = vld [vmem:[%s6852_s1 + $0xf28] sm:$0xff] }
 0x150   :  { %v514_v34 = vld [vmem:[%s6852_s1 + $0xf68] sm:$0xff]  ;;  %v4606_v35 = vcombine.low %v489_v14, %v497_v18 }
 0x152   :  { %3507 = vmatpush1.bf16.msra.mxu0 %v4446_v54  ;;  %3593 = vmatpush1.bf16.msra.mxu1 %v4448_v55  ;;  %v450_v54 = vld [vmem:[%s6852_s1 + $0xd68] sm:$0xff]  ;;  %v4542_v55 = vcombine.low %v425_v43, %v433_v45 }
 0x153   :  { %3508 = vmatprep.subr.bf16.mxu0 %v4463_v57  ;;  %3594 = vmatprep.subr.bf16.mxu1 %v4465_v58  ;;  %v4544_v57 = vcombine.low %v426_v46, %v434_v19  ;;  %v4559_v58 = vcombine.high %v441_v51, %v449_v52  ;;  %v4561_v59 = vcombine.high %v442_v53, %v450_v54  ;;  %v530_v43 = vld [vmem:[%s6852_s1 + $0xfe8] sm:$0xff] }
 0x154   :  { %v4624_v46 = vcombine.low %v506_v33, %v514_v34 }
 0x156   :  { %3509 = vmatpush1.bf16.msra.mxu0 %v4462_v63  ;;  %3595 = vmatpush1.bf16.msra.mxu1 %v4464_v0  ;;  %v466_v63 = vld [vmem:[%s6852_s1 + $0xde8] sm:$0xff]  ;;  %v4558_v0 = vcombine.low %v441_v51, %v449_v52  ;;  %v36_v51 = vld [vmem:[%s6852_s1 + $0x78] sm:$0xff] }
 0x157   :  { %3510 = vmatprep.subr.bf16.mxu0 %v4479_v1  ;;  %3596 = vmatprep.subr.bf16.mxu1 %v4481_v2  ;;  %v4560_v1 = vcombine.low %v442_v53, %v450_v54  ;;  %v4575_v2 = vcombine.high %v457_v60, %v465_v61  ;;  %v4577_v3 = vcombine.high %v458_v62, %v466_v63 }
 0x158   :  { %v5822_v11 = vpop.f32.mrb[0].mxu0  ;;  %v5830_v15 = vpop.f32.mrb[0].mxu1 }
 0x159   :  { %v5832_v16 = vpop.f32.mrb[1].mxu0  ;;  %v5842_v22 = vpop.f32.mrb[1].mxu1 }
 0x15a   :  { %v3801_v21 = vadd.f32 %v5832_v16, %v5822_v11  ;;  %v5844_v23 = vpop.f32.mrb[2].mxu0  ;;  %3511 = vmatpush1.bf16.msra.mxu0 %v4478_v7  ;;  %v5846_v25 = vpop.f32.mrb[2].mxu1  ;;  %3597 = vmatpush1.bf16.msra.mxu1 %v4480_v8  ;;  %v482_v7 = vld [vmem:[%s6852_s1 + $0xe68] sm:$0xff]  ;;  %v4574_v8 = vcombine.low %v457_v60, %v465_v61  ;;  %v52_v60 = vld [vmem:[%s6852_s1 + $0xf8] sm:$0xff] }
 0x15b   :  { %v5848_v26 = vpop.f32.mrb[3].mxu0  ;;  %3512 = vmatprep.subr.bf16.mxu0 %v4495_v9  ;;  %v5853_v31 = vpop.f32.mrb[3].mxu1  ;;  %3598 = vmatprep.subr.bf16.mxu1 %v4497_v12  ;;  %v4576_v9 = vcombine.low %v458_v62, %v466_v63  ;;  %v4591_v12 = vcombine.high %v473_v4, %v481_v5  ;;  %v4593_v13 = vcombine.high %v474_v6, %v482_v7 }
 0x15c   :  { %v3802_v29 = vadd.f32 %v3801_v21, %v5830_v15  ;;  %v3818_v30 = vadd.f32 %v5848_v26, %v5844_v23  ;;  %v498_v21 = vld [vmem:[%s6852_s1 + $0xee8] sm:$0xff] }
 0x15d   :  { %v4608_v36 = vcombine.low %v490_v20, %v498_v21 }
 0x15e   :  { %v5868_v38 = vadd.f32 %v3802_v29, %v5842_v22  ;;  %v3819_v39 = vadd.f32 %v3818_v30, %v5846_v25  ;;  %3513 = vmatpush1.bf16.msra.mxu0 %v4494_v24  ;;  %3599 = vmatpush1.bf16.msra.mxu1 %v4496_v27  ;;  %v4590_v24 = vcombine.low %v473_v4, %v481_v5  ;;  %v505_v30 = vld [vmem:[%s6852_s1 + $0xf20] sm:$0xff]  ;;  %v60_v4 = vld [vmem:[%s6852_s1 + $0x138] sm:$0xff] }
 0x15f   :  { %3514 = vmatprep.subr.bf16.mxu0 %v4511_v28  ;;  %3600 = vmatprep.subr.bf16.mxu1 %v4513_v32  ;;  %v4592_v27 = vcombine.low %v474_v6, %v482_v7  ;;  %v4607_v28 = vcombine.high %v489_v14, %v497_v18  ;;  %v4609_v29 = vcombine.high %v490_v20, %v498_v21  ;;  %v513_v32 = vld [vmem:[%s6852_s1 + $0xf60] sm:$0xff]  ;;  %v68_v5 = vld [vmem:[%s6852_s1 + $0x178] sm:$0xff] }
 0x160   :  { %v5872_v42 = vadd.f32 %v3819_v39, %v5853_v31  ;;  %v4623_v39 = vcombine.high %v505_v30, %v513_v32  ;;  %v4622_v45 = vcombine.low %v505_v30, %v513_v32  ;;  %v76_v14 = vld [vmem:[%s6852_s1 + $0x1b8] sm:$0xff]  ;;  %v4180_v21 = vcombine.low %v60_v4, %v68_v5 }
 0x161   :  { %v84_v18 = vld [vmem:[%s6852_s1 + $0x1f8] sm:$0xff] }
 0x162   :  { %3515 = vmatpush1.bf16.msra.mxu0 %v4510_v40  ;;  %3601 = vmatpush1.bf16.msra.mxu1 %v4512_v10  ;;  %v4625_v40 = vcombine.high %v506_v33, %v514_v34  ;;  %v521_v10 = vld [vmem:[%s6852_s1 + $0xfa0] sm:$0xff]  ;;  %v100_v30 = vld [vmem:[%s6852_s1 + $0x278] sm:$0xff]  ;;  %v4196_v33 = vcombine.low %v76_v14, %v84_v18 }
 0x163   :  { %3516 = vmatprep.subr.bf16.mxu0 %v4527_v41  ;;  %3602 = vmatprep.subr.bf16.mxu1 %v4529_v56  ;;  %v529_v41 = vld [vmem:[%s6852_s1 + $0xfe0] sm:$0xff]  ;;  %v522_v56 = vld [vmem:[%s6852_s1 + $0xfa8] sm:$0xff] }
 0x164   :  { %v4639_v19 = vcombine.high %v521_v10, %v529_v41  ;;  %v4638_v52 = vcombine.low %v521_v10, %v529_v41  ;;  %v4640_v53 = vcombine.low %v522_v56, %v530_v43  ;;  %v116_v10 = vld [vmem:[%s6852_s1 + $0x2f8] sm:$0xff] }
 0x166   :  { %3517 = vmatpush1.bf16.msra.mxu0 %v4526_v47  ;;  %3603 = vmatpush1.bf16.msra.mxu1 %v4528_v48  ;;  %v4641_v47 = vcombine.high %v522_v56, %v530_v43  ;;  %v27_v48 = vld [vmem:[%s6852_s1 + $0x30] sm:$0xff] }
 0x167   :  { %3518 = vmatprep.subr.bf16.mxu0 %v4543_v49  ;;  %3604 = vmatprep.subr.bf16.mxu1 %v4545_v50  ;;  %v35_v49 = vld [vmem:[%s6852_s1 + $0x70] sm:$0xff]  ;;  %v28_v50 = vld [vmem:[%s6852_s1 + $0x38] sm:$0xff] }
 0x168   :  { %v4147_v54 = vcombine.high %v27_v48, %v35_v49  ;;  %v4146_v61 = vcombine.low %v27_v48, %v35_v49  ;;  %v4148_v62 = vcombine.low %v28_v50, %v36_v51  ;;  %v132_v48 = vld [vmem:[%s6852_s1 + $0x378] sm:$0xff] }
 0x16a   :  { %3519 = vmatpush1.bf16.msra.mxu0 %v4542_v55  ;;  %3605 = vmatpush1.bf16.msra.mxu1 %v4544_v57  ;;  %v4149_v55 = vcombine.high %v28_v50, %v36_v51  ;;  %v43_v57 = vld [vmem:[%s6852_s1 + $0xb0] sm:$0xff] }
 0x16b   :  { %3520 = vmatprep.subr.bf16.mxu0 %v4559_v58  ;;  %3606 = vmatprep.subr.bf16.mxu1 %v4561_v59  ;;  %v51_v58 = vld [vmem:[%s6852_s1 + $0xf0] sm:$0xff]  ;;  %v44_v59 = vld [vmem:[%s6852_s1 + $0xb8] sm:$0xff] }
 0x16c   :  { %v4163_v63 = vcombine.high %v43_v57, %v51_v58  ;;  %v4162_v6 = vcombine.low %v43_v57, %v51_v58  ;;  %v4164_v7 = vcombine.low %v44_v59, %v52_v60  ;;  %v148_v57 = vld [vmem:[%s6852_s1 + $0x3f8] sm:$0xff] }
 0x16e   :  { %3521 = vmatpush1.bf16.msra.mxu0 %v4558_v0  ;;  %3607 = vmatpush1.bf16.msra.mxu1 %v4560_v1  ;;  %v4165_v0 = vcombine.high %v44_v59, %v52_v60  ;;  %v59_v1 = vld [vmem:[%s6852_s1 + $0x130] sm:$0xff] }
 0x16f   :  { %3522 = vmatprep.subr.bf16.mxu0 %v4575_v2  ;;  %3608 = vmatprep.subr.bf16.mxu1 %v4577_v3  ;;  %v67_v2 = vld [vmem:[%s6852_s1 + $0x170] sm:$0xff]  ;;  %v5991_v3 = vld [vmem:[%s6853_s0 + $0x8] ss:$16 sps:$4 sm:$0xff]  }
 0x170   :  { %v4178_v20 = vcombine.low %v59_v1, %v67_v2 }
 0x172   :  { %3523 = vmatpush1.bf16.msra.mxu0 %v4574_v8  ;;  %3609 = vmatpush1.bf16.msra.mxu1 %v4576_v9  ;;  %v4179_v8 = vcombine.high %v59_v1, %v67_v2  ;;  %v4181_v9 = vcombine.high %v60_v4, %v68_v5  ;;  %v164_v1 = vld [vmem:[%s6852_s1 + $0x478] sm:$0xff] }
 0x173   :  { %3524 = vmatprep.subr.bf16.mxu0 %v4591_v12  ;;  %3610 = vmatprep.subr.bf16.mxu1 %v4593_v13  ;;  %v75_v12 = vld [vmem:[%s6852_s1 + $0x1b0] sm:$0xff] }
 0x174   :  { %v83_v13 = vld [vmem:[%s6852_s1 + $0x1f0] sm:$0xff] }
 0x175   :  { %v4194_v32 = vcombine.low %v75_v12, %v83_v13 }
 0x176   :  { %3525 = vmatpush1.bf16.msra.mxu0 %v4590_v24  ;;  %3611 = vmatpush1.bf16.msra.mxu1 %v4592_v27  ;;  %v4195_v24 = vcombine.high %v75_v12, %v83_v13  ;;  %v4197_v27 = vcombine.high %v76_v14, %v84_v18  ;;  %v180_v12 = vld [vmem:[%s6852_s1 + $0x4f8] sm:$0xff] }
 0x177   :  { %3526 = vmatprep.subr.bf16.mxu0 %v4607_v28  ;;  %3612 = vmatprep.subr.bf16.mxu1 %v4609_v29  ;;  %v91_v28 = vld [vmem:[%s6852_s1 + $0x230] sm:$0xff] }
 0x178   :  { %v99_v29 = vld [vmem:[%s6852_s1 + $0x270] sm:$0xff] }
 0x179   :  { %v4211_v34 = vcombine.high %v91_v28, %v99_v29  ;;  %v4210_v41 = vcombine.low %v91_v28, %v99_v29  ;;  %v196_v28 = vld [vmem:[%s6852_s1 + $0x578] sm:$0xff] }
 0x17a   :  { %3527 = vmatpush1.bf16.msra.mxu0 %v4606_v35  ;;  %3613 = vmatpush1.bf16.msra.mxu1 %v4608_v36  ;;  %v107_v36 = vld [vmem:[%s6852_s1 + $0x2b0] sm:$0xff] }
 0x17b   :  { %3528 = vmatprep.subr.bf16.mxu0 %v4623_v39  ;;  %3614 = vmatprep.subr.bf16.mxu1 %v4625_v40  ;;  %v115_v39 = vld [vmem:[%s6852_s1 + $0x2f0] sm:$0xff]  ;;  %v108_v40 = vld [vmem:[%s6852_s1 + $0x2b8] sm:$0xff] }
 0x17c   :  { %v4227_v43 = vcombine.high %v107_v36, %v115_v39  ;;  %v4226_v49 = vcombine.low %v107_v36, %v115_v39  ;;  %v4228_v50 = vcombine.low %v108_v40, %v116_v10  ;;  %v212_v36 = vld [vmem:[%s6852_s1 + $0x5f8] sm:$0xff] }
 0x17e   :  { %3529 = vmatpush1.bf16.msra.mxu0 %v4622_v45  ;;  %3615 = vmatpush1.bf16.msra.mxu1 %v4624_v46  ;;  %v4229_v45 = vcombine.high %v108_v40, %v116_v10  ;;  %v123_v46 = vld [vmem:[%s6852_s1 + $0x330] sm:$0xff] }
 0x17f   :  { %3530 = vmatprep.subr.bf16.mxu0 %v4639_v19  ;;  %3616 = vmatprep.subr.bf16.mxu1 %v4641_v47  ;;  %v131_v19 = vld [vmem:[%s6852_s1 + $0x370] sm:$0xff]  ;;  %v124_v47 = vld [vmem:[%s6852_s1 + $0x338] sm:$0xff] }
 0x180   :  { %v4243_v51 = vcombine.high %v123_v46, %v131_v19  ;;  %v4242_v58 = vcombine.low %v123_v46, %v131_v19  ;;  %v4244_v59 = vcombine.low %v124_v47, %v132_v48  ;;  %v228_v46 = vld [vmem:[%s6852_s1 + $0x678] sm:$0xff] }
 0x182   :  { %3531 = vmatpush1.bf16.msra.mxu0 %v4638_v52  ;;  %3617 = vmatpush1.bf16.msra.mxu1 %v4640_v53  ;;  %v4245_v52 = vcombine.high %v124_v47, %v132_v48  ;;  %v139_v53 = vld [vmem:[%s6852_s1 + $0x3b0] sm:$0xff] }
 0x183   :  { %3629 = vmatprep.subr.bf16.mxu0 %v4147_v54  ;;  %3715 = vmatprep.subr.bf16.mxu1 %v4149_v55  ;;  %v147_v54 = vld [vmem:[%s6852_s1 + $0x3f0] sm:$0xff]  ;;  %v140_v55 = vld [vmem:[%s6852_s1 + $0x3b8] sm:$0xff] }
 0x184   :  { %v4259_v60 = vcombine.high %v139_v53, %v147_v54  ;;  %v4258_v2 = vcombine.low %v139_v53, %v147_v54  ;;  %v4260_v4 = vcombine.low %v140_v55, %v148_v57  ;;  %v244_v53 = vld [vmem:[%s6852_s1 + $0x6f8] sm:$0xff] }
 0x185   :  { %3533 = vmatmul.mubr.bf16.vlgmr.msra.gmra.mrb[8].mxu0 %v5991_v3  ;;  %3619 = vmatmul.mubr.bf16.vlgmr.msra.gmra.mrb[8].mxu1 %v5991_v3 }
 0x186   :  { %3630 = vmatpush1.bf16.msra.mxu0 %v4146_v61  ;;  %3716 = vmatpush1.bf16.msra.mxu1 %v4148_v62  ;;  %v4261_v61 = vcombine.high %v140_v55, %v148_v57  ;;  %v155_v62 = vld [vmem:[%s6852_s1 + $0x430] sm:$0xff] }
 0x187   :  { %3631 = vmatprep.subr.bf16.mxu0 %v4163_v63  ;;  %3717 = vmatprep.subr.bf16.mxu1 %v4165_v0  ;;  %v163_v63 = vld [vmem:[%s6852_s1 + $0x470] sm:$0xff]  ;;  %v156_v0 = vld [vmem:[%s6852_s1 + $0x438] sm:$0xff] }
 0x188   :  { %3661 = vmatprep.mubr.bf16.mxu0 %v5570_v17  ;;  %3747 = vmatprep.mubr.bf16.mxu1 %v5570_v17  ;;  %v92_v17 = vld [vmem:[%s6852_s1 + $0x238] sm:$0xff]  ;;  %v4275_v5 = vcombine.high %v155_v62, %v163_v63  ;;  %v4274_v13 = vcombine.low %v155_v62, %v163_v63  ;;  %v4276_v14 = vcombine.low %v156_v0, %v164_v1 }
 0x189   :  { %v4213_v35 = vcombine.high %v92_v17, %v100_v30  ;;  %v4212_v56 = vcombine.low %v92_v17, %v100_v30  ;;  %v260_v62 = vld [vmem:[%s6852_s1 + $0x778] sm:$0xff] }
 0x18a   :  { %3632 = vmatpush1.bf16.msra.mxu0 %v4162_v6  ;;  %3718 = vmatpush1.bf16.msra.mxu1 %v4164_v7  ;;  %v4277_v6 = vcombine.high %v156_v0, %v164_v1  ;;  %v171_v7 = vld [vmem:[%s6852_s1 + $0x4b0] sm:$0xff] }
 0x18b   :  { %3633 = vmatprep.subr.bf16.mxu0 %v4179_v8  ;;  %3719 = vmatprep.subr.bf16.mxu1 %v4181_v9  ;;  %v179_v8 = vld [vmem:[%s6852_s1 + $0x4f0] sm:$0xff]  ;;  %v172_v9 = vld [vmem:[%s6852_s1 + $0x4b8] sm:$0xff] }
 0x18c   :  { %v4291_v18 = vcombine.high %v171_v7, %v179_v8  ;;  %v4290_v29 = vcombine.low %v171_v7, %v179_v8  ;;  %v4292_v17 = vcombine.low %v172_v9, %v180_v12  ;;  %v276_v7 = vld [vmem:[%s6852_s1 + $0x7f8] sm:$0xff] }
 0x18e   :  { %3634 = vmatpush1.bf16.msra.mxu0 %v4178_v20  ;;  %3720 = vmatpush1.bf16.msra.mxu1 %v4180_v21  ;;  %v4293_v20 = vcombine.high %v172_v9, %v180_v12  ;;  %v187_v21 = vld [vmem:[%s6852_s1 + $0x530] sm:$0xff] }
 0x18f   :  { %3635 = vmatprep.subr.bf16.mxu0 %v4195_v24  ;;  %3721 = vmatprep.subr.bf16.mxu1 %v4197_v27  ;;  %v195_v24 = vld [vmem:[%s6852_s1 + $0x570] sm:$0xff]  ;;  %v188_v27 = vld [vmem:[%s6852_s1 + $0x538] sm:$0xff] }
 0x190   :  { %v4307_v30 = vcombine.high %v187_v21, %v195_v24  ;;  %v4306_v39 = vcombine.low %v187_v21, %v195_v24  ;;  %v4308_v40 = vcombine.low %v188_v27, %v196_v28  ;;  %v292_v21 = vld [vmem:[%s6852_s1 + $0x878] sm:$0xff] }
 0x192   :  { %3636 = vmatpush1.bf16.msra.mxu0 %v4194_v32  ;;  %3722 = vmatpush1.bf16.msra.mxu1 %v4196_v33  ;;  %v4309_v32 = vcombine.high %v188_v27, %v196_v28  ;;  %v203_v33 = vld [vmem:[%s6852_s1 + $0x5b0] sm:$0xff] }
 0x193   :  { %3637 = vmatprep.subr.bf16.mxu0 %v4211_v34  ;;  %3723 = vmatprep.subr.bf16.mxu1 %v4213_v35  ;;  %v211_v34 = vld [vmem:[%s6852_s1 + $0x5f0] sm:$0xff]  ;;  %v204_v35 = vld [vmem:[%s6852_s1 + $0x5b8] sm:$0xff] }
 0x194   :  { %v4323_v10 = vcombine.high %v203_v33, %v211_v34  ;;  %v4322_v19 = vcombine.low %v203_v33, %v211_v34  ;;  %v4324_v47 = vcombine.low %v204_v35, %v212_v36  ;;  %v308_v33 = vld [vmem:[%s6852_s1 + $0x8f8] sm:$0xff] }
 0x196   :  { %3638 = vmatpush1.bf16.msra.mxu0 %v4210_v41  ;;  %3724 = vmatpush1.bf16.msra.mxu1 %v4212_v56  ;;  %v4325_v41 = vcombine.high %v204_v35, %v212_v36  ;;  %v219_v56 = vld [vmem:[%s6852_s1 + $0x630] sm:$0xff] }
 0x197   :  { %3639 = vmatprep.subr.bf16.mxu0 %v4227_v43  ;;  %3725 = vmatprep.subr.bf16.mxu1 %v4229_v45  ;;  %v227_v43 = vld [vmem:[%s6852_s1 + $0x670] sm:$0xff]  ;;  %v220_v45 = vld [vmem:[%s6852_s1 + $0x638] sm:$0xff] }
 0x198   :  { %v4339_v48 = vcombine.high %v219_v56, %v227_v43  ;;  %v4338_v54 = vcombine.low %v219_v56, %v227_v43  ;;  %v4340_v55 = vcombine.low %v220_v45, %v228_v46  ;;  %v324_v56 = vld [vmem:[%s6852_s1 + $0x978] sm:$0xff] }
 0x19a   :  { %3640 = vmatpush1.bf16.msra.mxu0 %v4226_v49  ;;  %3726 = vmatpush1.bf16.msra.mxu1 %v4228_v50  ;;  %v4341_v49 = vcombine.high %v220_v45, %v228_v46  ;;  %v235_v50 = vld [vmem:[%s6852_s1 + $0x6b0] sm:$0xff] }
 0x19b   :  { %3641 = vmatprep.subr.bf16.mxu0 %v4243_v51  ;;  %3727 = vmatprep.subr.bf16.mxu1 %v4245_v52  ;;  %v243_v51 = vld [vmem:[%s6852_s1 + $0x6f0] sm:$0xff]  ;;  %v236_v52 = vld [vmem:[%s6852_s1 + $0x6b8] sm:$0xff] }
 0x19c   :  { %v4355_v57 = vcombine.high %v235_v50, %v243_v51  ;;  %v4354_v63 = vcombine.low %v235_v50, %v243_v51  ;;  %v4356_v0 = vcombine.low %v236_v52, %v244_v53 }
 0x19e   :  { %3642 = vmatpush1.bf16.msra.mxu0 %v4242_v58  ;;  %3728 = vmatpush1.bf16.msra.mxu1 %v4244_v59  ;;  %v4357_v58 = vcombine.high %v236_v52, %v244_v53  ;;  %v251_v59 = vld [vmem:[%s6852_s1 + $0x730] sm:$0xff] }
 0x19f   :  { %3643 = vmatprep.subr.bf16.mxu0 %v4259_v60  ;;  %3729 = vmatprep.subr.bf16.mxu1 %v4261_v61  ;;  %v259_v60 = vld [vmem:[%s6852_s1 + $0x770] sm:$0xff]  ;;  %v252_v61 = vld [vmem:[%s6852_s1 + $0x738] sm:$0xff] }
 0x1a0   :  { %v4371_v1 = vcombine.high %v251_v59, %v259_v60  ;;  %v4370_v8 = vcombine.low %v251_v59, %v259_v60  ;;  %v4372_v9 = vcombine.low %v252_v61, %v260_v62 }
 0x1a2   :  { %3644 = vmatpush1.bf16.msra.mxu0 %v4258_v2  ;;  %3730 = vmatpush1.bf16.msra.mxu1 %v4260_v4  ;;  %v4373_v2 = vcombine.high %v252_v61, %v260_v62  ;;  %v267_v4 = vld [vmem:[%s6852_s1 + $0x7b0] sm:$0xff] }
 0x1a3   :  { %3645 = vmatprep.subr.bf16.mxu0 %v4275_v5  ;;  %3731 = vmatprep.subr.bf16.mxu1 %v4277_v6  ;;  %v275_v5 = vld [vmem:[%s6852_s1 + $0x7f0] sm:$0xff]  ;;  %v268_v6 = vld [vmem:[%s6852_s1 + $0x7b8] sm:$0xff] }
 0x1a4   :  { %v4387_v12 = vcombine.high %v267_v4, %v275_v5  ;;  %v4386_v24 = vcombine.low %v267_v4, %v275_v5  ;;  %v4388_v27 = vcombine.low %v268_v6, %v276_v7  ;;  %v363_v62 = vld [vmem:[%s6852_s1 + $0xab0] sm:$0xff] }
 0x1a6   :  { %3646 = vmatpush1.bf16.msra.mxu0 %v4274_v13  ;;  %3732 = vmatpush1.bf16.msra.mxu1 %v4276_v14  ;;  %v4389_v13 = vcombine.high %v268_v6, %v276_v7  ;;  %v283_v14 = vld [vmem:[%s6852_s1 + $0x830] sm:$0xff] }
 0x1a7   :  { %3647 = vmatprep.subr.bf16.mxu0 %v4291_v18  ;;  %3733 = vmatprep.subr.bf16.mxu1 %v4293_v20  ;;  %v291_v18 = vld [vmem:[%s6852_s1 + $0x870] sm:$0xff]  ;;  %v284_v20 = vld [vmem:[%s6852_s1 + $0x838] sm:$0xff] }
 0x1a8   :  { %v4403_v28 = vcombine.high %v283_v14, %v291_v18  ;;  %v4402_v34 = vcombine.low %v283_v14, %v291_v18  ;;  %v4404_v35 = vcombine.low %v284_v20, %v292_v21  ;;  %v379_v7 = vld [vmem:[%s6852_s1 + $0xb30] sm:$0xff] }
 0x1aa   :  { %3648 = vmatpush1.bf16.msra.mxu0 %v4290_v29  ;;  %3734 = vmatpush1.bf16.msra.mxu1 %v4292_v17  ;;  %v4405_v29 = vcombine.high %v284_v20, %v292_v21  ;;  %v299_v17 = vld [vmem:[%s6852_s1 + $0x8b0] sm:$0xff] }
 0x1ab   :  { %3649 = vmatprep.subr.bf16.mxu0 %v4307_v30  ;;  %3735 = vmatprep.subr.bf16.mxu1 %v4309_v32  ;;  %v307_v30 = vld [vmem:[%s6852_s1 + $0x8f0] sm:$0xff]  ;;  %v300_v32 = vld [vmem:[%s6852_s1 + $0x8b8] sm:$0xff] }
 0x1ac   :  { %v4419_v36 = vcombine.high %v299_v17, %v307_v30  ;;  %v4418_v43 = vcombine.low %v299_v17, %v307_v30  ;;  %v4420_v45 = vcombine.low %v300_v32, %v308_v33  ;;  %v396_v30 = vld [vmem:[%s6852_s1 + $0xbb8] sm:$0xff] }
 0x1ae   :  { %3650 = vmatpush1.bf16.msra.mxu0 %v4306_v39  ;;  %3736 = vmatpush1.bf16.msra.mxu1 %v4308_v40  ;;  %v4421_v39 = vcombine.high %v300_v32, %v308_v33  ;;  %v315_v40 = vld [vmem:[%s6852_s1 + $0x930] sm:$0xff]  ;;  %v404_v32 = vld [vmem:[%s6852_s1 + $0xbf8] sm:$0xff] }
 0x1af   :  { %3651 = vmatprep.subr.bf16.mxu0 %v4323_v10  ;;  %3737 = vmatprep.subr.bf16.mxu1 %v4325_v41  ;;  %v323_v10 = vld [vmem:[%s6852_s1 + $0x970] sm:$0xff]  ;;  %v316_v41 = vld [vmem:[%s6852_s1 + $0x938] sm:$0xff] }
 0x1b0   :  { %v4435_v46 = vcombine.high %v315_v40, %v323_v10  ;;  %v4434_v50 = vcombine.low %v315_v40, %v323_v10  ;;  %v4436_v51 = vcombine.low %v316_v41, %v324_v56 }
 0x1b2   :  { %3652 = vmatpush1.bf16.msra.mxu0 %v4322_v19  ;;  %3738 = vmatpush1.bf16.msra.mxu1 %v4324_v47  ;;  %v4437_v19 = vcombine.high %v316_v41, %v324_v56  ;;  %v331_v47 = vld [vmem:[%s6852_s1 + $0x9b0] sm:$0xff] }
 0x1b3   :  { %3653 = vmatprep.subr.bf16.mxu0 %v4339_v48  ;;  %3739 = vmatprep.subr.bf16.mxu1 %v4341_v49  ;;  %v339_v48 = vld [vmem:[%s6852_s1 + $0x9f0] sm:$0xff]  ;;  %v340_v49 = vld [vmem:[%s6852_s1 + $0x9f8] sm:$0xff] }
 0x1b4   :  { %v4451_v52 = vcombine.high %v331_v47, %v339_v48 }
 0x1b6   :  { %3654 = vmatpush1.bf16.msra.mxu0 %v4338_v54  ;;  %3740 = vmatpush1.bf16.msra.mxu1 %v4340_v55  ;;  %v347_v54 = vld [vmem:[%s6852_s1 + $0xa30] sm:$0xff] }
 0x1b7   :  { %3655 = vmatprep.subr.bf16.mxu0 %v4355_v57  ;;  %3741 = vmatprep.subr.bf16.mxu1 %v4357_v58  ;;  %v355_v55 = vld [vmem:[%s6852_s1 + $0xa70] sm:$0xff]  ;;  %v356_v57 = vld [vmem:[%s6852_s1 + $0xa78] sm:$0xff]  ;;  %v4450_v58 = vcombine.low %v331_v47, %v339_v48 }
 0x1b8   :  { %v4467_v60 = vcombine.high %v347_v54, %v355_v55  ;;  %v412_v47 = vld [vmem:[%s6852_s1 + $0xc38] sm:$0xff] }
 0x1b9   :  { %v420_v48 = vld [vmem:[%s6852_s1 + $0xc78] sm:$0xff] }
 0x1ba   :  { %3656 = vmatpush1.bf16.msra.mxu0 %v4354_v63  ;;  %3742 = vmatpush1.bf16.msra.mxu1 %v4356_v0  ;;  %v371_v63 = vld [vmem:[%s6852_s1 + $0xaf0] sm:$0xff]  ;;  %v364_v0 = vld [vmem:[%s6852_s1 + $0xab8] sm:$0xff] }
 0x1bb   :  { %3657 = vmatprep.subr.bf16.mxu0 %v4371_v1  ;;  %3743 = vmatprep.subr.bf16.mxu1 %v4373_v2  ;;  %v372_v1 = vld [vmem:[%s6852_s1 + $0xaf8] sm:$0xff]  ;;  %v4466_v2 = vcombine.low %v347_v54, %v355_v55  ;;  %v4483_v5 = vcombine.high %v363_v62, %v371_v63  ;;  %v427_v54 = vld [vmem:[%s6852_s1 + $0xcb0] sm:$0xff] }
 0x1bc   :  { %v4485_v6 = vcombine.high %v364_v0, %v372_v1  ;;  %v4484_v14 = vcombine.low %v364_v0, %v372_v1  ;;  %v435_v55 = vld [vmem:[%s6852_s1 + $0xcf0] sm:$0xff]  ;;  %v444_v1 = vld [vmem:[%s6852_s1 + $0xd38] sm:$0xff] }
 0x1bd   :  { %v451_v0 = vld [vmem:[%s6852_s1 + $0xd70] sm:$0xff] }
 0x1be   :  { %3658 = vmatpush1.bf16.msra.mxu0 %v4370_v8  ;;  %3744 = vmatpush1.bf16.msra.mxu1 %v4372_v9  ;;  %v387_v8 = vld [vmem:[%s6852_s1 + $0xb70] sm:$0xff]  ;;  %v380_v9 = vld [vmem:[%s6852_s1 + $0xb38] sm:$0xff] }
 0x1bf   :  { %3659 = vmatprep.subr.bf16.mxu0 %v4387_v12  ;;  %3745 = vmatprep.subr.bf16.mxu1 %v4389_v13  ;;  %v388_v12 = vld [vmem:[%s6852_s1 + $0xb78] sm:$0xff]  ;;  %v4482_v13 = vcombine.low %v363_v62, %v371_v63  ;;  %v4499_v18 = vcombine.high %v379_v7, %v387_v8  ;;  %v443_v63 = vld [vmem:[%s6852_s1 + $0xd30] sm:$0xff] }
 0x1c0   :  { %v4501_v21 = vcombine.high %v380_v9, %v388_v12 }
 0x1c2   :  { %3660 = vmatpush1.bf16.msra.mxu0 %v4386_v24  ;;  %3746 = vmatpush1.bf16.msra.mxu1 %v4388_v27  ;;  %v395_v24 = vld [vmem:[%s6852_s1 + $0xbb0] sm:$0xff] }
 0x1c3   :  { %3672 = vmatprep.subr.bf16.mxu0 %v4403_v28  ;;  %3758 = vmatprep.subr.bf16.mxu1 %v4405_v29  ;;  %v403_v27 = vld [vmem:[%s6852_s1 + $0xbf0] sm:$0xff] }
 0x1c4   :  { %v4515_v41 = vcombine.high %v395_v24, %v403_v27 }
 0x1c5   :  { %3662 = vmatmul.mubr.bf16.vlgmr.msra.gmra.mrb[12].mxu0 %v5757_v37  ;;  %3748 = vmatmul.mubr.bf16.vlgmr.msra.gmra.mrb[12].mxu1 %v5757_v37  ;;  %v332_v37 = vld [vmem:[%s6852_s1 + $0x9b8] sm:$0xff] }
 0x1c6   :  { %3673 = vmatpush1.bf16.msra.mxu0 %v4402_v34  ;;  %3759 = vmatpush1.bf16.msra.mxu1 %v4404_v35  ;;  %v4453_v53 = vcombine.high %v332_v37, %v340_v49  ;;  %v4452_v59 = vcombine.low %v332_v37, %v340_v49  ;;  %v4498_v35 = vcombine.low %v379_v7, %v387_v8  ;;  %v459_v8 = vld [vmem:[%s6852_s1 + $0xdb0] sm:$0xff] }
 0x1c7   :  { %3674 = vmatprep.subr.bf16.mxu0 %v4419_v36  ;;  %3760 = vmatprep.subr.bf16.mxu1 %v4421_v39  ;;  %v4500_v36 = vcombine.low %v380_v9, %v388_v12  ;;  %v4514_v37 = vcombine.low %v395_v24, %v403_v27  ;;  %v4516_v49 = vcombine.low %v396_v30, %v404_v32  ;;  %v467_v9 = vld [vmem:[%s6852_s1 + $0xdf0] sm:$0xff]  ;;  %v460_v12 = vld [vmem:[%s6852_s1 + $0xdb8] sm:$0xff] }
 0x1c8   :  { %3704 = vmatprep.mubr.bf16.mxu0 %v5776_v44  ;;  %3790 = vmatprep.mubr.bf16.mxu1 %v5776_v44  ;;  %v348_v44 = vld [vmem:[%s6852_s1 + $0xa38] sm:$0xff]  ;;  %v475_v27 = vld [vmem:[%s6852_s1 + $0xe30] sm:$0xff] }
 0x1c9   :  { %v4469_v61 = vcombine.high %v348_v44, %v356_v57  ;;  %v4468_v4 = vcombine.low %v348_v44, %v356_v57  ;;  %v428_v57 = vld [vmem:[%s6852_s1 + $0xcb8] sm:$0xff] }
 0x1ca   :  { %3675 = vmatpush1.bf16.msra.mxu0 %v4418_v43  ;;  %3761 = vmatpush1.bf16.msra.mxu1 %v4420_v45  ;;  %v4517_v43 = vcombine.high %v396_v30, %v404_v32  ;;  %v411_v45 = vld [vmem:[%s6852_s1 + $0xc30] sm:$0xff]  ;;  %v476_v30 = vld [vmem:[%s6852_s1 + $0xe38] sm:$0xff] }
 0x1cb   :  { %3676 = vmatprep.subr.bf16.mxu0 %v4435_v46  ;;  %3762 = vmatprep.subr.bf16.mxu1 %v4437_v19  ;;  %v419_v46 = vld [vmem:[%s6852_s1 + $0xc70] sm:$0xff]  ;;  %v484_v32 = vld [vmem:[%s6852_s1 + $0xe78] sm:$0xff] }
 0x1ce   :  { %3677 = vmatpush1.bf16.msra.mxu0 %v4434_v50  ;;  %3763 = vmatpush1.bf16.msra.mxu1 %v4436_v51 }
 0x1cf   :  { %3678 = vmatprep.subr.bf16.mxu0 %v4451_v52  ;;  %3764 = vmatprep.subr.bf16.mxu1 %v4453_v53  ;;  %v4531_v52 = vcombine.high %v411_v45, %v419_v46  ;;  %v4533_v53 = vcombine.high %v412_v47, %v420_v48 }
 0x1d2   :  { %3679 = vmatpush1.bf16.msra.mxu0 %v4450_v58  ;;  %3765 = vmatpush1.bf16.msra.mxu1 %v4452_v59  ;;  %v436_v58 = vld [vmem:[%s6852_s1 + $0xcf8] sm:$0xff]  ;;  %v4530_v59 = vcombine.low %v411_v45, %v419_v46 }
 0x1d3   :  { %3680 = vmatprep.subr.bf16.mxu0 %v4467_v60  ;;  %3766 = vmatprep.subr.bf16.mxu1 %v4469_v61  ;;  %v4532_v60 = vcombine.low %v412_v47, %v420_v48  ;;  %v4547_v61 = vcombine.high %v427_v54, %v435_v55  ;;  %v4549_v62 = vcombine.high %v428_v57, %v436_v58  ;;  %v492_v45 = vld [vmem:[%s6852_s1 + $0xeb8] sm:$0xff] }
 0x1d4   :  { %v500_v46 = vld [vmem:[%s6852_s1 + $0xef8] sm:$0xff] }
 0x1d5   :  { %v4613_v48 = vcombine.high %v492_v45, %v500_v46 }
 0x1d6   :  { %3681 = vmatpush1.bf16.msra.mxu0 %v4466_v2  ;;  %3767 = vmatpush1.bf16.msra.mxu1 %v4468_v4  ;;  %v452_v2 = vld [vmem:[%s6852_s1 + $0xd78] sm:$0xff]  ;;  %v4546_v4 = vcombine.low %v427_v54, %v435_v55  ;;  %v4612_v54 = vcombine.low %v492_v45, %v500_v46 }
 0x1d7   :  { %3682 = vmatprep.subr.bf16.mxu0 %v4483_v5  ;;  %3768 = vmatprep.subr.bf16.mxu1 %v4485_v6  ;;  %v4548_v5 = vcombine.low %v428_v57, %v436_v58  ;;  %v4563_v6 = vcombine.high %v443_v63, %v451_v0  ;;  %v4565_v7 = vcombine.high %v444_v1, %v452_v2  ;;  %v523_v58 = vld [vmem:[%s6852_s1 + $0xfb0] sm:$0xff] }
 0x1d8   :  { %v6247_v20 = vpop.f32.mrb[4].mxu0  ;;  %v6257_v29 = vpop.f32.mrb[4].mxu1 }
 0x1d9   :  { %v3804_v28 = vadd.f32 %v5868_v38, %v6247_v20  ;;  %v6259_v17 = vpop.f32.mrb[5].mxu0  ;;  %v6267_v33 = vpop.f32.mrb[5].mxu1 }
 0x1da   :  { %v6269_v34 = vpop.f32.mrb[6].mxu0  ;;  %3683 = vmatpush1.bf16.msra.mxu0 %v4482_v13  ;;  %v6274_v40 = vpop.f32.mrb[6].mxu1  ;;  %3769 = vmatpush1.bf16.msra.mxu1 %v4484_v14  ;;  %v468_v13 = vld [vmem:[%s6852_s1 + $0xdf8] sm:$0xff]  ;;  %v4562_v14 = vcombine.low %v443_v63, %v451_v0 }
 0x1db   :  { %v3805_v38 = vadd.f32 %v3804_v28, %v6259_v17  ;;  %v3821_v39 = vadd.f32 %v5872_v42, %v6269_v34  ;;  %v6276_v10 = vpop.f32.mrb[7].mxu0  ;;  %3684 = vmatprep.subr.bf16.mxu0 %v4499_v18  ;;  %v6278_v56 = vpop.f32.mrb[7].mxu1  ;;  %3770 = vmatprep.subr.bf16.mxu1 %v4501_v21  ;;  %v4564_v18 = vcombine.low %v444_v1, %v452_v2  ;;  %v483_v28 = vld [vmem:[%s6852_s1 + $0xe70] sm:$0xff] }
 0x1dc   :  { %v4579_v21 = vcombine.high %v459_v8, %v467_v9  ;;  %v4581_v24 = vcombine.high %v460_v12, %v468_v13 }
 0x1dd   :  { %v3806_v42 = vadd.f32 %v3805_v38, %v6257_v29  ;;  %v3822_v19 = vadd.f32 %v3821_v39, %v6276_v10  ;;  %v4595_v38 = vcombine.high %v475_v27, %v483_v28  ;;  %v4597_v39 = vcombine.high %v476_v30, %v484_v32 }
 0x1de   :  { %3685 = vmatpush1.bf16.msra.mxu0 %v4498_v35  ;;  %3771 = vmatpush1.bf16.msra.mxu1 %v4500_v36  ;;  %v4578_v35 = vcombine.low %v459_v8, %v467_v9  ;;  %v4580_v36 = vcombine.low %v460_v12, %v468_v13 }
 0x1df   :  { %v6295_v50 = vadd.f32 %v3806_v42, %v6267_v33  ;;  %v3823_v51 = vadd.f32 %v3822_v19, %v6274_v40  ;;  %3686 = vmatprep.subr.bf16.mxu0 %v4515_v41  ;;  %3772 = vmatprep.subr.bf16.mxu1 %v4517_v43  ;;  %v491_v41 = vld [vmem:[%s6852_s1 + $0xeb0] sm:$0xff]  ;;  %v4594_v42 = vcombine.low %v475_v27, %v483_v28 }
 0x1e0   :  { %v499_v43 = vld [vmem:[%s6852_s1 + $0xef0] sm:$0xff]  ;;  %v4596_v19 = vcombine.low %v476_v30, %v484_v32  ;;  %v4695_v32 = vmov 0  }
 0x1e1   :  { %v6305_v44 = vadd.f32 %v3823_v51, %v6278_v56  ;;  %v4611_v47 = vcombine.high %v491_v41, %v499_v43  ;;  %v508_v51 = vld [vmem:[%s6852_s1 + $0xf38] sm:$0xff]  ;;  %4680 = vset.pattern.permute.xlu1 %v4695_v32  ;;  %4679 = vset.pattern.permute.xlu0 %v4695_v32 }
 0x1e2   :  { %3687 = vmatpush1.bf16.msra.mxu0 %v4514_v37  ;;  %3773 = vmatpush1.bf16.msra.mxu1 %v4516_v49  ;;  %v507_v37 = vld [vmem:[%s6852_s1 + $0xf30] sm:$0xff] }
 0x1e3   :  { %3688 = vmatprep.subr.bf16.mxu0 %v4531_v52  ;;  %3774 = vmatprep.subr.bf16.mxu1 %v4533_v53  ;;  %v515_v49 = vld [vmem:[%s6852_s1 + $0xf70] sm:$0xff]  ;;  %v516_v52 = vld [vmem:[%s6852_s1 + $0xf78] sm:$0xff]  ;;  %v4610_v53 = vcombine.low %v491_v41, %v499_v43 }
 0x1e4   :  { %v4627_v55 = vcombine.high %v507_v37, %v515_v49  ;;  %v4629_v57 = vcombine.high %v508_v51, %v516_v52  ;;  %v4628_v63 = vcombine.low %v508_v51, %v516_v52 }
 0x1e6   :  { %3689 = vmatpush1.bf16.msra.mxu0 %v4530_v59  ;;  %3775 = vmatpush1.bf16.msra.mxu1 %v4532_v60  ;;  %v531_v59 = vld [vmem:[%s6852_s1 + $0xff0] sm:$0xff]  ;;  %v524_v60 = vld [vmem:[%s6852_s1 + $0xfb8] sm:$0xff] }
 0x1e7   :  { %3690 = vmatprep.subr.bf16.mxu0 %v4547_v61  ;;  %3776 = vmatprep.subr.bf16.mxu1 %v4549_v62  ;;  %v532_v61 = vld [vmem:[%s6852_s1 + $0xff8] sm:$0xff]  ;;  %v4626_v62 = vcombine.low %v507_v37, %v515_v49  ;;  %v4643_v0 = vcombine.high %v523_v58, %v531_v59  ;;  %v4642_v2 = vcombine.low %v523_v58, %v531_v59 }
 0x1e8   :  { %v4645_v1 = vcombine.high %v524_v60, %v532_v61 }
 0x1ea   :  { %3691 = vmatpush1.bf16.msra.mxu0 %v4546_v4  ;;  %3777 = vmatpush1.bf16.msra.mxu1 %v4548_v5  ;;  %v4644_v4 = vcombine.low %v524_v60, %v532_v61 }
 0x1eb   :  { %3692 = vmatprep.subr.bf16.mxu0 %v4563_v6  ;;  %3778 = vmatprep.subr.bf16.mxu1 %v4565_v7 }
 0x1ee   :  { %3693 = vmatpush1.bf16.msra.mxu0 %v4562_v14  ;;  %3779 = vmatpush1.bf16.msra.mxu1 %v4564_v18 }
 0x1ef   :  { %3694 = vmatprep.subr.bf16.mxu0 %v4579_v21  ;;  %3780 = vmatprep.subr.bf16.mxu1 %v4581_v24 }
 0x1f2   :  { %3695 = vmatpush1.bf16.msra.mxu0 %v4578_v35  ;;  %3781 = vmatpush1.bf16.msra.mxu1 %v4580_v36  ;;  %v4018_v35 = vld [vmem:[%s6855_s3] sm:$0xff] }
 0x1f3   :  { %3696 = vmatprep.subr.bf16.mxu0 %v4595_v38  ;;  %3782 = vmatprep.subr.bf16.mxu1 %v4597_v39 }
 0x1f6   :  { %3697 = vmatpush1.bf16.msra.mxu0 %v4594_v42  ;;  %3783 = vmatpush1.bf16.msra.mxu1 %v4596_v19 }
 0x1f7   :  { %3698 = vmatprep.subr.bf16.mxu0 %v4611_v47  ;;  %3784 = vmatprep.subr.bf16.mxu1 %v4613_v48 }
 0x1fa   :  { %3699 = vmatpush1.bf16.msra.mxu0 %v4610_v53  ;;  %3785 = vmatpush1.bf16.msra.mxu1 %v4612_v54  ;;  %v3974_v54 = vld [vmem:[%s6854_s2] sm:$0xff] }
 0x1fb   :  { %3700 = vmatprep.subr.bf16.mxu0 %v4627_v55  ;;  %3786 = vmatprep.subr.bf16.mxu1 %v4629_v57 }
 0x1fe   :  { %3701 = vmatpush1.bf16.msra.mxu0 %v4626_v62  ;;  %3787 = vmatpush1.bf16.msra.mxu1 %v4628_v63 }
 0x1ff   :  { %3702 = vmatprep.subr.bf16.mxu0 %v4643_v0  ;;  %3788 = vmatprep.subr.bf16.mxu1 %v4645_v1 }
 0x202   :  { %3703 = vmatpush1.bf16.msra.mxu0 %v4642_v2  ;;  %3789 = vmatpush1.bf16.msra.mxu1 %v4644_v4 }
 0x205   :  { %3705 = vmatmul.mubr.bf16.vlgmr.msra.gmra.mrb[12].mxu0 %v5991_v3  ;;  %3791 = vmatmul.mubr.bf16.vlgmr.msra.gmra.mrb[12].mxu1 %v5991_v3 }
 0x258   :  { %v6387_v5 = vpop.f32.mrb[8].mxu0  ;;  %v6391_v7 = vpop.f32.mrb[8].mxu1 }
 0x259   :  { %v3808_v6 = vadd.f32 %v6295_v50, %v6387_v5  ;;  %v6393_v8 = vpop.f32.mrb[9].mxu0  ;;  %v6395_v9 = vpop.f32.mrb[9].mxu1 }
 0x25a   :  { %v6397_v12 = vpop.f32.mrb[10].mxu0  ;;  %v6402_v18 = vpop.f32.mrb[10].mxu1 }
 0x25b   :  { %v3809_v13 = vadd.f32 %v3808_v6, %v6393_v8  ;;  %v3825_v14 = vadd.f32 %v6305_v44, %v6397_v12  ;;  %v6404_v3 = vpop.f32.mrb[11].mxu0  ;;  %v6406_v21 = vpop.f32.mrb[11].mxu1  ;;  %v3975_v44 = vld [vmem:[%s6854_s2 + $0x8] sm:$0xff] }
 0x25c   :  { %3983 = vperm.xlu1 %4680, %v3975_v44  }
 0x25d   :  { %v3810_v50 = vadd.f32 %v3809_v13, %v6391_v7  ;;  %v3826_v24 = vadd.f32 %v3825_v14, %v6404_v3 }
 0x25f   :  { %v3811_v27 = vadd.f32 %v3810_v50, %v6395_v9  ;;  %v3827_v28 = vadd.f32 %v3826_v24, %v6402_v18 }
 0x260   :  { %4022 = vperm.xlu1 %4680, %v4018_v35  }
 0x261   :  { %v3828_v30 = vadd.f32 %v3827_v28, %v6406_v21 }
 0x2d8   :  { %v6419_v36 = vpop.f32.mrb[12].mxu0  ;;  %v6422_v39 = vpop.f32.mrb[12].mxu1 }
 0x2d9   :  { %v3812_v38 = vadd.f32 %v3811_v27, %v6419_v36  ;;  %v6424_v41 = vpop.f32.mrb[13].mxu0  ;;  %v6426_v43 = vpop.f32.mrb[13].mxu1 }
 0x2da   :  { %v6428_v45 = vpop.f32.mrb[14].mxu0  ;;  %v6432_v19 = vpop.f32.mrb[14].mxu1 }
 0x2db   :  { %v3813_v46 = vadd.f32 %v3812_v38, %v6424_v41  ;;  %v3829_v42 = vadd.f32 %v3828_v30, %v6428_v45  ;;  %v6434_v47 = vpop.f32.mrb[15].mxu0  ;;  %v6436_v48 = vpop.f32.mrb[15].mxu1 }
 0x2dd   :  { %v3830_v37 = vadd.f32 %v3829_v42, %v6434_v47  ;;  %v3814_v49 = vadd.f32 %v3813_v46, %v6422_v39 }
 0x2df   :  { %v3831_v51 = vadd.f32 %v3830_v37, %v6432_v19  ;;  %v3815_v52 = vadd.f32 %v3814_v49, %v6426_v43 }
 0x2e1   :  { %v3832_v53 = vadd.f32 %v3831_v51, %v6436_v48  ;;  %3816 = vadd.xlane.f32.xlu0 %v3815_v52 }
 0x2e5   :  { %3833 = vadd.xlane.f32.xlu0 %v3832_v53 }
 0x2fb   :  { %3978 = vperm.xlu0 %4679, %v3974_v54  }
 0x36e   :  { %v3817_v55 = vpop.xlane.xlu0 %3816 }
 0x36f   :  { %v6446_v57 = vmul.f32 0.00048828125, %v3817_v55 }
 0x371   :  { %v6450_v58 = vsub.f32 %v5822_v11, %v6446_v57  ;;  %v6454_v59 = vsub.f32 %v5832_v16, %v6446_v57  ;;  %v6458_v61 = vsub.f32 %v5830_v15, %v6446_v57  ;;  %v6468_v11 = vsub.f32 %v5842_v22, %v6446_v57 }
 0x372   :  { %v3834_v60 = vpop.xlane.xlu0 %3833  ;;  %v6472_v16 = vsub.f32 %v6247_v20, %v6446_v57  ;;  %v6486_v22 = vsub.f32 %v6259_v17, %v6446_v57  ;;  %v6492_v13 = vsub.f32 %v6257_v29, %v6446_v57  ;;  %v6506_v24 = vsub.f32 %v6267_v33, %v6446_v57 }
 0x373   :  { %v3870_v62 = vmul.f32 %v6450_v58, %v6450_v58  ;;  %v3871_v63 = vmul.f32 %v6454_v59, %v6454_v59  ;;  %v6464_v0 = vmul.f32 0.00048828125, %v3834_v60  ;;  %v3872_v15 = vmul.f32 %v6458_v61, %v6458_v61 }
 0x374   :  { %v3873_v20 = vmul.f32 %v6468_v11, %v6468_v11  ;;  %v3875_v29 = vmul.f32 %v6486_v22, %v6486_v22  ;;  %v3876_v30 = vmul.f32 %v6492_v13, %v6492_v13  ;;  %v6540_v37 = vsub.f32 %v6391_v7, %v6446_v57 }
 0x375   :  { %v3902_v1 = vadd.f32 %v3871_v63, %v3870_v62  ;;  %v6478_v2 = vsub.f32 %v5844_v23, %v6464_v0  ;;  %v6482_v4 = vsub.f32 %v5848_v26, %v6464_v0  ;;  %v3874_v23 = vmul.f32 %v6472_v16, %v6472_v16 }
 0x376   :  { %v6498_v26 = vsub.f32 %v5846_v25, %v6464_v0  ;;  %v6512_v28 = vsub.f32 %v5853_v31, %v6464_v0  ;;  %v6516_v25 = vsub.f32 %v6387_v5, %v6446_v57  ;;  %v6522_v33 = vsub.f32 %v6269_v34, %v6464_v0 }
 0x377   :  { %v3903_v6 = vadd.f32 %v3902_v1, %v3872_v15  ;;  %v3886_v17 = vmul.f32 %v6478_v2, %v6478_v2  ;;  %v3887_v50 = vmul.f32 %v6482_v4, %v6482_v4  ;;  %v6528_v31 = vsub.f32 %v6393_v8, %v6446_v57 }
 0x378   :  { %v3888_v44 = vmul.f32 %v6498_v26, %v6498_v26  ;;  %v3877_v5 = vmul.f32 %v6506_v24, %v6506_v24  ;;  %v6534_v46 = vsub.f32 %v6276_v10, %v6464_v0  ;;  %v3889_v34 = vmul.f32 %v6512_v28, %v6512_v28 }
 0x379   :  { %v3904_v14 = vadd.f32 %v3903_v6, %v3873_v20  ;;  %v3919_v35 = vadd.f32 %v3887_v50, %v3886_v17  ;;  %v3878_v8 = vmul.f32 %v6516_v25, %v6516_v25  ;;  %v6546_v51 = vsub.f32 %v6274_v40, %v6464_v0 }
 0x37a   :  { %v3890_v10 = vmul.f32 %v6522_v33, %v6522_v33  ;;  %v6552_v53 = vsub.f32 %v6395_v9, %v6446_v57  ;;  %v3879_v7 = vmul.f32 %v6528_v31, %v6528_v31  ;;  %v6558_v55 = vsub.f32 %v6278_v56, %v6464_v0 }
 0x37b   :  { %v3905_v27 = vadd.f32 %v3904_v14, %v3874_v23  ;;  %v3920_v42 = vadd.f32 %v3919_v35, %v3888_v44  ;;  %v3891_v40 = vmul.f32 %v6534_v46, %v6534_v46  ;;  %v6564_v62 = vsub.f32 %v6419_v36, %v6446_v57 }
 0x37c   :  { %v3880_v9 = vmul.f32 %v6540_v37, %v6540_v37  ;;  %v6570_v15 = vsub.f32 %v6397_v12, %v6464_v0  ;;  %v3892_v56 = vmul.f32 %v6546_v51, %v6546_v51  ;;  %v6576_v20 = vsub.f32 %v6424_v41, %v6446_v57 }
 0x37d   :  { %v3906_v32 = vadd.f32 %v3905_v27, %v3875_v29  ;;  %v3921_v52 = vadd.f32 %v3920_v42, %v3889_v34  ;;  %v3881_v36 = vmul.f32 %v6552_v53, %v6552_v53  ;;  %v6582_v23 = vsub.f32 %v6404_v3, %v6464_v0 }
 0x37e   :  { %v3893_v12 = vmul.f32 %v6558_v55, %v6558_v55  ;;  %v6588_v17 = vsub.f32 %v6422_v39, %v6446_v57  ;;  %v3882_v41 = vmul.f32 %v6564_v62, %v6564_v62  ;;  %v6594_v29 = vsub.f32 %v6402_v18, %v6464_v0 }
 0x37f   :  { %v3907_v38 = vadd.f32 %v3906_v32, %v3876_v30  ;;  %v3922_v60 = vadd.f32 %v3921_v52, %v3890_v10  ;;  %v3894_v3 = vmul.f32 %v6570_v15, %v6570_v15  ;;  %v3853_v30 = vsub.f32 %v6426_v43, %v6446_v57 }
 0x380   :  { %v3883_v32 = vmul.f32 %v6576_v20, %v6576_v20  ;;  %v6604_v44 = vsub.f32 %v6406_v21, %v6464_v0  ;;  %v3895_v35 = vmul.f32 %v6582_v23, %v6582_v23  ;;  %v6612_v34 = vsub.f32 %v6428_v45, %v6464_v0 }
 0x381   :  { %v3908_v49 = vadd.f32 %v3907_v38, %v3877_v5  ;;  %v3923_v1 = vadd.f32 %v3922_v60, %v3891_v40  ;;  %v3884_v5 = vmul.f32 %v6588_v17, %v6588_v17  ;;  %v3896_v43 = vmul.f32 %v6594_v29, %v6594_v29 }
 0x382   :  { %v3885_v42 = vmul.f32 %v3853_v30, %v3853_v30  ;;  %v6618_v21 = vsub.f32 %v6434_v47, %v6464_v0  ;;  %v3898_v45 = vmul.f32 %v6612_v34, %v6612_v34  ;;  %v6630_v40 = vsub.f32 %v6436_v48, %v6464_v0  ;;  %v6641_v48 = vpop.permute.xlu1 %3983 }
 0x383   :  { %v3909_v54 = vadd.f32 %v3908_v49, %v3878_v8  ;;  %v3924_v14 = vadd.f32 %v3923_v1, %v3892_v56  ;;  %v3897_v49 = vmul.f32 %v6604_v44, %v6604_v44 }
 0x384   :  { %v3899_v47 = vmul.f32 %v6618_v21, %v6618_v21 }
 0x385   :  { %v3910_v63 = vadd.f32 %v3909_v54, %v3879_v7  ;;  %v3925_v27 = vadd.f32 %v3924_v14, %v3893_v12  ;;  %v6624_v7 = vsub.f32 %v6432_v19, %v6464_v0  ;;  %v3901_v19 = vmul.f32 %v6630_v40, %v6630_v40 }
 0x386   :  { %v6643_v0 = vpop.permute.xlu1 %4022 }
 0x387   :  { %v3911_v6 = vadd.f32 %v3910_v63, %v3880_v9  ;;  %v3926_v18 = vadd.f32 %v3925_v27, %v3894_v3  ;;  %v3900_v9 = vmul.f32 %v6624_v7, %v6624_v7 }
 0x389   :  { %v3912_v50 = vadd.f32 %v3911_v6, %v3881_v36  ;;  %v3927_v57 = vadd.f32 %v3926_v18, %v3895_v35  ;;  %v4019_v36 = vld [vmem:[%s6855_s3 + $0x8] sm:$0xff] }
 0x38b   :  { %v3913_v39 = vadd.f32 %v3912_v50, %v3882_v41  ;;  %v3928_v10 = vadd.f32 %v3927_v57, %v3896_v43 }
 0x38d   :  { %v3914_v38 = vadd.f32 %v3913_v39, %v3883_v32  ;;  %v3929_v54 = vadd.f32 %v3928_v10, %v3897_v49 }
 0x38f   :  { %v3915_v8 = vadd.f32 %v3914_v38, %v3884_v5  ;;  %v3930_v60 = vadd.f32 %v3929_v54, %v3898_v45 }
 0x391   :  { %v3916_v52 = vadd.f32 %v3915_v8, %v3885_v42  ;;  %v3931_v63 = vadd.f32 %v3930_v60, %v3899_v47  ;;  %v3979_v42 = vpop.permute.xlu0 %3978 }
 0x393   :  { %3917 = vadd.xlane.f32.xlu1 %v3916_v52  ;;  %v3932_v56 = vadd.f32 %v3931_v63, %v3900_v9 }
 0x395   :  { %v3933_v1 = vadd.f32 %v3932_v56, %v3901_v19 }
 0x397   :  { %3934 = vadd.xlane.f32.xlu1 %v3933_v1 }
 0x3a8   :  { %4027 = vperm.xlu1 %4680, %v4019_v36  }
 0x420   :  { %v3918_v6 = vpop.xlane.xlu1 %3917 }
 0x421   :  { %v3936_v12 = vmul.f32 0.00048828125, %v3918_v6 }
 0x423   :  { %v3938_v14 = vadd.f32 1e-05, %v3936_v12 }
 0x424   :  { %v3935_v41 = vpop.xlane.xlu1 %3934 }
 0x425   :  { %4687 = vrsqrt.f32 %v3938_v14  ;;  %v3937_v50 = vmul.f32 0.00048828125, %v3935_v41 }
 0x427   :  { %v3939_v3 = vadd.f32 1e-05, %v3937_v50 }
 0x429   :  { %4689 = vrsqrt.f32 %v3939_v3 }
 0x42f   :  { %v4688_v27 = vpop.eup %4687 }
 0x430   :  { %v3942_v32 = vmul.f32 %v4688_v27, %v6450_v58  ;;  %v3943_v39 = vmul.f32 %v4688_v27, %v6454_v59  ;;  %v3944_v35 = vmul.f32 %v4688_v27, %v6458_v61  ;;  %v3945_v18 = vmul.f32 %v4688_v27, %v6468_v11 }
 0x431   :  { %v3946_v5 = vmul.f32 %v4688_v27, %v6472_v16  ;;  %v3947_v38 = vmul.f32 %v4688_v27, %v6486_v22  ;;  %v3948_v43 = vmul.f32 %v4688_v27, %v6492_v13  ;;  %v3949_v57 = vmul.f32 %v4688_v27, %v6506_v24 }
 0x432   :  { %v3950_v8 = vmul.f32 %v4688_v27, %v6516_v25  ;;  %v3951_v49 = vmul.f32 %v4688_v27, %v6528_v31  ;;  %v3952_v58 = vmul.f32 %v4688_v27, %v6540_v37  ;;  %v3953_v59 = vmul.f32 %v4688_v27, %v6552_v53 }
 0x433   :  { %v3954_v61 = vmul.f32 %v4688_v27, %v6564_v62  ;;  %v3955_v11 = vmul.f32 %v4688_v27, %v6576_v20  ;;  %v3956_v16 = vmul.f32 %v4688_v27, %v6588_v17  ;;  %v3957_v22 = vmul.f32 %v4688_v27, %v3853_v30  ;;  %v4690_v9 = vpop.eup %4689 }
 0x434   :  { %v3986_v10 = vmul.f32 %v3979_v42, %v3942_v32  ;;  %v3987_v13 = vmul.f32 %v3979_v42, %v3943_v39  ;;  %v3988_v52 = vmul.f32 %v3979_v42, %v3944_v35  ;;  %v3989_v24 = vmul.f32 %v3979_v42, %v3945_v18 }
 0x435   :  { %v6660_v45 = vmul.f32 %v3979_v42, %v3946_v5  ;;  %v6662_v25 = vmul.f32 %v3979_v42, %v3947_v38  ;;  %v6664_v31 = vmul.f32 %v3979_v42, %v3948_v43  ;;  %v6666_v37 = vmul.f32 %v3979_v42, %v3949_v57 }
 0x436   :  { %v6668_v53 = vmul.f32 %v3979_v42, %v3950_v8  ;;  %v6670_v62 = vmul.f32 %v3979_v42, %v3951_v49  ;;  %v6672_v20 = vmul.f32 %v3979_v42, %v3952_v58  ;;  %v6674_v17 = vmul.f32 %v3979_v42, %v3953_v59 }
 0x437   :  { %v6676_v30 = vmul.f32 %v3979_v42, %v3954_v61  ;;  %v6678_v54 = vmul.f32 %v3979_v42, %v3955_v11  ;;  %v6680_v47 = vmul.f32 %v3979_v42, %v3956_v16  ;;  %v6682_v60 = vmul.f32 %v3979_v42, %v3957_v22  ;;  %v4028_v42 = vpop.permute.xlu1 %4027 }
 0x438   :  { %v6685_v63 = vadd.f32 %v6643_v0, %v3986_v10  ;;  %v6688_v19 = vadd.f32 %v6643_v0, %v3987_v13  ;;  %v6691_v56 = vadd.f32 %v6643_v0, %v3988_v52  ;;  %v6694_v1 = vadd.f32 %v6643_v0, %v3989_v24 }
 0x439   :  { %v3958_v36 = vmul.f32 %v4690_v9, %v6478_v2  ;;  %v3959_v6 = vmul.f32 %v4690_v9, %v6482_v4  ;;  %v3960_v12 = vmul.f32 %v4690_v9, %v6498_v26  ;;  %v3961_v14 = vmul.f32 %v4690_v9, %v6512_v28 }
 0x43a   :  { %v3962_v41 = vmul.f32 %v4690_v9, %v6522_v33  ;;  %v3963_v50 = vmul.f32 %v4690_v9, %v6534_v46  ;;  %v3964_v3 = vmul.f32 %v4690_v9, %v6546_v51  ;;  %v3965_v27 = vmul.f32 %v4690_v9, %v6558_v55 }
 0x43b   :  { %v3966_v32 = vmul.f32 %v4690_v9, %v6570_v15  ;;  %v3967_v39 = vmul.f32 %v4690_v9, %v6582_v23  ;;  %v3968_v2 = vmul.f32 %v4690_v9, %v6594_v29  ;;  %v3969_v4 = vmul.f32 %v4690_v9, %v6604_v44 }
 0x43c   :  { %v3970_v26 = vmul.f32 %v4690_v9, %v6612_v34  ;;  %v3971_v28 = vmul.f32 %v4690_v9, %v6618_v21  ;;  %v3972_v33 = vmul.f32 %v4690_v9, %v6624_v7  ;;  %v3973_v46 = vmul.f32 %v4690_v9, %v6630_v40 }
 0x43d   :  { %v4002_v51 = vmul.f32 %v6641_v48, %v3958_v36  ;;  %v4003_v55 = vmul.f32 %v6641_v48, %v3959_v6  ;;  %v4004_v15 = vmul.f32 %v6641_v48, %v3960_v12  ;;  %v4005_v23 = vmul.f32 %v6641_v48, %v3961_v14 }
 0x43e   :  { %v4006_v29 = vmul.f32 %v6641_v48, %v3962_v41  ;;  %v4007_v44 = vmul.f32 %v6641_v48, %v3963_v50  ;;  %v4008_v34 = vmul.f32 %v6641_v48, %v3964_v3  ;;  %v4009_v21 = vmul.f32 %v6641_v48, %v3965_v27 }
 0x43f   :  { %v4010_v7 = vmul.f32 %v6641_v48, %v3966_v32  ;;  %v4011_v40 = vmul.f32 %v6641_v48, %v3967_v39  ;;  %v4012_v35 = vmul.f32 %v6641_v48, %v3968_v2  ;;  %v4013_v18 = vmul.f32 %v6641_v48, %v3969_v4 }
 0x440   :  { %v4014_v5 = vmul.f32 %v6641_v48, %v3970_v26  ;;  %v4015_v38 = vmul.f32 %v6641_v48, %v3971_v28  ;;  %v4016_v43 = vmul.f32 %v6641_v48, %v3972_v33  ;;  %v4017_v57 = vmul.f32 %v6641_v48, %v3973_v46 }
 0x441   :  { %v4046_v8 = vadd.f32 %v4028_v42, %v4002_v51  ;;  %v4047_v49 = vadd.f32 %v4028_v42, %v4003_v55  ;;  %v4048_v58 = vadd.f32 %v4028_v42, %v4004_v15  ;;  %v4049_v59 = vadd.f32 %v4028_v42, %v4005_v23 }
 0x442   :  { %v4050_v61 = vadd.f32 %v4028_v42, %v4006_v29  ;;  %v4051_v11 = vadd.f32 %v4028_v42, %v4007_v44  ;;  %v4052_v16 = vadd.f32 %v4028_v42, %v4008_v34  ;;  %v4053_v22 = vadd.f32 %v4028_v42, %v4009_v21 }
 0x443   :  { %v4054_v10 = vadd.f32 %v4028_v42, %v4010_v7  ;;  %v4055_v13 = vadd.f32 %v4028_v42, %v4011_v40  ;;  %v4056_v52 = vadd.f32 %v4028_v42, %v4012_v35  ;;  %v4057_v24 = vadd.f32 %v4028_v42, %v4013_v18 }
 0x444   :  { %v4058_v9 = vadd.f32 %v4028_v42, %v4014_v5  ;;  %v4059_v36 = vadd.f32 %v4028_v42, %v4015_v38  ;;  %v4060_v6 = vadd.f32 %v4028_v42, %v4016_v43  ;;  %v4061_v12 = vadd.f32 %v4028_v42, %v4017_v57 }
 0x445   :  { %v4078_v14 = vmax.f32 %v4046_v8, 0.0  ;;  %v4079_v41 = vmax.f32 %v4047_v49, 0.0  ;;  %v4080_v48 = vmax.f32 %v4048_v58, 0.0  ;;  %v4081_v50 = vmax.f32 %v4049_v59, 0.0 }
 0x446   :  { %v4082_v3 = vmax.f32 %v4050_v61, 0.0  ;;  %v4083_v27 = vmax.f32 %v4051_v11, 0.0  ;;  %v4084_v32 = vmax.f32 %v4052_v16, 0.0  ;;  %v4085_v39 = vmax.f32 %v4053_v22, 0.0 }
 0x447   :  { %v4086_v2 = vmax.f32 %v4054_v10, 0.0  ;;  %v4087_v4 = vmax.f32 %v4055_v13, 0.0  ;;  %v4088_v26 = vmax.f32 %v4056_v52, 0.0  ;;  %v4089_v28 = vmax.f32 %v4057_v24, 0.0  ;;  %4110 = vst [vmem:[%s6856_s4 + $0x80] sm:$0xff] %v4078_v14  ;;  %4111 = vst [vmem:[%s6856_s4 + $0x88] sm:$0xff] %v4079_v41 }
 0x448   :  { %4112 = vst [vmem:[%s6856_s4 + $0x90] sm:$0xff] %v4080_v48  ;;  %4113 = vst [vmem:[%s6856_s4 + $0x98] sm:$0xff] %v4081_v50  ;;  %v4090_v33 = vmax.f32 %v4058_v9, 0.0  ;;  %v4091_v46 = vmax.f32 %v4059_v36, 0.0  ;;  %v4092_v51 = vmax.f32 %v4060_v6, 0.0  ;;  %v4093_v55 = vmax.f32 %v4061_v12, 0.0 }
 0x449   :  { %4114 = vst [vmem:[%s6856_s4 + $0xa0] sm:$0xff] %v4082_v3  ;;  %4115 = vst [vmem:[%s6856_s4 + $0xa8] sm:$0xff] %v4083_v27  ;;  %v4034_v15 = vadd.f32 %v6643_v0, %v6660_v45  ;;  %v4035_v23 = vadd.f32 %v6643_v0, %v6662_v25  ;;  %v4036_v29 = vadd.f32 %v6643_v0, %v6664_v31  ;;  %v4063_v40 = vmax.f32 %v6688_v19, 0.0 }
 0x44a   :  { %4116 = vst [vmem:[%s6856_s4 + $0xb0] sm:$0xff] %v4084_v32  ;;  %4117 = vst [vmem:[%s6856_s4 + $0xb8] sm:$0xff] %v4085_v39  ;;  %v4037_v44 = vadd.f32 %v6643_v0, %v6666_v37  ;;  %v4038_v45 = vadd.f32 %v6643_v0, %v6668_v53  ;;  %v4039_v25 = vadd.f32 %v6643_v0, %v6670_v62  ;;  %v4062_v62 = vmax.f32 %v6685_v63, 0.0 }
 0x44b   :  { %4118 = vst [vmem:[%s6856_s4 + $0xc0] sm:$0xff] %v4086_v2  ;;  %4119 = vst [vmem:[%s6856_s4 + $0xc8] sm:$0xff] %v4087_v4  ;;  %v4040_v31 = vadd.f32 %v6643_v0, %v6672_v20  ;;  %v4041_v37 = vadd.f32 %v6643_v0, %v6674_v17  ;;  %v4042_v34 = vadd.f32 %v6643_v0, %v6676_v30  ;;  %v4064_v20 = vmax.f32 %v6691_v56, 0.0 }
 0x44c   :  { %4120 = vst [vmem:[%s6856_s4 + $0xd0] sm:$0xff] %v4088_v26  ;;  %4121 = vst [vmem:[%s6856_s4 + $0xd8] sm:$0xff] %v4089_v28  ;;  %v4043_v21 = vadd.f32 %v6643_v0, %v6678_v54  ;;  %v4044_v7 = vadd.f32 %v6643_v0, %v6680_v47  ;;  %v4045_v53 = vadd.f32 %v6643_v0, %v6682_v60  ;;  %v4065_v17 = vmax.f32 %v6694_v1, 0.0 }
 0x44d   :  { %4122 = vst [vmem:[%s6856_s4 + $0xe0] sm:$0xff] %v4090_v33  ;;  %4123 = vst [vmem:[%s6856_s4 + $0xe8] sm:$0xff] %v4091_v46  ;;  %v4066_v35 = vmax.f32 %v4034_v15, 0.0  ;;  %v4067_v18 = vmax.f32 %v4035_v23, 0.0  ;;  %v4068_v30 = vmax.f32 %v4036_v29, 0.0  ;;  %v4069_v5 = vmax.f32 %v4037_v44, 0.0 }
 0x44e   :  { %4124 = vst [vmem:[%s6856_s4 + $0xf0] sm:$0xff] %v4092_v51  ;;  %4125 = vst [vmem:[%s6856_s4 + $0xf8] sm:$0xff] %v4093_v55  ;;  %v4070_v38 = vmax.f32 %v4038_v45, 0.0  ;;  %v4071_v54 = vmax.f32 %v4039_v25, 0.0  ;;  %v4072_v43 = vmax.f32 %v4040_v31, 0.0  ;;  %v4073_v57 = vmax.f32 %v4041_v37, 0.0 }
 0x44f   :  { %4094 = vst [vmem:[%s6856_s4] sm:$0xff] %v4062_v62  ;;  %4095 = vst [vmem:[%s6856_s4 + $0x8] sm:$0xff] %v4063_v40  ;;  %v4074_v0 = vmax.f32 %v4042_v34, 0.0  ;;  %v4075_v47 = vmax.f32 %v4043_v21, 0.0  ;;  %v4076_v60 = vmax.f32 %v4044_v7, 0.0  ;;  %v4077_v63 = vmax.f32 %v4045_v53, 0.0 }
 0x450   :  { %4096 = vst [vmem:[%s6856_s4 + $0x10] sm:$0xff] %v4064_v20  ;;  %4097 = vst [vmem:[%s6856_s4 + $0x18] sm:$0xff] %v4065_v17 }
 0x451   :  { %4098 = vst [vmem:[%s6856_s4 + $0x20] sm:$0xff] %v4066_v35  ;;  %4099 = vst [vmem:[%s6856_s4 + $0x28] sm:$0xff] %v4067_v18 }
 0x452   :  { %4100 = vst [vmem:[%s6856_s4 + $0x30] sm:$0xff] %v4068_v30  ;;  %4101 = vst [vmem:[%s6856_s4 + $0x38] sm:$0xff] %v4069_v5 }
 0x453   :  { %4102 = vst [vmem:[%s6856_s4 + $0x40] sm:$0xff] %v4070_v38  ;;  %4103 = vst [vmem:[%s6856_s4 + $0x48] sm:$0xff] %v4071_v54 }
 0x454   :  { %4104 = vst [vmem:[%s6856_s4 + $0x50] sm:$0xff] %v4072_v43  ;;  %4105 = vst [vmem:[%s6856_s4 + $0x58] sm:$0xff] %v4073_v57 }
 0x455   :  { %4106 = vst [vmem:[%s6856_s4 + $0x60] sm:$0xff] %v4074_v0  ;;  %4107 = vst [vmem:[%s6856_s4 + $0x68] sm:$0xff] %v4075_v47 }
 0x456   :  { %4108 = vst [vmem:[%s6856_s4 + $0x70] sm:$0xff] %v4076_v60  ;;  %4109 = vst [vmem:[%s6856_s4 + $0x78] sm:$0xff] %v4077_v63 }

// kernel: generator_forward.9
= control target key start
LH: loop header
LB: loop body
LE: loop exit
PB: predicated region body
PF: predicated region fallthrough
CT: control target
= control target key end

     0   :  { %s3078_s12 = smov 0   ;;  %s3080_s13 = smov 0   ;;  %s3965_s0 = inlined_call_operand.vmem [shape: bf16[3,256], index: 0, kind: input, shape index: {}]   ;;  %s3966_s1 = inlined_call_operand.vmem [shape: bf16[256,8192], index: 1, kind: input, shape index: {}]   ;;  %s3967_s2 = inlined_call_operand.vmem [shape: f32[3,1], index: 2, kind: input, shape index: {}]   ;;  %s3968_s3 = inlined_call_operand.vmem [shape: f32[3,8192], index: 3, kind: output, shape index: {}]  }
   0x1   :  { %s3082_s14 = smov 0  }
   0x2 LB: > { %s2703_s15 = sadd.s32 4294967295, %s3055_s14   ;;  %s3095_s16 = sadd.s32 1, %s3055_s14   ;;  %s3055_s14 = sphi %s3082_s14, %s3971_s14   ;;  %s3051_s13 = sphi %s3080_s13, %s3970_s13   ;;  %s3047_s12 = sphi %s3078_s12, %s3969_s12  }
   0x3   : > { %s38_s17 = ssub.s32 %s3055_s14, %s3095_s16  ;;  %s41_s18 = sadd.s32 1, %s3051_s13 }
   0x4   : > { %p39_p0 = scmp.eq.s32.totalorder %s38_s17, 0  ;;  %p48_p1 = scmp.ne.s32.totalorder %s3051_s13, %s3047_s12 }
   0x5   : > { %p49_p2 = scmp.eq.s32.totalorder %s3055_s14, 0  ;;  %p2706_p4 = scmp.ge.s32.totalorder %s3055_s14, 4 }
   0x6   : > { %s3104_s19 = scalar_select %p39_p0, %s3051_s13, %s41_s18  }
   0x7   : > { %p50_p3 = por %p49_p2, %p48_p1  ;;  %127 = sbr.rel (%p2706_p4) target bundleno = 146 (0x92), region = 24 }
   0xe   : > { %130 = sbr.rel (!%p50_p3) target bundleno = 146 (0x92), region = 28  ;;  %s132_s20 = sand.u32 (%p50_p3), 1, %s3051_s13  }
   0xf   : > { %s2973_s21 = sshll.u32 (%p50_p3), %s3055_s14, 6  ;;  %s2707_s22 = sshll.u32 (%p50_p3), %s132_s20, 11 }
  0x10   : > { %s3112_s25 = scalar_lea.vmem (%p50_p3), %s3966_s1, %s2973_s21  ;;  %s3117_s26 = scalar_lea.vmem (%p50_p3), [#allocation2], %s2707_s22 }
  0x11   : > { %v150_v0 = vld [vmem:[%s3112_s25] sm:$0xff] (%p50_p3)  ;;  %v152_v1 = vld [vmem:[%s3112_s25 + $0x8] sm:$0xff] (%p50_p3)  ;;  %v154_v2 = vld [vmem:[%s3112_s25 + $0x10] sm:$0xff] (%p50_p3) }
  0x12   : > { %151 = vst [vmem:[%s3117_s26] sm:$0xff] (%p50_p3), %v150_v0  ;;  %153 = vst [vmem:[%s3117_s26 + $0x8] sm:$0xff] (%p50_p3), %v152_v1  ;;  %v156_v3 = vld [vmem:[%s3112_s25 + $0x18] sm:$0xff] (%p50_p3)  ;;  %v158_v4 = vld [vmem:[%s3112_s25 + $0x20] sm:$0xff] (%p50_p3) }
  0x13   : > { %155 = vst [vmem:[%s3117_s26 + $0x10] sm:$0xff] (%p50_p3), %v154_v2  ;;  %v160_v5 = vld [vmem:[%s3112_s25 + $0x28] sm:$0xff] (%p50_p3)  ;;  %157 = vst [vmem:[%s3117_s26 + $0x18] sm:$0xff] (%p50_p3), %v156_v3  ;;  %v162_v6 = vld [vmem:[%s3112_s25 + $0x30] sm:$0xff] (%p50_p3) }
  0x14   : > { %159 = vst [vmem:[%s3117_s26 + $0x20] sm:$0xff] (%p50_p3), %v158_v4  ;;  %161 = vst [vmem:[%s3117_s26 + $0x28] sm:$0xff] (%p50_p3), %v160_v5  ;;  %v164_v7 = vld [vmem:[%s3112_s25 + $0x38] sm:$0xff] (%p50_p3)  ;;  %v166_v8 = vld [vmem:[%s3112_s25 + $0x100] sm:$0xff] (%p50_p3) }
  0x15   : > { %163 = vst [vmem:[%s3117_s26 + $0x30] sm:$0xff] %v162_v6  ;;  %165 = vst [vmem:[%s3117_s26 + $0x38] sm:$0xff] %v164_v7  ;;  %v168_v9 = vld [vmem:[%s3112_s25 + $0x108] sm:$0xff]  ;;  %v170_v10 = vld [vmem:[%s3112_s25 + $0x110] sm:$0xff] }
  0x16   : > { %167 = vst [vmem:[%s3117_s26 + $0x40] sm:$0xff] %v166_v8  ;;  %v172_v11 = vld [vmem:[%s3112_s25 + $0x118] sm:$0xff]  ;;  %169 = vst [vmem:[%s3117_s26 + $0x48] sm:$0xff] %v168_v9  ;;  %v174_v12 = vld [vmem:[%s3112_s25 + $0x120] sm:$0xff] }
  0x17   : > { %171 = vst [vmem:[%s3117_s26 + $0x50] sm:$0xff] %v170_v10  ;;  %173 = vst [vmem:[%s3117_s26 + $0x58] sm:$0xff] %v172_v11  ;;  %v176_v13 = vld [vmem:[%s3112_s25 + $0x128] sm:$0xff]  ;;  %v178_v14 = vld [vmem:[%s3112_s25 + $0x130] sm:$0xff] }
  0x18   : > { %175 = vst [vmem:[%s3117_s26 + $0x60] sm:$0xff] %v174_v12  ;;  %177 = vst [vmem:[%s3117_s26 + $0x68] sm:$0xff] %v176_v13  ;;  %v180_v15 = vld [vmem:[%s3112_s25 + $0x138] sm:$0xff]  ;;  %v182_v16 = vld [vmem:[%s3112_s25 + $0x200] sm:$0xff] }
  0x19   : > { %179 = vst [vmem:[%s3117_s26 + $0x70] sm:$0xff] %v178_v14  ;;  %v184_v17 = vld [vmem:[%s3112_s25 + $0x208] sm:$0xff]  ;;  %181 = vst [vmem:[%s3117_s26 + $0x78] sm:$0xff] %v180_v15  ;;  %v186_v18 = vld [vmem:[%s3112_s25 + $0x210] sm:$0xff] }
  0x1a   : > { %183 = vst [vmem:[%s3117_s26 + $0x80] sm:$0xff] %v182_v16  ;;  %185 = vst [vmem:[%s3117_s26 + $0x88] sm:$0xff] %v184_v17  ;;  %v188_v19 = vld [vmem:[%s3112_s25 + $0x218] sm:$0xff]  ;;  %v190_v20 = vld [vmem:[%s3112_s25 + $0x220] sm:$0xff] }
  0x1b   : > { %187 = vst [vmem:[%s3117_s26 + $0x90] sm:$0xff] %v186_v18  ;;  %189 = vst [vmem:[%s3117_s26 + $0x98] sm:$0xff] %v188_v19  ;;  %v192_v21 = vld [vmem:[%s3112_s25 + $0x228] sm:$0xff]  ;;  %v194_v22 = vld [vmem:[%s3112_s25 + $0x230] sm:$0xff] }
  0x1c   : > { %191 = vst [vmem:[%s3117_s26 + $0xa0] sm:$0xff] %v190_v20  ;;  %v196_v23 = vld [vmem:[%s3112_s25 + $0x238] sm:$0xff]  ;;  %193 = vst [vmem:[%s3117_s26 + $0xa8] sm:$0xff] %v192_v21  ;;  %v198_v24 = vld [vmem:[%s3112_s25 + $0x300] sm:$0xff] }
  0x1d   : > { %195 = vst [vmem:[%s3117_s26 + $0xb0] sm:$0xff] %v194_v22  ;;  %197 = vst [vmem:[%s3117_s26 + $0xb8] sm:$0xff] %v196_v23  ;;  %v200_v25 = vld [vmem:[%s3112_s25 + $0x308] sm:$0xff]  ;;  %v202_v26 = vld [vmem:[%s3112_s25 + $0x310] sm:$0xff] }
  0x1e   : > { %199 = vst [vmem:[%s3117_s26 + $0xc0] sm:$0xff] %v198_v24  ;;  %201 = vst [vmem:[%s3117_s26 + $0xc8] sm:$0xff] %v200_v25  ;;  %v204_v27 = vld [vmem:[%s3112_s25 + $0x318] sm:$0xff]  ;;  %v206_v28 = vld [vmem:[%s3112_s25 + $0x320] sm:$0xff] }
  0x1f   : > { %203 = vst [vmem:[%s3117_s26 + $0xd0] sm:$0xff] %v202_v26  ;;  %v208_v29 = vld [vmem:[%s3112_s25 + $0x328] sm:$0xff]  ;;  %205 = vst [vmem:[%s3117_s26 + $0xd8] sm:$0xff] %v204_v27  ;;  %v210_v30 = vld [vmem:[%s3112_s25 + $0x330] sm:$0xff] }
  0x20   : > { %207 = vst [vmem:[%s3117_s26 + $0xe0] sm:$0xff] %v206_v28  ;;  %209 = vst [vmem:[%s3117_s26 + $0xe8] sm:$0xff] %v208_v29  ;;  %v212_v31 = vld [vmem:[%s3112_s25 + $0x338] sm:$0xff]  ;;  %v214_v32 = vld [vmem:[%s3112_s25 + $0x400] sm:$0xff] }
  0x21   : > { %211 = vst [vmem:[%s3117_s26 + $0xf0] sm:$0xff] %v210_v30  ;;  %213 = vst [vmem:[%s3117_s26 + $0xf8] sm:$0xff] %v212_v31  ;;  %v216_v33 = vld [vmem:[%s3112_s25 + $0x408] sm:$0xff]  ;;  %v218_v34 = vld [vmem:[%s3112_s25 + $0x410] sm:$0xff] }
  0x22   : > { %215 = vst [vmem:[%s3117_s26 + $0x100] sm:$0xff] %v214_v32  ;;  %v220_v35 = vld [vmem:[%s3112_s25 + $0x418] sm:$0xff]  ;;  %217 = vst [vmem:[%s3117_s26 + $0x108] sm:$0xff] %v216_v33  ;;  %v222_v36 = vld [vmem:[%s3112_s25 + $0x420] sm:$0xff] }
  0x23   : > { %219 = vst [vmem:[%s3117_s26 + $0x110] sm:$0xff] %v218_v34  ;;  %221 = vst [vmem:[%s3117_s26 + $0x118] sm:$0xff] %v220_v35  ;;  %v224_v37 = vld [vmem:[%s3112_s25 + $0x428] sm:$0xff]  ;;  %v226_v38 = vld [vmem:[%s3112_s25 + $0x430] sm:$0xff] }
  0x24   : > { %223 = vst [vmem:[%s3117_s26 + $0x120] sm:$0xff] %v222_v36  ;;  %225 = vst [vmem:[%s3117_s26 + $0x128] sm:$0xff] %v224_v37  ;;  %v228_v39 = vld [vmem:[%s3112_s25 + $0x438] sm:$0xff]  ;;  %v230_v40 = vld [vmem:[%s3112_s25 + $0x500] sm:$0xff] }
  0x25   : > { %227 = vst [vmem:[%s3117_s26 + $0x130] sm:$0xff] %v226_v38  ;;  %v232_v41 = vld [vmem:[%s3112_s25 + $0x508] sm:$0xff]  ;;  %229 = vst [vmem:[%s3117_s26 + $0x138] sm:$0xff] %v228_v39  ;;  %v234_v42 = vld [vmem:[%s3112_s25 + $0x510] sm:$0xff] }
  0x26   : > { %231 = vst [vmem:[%s3117_s26 + $0x140] sm:$0xff] %v230_v40  ;;  %233 = vst [vmem:[%s3117_s26 + $0x148] sm:$0xff] %v232_v41  ;;  %v236_v43 = vld [vmem:[%s3112_s25 + $0x518] sm:$0xff]  ;;  %v238_v44 = vld [vmem:[%s3112_s25 + $0x520] sm:$0xff] }
  0x27   : > { %235 = vst [vmem:[%s3117_s26 + $0x150] sm:$0xff] %v234_v42  ;;  %237 = vst [vmem:[%s3117_s26 + $0x158] sm:$0xff] %v236_v43  ;;  %v240_v45 = vld [vmem:[%s3112_s25 + $0x528] sm:$0xff]  ;;  %v242_v46 = vld [vmem:[%s3112_s25 + $0x530] sm:$0xff] }
  0x28   : > { %239 = vst [vmem:[%s3117_s26 + $0x160] sm:$0xff] %v238_v44  ;;  %v244_v47 = vld [vmem:[%s3112_s25 + $0x538] sm:$0xff]  ;;  %241 = vst [vmem:[%s3117_s26 + $0x168] sm:$0xff] %v240_v45  ;;  %v246_v48 = vld [vmem:[%s3112_s25 + $0x600] sm:$0xff] }
  0x29   : > { %243 = vst [vmem:[%s3117_s26 + $0x170] sm:$0xff] %v242_v46  ;;  %245 = vst [vmem:[%s3117_s26 + $0x178] sm:$0xff] %v244_v47  ;;  %v248_v49 = vld [vmem:[%s3112_s25 + $0x608] sm:$0xff]  ;;  %v250_v50 = vld [vmem:[%s3112_s25 + $0x610] sm:$0xff] }
  0x2a   : > { %247 = vst [vmem:[%s3117_s26 + $0x180] sm:$0xff] %v246_v48  ;;  %249 = vst [vmem:[%s3117_s26 + $0x188] sm:$0xff] %v248_v49  ;;  %v252_v51 = vld [vmem:[%s3112_s25 + $0x618] sm:$0xff]  ;;  %v254_v52 = vld [vmem:[%s3112_s25 + $0x620] sm:$0xff] }
  0x2b   : > { %251 = vst [vmem:[%s3117_s26 + $0x190] sm:$0xff] %v250_v50  ;;  %v256_v53 = vld [vmem:[%s3112_s25 + $0x628] sm:$0xff]  ;;  %253 = vst [vmem:[%s3117_s26 + $0x198] sm:$0xff] %v252_v51  ;;  %v258_v54 = vld [vmem:[%s3112_s25 + $0x630] sm:$0xff] }
  0x2c   : > { %255 = vst [vmem:[%s3117_s26 + $0x1a0] sm:$0xff] %v254_v52  ;;  %257 = vst [vmem:[%s3117_s26 + $0x1a8] sm:$0xff] %v256_v53  ;;  %v260_v55 = vld [vmem:[%s3112_s25 + $0x638] sm:$0xff]  ;;  %v262_v56 = vld [vmem:[%s3112_s25 + $0x700] sm:$0xff] }
  0x2d   : > { %259 = vst [vmem:[%s3117_s26 + $0x1b0] sm:$0xff] %v258_v54  ;;  %261 = vst [vmem:[%s3117_s26 + $0x1b8] sm:$0xff] %v260_v55  ;;  %v264_v57 = vld [vmem:[%s3112_s25 + $0x708] sm:$0xff]  ;;  %v266_v58 = vld [vmem:[%s3112_s25 + $0x710] sm:$0xff] }
  0x2e   : > { %263 = vst [vmem:[%s3117_s26 + $0x1c0] sm:$0xff] %v262_v56  ;;  %v268_v59 = vld [vmem:[%s3112_s25 + $0x718] sm:$0xff]  ;;  %265 = vst [vmem:[%s3117_s26 + $0x1c8] sm:$0xff] %v264_v57  ;;  %v270_v60 = vld [vmem:[%s3112_s25 + $0x720] sm:$0xff] }
  0x2f   : > { %267 = vst [vmem:[%s3117_s26 + $0x1d0] sm:$0xff] %v266_v58  ;;  %269 = vst [vmem:[%s3117_s26 + $0x1d8] sm:$0xff] %v268_v59  ;;  %v272_v61 = vld [vmem:[%s3112_s25 + $0x728] sm:$0xff]  ;;  %v274_v62 = vld [vmem:[%s3112_s25 + $0x730] sm:$0xff] }
  0x30   : > { %271 = vst [vmem:[%s3117_s26 + $0x1e0] sm:$0xff] %v270_v60  ;;  %273 = vst [vmem:[%s3117_s26 + $0x1e8] sm:$0xff] %v272_v61  ;;  %v276_v63 = vld [vmem:[%s3112_s25 + $0x738] sm:$0xff]  ;;  %v278_v0 = vld [vmem:[%s3112_s25 + $0x800] sm:$0xff] }
  0x31   : > { %275 = vst [vmem:[%s3117_s26 + $0x1f0] sm:$0xff] %v274_v62  ;;  %v280_v1 = vld [vmem:[%s3112_s25 + $0x808] sm:$0xff]  ;;  %277 = vst [vmem:[%s3117_s26 + $0x1f8] sm:$0xff] %v276_v63  ;;  %v282_v2 = vld [vmem:[%s3112_s25 + $0x810] sm:$0xff] }
  0x32   : > { %279 = vst [vmem:[%s3117_s26 + $0x200] sm:$0xff] %v278_v0  ;;  %281 = vst [vmem:[%s3117_s26 + $0x208] sm:$0xff] %v280_v1  ;;  %v284_v3 = vld [vmem:[%s3112_s25 + $0x818] sm:$0xff]  ;;  %v286_v4 = vld [vmem:[%s3112_s25 + $0x820] sm:$0xff] }
  0x33   : > { %283 = vst [vmem:[%s3117_s26 + $0x210] sm:$0xff] %v282_v2  ;;  %285 = vst [vmem:[%s3117_s26 + $0x218] sm:$0xff] %v284_v3  ;;  %v288_v5 = vld [vmem:[%s3112_s25 + $0x828] sm:$0xff]  ;;  %v290_v6 = vld [vmem:[%s3112_s25 + $0x830] sm:$0xff] }
  0x34   : > { %287 = vst [vmem:[%s3117_s26 + $0x220] sm:$0xff] %v286_v4  ;;  %v292_v7 = vld [vmem:[%s3112_s25 + $0x838] sm:$0xff]  ;;  %289 = vst [vmem:[%s3117_s26 + $0x228] sm:$0xff] %v288_v5  ;;  %v294_v8 = vld [vmem:[%s3112_s25 + $0x900] sm:$0xff] }
  0x35   : > { %291 = vst [vmem:[%s3117_s26 + $0x230] sm:$0xff] %v290_v6  ;;  %293 = vst [vmem:[%s3117_s26 + $0x238] sm:$0xff] %v292_v7  ;;  %v296_v9 = vld [vmem:[%s3112_s25 + $0x908] sm:$0xff]  ;;  %v298_v10 = vld [vmem:[%s3112_s25 + $0x910] sm:$0xff] }
  0x36   : > { %295 = vst [vmem:[%s3117_s26 + $0x240] sm:$0xff] %v294_v8  ;;  %297 = vst [vmem:[%s3117_s26 + $0x248] sm:$0xff] %v296_v9  ;;  %v300_v11 = vld [vmem:[%s3112_s25 + $0x918] sm:$0xff]  ;;  %v302_v12 = vld [vmem:[%s3112_s25 + $0x920] sm:$0xff] }
  0x37   : > { %299 = vst [vmem:[%s3117_s26 + $0x250] sm:$0xff] %v298_v10  ;;  %v304_v13 = vld [vmem:[%s3112_s25 + $0x928] sm:$0xff]  ;;  %301 = vst [vmem:[%s3117_s26 + $0x258] sm:$0xff] %v300_v11  ;;  %v306_v14 = vld [vmem:[%s3112_s25 + $0x930] sm:$0xff] }
  0x38   : > { %303 = vst [vmem:[%s3117_s26 + $0x260] sm:$0xff] %v302_v12  ;;  %305 = vst [vmem:[%s3117_s26 + $0x268] sm:$0xff] %v304_v13  ;;  %v308_v15 = vld [vmem:[%s3112_s25 + $0x938] sm:$0xff]  ;;  %v310_v16 = vld [vmem:[%s3112_s25 + $0xa00] sm:$0xff] }
  0x39   : > { %307 = vst [vmem:[%s3117_s26 + $0x270] sm:$0xff] %v306_v14  ;;  %309 = vst [vmem:[%s3117_s26 + $0x278] sm:$0xff] %v308_v15  ;;  %v312_v17 = vld [vmem:[%s3112_s25 + $0xa08] sm:$0xff]  ;;  %v314_v18 = vld [vmem:[%s3112_s25 + $0xa10] sm:$0xff] }
  0x3a   : > { %311 = vst [vmem:[%s3117_s26 + $0x280] sm:$0xff] %v310_v16  ;;  %v316_v19 = vld [vmem:[%s3112_s25 + $0xa18] sm:$0xff]  ;;  %313 = vst [vmem:[%s3117_s26 + $0x288] sm:$0xff] %v312_v17  ;;  %v318_v20 = vld [vmem:[%s3112_s25 + $0xa20] sm:$0xff] }
  0x3b   : > { %315 = vst [vmem:[%s3117_s26 + $0x290] sm:$0xff] %v314_v18  ;;  %317 = vst [vmem:[%s3117_s26 + $0x298] sm:$0xff] %v316_v19  ;;  %v320_v21 = vld [vmem:[%s3112_s25 + $0xa28] sm:$0xff]  ;;  %v322_v22 = vld [vmem:[%s3112_s25 + $0xa30] sm:$0xff] }
  0x3c   : > { %319 = vst [vmem:[%s3117_s26 + $0x2a0] sm:$0xff] %v318_v20  ;;  %321 = vst [vmem:[%s3117_s26 + $0x2a8] sm:$0xff] %v320_v21  ;;  %v324_v23 = vld [vmem:[%s3112_s25 + $0xa38] sm:$0xff]  ;;  %v326_v24 = vld [vmem:[%s3112_s25 + $0xb00] sm:$0xff] }
  0x3d   : > { %323 = vst [vmem:[%s3117_s26 + $0x2b0] sm:$0xff] %v322_v22  ;;  %v328_v25 = vld [vmem:[%s3112_s25 + $0xb08] sm:$0xff]  ;;  %325 = vst [vmem:[%s3117_s26 + $0x2b8] sm:$0xff] %v324_v23  ;;  %v330_v26 = vld [vmem:[%s3112_s25 + $0xb10] sm:$0xff] }
  0x3e   : > { %327 = vst [vmem:[%s3117_s26 + $0x2c0] sm:$0xff] %v326_v24  ;;  %329 = vst [vmem:[%s3117_s26 + $0x2c8] sm:$0xff] %v328_v25  ;;  %v332_v27 = vld [vmem:[%s3112_s25 + $0xb18] sm:$0xff]  ;;  %v334_v28 = vld [vmem:[%s3112_s25 + $0xb20] sm:$0xff] }
  0x3f   : > { %331 = vst [vmem:[%s3117_s26 + $0x2d0] sm:$0xff] %v330_v26  ;;  %333 = vst [vmem:[%s3117_s26 + $0x2d8] sm:$0xff] %v332_v27  ;;  %v336_v29 = vld [vmem:[%s3112_s25 + $0xb28] sm:$0xff]  ;;  %v338_v30 = vld [vmem:[%s3112_s25 + $0xb30] sm:$0xff] }
  0x40   : > { %335 = vst [vmem:[%s3117_s26 + $0x2e0] sm:$0xff] %v334_v28  ;;  %v340_v31 = vld [vmem:[%s3112_s25 + $0xb38] sm:$0xff]  ;;  %337 = vst [vmem:[%s3117_s26 + $0x2e8] sm:$0xff] %v336_v29  ;;  %v342_v32 = vld [vmem:[%s3112_s25 + $0xc00] sm:$0xff] }
  0x41   : > { %339 = vst [vmem:[%s3117_s26 + $0x2f0] sm:$0xff] %v338_v30  ;;  %341 = vst [vmem:[%s3117_s26 + $0x2f8] sm:$0xff] %v340_v31  ;;  %v344_v33 = vld [vmem:[%s3112_s25 + $0xc08] sm:$0xff]  ;;  %v346_v34 = vld [vmem:[%s3112_s25 + $0xc10] sm:$0xff] }
  0x42   : > { %343 = vst [vmem:[%s3117_s26 + $0x300] sm:$0xff] %v342_v32  ;;  %345 = vst [vmem:[%s3117_s26 + $0x308] sm:$0xff] %v344_v33  ;;  %v348_v35 = vld [vmem:[%s3112_s25 + $0xc18] sm:$0xff]  ;;  %v350_v36 = vld [vmem:[%s3112_s25 + $0xc20] sm:$0xff] }
  0x43   : > { %347 = vst [vmem:[%s3117_s26 + $0x310] sm:$0xff] %v346_v34  ;;  %v352_v37 = vld [vmem:[%s3112_s25 + $0xc28] sm:$0xff]  ;;  %349 = vst [vmem:[%s3117_s26 + $0x318] sm:$0xff] %v348_v35  ;;  %v354_v38 = vld [vmem:[%s3112_s25 + $0xc30] sm:$0xff] }
  0x44   : > { %351 = vst [vmem:[%s3117_s26 + $0x320] sm:$0xff] %v350_v36  ;;  %353 = vst [vmem:[%s3117_s26 + $0x328] sm:$0xff] %v352_v37  ;;  %v356_v39 = vld [vmem:[%s3112_s25 + $0xc38] sm:$0xff]  ;;  %v358_v40 = vld [vmem:[%s3112_s25 + $0xd00] sm:$0xff] }
  0x45   : > { %355 = vst [vmem:[%s3117_s26 + $0x330] sm:$0xff] %v354_v38  ;;  %357 = vst [vmem:[%s3117_s26 + $0x338] sm:$0xff] %v356_v39  ;;  %v360_v41 = vld [vmem:[%s3112_s25 + $0xd08] sm:$0xff]  ;;  %v362_v42 = vld [vmem:[%s3112_s25 + $0xd10] sm:$0xff] }
  0x46   : > { %359 = vst [vmem:[%s3117_s26 + $0x340] sm:$0xff] %v358_v40  ;;  %v364_v43 = vld [vmem:[%s3112_s25 + $0xd18] sm:$0xff]  ;;  %361 = vst [vmem:[%s3117_s26 + $0x348] sm:$0xff] %v360_v41  ;;  %v366_v44 = vld [vmem:[%s3112_s25 + $0xd20] sm:$0xff] }
  0x47   : > { %363 = vst [vmem:[%s3117_s26 + $0x350] sm:$0xff] %v362_v42  ;;  %365 = vst [vmem:[%s3117_s26 + $0x358] sm:$0xff] %v364_v43  ;;  %v368_v45 = vld [vmem:[%s3112_s25 + $0xd28] sm:$0xff]  ;;  %v370_v46 = vld [vmem:[%s3112_s25 + $0xd30] sm:$0xff] }
  0x48   : > { %367 = vst [vmem:[%s3117_s26 + $0x360] sm:$0xff] %v366_v44  ;;  %369 = vst [vmem:[%s3117_s26 + $0x368] sm:$0xff] %v368_v45  ;;  %v372_v47 = vld [vmem:[%s3112_s25 + $0xd38] sm:$0xff]  ;;  %v374_v48 = vld [vmem:[%s3112_s25 + $0xe00] sm:$0xff] }
  0x49   : > { %371 = vst [vmem:[%s3117_s26 + $0x370] sm:$0xff] %v370_v46  ;;  %v376_v49 = vld [vmem:[%s3112_s25 + $0xe08] sm:$0xff]  ;;  %373 = vst [vmem:[%s3117_s26 + $0x378] sm:$0xff] %v372_v47  ;;  %v378_v50 = vld [vmem:[%s3112_s25 + $0xe10] sm:$0xff] }
  0x4a   : > { %375 = vst [vmem:[%s3117_s26 + $0x380] sm:$0xff] %v374_v48  ;;  %377 = vst [vmem:[%s3117_s26 + $0x388] sm:$0xff] %v376_v49  ;;  %v380_v51 = vld [vmem:[%s3112_s25 + $0xe18] sm:$0xff]  ;;  %v382_v52 = vld [vmem:[%s3112_s25 + $0xe20] sm:$0xff] }
  0x4b   : > { %379 = vst [vmem:[%s3117_s26 + $0x390] sm:$0xff] %v378_v50  ;;  %381 = vst [vmem:[%s3117_s26 + $0x398] sm:$0xff] %v380_v51  ;;  %v384_v53 = vld [vmem:[%s3112_s25 + $0xe28] sm:$0xff]  ;;  %v386_v54 = vld [vmem:[%s3112_s25 + $0xe30] sm:$0xff] }
  0x4c   : > { %383 = vst [vmem:[%s3117_s26 + $0x3a0] sm:$0xff] %v382_v52  ;;  %v388_v55 = vld [vmem:[%s3112_s25 + $0xe38] sm:$0xff]  ;;  %385 = vst [vmem:[%s3117_s26 + $0x3a8] sm:$0xff] %v384_v53  ;;  %v390_v56 = vld [vmem:[%s3112_s25 + $0xf00] sm:$0xff] }
  0x4d   : > { %387 = vst [vmem:[%s3117_s26 + $0x3b0] sm:$0xff] %v386_v54  ;;  %389 = vst [vmem:[%s3117_s26 + $0x3b8] sm:$0xff] %v388_v55  ;;  %v392_v57 = vld [vmem:[%s3112_s25 + $0xf08] sm:$0xff]  ;;  %v394_v58 = vld [vmem:[%s3112_s25 + $0xf10] sm:$0xff] }
  0x4e   : > { %391 = vst [vmem:[%s3117_s26 + $0x3c0] sm:$0xff] %v390_v56  ;;  %393 = vst [vmem:[%s3117_s26 + $0x3c8] sm:$0xff] %v392_v57  ;;  %v396_v59 = vld [vmem:[%s3112_s25 + $0xf18] sm:$0xff]  ;;  %v398_v60 = vld [vmem:[%s3112_s25 + $0xf20] sm:$0xff] }
  0x4f   : > { %395 = vst [vmem:[%s3117_s26 + $0x3d0] sm:$0xff] %v394_v58  ;;  %v400_v61 = vld [vmem:[%s3112_s25 + $0xf28] sm:$0xff]  ;;  %397 = vst [vmem:[%s3117_s26 + $0x3d8] sm:$0xff] %v396_v59  ;;  %v402_v62 = vld [vmem:[%s3112_s25 + $0xf30] sm:$0xff] }
  0x50   : > { %399 = vst [vmem:[%s3117_s26 + $0x3e0] sm:$0xff] %v398_v60  ;;  %401 = vst [vmem:[%s3117_s26 + $0x3e8] sm:$0xff] %v400_v61  ;;  %v404_v63 = vld [vmem:[%s3112_s25 + $0xf38] sm:$0xff]  ;;  %v406_v0 = vld [vmem:[%s3112_s25 + $0x1000] sm:$0xff] }
  0x51   : > { %403 = vst [vmem:[%s3117_s26 + $0x3f0] sm:$0xff] %v402_v62  ;;  %405 = vst [vmem:[%s3117_s26 + $0x3f8] sm:$0xff] %v404_v63  ;;  %v408_v1 = vld [vmem:[%s3112_s25 + $0x1008] sm:$0xff]  ;;  %v410_v2 = vld [vmem:[%s3112_s25 + $0x1010] sm:$0xff] }
  0x52   : > { %407 = vst [vmem:[%s3117_s26 + $0x400] sm:$0xff] %v406_v0  ;;  %v412_v3 = vld [vmem:[%s3112_s25 + $0x1018] sm:$0xff]  ;;  %409 = vst [vmem:[%s3117_s26 + $0x408] sm:$0xff] %v408_v1  ;;  %v414_v4 = vld [vmem:[%s3112_s25 + $0x1020] sm:$0xff] }
  0x53   : > { %411 = vst [vmem:[%s3117_s26 + $0x410] sm:$0xff] %v410_v2  ;;  %413 = vst [vmem:[%s3117_s26 + $0x418] sm:$0xff] %v412_v3  ;;  %v416_v5 = vld [vmem:[%s3112_s25 + $0x1028] sm:$0xff]  ;;  %v418_v6 = vld [vmem:[%s3112_s25 + $0x1030] sm:$0xff] }
  0x54   : > { %415 = vst [vmem:[%s3117_s26 + $0x420] sm:$0xff] %v414_v4  ;;  %417 = vst [vmem:[%s3117_s26 + $0x428] sm:$0xff] %v416_v5  ;;  %v420_v7 = vld [vmem:[%s3112_s25 + $0x1038] sm:$0xff]  ;;  %v422_v8 = vld [vmem:[%s3112_s25 + $0x1100] sm:$0xff] }
  0x55   : > { %419 = vst [vmem:[%s3117_s26 + $0x430] sm:$0xff] %v418_v6  ;;  %v424_v9 = vld [vmem:[%s3112_s25 + $0x1108] sm:$0xff]  ;;  %421 = vst [vmem:[%s3117_s26 + $0x438] sm:$0xff] %v420_v7  ;;  %v426_v10 = vld [vmem:[%s3112_s25 + $0x1110] sm:$0xff] }
  0x56   : > { %423 = vst [vmem:[%s3117_s26 + $0x440] sm:$0xff] %v422_v8  ;;  %425 = vst [vmem:[%s3117_s26 + $0x448] sm:$0xff] %v424_v9  ;;  %v428_v11 = vld [vmem:[%s3112_s25 + $0x1118] sm:$0xff]  ;;  %v430_v12 = vld [vmem:[%s3112_s25 + $0x1120] sm:$0xff] }
  0x57   : > { %427 = vst [vmem:[%s3117_s26 + $0x450] sm:$0xff] %v426_v10  ;;  %429 = vst [vmem:[%s3117_s26 + $0x458] sm:$0xff] %v428_v11  ;;  %v432_v13 = vld [vmem:[%s3112_s25 + $0x1128] sm:$0xff]  ;;  %v434_v14 = vld [vmem:[%s3112_s25 + $0x1130] sm:$0xff] }
  0x58   : > { %431 = vst [vmem:[%s3117_s26 + $0x460] sm:$0xff] %v430_v12  ;;  %v436_v15 = vld [vmem:[%s3112_s25 + $0x1138] sm:$0xff]  ;;  %433 = vst [vmem:[%s3117_s26 + $0x468] sm:$0xff] %v432_v13  ;;  %v438_v16 = vld [vmem:[%s3112_s25 + $0x1200] sm:$0xff] }
  0x59   : > { %435 = vst [vmem:[%s3117_s26 + $0x470] sm:$0xff] %v434_v14  ;;  %437 = vst [vmem:[%s3117_s26 + $0x478] sm:$0xff] %v436_v15  ;;  %v440_v17 = vld [vmem:[%s3112_s25 + $0x1208] sm:$0xff]  ;;  %v442_v18 = vld [vmem:[%s3112_s25 + $0x1210] sm:$0xff] }
  0x5a   : > { %439 = vst [vmem:[%s3117_s26 + $0x480] sm:$0xff] %v438_v16  ;;  %441 = vst [vmem:[%s3117_s26 + $0x488] sm:$0xff] %v440_v17  ;;  %v444_v19 = vld [vmem:[%s3112_s25 + $0x1218] sm:$0xff]  ;;  %v446_v20 = vld [vmem:[%s3112_s25 + $0x1220] sm:$0xff] }
  0x5b   : > { %443 = vst [vmem:[%s3117_s26 + $0x490] sm:$0xff] %v442_v18  ;;  %v448_v21 = vld [vmem:[%s3112_s25 + $0x1228] sm:$0xff]  ;;  %445 = vst [vmem:[%s3117_s26 + $0x498] sm:$0xff] %v444_v19  ;;  %v450_v22 = vld [vmem:[%s3112_s25 + $0x1230] sm:$0xff] }
  0x5c   : > { %447 = vst [vmem:[%s3117_s26 + $0x4a0] sm:$0xff] %v446_v20  ;;  %449 = vst [vmem:[%s3117_s26 + $0x4a8] sm:$0xff] %v448_v21  ;;  %v452_v23 = vld [vmem:[%s3112_s25 + $0x1238] sm:$0xff]  ;;  %v454_v24 = vld [vmem:[%s3112_s25 + $0x1300] sm:$0xff] }
  0x5d   : > { %451 = vst [vmem:[%s3117_s26 + $0x4b0] sm:$0xff] %v450_v22  ;;  %453 = vst [vmem:[%s3117_s26 + $0x4b8] sm:$0xff] %v452_v23  ;;  %v456_v25 = vld [vmem:[%s3112_s25 + $0x1308] sm:$0xff]  ;;  %v458_v26 = vld [vmem:[%s3112_s25 + $0x1310] sm:$0xff] }
  0x5e   : > { %455 = vst [vmem:[%s3117_s26 + $0x4c0] sm:$0xff] %v454_v24  ;;  %v460_v27 = vld [vmem:[%s3112_s25 + $0x1318] sm:$0xff]  ;;  %457 = vst [vmem:[%s3117_s26 + $0x4c8] sm:$0xff] %v456_v25  ;;  %v462_v28 = vld [vmem:[%s3112_s25 + $0x1320] sm:$0xff] }
  0x5f   : > { %459 = vst [vmem:[%s3117_s26 + $0x4d0] sm:$0xff] %v458_v26  ;;  %461 = vst [vmem:[%s3117_s26 + $0x4d8] sm:$0xff] %v460_v27  ;;  %v464_v29 = vld [vmem:[%s3112_s25 + $0x1328] sm:$0xff]  ;;  %v466_v30 = vld [vmem:[%s3112_s25 + $0x1330] sm:$0xff] }
  0x60   : > { %463 = vst [vmem:[%s3117_s26 + $0x4e0] sm:$0xff] %v462_v28  ;;  %465 = vst [vmem:[%s3117_s26 + $0x4e8] sm:$0xff] %v464_v29  ;;  %v468_v31 = vld [vmem:[%s3112_s25 + $0x1338] sm:$0xff]  ;;  %v470_v32 = vld [vmem:[%s3112_s25 + $0x1400] sm:$0xff] }
  0x61   : > { %467 = vst [vmem:[%s3117_s26 + $0x4f0] sm:$0xff] %v466_v30  ;;  %v472_v33 = vld [vmem:[%s3112_s25 + $0x1408] sm:$0xff]  ;;  %469 = vst [vmem:[%s3117_s26 + $0x4f8] sm:$0xff] %v468_v31  ;;  %v474_v34 = vld [vmem:[%s3112_s25 + $0x1410] sm:$0xff] }
  0x62   : > { %471 = vst [vmem:[%s3117_s26 + $0x500] sm:$0xff] %v470_v32  ;;  %473 = vst [vmem:[%s3117_s26 + $0x508] sm:$0xff] %v472_v33  ;;  %v476_v35 = vld [vmem:[%s3112_s25 + $0x1418] sm:$0xff]  ;;  %v478_v36 = vld [vmem:[%s3112_s25 + $0x1420] sm:$0xff] }
  0x63   : > { %475 = vst [vmem:[%s3117_s26 + $0x510] sm:$0xff] %v474_v34  ;;  %477 = vst [vmem:[%s3117_s26 + $0x518] sm:$0xff] %v476_v35  ;;  %v480_v37 = vld [vmem:[%s3112_s25 + $0x1428] sm:$0xff]  ;;  %v482_v38 = vld [vmem:[%s3112_s25 + $0x1430] sm:$0xff] }
  0x64   : > { %479 = vst [vmem:[%s3117_s26 + $0x520] sm:$0xff] %v478_v36  ;;  %v484_v39 = vld [vmem:[%s3112_s25 + $0x1438] sm:$0xff]  ;;  %481 = vst [vmem:[%s3117_s26 + $0x528] sm:$0xff] %v480_v37  ;;  %v486_v40 = vld [vmem:[%s3112_s25 + $0x1500] sm:$0xff] }
  0x65   : > { %483 = vst [vmem:[%s3117_s26 + $0x530] sm:$0xff] %v482_v38  ;;  %485 = vst [vmem:[%s3117_s26 + $0x538] sm:$0xff] %v484_v39  ;;  %v488_v41 = vld [vmem:[%s3112_s25 + $0x1508] sm:$0xff]  ;;  %v490_v42 = vld [vmem:[%s3112_s25 + $0x1510] sm:$0xff] }
  0x66   : > { %487 = vst [vmem:[%s3117_s26 + $0x540] sm:$0xff] %v486_v40  ;;  %489 = vst [vmem:[%s3117_s26 + $0x548] sm:$0xff] %v488_v41  ;;  %v492_v43 = vld [vmem:[%s3112_s25 + $0x1518] sm:$0xff]  ;;  %v494_v44 = vld [vmem:[%s3112_s25 + $0x1520] sm:$0xff] }
  0x67   : > { %491 = vst [vmem:[%s3117_s26 + $0x550] sm:$0xff] %v490_v42  ;;  %v496_v45 = vld [vmem:[%s3112_s25 + $0x1528] sm:$0xff]  ;;  %493 = vst [vmem:[%s3117_s26 + $0x558] sm:$0xff] %v492_v43  ;;  %v498_v46 = vld [vmem:[%s3112_s25 + $0x1530] sm:$0xff] }
  0x68   : > { %495 = vst [vmem:[%s3117_s26 + $0x560] sm:$0xff] %v494_v44  ;;  %497 = vst [vmem:[%s3117_s26 + $0x568] sm:$0xff] %v496_v45  ;;  %v500_v47 = vld [vmem:[%s3112_s25 + $0x1538] sm:$0xff]  ;;  %v502_v48 = vld [vmem:[%s3112_s25 + $0x1600] sm:$0xff] }
  0x69   : > { %499 = vst [vmem:[%s3117_s26 + $0x570] sm:$0xff] %v498_v46  ;;  %501 = vst [vmem:[%s3117_s26 + $0x578] sm:$0xff] %v500_v47  ;;  %v504_v49 = vld [vmem:[%s3112_s25 + $0x1608] sm:$0xff]  ;;  %v506_v50 = vld [vmem:[%s3112_s25 + $0x1610] sm:$0xff] }
  0x6a   : > { %503 = vst [vmem:[%s3117_s26 + $0x580] sm:$0xff] %v502_v48  ;;  %v508_v51 = vld [vmem:[%s3112_s25 + $0x1618] sm:$0xff]  ;;  %505 = vst [vmem:[%s3117_s26 + $0x588] sm:$0xff] %v504_v49  ;;  %v510_v52 = vld [vmem:[%s3112_s25 + $0x1620] sm:$0xff] }
  0x6b   : > { %507 = vst [vmem:[%s3117_s26 + $0x590] sm:$0xff] %v506_v50  ;;  %509 = vst [vmem:[%s3117_s26 + $0x598] sm:$0xff] %v508_v51  ;;  %v512_v53 = vld [vmem:[%s3112_s25 + $0x1628] sm:$0xff]  ;;  %v514_v54 = vld [vmem:[%s3112_s25 + $0x1630] sm:$0xff] }
  0x6c   : > { %511 = vst [vmem:[%s3117_s26 + $0x5a0] sm:$0xff] %v510_v52  ;;  %513 = vst [vmem:[%s3117_s26 + $0x5a8] sm:$0xff] %v512_v53  ;;  %v516_v55 = vld [vmem:[%s3112_s25 + $0x1638] sm:$0xff]  ;;  %v518_v56 = vld [vmem:[%s3112_s25 + $0x1700] sm:$0xff] }
  0x6d   : > { %515 = vst [vmem:[%s3117_s26 + $0x5b0] sm:$0xff] %v514_v54  ;;  %v520_v57 = vld [vmem:[%s3112_s25 + $0x1708] sm:$0xff]  ;;  %517 = vst [vmem:[%s3117_s26 + $0x5b8] sm:$0xff] %v516_v55  ;;  %v522_v58 = vld [vmem:[%s3112_s25 + $0x1710] sm:$0xff] }
  0x6e   : > { %519 = vst [vmem:[%s3117_s26 + $0x5c0] sm:$0xff] %v518_v56  ;;  %521 = vst [vmem:[%s3117_s26 + $0x5c8] sm:$0xff] %v520_v57  ;;  %v524_v59 = vld [vmem:[%s3112_s25 + $0x1718] sm:$0xff]  ;;  %v526_v60 = vld [vmem:[%s3112_s25 + $0x1720] sm:$0xff] }
  0x6f   : > { %523 = vst [vmem:[%s3117_s26 + $0x5d0] sm:$0xff] %v522_v58  ;;  %525 = vst [vmem:[%s3117_s26 + $0x5d8] sm:$0xff] %v524_v59  ;;  %v528_v61 = vld [vmem:[%s3112_s25 + $0x1728] sm:$0xff]  ;;  %v530_v62 = vld [vmem:[%s3112_s25 + $0x1730] sm:$0xff] }
  0x70   : > { %527 = vst [vmem:[%s3117_s26 + $0x5e0] sm:$0xff] %v526_v60  ;;  %v532_v63 = vld [vmem:[%s3112_s25 + $0x1738] sm:$0xff]  ;;  %529 = vst [vmem:[%s3117_s26 + $0x5e8] sm:$0xff] %v528_v61  ;;  %v534_v0 = vld [vmem:[%s3112_s25 + $0x1800] sm:$0xff] }
  0x71   : > { %531 = vst [vmem:[%s3117_s26 + $0x5f0] sm:$0xff] %v530_v62  ;;  %533 = vst [vmem:[%s3117_s26 + $0x5f8] sm:$0xff] %v532_v63  ;;  %v536_v1 = vld [vmem:[%s3112_s25 + $0x1808] sm:$0xff]  ;;  %v538_v2 = vld [vmem:[%s3112_s25 + $0x1810] sm:$0xff] }
  0x72   : > { %535 = vst [vmem:[%s3117_s26 + $0x600] sm:$0xff] %v534_v0  ;;  %537 = vst [vmem:[%s3117_s26 + $0x608] sm:$0xff] %v536_v1  ;;  %v540_v3 = vld [vmem:[%s3112_s25 + $0x1818] sm:$0xff]  ;;  %v542_v4 = vld [vmem:[%s3112_s25 + $0x1820] sm:$0xff] }
  0x73   : > { %539 = vst [vmem:[%s3117_s26 + $0x610] sm:$0xff] %v538_v2  ;;  %v544_v5 = vld [vmem:[%s3112_s25 + $0x1828] sm:$0xff]  ;;  %541 = vst [vmem:[%s3117_s26 + $0x618] sm:$0xff] %v540_v3  ;;  %v546_v6 = vld [vmem:[%s3112_s25 + $0x1830] sm:$0xff] }
  0x74   : > { %543 = vst [vmem:[%s3117_s26 + $0x620] sm:$0xff] %v542_v4  ;;  %545 = vst [vmem:[%s3117_s26 + $0x628] sm:$0xff] %v544_v5  ;;  %v548_v7 = vld [vmem:[%s3112_s25 + $0x1838] sm:$0xff]  ;;  %v550_v8 = vld [vmem:[%s3112_s25 + $0x1900] sm:$0xff] }
  0x75   : > { %547 = vst [vmem:[%s3117_s26 + $0x630] sm:$0xff] %v546_v6  ;;  %549 = vst [vmem:[%s3117_s26 + $0x638] sm:$0xff] %v548_v7  ;;  %v552_v9 = vld [vmem:[%s3112_s25 + $0x1908] sm:$0xff]  ;;  %v554_v10 = vld [vmem:[%s3112_s25 + $0x1910] sm:$0xff] }
  0x76   : > { %551 = vst [vmem:[%s3117_s26 + $0x640] sm:$0xff] %v550_v8  ;;  %v556_v11 = vld [vmem:[%s3112_s25 + $0x1918] sm:$0xff]  ;;  %553 = vst [vmem:[%s3117_s26 + $0x648] sm:$0xff] %v552_v9  ;;  %v558_v12 = vld [vmem:[%s3112_s25 + $0x1920] sm:$0xff] }
  0x77   : > { %555 = vst [vmem:[%s3117_s26 + $0x650] sm:$0xff] %v554_v10  ;;  %557 = vst [vmem:[%s3117_s26 + $0x658] sm:$0xff] %v556_v11  ;;  %v560_v13 = vld [vmem:[%s3112_s25 + $0x1928] sm:$0xff]  ;;  %v562_v14 = vld [vmem:[%s3112_s25 + $0x1930] sm:$0xff] }
  0x78   : > { %559 = vst [vmem:[%s3117_s26 + $0x660] sm:$0xff] %v558_v12  ;;  %561 = vst [vmem:[%s3117_s26 + $0x668] sm:$0xff] %v560_v13  ;;  %v564_v15 = vld [vmem:[%s3112_s25 + $0x1938] sm:$0xff]  ;;  %v566_v16 = vld [vmem:[%s3112_s25 + $0x1a00] sm:$0xff] }
  0x79   : > { %563 = vst [vmem:[%s3117_s26 + $0x670] sm:$0xff] %v562_v14  ;;  %v568_v17 = vld [vmem:[%s3112_s25 + $0x1a08] sm:$0xff]  ;;  %565 = vst [vmem:[%s3117_s26 + $0x678] sm:$0xff] %v564_v15  ;;  %v570_v18 = vld [vmem:[%s3112_s25 + $0x1a10] sm:$0xff] }
  0x7a   : > { %567 = vst [vmem:[%s3117_s26 + $0x680] sm:$0xff] %v566_v16  ;;  %569 = vst [vmem:[%s3117_s26 + $0x688] sm:$0xff] %v568_v17  ;;  %v572_v19 = vld [vmem:[%s3112_s25 + $0x1a18] sm:$0xff]  ;;  %v574_v20 = vld [vmem:[%s3112_s25 + $0x1a20] sm:$0xff] }
  0x7b   : > { %571 = vst [vmem:[%s3117_s26 + $0x690] sm:$0xff] %v570_v18  ;;  %573 = vst [vmem:[%s3117_s26 + $0x698] sm:$0xff] %v572_v19  ;;  %v576_v21 = vld [vmem:[%s3112_s25 + $0x1a28] sm:$0xff]  ;;  %v578_v22 = vld [vmem:[%s3112_s25 + $0x1a30] sm:$0xff] }
  0x7c   : > { %575 = vst [vmem:[%s3117_s26 + $0x6a0] sm:$0xff] %v574_v20  ;;  %v580_v23 = vld [vmem:[%s3112_s25 + $0x1a38] sm:$0xff]  ;;  %577 = vst [vmem:[%s3117_s26 + $0x6a8] sm:$0xff] %v576_v21  ;;  %v582_v24 = vld [vmem:[%s3112_s25 + $0x1b00] sm:$0xff] }
  0x7d   : > { %579 = vst [vmem:[%s3117_s26 + $0x6b0] sm:$0xff] %v578_v22  ;;  %581 = vst [vmem:[%s3117_s26 + $0x6b8] sm:$0xff] %v580_v23  ;;  %v584_v25 = vld [vmem:[%s3112_s25 + $0x1b08] sm:$0xff]  ;;  %v586_v26 = vld [vmem:[%s3112_s25 + $0x1b10] sm:$0xff] }
  0x7e   : > { %583 = vst [vmem:[%s3117_s26 + $0x6c0] sm:$0xff] %v582_v24  ;;  %585 = vst [vmem:[%s3117_s26 + $0x6c8] sm:$0xff] %v584_v25  ;;  %v588_v27 = vld [vmem:[%s3112_s25 + $0x1b18] sm:$0xff]  ;;  %v590_v28 = vld [vmem:[%s3112_s25 + $0x1b20] sm:$0xff] }
  0x7f   : > { %587 = vst [vmem:[%s3117_s26 + $0x6d0] sm:$0xff] %v586_v26  ;;  %v592_v29 = vld [vmem:[%s3112_s25 + $0x1b28] sm:$0xff]  ;;  %589 = vst [vmem:[%s3117_s26 + $0x6d8] sm:$0xff] %v588_v27  ;;  %v594_v30 = vld [vmem:[%s3112_s25 + $0x1b30] sm:$0xff] }
  0x80   : > { %591 = vst [vmem:[%s3117_s26 + $0x6e0] sm:$0xff] %v590_v28  ;;  %593 = vst [vmem:[%s3117_s26 + $0x6e8] sm:$0xff] %v592_v29  ;;  %v596_v31 = vld [vmem:[%s3112_s25 + $0x1b38] sm:$0xff]  ;;  %v598_v32 = vld [vmem:[%s3112_s25 + $0x1c00] sm:$0xff] }
  0x81   : > { %595 = vst [vmem:[%s3117_s26 + $0x6f0] sm:$0xff] %v594_v30  ;;  %597 = vst [vmem:[%s3117_s26 + $0x6f8] sm:$0xff] %v596_v31  ;;  %v600_v33 = vld [vmem:[%s3112_s25 + $0x1c08] sm:$0xff]  ;;  %v602_v34 = vld [vmem:[%s3112_s25 + $0x1c10] sm:$0xff] }
  0x82   : > { %599 = vst [vmem:[%s3117_s26 + $0x700] sm:$0xff] %v598_v32  ;;  %v604_v35 = vld [vmem:[%s3112_s25 + $0x1c18] sm:$0xff]  ;;  %601 = vst [vmem:[%s3117_s26 + $0x708] sm:$0xff] %v600_v33  ;;  %v606_v36 = vld [vmem:[%s3112_s25 + $0x1c20] sm:$0xff] }
  0x83   : > { %603 = vst [vmem:[%s3117_s26 + $0x710] sm:$0xff] %v602_v34  ;;  %605 = vst [vmem:[%s3117_s26 + $0x718] sm:$0xff] %v604_v35  ;;  %v608_v37 = vld [vmem:[%s3112_s25 + $0x1c28] sm:$0xff]  ;;  %v610_v38 = vld [vmem:[%s3112_s25 + $0x1c30] sm:$0xff] }
  0x84   : > { %607 = vst [vmem:[%s3117_s26 + $0x720] sm:$0xff] %v606_v36  ;;  %609 = vst [vmem:[%s3117_s26 + $0x728] sm:$0xff] %v608_v37  ;;  %v612_v39 = vld [vmem:[%s3112_s25 + $0x1c38] sm:$0xff]  ;;  %v614_v40 = vld [vmem:[%s3112_s25 + $0x1d00] sm:$0xff] }
  0x85   : > { %611 = vst [vmem:[%s3117_s26 + $0x730] sm:$0xff] %v610_v38  ;;  %v616_v41 = vld [vmem:[%s3112_s25 + $0x1d08] sm:$0xff]  ;;  %613 = vst [vmem:[%s3117_s26 + $0x738] sm:$0xff] %v612_v39  ;;  %v618_v42 = vld [vmem:[%s3112_s25 + $0x1d10] sm:$0xff] }
  0x86   : > { %615 = vst [vmem:[%s3117_s26 + $0x740] sm:$0xff] %v614_v40  ;;  %617 = vst [vmem:[%s3117_s26 + $0x748] sm:$0xff] %v616_v41  ;;  %v620_v43 = vld [vmem:[%s3112_s25 + $0x1d18] sm:$0xff]  ;;  %v622_v44 = vld [vmem:[%s3112_s25 + $0x1d20] sm:$0xff] }
  0x87   : > { %619 = vst [vmem:[%s3117_s26 + $0x750] sm:$0xff] %v618_v42  ;;  %621 = vst [vmem:[%s3117_s26 + $0x758] sm:$0xff] %v620_v43  ;;  %v624_v45 = vld [vmem:[%s3112_s25 + $0x1d28] sm:$0xff]  ;;  %v626_v46 = vld [vmem:[%s3112_s25 + $0x1d30] sm:$0xff] }
  0x88   : > { %623 = vst [vmem:[%s3117_s26 + $0x760] sm:$0xff] %v622_v44  ;;  %v628_v47 = vld [vmem:[%s3112_s25 + $0x1d38] sm:$0xff]  ;;  %625 = vst [vmem:[%s3117_s26 + $0x768] sm:$0xff] %v624_v45  ;;  %v630_v48 = vld [vmem:[%s3112_s25 + $0x1e00] sm:$0xff] }
  0x89   : > { %627 = vst [vmem:[%s3117_s26 + $0x770] sm:$0xff] %v626_v46  ;;  %629 = vst [vmem:[%s3117_s26 + $0x778] sm:$0xff] %v628_v47  ;;  %v632_v49 = vld [vmem:[%s3112_s25 + $0x1e08] sm:$0xff]  ;;  %v634_v50 = vld [vmem:[%s3112_s25 + $0x1e10] sm:$0xff] }
  0x8a   : > { %631 = vst [vmem:[%s3117_s26 + $0x780] sm:$0xff] %v630_v48  ;;  %633 = vst [vmem:[%s3117_s26 + $0x788] sm:$0xff] %v632_v49  ;;  %v636_v51 = vld [vmem:[%s3112_s25 + $0x1e18] sm:$0xff]  ;;  %v638_v52 = vld [vmem:[%s3112_s25 + $0x1e20] sm:$0xff] }
  0x8b   : > { %635 = vst [vmem:[%s3117_s26 + $0x790] sm:$0xff] %v634_v50  ;;  %v640_v53 = vld [vmem:[%s3112_s25 + $0x1e28] sm:$0xff]  ;;  %637 = vst [vmem:[%s3117_s26 + $0x798] sm:$0xff] %v636_v51  ;;  %v642_v54 = vld [vmem:[%s3112_s25 + $0x1e30] sm:$0xff] }
  0x8c   : > { %639 = vst [vmem:[%s3117_s26 + $0x7a0] sm:$0xff] %v638_v52  ;;  %641 = vst [vmem:[%s3117_s26 + $0x7a8] sm:$0xff] %v640_v53  ;;  %v644_v55 = vld [vmem:[%s3112_s25 + $0x1e38] sm:$0xff]  ;;  %v646_v56 = vld [vmem:[%s3112_s25 + $0x1f00] sm:$0xff] }
  0x8d   : > { %643 = vst [vmem:[%s3117_s26 + $0x7b0] sm:$0xff] %v642_v54  ;;  %645 = vst [vmem:[%s3117_s26 + $0x7b8] sm:$0xff] %v644_v55  ;;  %v648_v57 = vld [vmem:[%s3112_s25 + $0x1f08] sm:$0xff]  ;;  %v650_v58 = vld [vmem:[%s3112_s25 + $0x1f10] sm:$0xff] }
  0x8e   : > { %647 = vst [vmem:[%s3117_s26 + $0x7c0] sm:$0xff] %v646_v56  ;;  %v652_v59 = vld [vmem:[%s3112_s25 + $0x1f18] sm:$0xff]  ;;  %649 = vst [vmem:[%s3117_s26 + $0x7c8] sm:$0xff] %v648_v57  ;;  %v654_v60 = vld [vmem:[%s3112_s25 + $0x1f20] sm:$0xff] }
  0x8f   : > { %651 = vst [vmem:[%s3117_s26 + $0x7d0] sm:$0xff] %v650_v58  ;;  %653 = vst [vmem:[%s3117_s26 + $0x7d8] sm:$0xff] %v652_v59  ;;  %v656_v61 = vld [vmem:[%s3112_s25 + $0x1f28] sm:$0xff]  ;;  %v658_v62 = vld [vmem:[%s3112_s25 + $0x1f30] sm:$0xff] }
  0x90   : > { %655 = vst [vmem:[%s3117_s26 + $0x7e0] sm:$0xff] %v654_v60  ;;  %657 = vst [vmem:[%s3117_s26 + $0x7e8] sm:$0xff] %v656_v61  ;;  %v660_v63 = vld [vmem:[%s3112_s25 + $0x1f38] sm:$0xff] }
  0x91   : > { %659 = vst [vmem:[%s3117_s26 + $0x7f0] sm:$0xff] %v658_v62  ;;  %661 = vst [vmem:[%s3117_s26 + $0x7f8] sm:$0xff] %v660_v63 }
  0x92 PF: > { %p2710_p5 = scmp.ge.s32.totalorder %s3055_s14, 1  ;;  %p666_p6 = scmp.lt.s32.totalorder %s3055_s14, 5 }
  0x94   : > { %p667_p7 = pnand %p2710_p5, %p666_p6 }
  0x95   : > { %s673_s27 = sand.u32 (!%p667_p7), 1, %s3047_s12   ;;  %v3634_v0 = vld.sshfl [vmem:[%s3965_s0] sm:$0x33 pattern:$0x76325410] (!%p667_p7)  ;;  %v3057_v60 = vmov (!%p667_p7), 0  }
  0x96   : > { %670 = sbr.rel (%p667_p7) target bundleno = 643 (0x283), region = 51  ;;  %s2711_s30 = sshll.u32 (!%p667_p7), %s673_s27, 11  ;;  %v3638_v1 = vcombine.high (!%p667_p7), %v3634_v0, %v3634_v0  ;;  %2999 = vset.pattern.permute.xlu0 (!%p667_p7), %v3057_v60 }
  0x97   : > { %s3640_s4 = scalar_lea.vmem (!%p667_p7), [#allocation2], %s2711_s30  ;;  %s2712_s9 = sshll.u32 (!%p667_p7), %s2703_s15, 4 }
  0x98   : > { %v704_v2 = vld [vmem:[%s3640_s4] sm:$0xff] (!%p667_p7)  ;;  %v705_v4 = vld [vmem:[%s3640_s4 + $0x8] sm:$0xff] (!%p667_p7)  ;;  %2289 = vmatprep.mubr.bf16.mxu0 (!%p667_p7), %v3638_v1  ;;  %2330 = vmatprep.mubr.bf16.mxu1 (!%p667_p7), %v3638_v1  ;;  %p698_p8 = scmp.lt.s32.totalorder (!%p667_p7), %s2712_s9, 63 }
  0x99   : > { %v712_v3 = vld [vmem:[%s3640_s4 + $0x40] sm:$0xff] (!%p667_p7)  ;;  %v713_v6 = vld [vmem:[%s3640_s4 + $0x48] sm:$0xff] (!%p667_p7) }
  0x9a   : > { %v2716_v5 = vcombine.high (!%p667_p7), %v704_v2, %v712_v3  ;;  %v2715_v7 = vcombine.low (!%p667_p7), %v704_v2, %v712_v3  ;;  %v720_v8 = vld [vmem:[%s3640_s4 + $0x80] sm:$0xff] (!%p667_p7)  ;;  %v2718_v10 = vcombine.high (!%p667_p7), %v705_v4, %v713_v6  ;;  %v2717_v11 = vcombine.low (!%p667_p7), %v705_v4, %v713_v6  ;;  %v721_v13 = vld [vmem:[%s3640_s4 + $0x88] sm:$0xff] (!%p667_p7) }
  0x9b   : > { %v728_v9 = vld [vmem:[%s3640_s4 + $0xc0] sm:$0xff] (!%p667_p7)  ;;  %v729_v14 = vld [vmem:[%s3640_s4 + $0xc8] sm:$0xff] (!%p667_p7) }
  0x9c   : > { %v2732_v12 = vcombine.high (!%p667_p7), %v720_v8, %v728_v9  ;;  %v736_v15 = vld [vmem:[%s3640_s4 + $0x100] sm:$0xff] (!%p667_p7)  ;;  %2257 = vmatprep.subr.bf16.mxu0 (!%p667_p7), %v2716_v5  ;;  %v2734_v16 = vcombine.high (!%p667_p7), %v721_v13, %v729_v14  ;;  %v737_v18 = vld [vmem:[%s3640_s4 + $0x108] sm:$0xff] (!%p667_p7)  ;;  %2298 = vmatprep.subr.bf16.mxu1 (!%p667_p7), %v2718_v10  ;;  %v2731_v20 = vcombine.low (!%p667_p7), %v720_v8, %v728_v9 }
  0x9d   : > { %v744_v17 = vld [vmem:[%s3640_s4 + $0x140] sm:$0xff]  ;;  %v745_v19 = vld [vmem:[%s3640_s4 + $0x148] sm:$0xff]  ;;  %2258 = vmatpush1.bf16.msra.mxu0 %v2715_v7  ;;  %2299 = vmatpush1.bf16.msra.mxu1 %v2717_v11  ;;  %v2733_v21 = vcombine.low %v721_v13, %v729_v14  ;;  %s3973_s9 = smov (!%p698_p8, %s2712_s9), 63 }
  0x9e   : > { %2259 = vmatprep.subr.bf16.mxu0 %v2732_v12  ;;  %v2748_v22 = vcombine.high %v736_v15, %v744_v17  ;;  %2300 = vmatprep.subr.bf16.mxu1 %v2734_v16  ;;  %v2750_v23 = vcombine.high %v737_v18, %v745_v19  ;;  %v752_v24 = vld [vmem:[%s3640_s4 + $0x180] sm:$0xff]  ;;  %v753_v26 = vld [vmem:[%s3640_s4 + $0x188] sm:$0xff]  ;;  %v2747_v28 = vcombine.low %v736_v15, %v744_v17  ;;  %s2713_s10 = sshll.u32 %s3973_s9, 2 }
  0x9f   : > { %v760_v25 = vld [vmem:[%s3640_s4 + $0x1c0] sm:$0xff]  ;;  %v761_v27 = vld [vmem:[%s3640_s4 + $0x1c8] sm:$0xff]  ;;  %v2749_v29 = vcombine.low %v737_v18, %v745_v19  ;;  %s3933_s14 = scalar_lea.vmem %s3968_s3, %s2713_s10 }
  0xa0   : > { %v2764_v30 = vcombine.high %v752_v24, %v760_v25  ;;  %v2766_v31 = vcombine.high %v753_v26, %v761_v27  ;;  %v768_v32 = vld [vmem:[%s3640_s4 + $0x200] sm:$0xff]  ;;  %v769_v34 = vld [vmem:[%s3640_s4 + $0x208] sm:$0xff]  ;;  %v2763_v36 = vcombine.low %v752_v24, %v760_v25  ;;  %v2765_v37 = vcombine.low %v753_v26, %v761_v27 }
  0xa1   : > { %2260 = vmatpush1.bf16.msra.mxu0 %v2731_v20  ;;  %2301 = vmatpush1.bf16.msra.mxu1 %v2733_v21  ;;  %v776_v33 = vld [vmem:[%s3640_s4 + $0x240] sm:$0xff]  ;;  %v777_v35 = vld [vmem:[%s3640_s4 + $0x248] sm:$0xff] }
  0xa2   : > { %2261 = vmatprep.subr.bf16.mxu0 %v2748_v22  ;;  %2302 = vmatprep.subr.bf16.mxu1 %v2750_v23  ;;  %v2780_v38 = vcombine.high %v768_v32, %v776_v33  ;;  %v2782_v39 = vcombine.high %v769_v34, %v777_v35  ;;  %v784_v40 = vld [vmem:[%s3640_s4 + $0x280] sm:$0xff]  ;;  %v785_v42 = vld [vmem:[%s3640_s4 + $0x288] sm:$0xff]  ;;  %v2779_v44 = vcombine.low %v768_v32, %v776_v33 }
  0xa3   : > { %v792_v41 = vld [vmem:[%s3640_s4 + $0x2c0] sm:$0xff]  ;;  %v793_v43 = vld [vmem:[%s3640_s4 + $0x2c8] sm:$0xff]  ;;  %v2781_v45 = vcombine.low %v769_v34, %v777_v35 }
  0xa4   : > { %v2796_v46 = vcombine.high %v784_v40, %v792_v41  ;;  %v2798_v47 = vcombine.high %v785_v42, %v793_v43  ;;  %v800_v48 = vld [vmem:[%s3640_s4 + $0x300] sm:$0xff]  ;;  %v801_v50 = vld [vmem:[%s3640_s4 + $0x308] sm:$0xff]  ;;  %v2795_v52 = vcombine.low %v784_v40, %v792_v41  ;;  %v2797_v53 = vcombine.low %v785_v42, %v793_v43 }
  0xa5   : > { %2262 = vmatpush1.bf16.msra.mxu0 %v2747_v28  ;;  %2303 = vmatpush1.bf16.msra.mxu1 %v2749_v29  ;;  %v808_v49 = vld [vmem:[%s3640_s4 + $0x340] sm:$0xff]  ;;  %v809_v51 = vld [vmem:[%s3640_s4 + $0x348] sm:$0xff] }
  0xa6   : > { %2263 = vmatprep.subr.bf16.mxu0 %v2764_v30  ;;  %2304 = vmatprep.subr.bf16.mxu1 %v2766_v31  ;;  %v2812_v54 = vcombine.high %v800_v48, %v808_v49  ;;  %v2814_v55 = vcombine.high %v801_v50, %v809_v51  ;;  %v816_v56 = vld [vmem:[%s3640_s4 + $0x380] sm:$0xff]  ;;  %v817_v58 = vld [vmem:[%s3640_s4 + $0x388] sm:$0xff]  ;;  %v2811_v61 = vcombine.low %v800_v48, %v808_v49 }
  0xa7   : > { %v824_v57 = vld [vmem:[%s3640_s4 + $0x3c0] sm:$0xff]  ;;  %v825_v59 = vld [vmem:[%s3640_s4 + $0x3c8] sm:$0xff]  ;;  %v2813_v62 = vcombine.low %v801_v50, %v809_v51 }
  0xa8   : > { %v2828_v63 = vcombine.high %v816_v56, %v824_v57  ;;  %v2830_v2 = vcombine.high %v817_v58, %v825_v59  ;;  %v832_v3 = vld [vmem:[%s3640_s4 + $0x400] sm:$0xff]  ;;  %v833_v5 = vld [vmem:[%s3640_s4 + $0x408] sm:$0xff]  ;;  %v2827_v7 = vcombine.low %v816_v56, %v824_v57  ;;  %v2829_v8 = vcombine.low %v817_v58, %v825_v59 }
  0xa9   : > { %2264 = vmatpush1.bf16.msra.mxu0 %v2763_v36  ;;  %2305 = vmatpush1.bf16.msra.mxu1 %v2765_v37  ;;  %v840_v4 = vld [vmem:[%s3640_s4 + $0x440] sm:$0xff]  ;;  %v841_v6 = vld [vmem:[%s3640_s4 + $0x448] sm:$0xff] }
  0xaa   : > { %2265 = vmatprep.subr.bf16.mxu0 %v2780_v38  ;;  %2306 = vmatprep.subr.bf16.mxu1 %v2782_v39  ;;  %v2844_v9 = vcombine.high %v832_v3, %v840_v4  ;;  %v2846_v10 = vcombine.high %v833_v5, %v841_v6  ;;  %v848_v11 = vld [vmem:[%s3640_s4 + $0x480] sm:$0xff]  ;;  %v849_v13 = vld [vmem:[%s3640_s4 + $0x488] sm:$0xff]  ;;  %v2843_v15 = vcombine.low %v832_v3, %v840_v4 }
  0xab   : > { %v856_v12 = vld [vmem:[%s3640_s4 + $0x4c0] sm:$0xff]  ;;  %v857_v14 = vld [vmem:[%s3640_s4 + $0x4c8] sm:$0xff]  ;;  %v2845_v16 = vcombine.low %v833_v5, %v841_v6  ;;  %v706_v6 = vld [vmem:[%s3640_s4 + $0x10] sm:$0xff] }
  0xac   : > { %v2860_v17 = vcombine.high %v848_v11, %v856_v12  ;;  %v2862_v18 = vcombine.high %v849_v13, %v857_v14  ;;  %v864_v19 = vld [vmem:[%s3640_s4 + $0x500] sm:$0xff]  ;;  %v865_v21 = vld [vmem:[%s3640_s4 + $0x508] sm:$0xff]  ;;  %v2859_v23 = vcombine.low %v848_v11, %v856_v12  ;;  %v2861_v24 = vcombine.low %v849_v13, %v857_v14  ;;  %v722_v14 = vld [vmem:[%s3640_s4 + $0x90] sm:$0xff] }
  0xad   : > { %2266 = vmatpush1.bf16.msra.mxu0 %v2779_v44  ;;  %2307 = vmatpush1.bf16.msra.mxu1 %v2781_v45  ;;  %v872_v20 = vld [vmem:[%s3640_s4 + $0x540] sm:$0xff]  ;;  %v873_v22 = vld [vmem:[%s3640_s4 + $0x548] sm:$0xff] }
  0xae   : > { %2267 = vmatprep.subr.bf16.mxu0 %v2796_v46  ;;  %2308 = vmatprep.subr.bf16.mxu1 %v2798_v47  ;;  %v2876_v25 = vcombine.high %v864_v19, %v872_v20  ;;  %v2878_v26 = vcombine.high %v865_v21, %v873_v22  ;;  %v880_v27 = vld [vmem:[%s3640_s4 + $0x580] sm:$0xff]  ;;  %v881_v29 = vld [vmem:[%s3640_s4 + $0x588] sm:$0xff]  ;;  %v2875_v31 = vcombine.low %v864_v19, %v872_v20 }
  0xaf   : > { %v888_v28 = vld [vmem:[%s3640_s4 + $0x5c0] sm:$0xff]  ;;  %v889_v30 = vld [vmem:[%s3640_s4 + $0x5c8] sm:$0xff]  ;;  %v2877_v32 = vcombine.low %v865_v21, %v873_v22  ;;  %v738_v22 = vld [vmem:[%s3640_s4 + $0x110] sm:$0xff] }
  0xb0   : > { %v2892_v33 = vcombine.high %v880_v27, %v888_v28  ;;  %v2894_v34 = vcombine.high %v881_v29, %v889_v30  ;;  %v896_v35 = vld [vmem:[%s3640_s4 + $0x600] sm:$0xff]  ;;  %v897_v37 = vld [vmem:[%s3640_s4 + $0x608] sm:$0xff]  ;;  %v2891_v39 = vcombine.low %v880_v27, %v888_v28  ;;  %v2893_v40 = vcombine.low %v881_v29, %v889_v30  ;;  %v754_v30 = vld [vmem:[%s3640_s4 + $0x190] sm:$0xff] }
  0xb1   : > { %2268 = vmatpush1.bf16.msra.mxu0 %v2795_v52  ;;  %2309 = vmatpush1.bf16.msra.mxu1 %v2797_v53  ;;  %v904_v36 = vld [vmem:[%s3640_s4 + $0x640] sm:$0xff]  ;;  %v905_v38 = vld [vmem:[%s3640_s4 + $0x648] sm:$0xff] }
  0xb2   : > { %2269 = vmatprep.subr.bf16.mxu0 %v2812_v54  ;;  %2310 = vmatprep.subr.bf16.mxu1 %v2814_v55  ;;  %v2908_v41 = vcombine.high %v896_v35, %v904_v36  ;;  %v2910_v42 = vcombine.high %v897_v37, %v905_v38  ;;  %v912_v43 = vld [vmem:[%s3640_s4 + $0x680] sm:$0xff]  ;;  %v913_v45 = vld [vmem:[%s3640_s4 + $0x688] sm:$0xff]  ;;  %v2907_v47 = vcombine.low %v896_v35, %v904_v36 }
  0xb3   : > { %v920_v44 = vld [vmem:[%s3640_s4 + $0x6c0] sm:$0xff]  ;;  %v921_v46 = vld [vmem:[%s3640_s4 + $0x6c8] sm:$0xff]  ;;  %v2909_v48 = vcombine.low %v897_v37, %v905_v38  ;;  %v770_v38 = vld [vmem:[%s3640_s4 + $0x210] sm:$0xff] }
  0xb4   : > { %v2924_v49 = vcombine.high %v912_v43, %v920_v44  ;;  %v2926_v50 = vcombine.high %v913_v45, %v921_v46  ;;  %v928_v51 = vld [vmem:[%s3640_s4 + $0x700] sm:$0xff]  ;;  %v929_v54 = vld [vmem:[%s3640_s4 + $0x708] sm:$0xff]  ;;  %v2923_v56 = vcombine.low %v912_v43, %v920_v44  ;;  %v2925_v57 = vcombine.low %v913_v45, %v921_v46  ;;  %v786_v46 = vld [vmem:[%s3640_s4 + $0x290] sm:$0xff] }
  0xb5   : > { %2270 = vmatpush1.bf16.msra.mxu0 %v2811_v61  ;;  %2311 = vmatpush1.bf16.msra.mxu1 %v2813_v62  ;;  %v936_v52 = vld [vmem:[%s3640_s4 + $0x740] sm:$0xff]  ;;  %v937_v55 = vld [vmem:[%s3640_s4 + $0x748] sm:$0xff] }
  0xb6   : > { %2271 = vmatprep.subr.bf16.mxu0 %v2828_v63  ;;  %2312 = vmatprep.subr.bf16.mxu1 %v2830_v2  ;;  %v960_v53 = vld [vmem:[%s3967_s2] sm:$0x7]  ;;  %v2940_v58 = vcombine.high %v928_v51, %v936_v52  ;;  %v2942_v59 = vcombine.high %v929_v54, %v937_v55  ;;  %v945_v62 = vld [vmem:[%s3640_s4 + $0x788] sm:$0xff]  ;;  %v2939_v2 = vcombine.low %v928_v51, %v936_v52 }
  0xb7   : > { %963 = vperm.xlu0 %2999, %v960_v53   ;;  %v944_v60 = vld [vmem:[%s3640_s4 + $0x780] sm:$0xff]  ;;  %v953_v63 = vld [vmem:[%s3640_s4 + $0x7c8] sm:$0xff]  ;;  %v2941_v3 = vcombine.low %v929_v54, %v937_v55  ;;  %v802_v54 = vld [vmem:[%s3640_s4 + $0x310] sm:$0xff] }
  0xb8   : > { %v952_v61 = vld [vmem:[%s3640_s4 + $0x7c0] sm:$0xff]  ;;  %v2958_v5 = vcombine.high %v945_v62, %v953_v63  ;;  %v2957_v11 = vcombine.low %v945_v62, %v953_v63  ;;  %v810_v55 = vld [vmem:[%s3640_s4 + $0x350] sm:$0xff] }
  0xb9   : > { %2272 = vmatpush1.bf16.msra.mxu0 %v2827_v7  ;;  %2313 = vmatpush1.bf16.msra.mxu1 %v2829_v8  ;;  %v2956_v4 = vcombine.high %v944_v60, %v952_v61  ;;  %v714_v7 = vld [vmem:[%s3640_s4 + $0x50] sm:$0xff]  ;;  %v707_v8 = vld [vmem:[%s3640_s4 + $0x18] sm:$0xff] }
  0xba   : > { %2273 = vmatprep.subr.bf16.mxu0 %v2844_v9  ;;  %2314 = vmatprep.subr.bf16.mxu1 %v2846_v10  ;;  %v715_v9 = vld [vmem:[%s3640_s4 + $0x58] sm:$0xff]  ;;  %v2955_v10 = vcombine.low %v944_v60, %v952_v61  ;;  %v2720_v12 = vcombine.high %v706_v6, %v714_v7  ;;  %v2816_v60 = vcombine.high %v802_v54, %v810_v55  ;;  %v818_v62 = vld [vmem:[%s3640_s4 + $0x390] sm:$0xff] }
  0xbb   : > { %v2722_v13 = vcombine.high %v707_v8, %v715_v9  ;;  %v2721_v19 = vcombine.low %v707_v8, %v715_v9  ;;  %v826_v63 = vld [vmem:[%s3640_s4 + $0x3d0] sm:$0xff] }
  0xbc   : > { %v834_v8 = vld [vmem:[%s3640_s4 + $0x410] sm:$0xff] }
  0xbd   : > { %2274 = vmatpush1.bf16.msra.mxu0 %v2843_v15  ;;  %2315 = vmatpush1.bf16.msra.mxu1 %v2845_v16  ;;  %v730_v15 = vld [vmem:[%s3640_s4 + $0xd0] sm:$0xff]  ;;  %v723_v16 = vld [vmem:[%s3640_s4 + $0x98] sm:$0xff] }
  0xbe   : > { %2275 = vmatprep.subr.bf16.mxu0 %v2860_v17  ;;  %2316 = vmatprep.subr.bf16.mxu1 %v2862_v18  ;;  %v731_v17 = vld [vmem:[%s3640_s4 + $0xd8] sm:$0xff]  ;;  %v2719_v18 = vcombine.low %v706_v6, %v714_v7  ;;  %v2736_v20 = vcombine.high %v722_v14, %v730_v15  ;;  %v2832_v6 = vcombine.high %v818_v62, %v826_v63  ;;  %v842_v9 = vld [vmem:[%s3640_s4 + $0x450] sm:$0xff] }
  0xbf   : > { %v2738_v21 = vcombine.high %v723_v16, %v731_v17  ;;  %v2737_v27 = vcombine.low %v723_v16, %v731_v17  ;;  %v850_v16 = vld [vmem:[%s3640_s4 + $0x490] sm:$0xff] }
  0xc0   : > { %v858_v17 = vld [vmem:[%s3640_s4 + $0x4d0] sm:$0xff] }
  0xc1   : > { %2276 = vmatpush1.bf16.msra.mxu0 %v2859_v23  ;;  %2317 = vmatpush1.bf16.msra.mxu1 %v2861_v24  ;;  %v746_v23 = vld [vmem:[%s3640_s4 + $0x150] sm:$0xff]  ;;  %v739_v24 = vld [vmem:[%s3640_s4 + $0x118] sm:$0xff] }
  0xc2   : > { %2277 = vmatprep.subr.bf16.mxu0 %v2876_v25  ;;  %2318 = vmatprep.subr.bf16.mxu1 %v2878_v26  ;;  %v747_v25 = vld [vmem:[%s3640_s4 + $0x158] sm:$0xff]  ;;  %v2735_v26 = vcombine.low %v722_v14, %v730_v15  ;;  %v2752_v28 = vcombine.high %v738_v22, %v746_v23  ;;  %v2848_v14 = vcombine.high %v834_v8, %v842_v9 }
  0xc3   : > { %v2754_v29 = vcombine.high %v739_v24, %v747_v25  ;;  %v2753_v35 = vcombine.low %v739_v24, %v747_v25  ;;  %v866_v24 = vld [vmem:[%s3640_s4 + $0x510] sm:$0xff] }
  0xc4   : > { %v874_v25 = vld [vmem:[%s3640_s4 + $0x550] sm:$0xff] }
  0xc5   : > { %2278 = vmatpush1.bf16.msra.mxu0 %v2875_v31  ;;  %2319 = vmatpush1.bf16.msra.mxu1 %v2877_v32  ;;  %v762_v31 = vld [vmem:[%s3640_s4 + $0x1d0] sm:$0xff]  ;;  %v755_v32 = vld [vmem:[%s3640_s4 + $0x198] sm:$0xff] }
  0xc6   : > { %2279 = vmatprep.subr.bf16.mxu0 %v2892_v33  ;;  %2320 = vmatprep.subr.bf16.mxu1 %v2894_v34  ;;  %v763_v33 = vld [vmem:[%s3640_s4 + $0x1d8] sm:$0xff]  ;;  %v2751_v34 = vcombine.low %v738_v22, %v746_v23  ;;  %v2768_v36 = vcombine.high %v754_v30, %v762_v31  ;;  %v2864_v22 = vcombine.high %v850_v16, %v858_v17 }
  0xc7   : > { %v2770_v37 = vcombine.high %v755_v32, %v763_v33  ;;  %v2769_v43 = vcombine.low %v755_v32, %v763_v33  ;;  %v882_v32 = vld [vmem:[%s3640_s4 + $0x590] sm:$0xff] }
  0xc8   : > { %v890_v33 = vld [vmem:[%s3640_s4 + $0x5d0] sm:$0xff] }
  0xc9   : > { %2280 = vmatpush1.bf16.msra.mxu0 %v2891_v39  ;;  %2321 = vmatpush1.bf16.msra.mxu1 %v2893_v40  ;;  %v778_v39 = vld [vmem:[%s3640_s4 + $0x250] sm:$0xff]  ;;  %v771_v40 = vld [vmem:[%s3640_s4 + $0x218] sm:$0xff] }
  0xca   : > { %2281 = vmatprep.subr.bf16.mxu0 %v2908_v41  ;;  %2322 = vmatprep.subr.bf16.mxu1 %v2910_v42  ;;  %v779_v41 = vld [vmem:[%s3640_s4 + $0x258] sm:$0xff]  ;;  %v2767_v42 = vcombine.low %v754_v30, %v762_v31  ;;  %v2784_v44 = vcombine.high %v770_v38, %v778_v39  ;;  %v2880_v30 = vcombine.high %v866_v24, %v874_v25 }
  0xcb   : > { %v2786_v45 = vcombine.high %v771_v40, %v779_v41  ;;  %v2785_v51 = vcombine.low %v771_v40, %v779_v41  ;;  %v898_v40 = vld [vmem:[%s3640_s4 + $0x610] sm:$0xff] }
  0xcc   : > { %v906_v41 = vld [vmem:[%s3640_s4 + $0x650] sm:$0xff] }
  0xcd   : > { %2282 = vmatpush1.bf16.msra.mxu0 %v2907_v47  ;;  %2323 = vmatpush1.bf16.msra.mxu1 %v2909_v48  ;;  %v794_v47 = vld [vmem:[%s3640_s4 + $0x2d0] sm:$0xff]  ;;  %v787_v48 = vld [vmem:[%s3640_s4 + $0x298] sm:$0xff] }
  0xce   : > { %2283 = vmatprep.subr.bf16.mxu0 %v2924_v49  ;;  %2324 = vmatprep.subr.bf16.mxu1 %v2926_v50  ;;  %v795_v49 = vld [vmem:[%s3640_s4 + $0x2d8] sm:$0xff]  ;;  %v2783_v50 = vcombine.low %v770_v38, %v778_v39  ;;  %v2800_v52 = vcombine.high %v786_v46, %v794_v47  ;;  %v2896_v38 = vcombine.high %v882_v32, %v890_v33 }
  0xcf   : > { %v2802_v53 = vcombine.high %v787_v48, %v795_v49 }
  0xd1   : > { %2284 = vmatpush1.bf16.msra.mxu0 %v2923_v56  ;;  %2325 = vmatpush1.bf16.msra.mxu1 %v2925_v57  ;;  %v803_v56 = vld [vmem:[%s3640_s4 + $0x318] sm:$0xff] }
  0xd2   : > { %2285 = vmatprep.subr.bf16.mxu0 %v2940_v58  ;;  %2326 = vmatprep.subr.bf16.mxu1 %v2942_v59  ;;  %v811_v57 = vld [vmem:[%s3640_s4 + $0x358] sm:$0xff]  ;;  %v2799_v58 = vcombine.low %v786_v46, %v794_v47  ;;  %v2801_v59 = vcombine.low %v787_v48, %v795_v49  ;;  %v2912_v46 = vcombine.high %v898_v40, %v906_v41  ;;  %v914_v48 = vld [vmem:[%s3640_s4 + $0x690] sm:$0xff] }
  0xd3   : > { %v2818_v61 = vcombine.high %v803_v56, %v811_v57  ;;  %v922_v49 = vld [vmem:[%s3640_s4 + $0x6d0] sm:$0xff] }
  0xd5   : > { %2286 = vmatpush1.bf16.msra.mxu0 %v2939_v2  ;;  %2327 = vmatpush1.bf16.msra.mxu1 %v2941_v3  ;;  %v819_v2 = vld [vmem:[%s3640_s4 + $0x398] sm:$0xff] }
  0xd6   : > { %2287 = vmatprep.subr.bf16.mxu0 %v2956_v4  ;;  %2328 = vmatprep.subr.bf16.mxu1 %v2958_v5  ;;  %v827_v3 = vld [vmem:[%s3640_s4 + $0x3d8] sm:$0xff]  ;;  %v2815_v4 = vcombine.low %v802_v54, %v810_v55  ;;  %v2817_v5 = vcombine.low %v803_v56, %v811_v57  ;;  %v2928_v54 = vcombine.high %v914_v48, %v922_v49  ;;  %v930_v56 = vld [vmem:[%s3640_s4 + $0x710] sm:$0xff] }
  0xd7   : > { %v2834_v7 = vcombine.high %v819_v2, %v827_v3  ;;  %v938_v57 = vld [vmem:[%s3640_s4 + $0x750] sm:$0xff] }
  0xd9   : > { %2288 = vmatpush1.bf16.msra.mxu0 %v2955_v10  ;;  %2329 = vmatpush1.bf16.msra.mxu1 %v2957_v11  ;;  %v835_v10 = vld [vmem:[%s3640_s4 + $0x418] sm:$0xff] }
  0xda   : > { %2339 = vmatprep.subr.bf16.mxu0 %v2720_v12  ;;  %2380 = vmatprep.subr.bf16.mxu1 %v2722_v13  ;;  %v843_v11 = vld [vmem:[%s3640_s4 + $0x458] sm:$0xff]  ;;  %v2831_v12 = vcombine.low %v818_v62, %v826_v63  ;;  %v2833_v13 = vcombine.low %v819_v2, %v827_v3  ;;  %v2944_v62 = vcombine.high %v930_v56, %v938_v57  ;;  %v946_v2 = vld [vmem:[%s3640_s4 + $0x790] sm:$0xff] }
  0xdb   : > { %v2850_v15 = vcombine.high %v835_v10, %v843_v11  ;;  %v954_v3 = vld [vmem:[%s3640_s4 + $0x7d0] sm:$0xff] }
  0xdc   : > { %2290 = vmatmul.mubr.bf16.vlgmr.msra.gmra.mrb[0].mxu0 %v3634_v0  ;;  %2331 = vmatmul.mubr.bf16.vlgmr.msra.gmra.mrb[0].mxu1 %v3634_v0 }
  0xdd   : > { %2340 = vmatpush1.bf16.msra.mxu0 %v2719_v18  ;;  %2381 = vmatpush1.bf16.msra.mxu1 %v2721_v19  ;;  %v851_v18 = vld [vmem:[%s3640_s4 + $0x498] sm:$0xff] }
  0xde   : > { %2341 = vmatprep.subr.bf16.mxu0 %v2736_v20  ;;  %2382 = vmatprep.subr.bf16.mxu1 %v2738_v21  ;;  %v859_v19 = vld [vmem:[%s3640_s4 + $0x4d8] sm:$0xff]  ;;  %v2847_v20 = vcombine.low %v834_v8, %v842_v9  ;;  %v2849_v21 = vcombine.low %v835_v10, %v843_v11  ;;  %v2960_v8 = vcombine.high %v946_v2, %v954_v3  ;;  %v708_v10 = vld [vmem:[%s3640_s4 + $0x20] sm:$0xff] }
  0xdf   : > { %2371 = vmatprep.mubr.bf16.mxu0 %v3638_v1  ;;  %2412 = vmatprep.mubr.bf16.mxu1 %v3638_v1  ;;  %v2866_v23 = vcombine.high %v851_v18, %v859_v19  ;;  %v716_v11 = vld [vmem:[%s3640_s4 + $0x60] sm:$0xff] }
  0xe1   : > { %2342 = vmatpush1.bf16.msra.mxu0 %v2735_v26  ;;  %2383 = vmatpush1.bf16.msra.mxu1 %v2737_v27  ;;  %v867_v26 = vld [vmem:[%s3640_s4 + $0x518] sm:$0xff] }
  0xe2   : > { %2343 = vmatprep.subr.bf16.mxu0 %v2752_v28  ;;  %2384 = vmatprep.subr.bf16.mxu1 %v2754_v29  ;;  %v875_v27 = vld [vmem:[%s3640_s4 + $0x558] sm:$0xff]  ;;  %v2863_v28 = vcombine.low %v850_v16, %v858_v17  ;;  %v2865_v29 = vcombine.low %v851_v18, %v859_v19  ;;  %v2724_v16 = vcombine.high %v708_v10, %v716_v11  ;;  %v724_v18 = vld [vmem:[%s3640_s4 + $0xa0] sm:$0xff] }
  0xe3   : > { %v2882_v31 = vcombine.high %v867_v26, %v875_v27  ;;  %v732_v19 = vld [vmem:[%s3640_s4 + $0xe0] sm:$0xff] }
  0xe5   : > { %2344 = vmatpush1.bf16.msra.mxu0 %v2751_v34  ;;  %2385 = vmatpush1.bf16.msra.mxu1 %v2753_v35  ;;  %v883_v34 = vld [vmem:[%s3640_s4 + $0x598] sm:$0xff] }
  0xe6   : > { %2345 = vmatprep.subr.bf16.mxu0 %v2768_v36  ;;  %2386 = vmatprep.subr.bf16.mxu1 %v2770_v37  ;;  %v891_v35 = vld [vmem:[%s3640_s4 + $0x5d8] sm:$0xff]  ;;  %v2879_v36 = vcombine.low %v866_v24, %v874_v25  ;;  %v2881_v37 = vcombine.low %v867_v26, %v875_v27  ;;  %v2740_v24 = vcombine.high %v724_v18, %v732_v19  ;;  %v740_v26 = vld [vmem:[%s3640_s4 + $0x120] sm:$0xff] }
  0xe7   : > { %v2898_v39 = vcombine.high %v883_v34, %v891_v35  ;;  %v748_v27 = vld [vmem:[%s3640_s4 + $0x160] sm:$0xff] }
  0xe9   : > { %2346 = vmatpush1.bf16.msra.mxu0 %v2767_v42  ;;  %2387 = vmatpush1.bf16.msra.mxu1 %v2769_v43  ;;  %v899_v42 = vld [vmem:[%s3640_s4 + $0x618] sm:$0xff] }
  0xea   : > { %2347 = vmatprep.subr.bf16.mxu0 %v2784_v44  ;;  %2388 = vmatprep.subr.bf16.mxu1 %v2786_v45  ;;  %v907_v43 = vld [vmem:[%s3640_s4 + $0x658] sm:$0xff]  ;;  %v2895_v44 = vcombine.low %v882_v32, %v890_v33  ;;  %v2897_v45 = vcombine.low %v883_v34, %v891_v35  ;;  %v2756_v32 = vcombine.high %v740_v26, %v748_v27  ;;  %v756_v34 = vld [vmem:[%s3640_s4 + $0x1a0] sm:$0xff] }
  0xeb   : > { %v2914_v47 = vcombine.high %v899_v42, %v907_v43  ;;  %v764_v35 = vld [vmem:[%s3640_s4 + $0x1e0] sm:$0xff] }
  0xed   : > { %2348 = vmatpush1.bf16.msra.mxu0 %v2783_v50  ;;  %2389 = vmatpush1.bf16.msra.mxu1 %v2785_v51  ;;  %v915_v50 = vld [vmem:[%s3640_s4 + $0x698] sm:$0xff] }
  0xee   : > { %2349 = vmatprep.subr.bf16.mxu0 %v2800_v52  ;;  %2390 = vmatprep.subr.bf16.mxu1 %v2802_v53  ;;  %v923_v51 = vld [vmem:[%s3640_s4 + $0x6d8] sm:$0xff]  ;;  %v2911_v52 = vcombine.low %v898_v40, %v906_v41  ;;  %v2913_v53 = vcombine.low %v899_v42, %v907_v43  ;;  %v772_v41 = vld [vmem:[%s3640_s4 + $0x220] sm:$0xff]  ;;  %v773_v43 = vld [vmem:[%s3640_s4 + $0x228] sm:$0xff] }
  0xef   : > { %v2930_v55 = vcombine.high %v915_v50, %v923_v51  ;;  %v780_v42 = vld [vmem:[%s3640_s4 + $0x260] sm:$0xff] }
  0xf1   : > { %2350 = vmatpush1.bf16.msra.mxu0 %v2799_v58  ;;  %2391 = vmatpush1.bf16.msra.mxu1 %v2801_v59  ;;  %v931_v58 = vld [vmem:[%s3640_s4 + $0x718] sm:$0xff] }
  0xf2   : > { %2351 = vmatprep.subr.bf16.mxu0 %v2816_v60  ;;  %2392 = vmatprep.subr.bf16.mxu1 %v2818_v61  ;;  %v939_v59 = vld [vmem:[%s3640_s4 + $0x758] sm:$0xff]  ;;  %v2927_v60 = vcombine.low %v914_v48, %v922_v49  ;;  %v2929_v61 = vcombine.low %v915_v50, %v923_v51  ;;  %v788_v49 = vld [vmem:[%s3640_s4 + $0x2a0] sm:$0xff]  ;;  %v789_v51 = vld [vmem:[%s3640_s4 + $0x2a8] sm:$0xff] }
  0xf3   : > { %v2946_v63 = vcombine.high %v931_v58, %v939_v59  ;;  %v796_v50 = vld [vmem:[%s3640_s4 + $0x2e0] sm:$0xff] }
  0xf5   : > { %2352 = vmatpush1.bf16.msra.mxu0 %v2815_v4  ;;  %2393 = vmatpush1.bf16.msra.mxu1 %v2817_v5  ;;  %v947_v4 = vld [vmem:[%s3640_s4 + $0x798] sm:$0xff] }
  0xf6   : > { %2353 = vmatprep.subr.bf16.mxu0 %v2832_v6  ;;  %2394 = vmatprep.subr.bf16.mxu1 %v2834_v7  ;;  %v955_v5 = vld [vmem:[%s3640_s4 + $0x7d8] sm:$0xff]  ;;  %v2943_v6 = vcombine.low %v930_v56, %v938_v57  ;;  %v2945_v7 = vcombine.low %v931_v58, %v939_v59  ;;  %v804_v57 = vld [vmem:[%s3640_s4 + $0x320] sm:$0xff]  ;;  %v805_v59 = vld [vmem:[%s3640_s4 + $0x328] sm:$0xff] }
  0xf7   : > { %v2962_v9 = vcombine.high %v947_v4, %v955_v5  ;;  %v812_v58 = vld [vmem:[%s3640_s4 + $0x360] sm:$0xff] }
  0xf9   : > { %2354 = vmatpush1.bf16.msra.mxu0 %v2831_v12  ;;  %2395 = vmatpush1.bf16.msra.mxu1 %v2833_v13  ;;  %v709_v12 = vld [vmem:[%s3640_s4 + $0x28] sm:$0xff] }
  0xfa   : > { %2355 = vmatprep.subr.bf16.mxu0 %v2848_v14  ;;  %2396 = vmatprep.subr.bf16.mxu1 %v2850_v15  ;;  %v717_v13 = vld [vmem:[%s3640_s4 + $0x68] sm:$0xff]  ;;  %v2959_v14 = vcombine.low %v946_v2, %v954_v3  ;;  %v2961_v15 = vcombine.low %v947_v4, %v955_v5  ;;  %v820_v3 = vld [vmem:[%s3640_s4 + $0x3a0] sm:$0xff] }
  0xfb   : > { %v2726_v17 = vcombine.high %v709_v12, %v717_v13  ;;  %v828_v4 = vld [vmem:[%s3640_s4 + $0x3e0] sm:$0xff]  ;;  %v821_v5 = vld [vmem:[%s3640_s4 + $0x3a8] sm:$0xff] }
  0xfd   : > { %2356 = vmatpush1.bf16.msra.mxu0 %v2847_v20  ;;  %2397 = vmatpush1.bf16.msra.mxu1 %v2849_v21  ;;  %v725_v20 = vld [vmem:[%s3640_s4 + $0xa8] sm:$0xff] }
  0xfe   : > { %2357 = vmatprep.subr.bf16.mxu0 %v2864_v22  ;;  %2398 = vmatprep.subr.bf16.mxu1 %v2866_v23  ;;  %v733_v21 = vld [vmem:[%s3640_s4 + $0xe8] sm:$0xff]  ;;  %v2723_v22 = vcombine.low %v708_v10, %v716_v11  ;;  %v2725_v23 = vcombine.low %v709_v12, %v717_v13  ;;  %v836_v11 = vld [vmem:[%s3640_s4 + $0x420] sm:$0xff] }
  0xff   : > { %v2742_v25 = vcombine.high %v725_v20, %v733_v21  ;;  %v844_v12 = vld [vmem:[%s3640_s4 + $0x460] sm:$0xff]  ;;  %v837_v13 = vld [vmem:[%s3640_s4 + $0x428] sm:$0xff] }
 0x101   : > { %2358 = vmatpush1.bf16.msra.mxu0 %v2863_v28  ;;  %2399 = vmatpush1.bf16.msra.mxu1 %v2865_v29  ;;  %v741_v28 = vld [vmem:[%s3640_s4 + $0x128] sm:$0xff] }
 0x102   : > { %2359 = vmatprep.subr.bf16.mxu0 %v2880_v30  ;;  %2400 = vmatprep.subr.bf16.mxu1 %v2882_v31  ;;  %v749_v29 = vld [vmem:[%s3640_s4 + $0x168] sm:$0xff]  ;;  %v2739_v30 = vcombine.low %v724_v18, %v732_v19  ;;  %v2741_v31 = vcombine.low %v725_v20, %v733_v21  ;;  %v852_v19 = vld [vmem:[%s3640_s4 + $0x4a0] sm:$0xff] }
 0x103   : > { %v2758_v33 = vcombine.high %v741_v28, %v749_v29  ;;  %v860_v20 = vld [vmem:[%s3640_s4 + $0x4e0] sm:$0xff]  ;;  %v853_v21 = vld [vmem:[%s3640_s4 + $0x4a8] sm:$0xff] }
 0x105   : > { %2360 = vmatpush1.bf16.msra.mxu0 %v2879_v36  ;;  %2401 = vmatpush1.bf16.msra.mxu1 %v2881_v37  ;;  %v757_v36 = vld [vmem:[%s3640_s4 + $0x1a8] sm:$0xff] }
 0x106   : > { %2361 = vmatprep.subr.bf16.mxu0 %v2896_v38  ;;  %2402 = vmatprep.subr.bf16.mxu1 %v2898_v39  ;;  %v765_v37 = vld [vmem:[%s3640_s4 + $0x1e8] sm:$0xff]  ;;  %v2757_v38 = vcombine.low %v741_v28, %v749_v29  ;;  %v2772_v39 = vcombine.high %v756_v34, %v764_v35  ;;  %v876_v28 = vld [vmem:[%s3640_s4 + $0x560] sm:$0xff] }
 0x107   : > { %v2774_v40 = vcombine.high %v757_v36, %v765_v37  ;;  %v869_v29 = vld [vmem:[%s3640_s4 + $0x528] sm:$0xff] }
 0x109   : > { %2362 = vmatpush1.bf16.msra.mxu0 %v2895_v44  ;;  %2403 = vmatpush1.bf16.msra.mxu1 %v2897_v45  ;;  %v781_v44 = vld [vmem:[%s3640_s4 + $0x268] sm:$0xff]  ;;  %v2771_v45 = vcombine.low %v756_v34, %v764_v35  ;;  %v884_v35 = vld [vmem:[%s3640_s4 + $0x5a0] sm:$0xff] }
 0x10a   : > { %2363 = vmatprep.subr.bf16.mxu0 %v2912_v46  ;;  %2404 = vmatprep.subr.bf16.mxu1 %v2914_v47  ;;  %v2773_v46 = vcombine.low %v757_v36, %v765_v37  ;;  %v2788_v47 = vcombine.high %v772_v41, %v780_v42  ;;  %v2790_v48 = vcombine.high %v773_v43, %v781_v44  ;;  %v892_v36 = vld [vmem:[%s3640_s4 + $0x5e0] sm:$0xff]  ;;  %v885_v37 = vld [vmem:[%s3640_s4 + $0x5a8] sm:$0xff] }
 0x10d   : > { %2364 = vmatpush1.bf16.msra.mxu0 %v2911_v52  ;;  %2405 = vmatpush1.bf16.msra.mxu1 %v2913_v53  ;;  %v797_v52 = vld [vmem:[%s3640_s4 + $0x2e8] sm:$0xff]  ;;  %v2787_v53 = vcombine.low %v772_v41, %v780_v42  ;;  %v900_v42 = vld [vmem:[%s3640_s4 + $0x620] sm:$0xff] }
 0x10e   : > { %2365 = vmatprep.subr.bf16.mxu0 %v2928_v54  ;;  %2406 = vmatprep.subr.bf16.mxu1 %v2930_v55  ;;  %v2789_v54 = vcombine.low %v773_v43, %v781_v44  ;;  %v2804_v55 = vcombine.high %v788_v49, %v796_v50  ;;  %v2806_v56 = vcombine.high %v789_v51, %v797_v52  ;;  %v908_v43 = vld [vmem:[%s3640_s4 + $0x660] sm:$0xff]  ;;  %v901_v44 = vld [vmem:[%s3640_s4 + $0x628] sm:$0xff] }
 0x111   : > { %2366 = vmatpush1.bf16.msra.mxu0 %v2927_v60  ;;  %2407 = vmatpush1.bf16.msra.mxu1 %v2929_v61  ;;  %v813_v60 = vld [vmem:[%s3640_s4 + $0x368] sm:$0xff]  ;;  %v2803_v61 = vcombine.low %v788_v49, %v796_v50  ;;  %v916_v50 = vld [vmem:[%s3640_s4 + $0x6a0] sm:$0xff] }
 0x112   : > { %2367 = vmatprep.subr.bf16.mxu0 %v2944_v62  ;;  %2408 = vmatprep.subr.bf16.mxu1 %v2946_v63  ;;  %v2805_v62 = vcombine.low %v789_v51, %v797_v52  ;;  %v2820_v63 = vcombine.high %v804_v57, %v812_v58  ;;  %v2822_v2 = vcombine.high %v805_v59, %v813_v60  ;;  %v924_v51 = vld [vmem:[%s3640_s4 + $0x6e0] sm:$0xff]  ;;  %v917_v52 = vld [vmem:[%s3640_s4 + $0x6a8] sm:$0xff] }
 0x115   : > { %2368 = vmatpush1.bf16.msra.mxu0 %v2943_v6  ;;  %2409 = vmatpush1.bf16.msra.mxu1 %v2945_v7  ;;  %v829_v6 = vld [vmem:[%s3640_s4 + $0x3e8] sm:$0xff]  ;;  %v2819_v7 = vcombine.low %v804_v57, %v812_v58  ;;  %v932_v58 = vld [vmem:[%s3640_s4 + $0x720] sm:$0xff] }
 0x116   : > { %2369 = vmatprep.subr.bf16.mxu0 %v2960_v8  ;;  %2410 = vmatprep.subr.bf16.mxu1 %v2962_v9  ;;  %v2821_v8 = vcombine.low %v805_v59, %v813_v60  ;;  %v2836_v9 = vcombine.high %v820_v3, %v828_v4  ;;  %v2838_v10 = vcombine.high %v821_v5, %v829_v6  ;;  %v940_v59 = vld [vmem:[%s3640_s4 + $0x760] sm:$0xff]  ;;  %v933_v60 = vld [vmem:[%s3640_s4 + $0x728] sm:$0xff] }
 0x119   : > { %2370 = vmatpush1.bf16.msra.mxu0 %v2959_v14  ;;  %2411 = vmatpush1.bf16.msra.mxu1 %v2961_v15  ;;  %v845_v14 = vld [vmem:[%s3640_s4 + $0x468] sm:$0xff]  ;;  %v2835_v15 = vcombine.low %v820_v3, %v828_v4  ;;  %v948_v4 = vld [vmem:[%s3640_s4 + $0x7a0] sm:$0xff] }
 0x11a   : > { %2421 = vmatprep.subr.bf16.mxu0 %v2724_v16  ;;  %2462 = vmatprep.subr.bf16.mxu1 %v2726_v17  ;;  %v2837_v16 = vcombine.low %v821_v5, %v829_v6  ;;  %v2852_v17 = vcombine.high %v836_v11, %v844_v12  ;;  %v2854_v18 = vcombine.high %v837_v13, %v845_v14  ;;  %v956_v5 = vld [vmem:[%s3640_s4 + $0x7e0] sm:$0xff]  ;;  %v949_v6 = vld [vmem:[%s3640_s4 + $0x7a8] sm:$0xff] }
 0x11c   : > { %2372 = vmatmul.mubr.bf16.vlgmr.msra.gmra.mrb[4].mxu0 %v3634_v0  ;;  %2413 = vmatmul.mubr.bf16.vlgmr.msra.gmra.mrb[4].mxu1 %v3634_v0  ;;  %v2755_v0 = vcombine.low %v740_v26, %v748_v27  ;;  %v868_v27 = vld [vmem:[%s3640_s4 + $0x520] sm:$0xff] }
 0x11d   : > { %2422 = vmatpush1.bf16.msra.mxu0 %v2723_v22  ;;  %2463 = vmatpush1.bf16.msra.mxu1 %v2725_v23  ;;  %v861_v22 = vld [vmem:[%s3640_s4 + $0x4e8] sm:$0xff]  ;;  %v2851_v23 = vcombine.low %v836_v11, %v844_v12  ;;  %v710_v12 = vld [vmem:[%s3640_s4 + $0x30] sm:$0xff] }
 0x11e   : > { %2423 = vmatprep.subr.bf16.mxu0 %v2740_v24  ;;  %2464 = vmatprep.subr.bf16.mxu1 %v2742_v25  ;;  %v2853_v24 = vcombine.low %v837_v13, %v845_v14  ;;  %v2868_v25 = vcombine.high %v852_v19, %v860_v20  ;;  %v2870_v26 = vcombine.high %v853_v21, %v861_v22  ;;  %v718_v13 = vld [vmem:[%s3640_s4 + $0x70] sm:$0xff]  ;;  %v711_v14 = vld [vmem:[%s3640_s4 + $0x38] sm:$0xff] }
 0x11f   : > { %2453 = vmatprep.mubr.bf16.mxu0 %v3638_v1  ;;  %2494 = vmatprep.mubr.bf16.mxu1 %v3638_v1 }
 0x121   : > { %2424 = vmatpush1.bf16.msra.mxu0 %v2739_v30  ;;  %2465 = vmatpush1.bf16.msra.mxu1 %v2741_v31  ;;  %v877_v30 = vld [vmem:[%s3640_s4 + $0x568] sm:$0xff]  ;;  %v2867_v31 = vcombine.low %v852_v19, %v860_v20  ;;  %v726_v20 = vld [vmem:[%s3640_s4 + $0xb0] sm:$0xff] }
 0x122   : > { %2425 = vmatprep.subr.bf16.mxu0 %v2756_v32  ;;  %2466 = vmatprep.subr.bf16.mxu1 %v2758_v33  ;;  %v2869_v32 = vcombine.low %v853_v21, %v861_v22  ;;  %v2884_v33 = vcombine.high %v868_v27, %v876_v28  ;;  %v2886_v34 = vcombine.high %v869_v29, %v877_v30  ;;  %v734_v21 = vld [vmem:[%s3640_s4 + $0xf0] sm:$0xff]  ;;  %v727_v22 = vld [vmem:[%s3640_s4 + $0xb8] sm:$0xff] }
 0x125   : > { %2426 = vmatpush1.bf16.msra.mxu0 %v2755_v0  ;;  %2467 = vmatpush1.bf16.msra.mxu1 %v2757_v38  ;;  %v893_v0 = vld [vmem:[%s3640_s4 + $0x5e8] sm:$0xff]  ;;  %v2883_v38 = vcombine.low %v868_v27, %v876_v28  ;;  %v742_v28 = vld [vmem:[%s3640_s4 + $0x130] sm:$0xff] }
 0x126   : > { %2427 = vmatprep.subr.bf16.mxu0 %v2772_v39  ;;  %2468 = vmatprep.subr.bf16.mxu1 %v2774_v40  ;;  %v2885_v39 = vcombine.low %v869_v29, %v877_v30  ;;  %v2900_v40 = vcombine.high %v884_v35, %v892_v36  ;;  %v2902_v41 = vcombine.high %v885_v37, %v893_v0  ;;  %v750_v29 = vld [vmem:[%s3640_s4 + $0x170] sm:$0xff]  ;;  %v3860_v30 = vld.sshfl [vmem:[%s3965_s0] sm:$0x33 pattern:$0x76325410] }
 0x129   : > { %2428 = vmatpush1.bf16.msra.mxu0 %v2771_v45  ;;  %2469 = vmatpush1.bf16.msra.mxu1 %v2773_v46  ;;  %v909_v45 = vld [vmem:[%s3640_s4 + $0x668] sm:$0xff]  ;;  %v2899_v46 = vcombine.low %v884_v35, %v892_v36  ;;  %v2760_v35 = vcombine.high %v742_v28, %v750_v29 }
 0x12a   : > { %2429 = vmatprep.subr.bf16.mxu0 %v2788_v47  ;;  %2470 = vmatprep.subr.bf16.mxu1 %v2790_v48  ;;  %v2901_v47 = vcombine.low %v885_v37, %v893_v0  ;;  %v2916_v48 = vcombine.high %v900_v42, %v908_v43  ;;  %v2918_v49 = vcombine.high %v901_v44, %v909_v45  ;;  %v758_v37 = vld [vmem:[%s3640_s4 + $0x1b0] sm:$0xff] }
 0x12b   : > { %v766_v0 = vld [vmem:[%s3640_s4 + $0x1f0] sm:$0xff] }
 0x12d   : > { %2430 = vmatpush1.bf16.msra.mxu0 %v2787_v53  ;;  %2471 = vmatpush1.bf16.msra.mxu1 %v2789_v54  ;;  %v925_v53 = vld [vmem:[%s3640_s4 + $0x6e8] sm:$0xff]  ;;  %v2915_v54 = vcombine.low %v900_v42, %v908_v43  ;;  %v2776_v42 = vcombine.high %v758_v37, %v766_v0 }
 0x12e   : > { %2431 = vmatprep.subr.bf16.mxu0 %v2804_v55  ;;  %2472 = vmatprep.subr.bf16.mxu1 %v2806_v56  ;;  %v2917_v55 = vcombine.low %v901_v44, %v909_v45  ;;  %v2932_v56 = vcombine.high %v916_v50, %v924_v51  ;;  %v2934_v57 = vcombine.high %v917_v52, %v925_v53  ;;  %v774_v44 = vld [vmem:[%s3640_s4 + $0x230] sm:$0xff] }
 0x12f   : > { %v782_v45 = vld [vmem:[%s3640_s4 + $0x270] sm:$0xff] }
 0x131   : > { %2432 = vmatpush1.bf16.msra.mxu0 %v2803_v61  ;;  %2473 = vmatpush1.bf16.msra.mxu1 %v2805_v62  ;;  %v941_v61 = vld [vmem:[%s3640_s4 + $0x768] sm:$0xff]  ;;  %v2931_v62 = vcombine.low %v916_v50, %v924_v51  ;;  %v790_v51 = vld [vmem:[%s3640_s4 + $0x2b0] sm:$0xff] }
 0x132   : > { %2433 = vmatprep.subr.bf16.mxu0 %v2820_v63  ;;  %2474 = vmatprep.subr.bf16.mxu1 %v2822_v2  ;;  %v2933_v63 = vcombine.low %v917_v52, %v925_v53  ;;  %v2948_v2 = vcombine.high %v932_v58, %v940_v59  ;;  %v2950_v3 = vcombine.high %v933_v60, %v941_v61  ;;  %v798_v52 = vld [vmem:[%s3640_s4 + $0x2f0] sm:$0xff]  ;;  %v791_v53 = vld [vmem:[%s3640_s4 + $0x2b8] sm:$0xff] }
 0x135   : > { %2434 = vmatpush1.bf16.msra.mxu0 %v2819_v7  ;;  %2475 = vmatpush1.bf16.msra.mxu1 %v2821_v8  ;;  %v957_v7 = vld [vmem:[%s3640_s4 + $0x7e8] sm:$0xff]  ;;  %v2947_v8 = vcombine.low %v932_v58, %v940_v59  ;;  %v806_v59 = vld [vmem:[%s3640_s4 + $0x330] sm:$0xff] }
 0x136   : > { %2435 = vmatprep.subr.bf16.mxu0 %v2836_v9  ;;  %2476 = vmatprep.subr.bf16.mxu1 %v2838_v10  ;;  %v2949_v9 = vcombine.low %v933_v60, %v941_v61  ;;  %v2964_v10 = vcombine.high %v948_v4, %v956_v5  ;;  %v2966_v11 = vcombine.high %v949_v6, %v957_v7  ;;  %v814_v60 = vld [vmem:[%s3640_s4 + $0x370] sm:$0xff]  ;;  %v807_v61 = vld [vmem:[%s3640_s4 + $0x338] sm:$0xff] }
 0x139   : > { %2436 = vmatpush1.bf16.msra.mxu0 %v2835_v15  ;;  %2477 = vmatpush1.bf16.msra.mxu1 %v2837_v16  ;;  %v719_v15 = vld [vmem:[%s3640_s4 + $0x78] sm:$0xff]  ;;  %v2963_v16 = vcombine.low %v948_v4, %v956_v5  ;;  %v822_v5 = vld [vmem:[%s3640_s4 + $0x3b0] sm:$0xff] }
 0x13a   : > { %2437 = vmatprep.subr.bf16.mxu0 %v2852_v17  ;;  %2478 = vmatprep.subr.bf16.mxu1 %v2854_v18  ;;  %v2965_v17 = vcombine.low %v949_v6, %v957_v7  ;;  %v2728_v18 = vcombine.high %v710_v12, %v718_v13  ;;  %v2730_v19 = vcombine.high %v711_v14, %v719_v15  ;;  %v830_v6 = vld [vmem:[%s3640_s4 + $0x3f0] sm:$0xff]  ;;  %v823_v7 = vld [vmem:[%s3640_s4 + $0x3b8] sm:$0xff] }
 0x13d   : > { %2438 = vmatpush1.bf16.msra.mxu0 %v2851_v23  ;;  %2479 = vmatpush1.bf16.msra.mxu1 %v2853_v24  ;;  %v735_v23 = vld [vmem:[%s3640_s4 + $0xf8] sm:$0xff]  ;;  %v2727_v24 = vcombine.low %v710_v12, %v718_v13  ;;  %v838_v13 = vld [vmem:[%s3640_s4 + $0x430] sm:$0xff] }
 0x13e   : > { %2439 = vmatprep.subr.bf16.mxu0 %v2868_v25  ;;  %2480 = vmatprep.subr.bf16.mxu1 %v2870_v26  ;;  %v2729_v25 = vcombine.low %v711_v14, %v719_v15  ;;  %v2744_v26 = vcombine.high %v726_v20, %v734_v21  ;;  %v2746_v27 = vcombine.high %v727_v22, %v735_v23  ;;  %v846_v14 = vld [vmem:[%s3640_s4 + $0x470] sm:$0xff]  ;;  %v839_v15 = vld [vmem:[%s3640_s4 + $0x438] sm:$0xff] }
 0x141   : > { %2440 = vmatpush1.bf16.msra.mxu0 %v2867_v31  ;;  %2481 = vmatpush1.bf16.msra.mxu1 %v2869_v32  ;;  %v743_v31 = vld [vmem:[%s3640_s4 + $0x138] sm:$0xff] }
 0x142   : > { %2441 = vmatprep.subr.bf16.mxu0 %v2884_v33  ;;  %2482 = vmatprep.subr.bf16.mxu1 %v2886_v34  ;;  %v751_v32 = vld [vmem:[%s3640_s4 + $0x178] sm:$0xff]  ;;  %v2743_v33 = vcombine.low %v726_v20, %v734_v21  ;;  %v2745_v34 = vcombine.low %v727_v22, %v735_v23  ;;  %v854_v21 = vld [vmem:[%s3640_s4 + $0x4b0] sm:$0xff] }
 0x143   : > { %v2762_v36 = vcombine.high %v743_v31, %v751_v32  ;;  %v862_v22 = vld [vmem:[%s3640_s4 + $0x4f0] sm:$0xff]  ;;  %v855_v23 = vld [vmem:[%s3640_s4 + $0x4b8] sm:$0xff] }
 0x145   : > { %2442 = vmatpush1.bf16.msra.mxu0 %v2883_v38  ;;  %2483 = vmatpush1.bf16.msra.mxu1 %v2885_v39  ;;  %v759_v38 = vld [vmem:[%s3640_s4 + $0x1b8] sm:$0xff] }
 0x146   : > { %2443 = vmatprep.subr.bf16.mxu0 %v2900_v40  ;;  %2484 = vmatprep.subr.bf16.mxu1 %v2902_v41  ;;  %v767_v39 = vld [vmem:[%s3640_s4 + $0x1f8] sm:$0xff]  ;;  %v2759_v40 = vcombine.low %v742_v28, %v750_v29  ;;  %v2761_v41 = vcombine.low %v743_v31, %v751_v32  ;;  %v870_v29 = vld [vmem:[%s3640_s4 + $0x530] sm:$0xff] }
 0x147   : > { %v2778_v43 = vcombine.high %v759_v38, %v767_v39  ;;  %v878_v31 = vld [vmem:[%s3640_s4 + $0x570] sm:$0xff]  ;;  %v871_v32 = vld [vmem:[%s3640_s4 + $0x538] sm:$0xff] }
 0x149   : > { %2444 = vmatpush1.bf16.msra.mxu0 %v2899_v46  ;;  %2485 = vmatpush1.bf16.msra.mxu1 %v2901_v47  ;;  %v775_v46 = vld [vmem:[%s3640_s4 + $0x238] sm:$0xff] }
 0x14a   : > { %2445 = vmatprep.subr.bf16.mxu0 %v2916_v48  ;;  %2486 = vmatprep.subr.bf16.mxu1 %v2918_v49  ;;  %v783_v47 = vld [vmem:[%s3640_s4 + $0x278] sm:$0xff]  ;;  %v2775_v48 = vcombine.low %v758_v37, %v766_v0  ;;  %v2792_v49 = vcombine.high %v774_v44, %v782_v45  ;;  %v886_v0 = vld [vmem:[%s3640_s4 + $0x5b0] sm:$0xff] }
 0x14b   : > { %v2794_v50 = vcombine.high %v775_v46, %v783_v47 }
 0x14d   : > { %2446 = vmatpush1.bf16.msra.mxu0 %v2915_v54  ;;  %2487 = vmatpush1.bf16.msra.mxu1 %v2917_v55  ;;  %v799_v54 = vld [vmem:[%s3640_s4 + $0x2f8] sm:$0xff]  ;;  %v2791_v55 = vcombine.low %v774_v44, %v782_v45  ;;  %v902_v45 = vld [vmem:[%s3640_s4 + $0x630] sm:$0xff] }
 0x14e   : > { %2447 = vmatprep.subr.bf16.mxu0 %v2932_v56  ;;  %2488 = vmatprep.subr.bf16.mxu1 %v2934_v57  ;;  %v2793_v56 = vcombine.low %v775_v46, %v783_v47  ;;  %v2808_v57 = vcombine.high %v790_v51, %v798_v52  ;;  %v2810_v58 = vcombine.high %v791_v53, %v799_v54  ;;  %v910_v46 = vld [vmem:[%s3640_s4 + $0x670] sm:$0xff]  ;;  %v903_v47 = vld [vmem:[%s3640_s4 + $0x638] sm:$0xff] }
 0x151   : > { %2448 = vmatpush1.bf16.msra.mxu0 %v2931_v62  ;;  %2489 = vmatpush1.bf16.msra.mxu1 %v2933_v63  ;;  %v815_v62 = vld [vmem:[%s3640_s4 + $0x378] sm:$0xff]  ;;  %v2807_v63 = vcombine.low %v790_v51, %v798_v52  ;;  %v918_v52 = vld [vmem:[%s3640_s4 + $0x6b0] sm:$0xff] }
 0x152   : > { %2449 = vmatprep.subr.bf16.mxu0 %v2948_v2  ;;  %2490 = vmatprep.subr.bf16.mxu1 %v2950_v3  ;;  %v2809_v2 = vcombine.low %v791_v53, %v799_v54  ;;  %v2824_v3 = vcombine.high %v806_v59, %v814_v60  ;;  %v2826_v4 = vcombine.high %v807_v61, %v815_v62  ;;  %v926_v53 = vld [vmem:[%s3640_s4 + $0x6f0] sm:$0xff]  ;;  %v919_v54 = vld [vmem:[%s3640_s4 + $0x6b8] sm:$0xff] }
 0x155   : > { %2450 = vmatpush1.bf16.msra.mxu0 %v2947_v8  ;;  %2491 = vmatpush1.bf16.msra.mxu1 %v2949_v9  ;;  %v831_v8 = vld [vmem:[%s3640_s4 + $0x3f8] sm:$0xff]  ;;  %v2823_v9 = vcombine.low %v806_v59, %v814_v60  ;;  %v934_v60 = vld [vmem:[%s3640_s4 + $0x730] sm:$0xff] }
 0x156   : > { %2451 = vmatprep.subr.bf16.mxu0 %v2964_v10  ;;  %2492 = vmatprep.subr.bf16.mxu1 %v2966_v11  ;;  %v2825_v10 = vcombine.low %v807_v61, %v815_v62  ;;  %v2840_v11 = vcombine.high %v822_v5, %v830_v6  ;;  %v2842_v12 = vcombine.high %v823_v7, %v831_v8  ;;  %v942_v61 = vld [vmem:[%s3640_s4 + $0x770] sm:$0xff]  ;;  %v935_v62 = vld [vmem:[%s3640_s4 + $0x738] sm:$0xff] }
 0x159   : > { %2452 = vmatpush1.bf16.msra.mxu0 %v2963_v16  ;;  %2493 = vmatpush1.bf16.msra.mxu1 %v2965_v17  ;;  %v847_v16 = vld [vmem:[%s3640_s4 + $0x478] sm:$0xff]  ;;  %v2839_v17 = vcombine.low %v822_v5, %v830_v6  ;;  %v950_v6 = vld [vmem:[%s3640_s4 + $0x7b0] sm:$0xff] }
 0x15a   : > { %2503 = vmatprep.subr.bf16.mxu0 %v2728_v18  ;;  %2544 = vmatprep.subr.bf16.mxu1 %v2730_v19  ;;  %v2841_v18 = vcombine.low %v823_v7, %v831_v8  ;;  %v2856_v19 = vcombine.high %v838_v13, %v846_v14  ;;  %v2858_v20 = vcombine.high %v839_v15, %v847_v16  ;;  %v958_v7 = vld [vmem:[%s3640_s4 + $0x7f0] sm:$0xff]  ;;  %v951_v8 = vld [vmem:[%s3640_s4 + $0x7b8] sm:$0xff] }
 0x15c   : > { %2454 = vmatmul.mubr.bf16.vlgmr.msra.gmra.mrb[8].mxu0 %v3860_v30  ;;  %2495 = vmatmul.mubr.bf16.vlgmr.msra.gmra.mrb[8].mxu1 %v3860_v30 }
 0x15d   : > { %2504 = vmatpush1.bf16.msra.mxu0 %v2727_v24  ;;  %2545 = vmatpush1.bf16.msra.mxu1 %v2729_v25  ;;  %v863_v24 = vld [vmem:[%s3640_s4 + $0x4f8] sm:$0xff]  ;;  %v2855_v25 = vcombine.low %v838_v13, %v846_v14  ;;  %v2967_v14 = vcombine.low %v950_v6, %v958_v7 }
 0x15e   : > { %2505 = vmatprep.subr.bf16.mxu0 %v2744_v26  ;;  %2546 = vmatprep.subr.bf16.mxu1 %v2746_v27  ;;  %v2857_v26 = vcombine.low %v839_v15, %v847_v16  ;;  %v2872_v27 = vcombine.high %v854_v21, %v862_v22  ;;  %v2874_v28 = vcombine.high %v855_v23, %v863_v24  ;;  %v3922_v16 = vpop.permute.xlu0 %963 }
 0x15f   : > { %2535 = vmatprep.mubr.bf16.mxu0 %v3638_v1  ;;  %2576 = vmatprep.mubr.bf16.mxu1 %v3638_v1  ;;  %v2777_v1 = vcombine.low %v759_v38, %v767_v39  ;;  %v894_v38 = vld [vmem:[%s3640_s4 + $0x5f0] sm:$0xff]  ;;  %v887_v39 = vld [vmem:[%s3640_s4 + $0x5b8] sm:$0xff] }
 0x161   : > { %2506 = vmatpush1.bf16.msra.mxu0 %v2743_v33  ;;  %2547 = vmatpush1.bf16.msra.mxu1 %v2745_v34  ;;  %v879_v33 = vld [vmem:[%s3640_s4 + $0x578] sm:$0xff]  ;;  %v2871_v34 = vcombine.low %v854_v21, %v862_v22 }
 0x162   : > { %2507 = vmatprep.subr.bf16.mxu0 %v2760_v35  ;;  %2548 = vmatprep.subr.bf16.mxu1 %v2762_v36  ;;  %v2873_v35 = vcombine.low %v855_v23, %v863_v24  ;;  %v2888_v36 = vcombine.high %v870_v29, %v878_v31  ;;  %v2890_v37 = vcombine.high %v871_v32, %v879_v33 }
 0x165   : > { %2508 = vmatpush1.bf16.msra.mxu0 %v2759_v40  ;;  %2549 = vmatpush1.bf16.msra.mxu1 %v2761_v41  ;;  %v895_v40 = vld [vmem:[%s3640_s4 + $0x5f8] sm:$0xff]  ;;  %v2887_v41 = vcombine.low %v870_v29, %v878_v31 }
 0x166   : > { %2509 = vmatprep.subr.bf16.mxu0 %v2776_v42  ;;  %2550 = vmatprep.subr.bf16.mxu1 %v2778_v43  ;;  %v2889_v42 = vcombine.low %v871_v32, %v879_v33  ;;  %v2904_v43 = vcombine.high %v886_v0, %v894_v38  ;;  %v2906_v44 = vcombine.high %v887_v39, %v895_v40 }
 0x169   : > { %2510 = vmatpush1.bf16.msra.mxu0 %v2775_v48  ;;  %2551 = vmatpush1.bf16.msra.mxu1 %v2777_v1  ;;  %v911_v48 = vld [vmem:[%s3640_s4 + $0x678] sm:$0xff]  ;;  %v2903_v1 = vcombine.low %v886_v0, %v894_v38 }
 0x16a   : > { %2511 = vmatprep.subr.bf16.mxu0 %v2792_v49  ;;  %2552 = vmatprep.subr.bf16.mxu1 %v2794_v50  ;;  %v2905_v49 = vcombine.low %v887_v39, %v895_v40  ;;  %v2920_v50 = vcombine.high %v902_v45, %v910_v46  ;;  %v2922_v51 = vcombine.high %v903_v47, %v911_v48 }
 0x16d   : > { %2512 = vmatpush1.bf16.msra.mxu0 %v2791_v55  ;;  %2553 = vmatpush1.bf16.msra.mxu1 %v2793_v56  ;;  %v927_v55 = vld [vmem:[%s3640_s4 + $0x6f8] sm:$0xff]  ;;  %v2919_v56 = vcombine.low %v902_v45, %v910_v46 }
 0x16e   : > { %2513 = vmatprep.subr.bf16.mxu0 %v2808_v57  ;;  %2554 = vmatprep.subr.bf16.mxu1 %v2810_v58  ;;  %v2921_v57 = vcombine.low %v903_v47, %v911_v48  ;;  %v2936_v58 = vcombine.high %v918_v52, %v926_v53  ;;  %v2938_v59 = vcombine.high %v919_v54, %v927_v55 }
 0x171   : > { %2514 = vmatpush1.bf16.msra.mxu0 %v2807_v63  ;;  %2555 = vmatpush1.bf16.msra.mxu1 %v2809_v2  ;;  %v943_v63 = vld [vmem:[%s3640_s4 + $0x778] sm:$0xff]  ;;  %v2935_v2 = vcombine.low %v918_v52, %v926_v53 }
 0x172   : > { %2515 = vmatprep.subr.bf16.mxu0 %v2824_v3  ;;  %2556 = vmatprep.subr.bf16.mxu1 %v2826_v4  ;;  %v2937_v3 = vcombine.low %v919_v54, %v927_v55  ;;  %v2952_v4 = vcombine.high %v934_v60, %v942_v61  ;;  %v2954_v5 = vcombine.high %v935_v62, %v943_v63 }
 0x175   : > { %2516 = vmatpush1.bf16.msra.mxu0 %v2823_v9  ;;  %2557 = vmatpush1.bf16.msra.mxu1 %v2825_v10  ;;  %v959_v9 = vld [vmem:[%s3640_s4 + $0x7f8] sm:$0xff]  ;;  %v2951_v10 = vcombine.low %v934_v60, %v942_v61 }
 0x176   : > { %2517 = vmatprep.subr.bf16.mxu0 %v2840_v11  ;;  %2558 = vmatprep.subr.bf16.mxu1 %v2842_v12  ;;  %v2953_v11 = vcombine.low %v935_v62, %v943_v63  ;;  %v2968_v12 = vcombine.high %v950_v6, %v958_v7  ;;  %v2970_v13 = vcombine.high %v951_v8, %v959_v9 }
 0x177   : > { %v2969_v15 = vcombine.low %v951_v8, %v959_v9 }
 0x179   : > { %2518 = vmatpush1.bf16.msra.mxu0 %v2839_v17  ;;  %2559 = vmatpush1.bf16.msra.mxu1 %v2841_v18 }
 0x17a   : > { %2519 = vmatprep.subr.bf16.mxu0 %v2856_v19  ;;  %2560 = vmatprep.subr.bf16.mxu1 %v2858_v20 }
 0x17d   : > { %2520 = vmatpush1.bf16.msra.mxu0 %v2855_v25  ;;  %2561 = vmatpush1.bf16.msra.mxu1 %v2857_v26 }
 0x17e   : > { %2521 = vmatprep.subr.bf16.mxu0 %v2872_v27  ;;  %2562 = vmatprep.subr.bf16.mxu1 %v2874_v28 }
 0x181   : > { %2522 = vmatpush1.bf16.msra.mxu0 %v2871_v34  ;;  %2563 = vmatpush1.bf16.msra.mxu1 %v2873_v35 }
 0x182   : > { %2523 = vmatprep.subr.bf16.mxu0 %v2888_v36  ;;  %2564 = vmatprep.subr.bf16.mxu1 %v2890_v37 }
 0x185   : > { %2524 = vmatpush1.bf16.msra.mxu0 %v2887_v41  ;;  %2565 = vmatpush1.bf16.msra.mxu1 %v2889_v42 }
 0x186   : > { %2525 = vmatprep.subr.bf16.mxu0 %v2904_v43  ;;  %2566 = vmatprep.subr.bf16.mxu1 %v2906_v44 }
 0x189   : > { %2526 = vmatpush1.bf16.msra.mxu0 %v2903_v1  ;;  %2567 = vmatpush1.bf16.msra.mxu1 %v2905_v49 }
 0x18a   : > { %2527 = vmatprep.subr.bf16.mxu0 %v2920_v50  ;;  %2568 = vmatprep.subr.bf16.mxu1 %v2922_v51 }
 0x18d   : > { %2528 = vmatpush1.bf16.msra.mxu0 %v2919_v56  ;;  %2569 = vmatpush1.bf16.msra.mxu1 %v2921_v57 }
 0x18e   : > { %2529 = vmatprep.subr.bf16.mxu0 %v2936_v58  ;;  %2570 = vmatprep.subr.bf16.mxu1 %v2938_v59 }
 0x191   : > { %2530 = vmatpush1.bf16.msra.mxu0 %v2935_v2  ;;  %2571 = vmatpush1.bf16.msra.mxu1 %v2937_v3 }
 0x192   : > { %2531 = vmatprep.subr.bf16.mxu0 %v2952_v4  ;;  %2572 = vmatprep.subr.bf16.mxu1 %v2954_v5 }
 0x195   : > { %2532 = vmatpush1.bf16.msra.mxu0 %v2951_v10  ;;  %2573 = vmatpush1.bf16.msra.mxu1 %v2953_v11 }
 0x196   : > { %2533 = vmatprep.subr.bf16.mxu0 %v2968_v12  ;;  %2574 = vmatprep.subr.bf16.mxu1 %v2970_v13 }
 0x199   : > { %2534 = vmatpush1.bf16.msra.mxu0 %v2967_v14  ;;  %2575 = vmatpush1.bf16.msra.mxu1 %v2969_v15 }
 0x19c   : > { %2536 = vmatmul.mubr.bf16.vlgmr.msra.gmra.mrb[12].mxu0 %v3860_v30  ;;  %2577 = vmatmul.mubr.bf16.vlgmr.msra.gmra.mrb[12].mxu1 %v3860_v30 }
 0x1af   : > { %v2291_v17 = vpop.f32.mrb[0].mxu0  ;;  %v2332_v18 = vpop.f32.mrb[0].mxu1 }
 0x1b0   : > { %v2292_v19 = vadd.f32 %v2291_v17, %v3922_v16  ;;  %v2293_v20 = vpop.f32.mrb[1].mxu0  ;;  %v2333_v22 = vadd.f32 %v2332_v18, %v3922_v16  ;;  %v2334_v23 = vpop.f32.mrb[1].mxu1 }
 0x1b1   : > { %v2294_v21 = vadd.f32 %v2293_v20, %v3922_v16  ;;  %v2295_v24 = vpop.f32.mrb[2].mxu0  ;;  %v2335_v25 = vadd.f32 %v2334_v23, %v3922_v16  ;;  %v2336_v30 = vpop.f32.mrb[2].mxu1 }
 0x1b2   : > { %3000 = vtanh.f32 %v2292_v19  ;;  %v2296_v26 = vpop.f32.mrb[3].mxu0  ;;  %v2337_v27 = vpop.f32.mrb[3].mxu1 }
 0x1b3   : > { %3002 = vtanh.f32 %v2294_v21 }
 0x1b4   : > { %3004 = vtanh.f32 %v2333_v22 }
 0x1b5   : > { %3006 = vtanh.f32 %v2335_v25 }
 0x1bc   : > { %v3001_v28 = vpop.eup %3000 }
 0x1bd   : > { %v3003_v29 = vpop.eup %3002 }
 0x1be   : > { %v3005_v31 = vpop.eup %3004  ;;  %v2617_v32 = vcombine.low %v3001_v28, %v3003_v29 }
 0x1bf   : > { %v3007_v33 = vpop.eup %3006 }
 0x1c0   : > { %2633 = vst [vmem:[%s3933_s14] sm:$0x77] %v2617_v32  ;;  %v2618_v34 = vcombine.low %v3005_v31, %v3007_v33 }
 0x1c2   : > { %2634 = vst [vmem:[%s3933_s14 + $0x8] sm:$0x77] %v2618_v34 }
 0x1ef   : > { %v2373_v35 = vpop.f32.mrb[4].mxu0  ;;  %v2414_v37 = vpop.f32.mrb[4].mxu1 }
 0x1f0   : > { %v2374_v36 = vadd.f32 %v2373_v35, %v3922_v16  ;;  %v2375_v0 = vpop.f32.mrb[5].mxu0  ;;  %v2415_v38 = vadd.f32 %v2414_v37, %v3922_v16  ;;  %v2416_v40 = vpop.f32.mrb[5].mxu1 }
 0x1f1   : > { %v2376_v39 = vadd.f32 %v2375_v0, %v3922_v16  ;;  %v2377_v41 = vpop.f32.mrb[6].mxu0  ;;  %v2417_v42 = vadd.f32 %v2416_v40, %v3922_v16  ;;  %v2418_v43 = vpop.f32.mrb[6].mxu1 }
 0x1f2   : > { %3008 = vtanh.f32 %v2374_v36  ;;  %v2378_v44 = vpop.f32.mrb[7].mxu0  ;;  %v2419_v45 = vpop.f32.mrb[7].mxu1 }
 0x1f3   : > { %3010 = vtanh.f32 %v2415_v38 }
 0x1f4   : > { %3012 = vtanh.f32 %v2376_v39 }
 0x1f5   : > { %3014 = vtanh.f32 %v2417_v42 }
 0x1fc   : > { %v3009_v46 = vpop.eup %3008 }
 0x1fd   : > { %v3011_v47 = vpop.eup %3010 }
 0x1fe   : > { %v3013_v48 = vpop.eup %3012 }
 0x1ff   : > { %v3015_v1 = vpop.eup %3014  ;;  %v2619_v49 = vcombine.low %v3009_v46, %v3013_v48 }
 0x200   : > { %v2620_v50 = vcombine.low %v3011_v47, %v3015_v1 }
 0x201   : > { %2635 = vst [vmem:[%s3933_s14 + $0x10] sm:$0x77] %v2619_v49 }
 0x202   : > { %2636 = vst [vmem:[%s3933_s14 + $0x18] sm:$0x77] %v2620_v50 }
 0x22f   : > { %v2455_v51 = vpop.f32.mrb[8].mxu0  ;;  %v2496_v53 = vpop.f32.mrb[8].mxu1 }
 0x230   : > { %v2456_v52 = vadd.f32 %v2455_v51, %v3922_v16  ;;  %v2457_v54 = vpop.f32.mrb[9].mxu0  ;;  %v2497_v55 = vadd.f32 %v2496_v53, %v3922_v16  ;;  %v2498_v57 = vpop.f32.mrb[9].mxu1 }
 0x231   : > { %v2458_v56 = vadd.f32 %v2457_v54, %v3922_v16  ;;  %v2459_v58 = vpop.f32.mrb[10].mxu0  ;;  %v2499_v59 = vadd.f32 %v2498_v57, %v3922_v16  ;;  %v2500_v60 = vpop.f32.mrb[10].mxu1 }
 0x232   : > { %3016 = vtanh.f32 %v2456_v52  ;;  %v2460_v61 = vpop.f32.mrb[11].mxu0  ;;  %v2501_v62 = vpop.f32.mrb[11].mxu1 }
 0x233   : > { %3018 = vtanh.f32 %v2497_v55 }
 0x234   : > { %3020 = vtanh.f32 %v2458_v56 }
 0x235   : > { %3022 = vtanh.f32 %v2499_v59 }
 0x23c   : > { %v3017_v63 = vpop.eup %3016 }
 0x23d   : > { %v3019_v2 = vpop.eup %3018 }
 0x23e   : > { %v3021_v3 = vpop.eup %3020 }
 0x23f   : > { %v3023_v4 = vpop.eup %3022  ;;  %v2621_v5 = vcombine.low %v3017_v63, %v3021_v3 }
 0x240   : > { %v2622_v6 = vcombine.low %v3019_v2, %v3023_v4 }
 0x241   : > { %2637 = vst [vmem:[%s3933_s14 + $0x20] sm:$0x77] %v2621_v5 }
 0x242   : > { %2638 = vst [vmem:[%s3933_s14 + $0x28] sm:$0x77] %v2622_v6 }
 0x26f   : > { %v2537_v7 = vpop.f32.mrb[12].mxu0  ;;  %v2578_v9 = vpop.f32.mrb[12].mxu1 }
 0x270   : > { %v2538_v8 = vadd.f32 %v2537_v7, %v3922_v16  ;;  %v2539_v10 = vpop.f32.mrb[13].mxu0  ;;  %v2579_v11 = vadd.f32 %v2578_v9, %v3922_v16  ;;  %v2580_v13 = vpop.f32.mrb[13].mxu1 }
 0x271   : > { %v2540_v12 = vadd.f32 %v2539_v10, %v3922_v16  ;;  %v2541_v14 = vpop.f32.mrb[14].mxu0  ;;  %v2581_v15 = vadd.f32 %v2580_v13, %v3922_v16  ;;  %v2582_v17 = vpop.f32.mrb[14].mxu1 }
 0x272   : > { %3024 = vtanh.f32 %v2538_v8  ;;  %v2542_v18 = vpop.f32.mrb[15].mxu0  ;;  %v2583_v19 = vpop.f32.mrb[15].mxu1 }
 0x273   : > { %3026 = vtanh.f32 %v2579_v11 }
 0x274   : > { %3028 = vtanh.f32 %v2540_v12 }
 0x275   : > { %3030 = vtanh.f32 %v2581_v15 }
 0x27c   : > { %v3025_v20 = vpop.eup %3024 }
 0x27d   : > { %v3027_v21 = vpop.eup %3026 }
 0x27e   : > { %v3029_v22 = vpop.eup %3028 }
 0x27f   : > { %v3031_v23 = vpop.eup %3030  ;;  %v2623_v24 = vcombine.low %v3025_v20, %v3029_v22 }
 0x280   : > { %v2624_v25 = vcombine.low %v3027_v21, %v3031_v23 }
 0x281   : > { %2639 = vst [vmem:[%s3933_s14 + $0x30] sm:$0x77] %v2623_v24 }
 0x282   : > { %2640 = vst [vmem:[%s3933_s14 + $0x38] sm:$0x77] %v2624_v25 }
 0x283 PF: > { %p10_p9 = scmp.ge.s32.totalorder %s3095_s16, 6   ;;  %s3969_s12 = smov %s3051_s13 }
 0x284   : > { %s3970_s13 = smov %s3104_s19  ;;  %s3971_s14 = smov %s3095_s16 }
 0x285   :  { %12 = sbr.rel (!%p10_p9) target bundleno = 2 (0x2), region = 90 }

</bundles_post_ra>
